<compile_context>
chip_gen: v6e
topology: v6e:2x2x1
jax: 0.10.0
libtpu: 0.0.40
codegen_flags: <defaults>
</compile_context>

<pallas_src>
import functools

import numpy as np
import jax
import jax.numpy as jnp
from jax.experimental import pallas as pl
from jax.experimental.pallas import tpu as pltpu

C_MID = 256   # map1 / map3 output channels (fixed by the module)
C_BIG = 512   # map2 output channels
KW = 3        # map1 kernel width


def _ru8(x):
    return ((x + 7) // 8) * 8


def _head_rows(F, Z, L):
    """Sublane-aligned row offsets of wlp / w1n / w1l inside the head slab."""
    r_wlp = 0
    r_w1n = _ru8(F)
    r_w1l = r_w1n + _ru8(Z)
    rows = r_w1l + _ru8(L)
    return r_wlp, r_w1n, r_w1l, rows


# ------------------------------ Pallas kernel ------------------------------

def _generator_kernel(inp_ref, head_ref, vec_ref, w1c_ref, w2c_ref, w3c_ref,
                      o_ref, x_sc, *, Z, F, L, C1, A):
    f32 = jnp.float32
    hi = jax.lax.Precision.HIGHEST
    B = inp_ref.shape[0]
    r_wlp, r_w1n, r_w1l, _ = _head_rows(F, Z, L)

    inp = inp_ref[...]                                   # (B, Z+F)
    noise = inp[:, :Z]
    labels = inp[:, Z:Z + F]

    # static views into the packed parameter slabs (no extra DMAs)
    wlp = head_ref[r_wlp:r_wlp + F, :L]                  # (F, L)
    w1n = head_ref[r_w1n:r_w1n + Z, :C1 * A]             # (Z, A*C1)  (permuted cols)
    w1l = head_ref[r_w1l:r_w1l + L, :C1 * A]             # (L, A*C1)

    blp = vec_ref[0:1, :L]
    b1 = vec_ref[1:2, :C1 * A]
    b1c = vec_ref[2:3, :C_MID]
    b2c = vec_ref[3:4, :C_BIG]
    b3c = vec_ref[4:5, :C_MID]
    w4r = vec_ref[5:6, :C_MID]
    b4c = vec_ref[6:7, :1]

    # ---- head: label_proj -> (concat folded into split matmuls) -> l1 ----
    lp = jnp.maximum(
        jnp.dot(labels, wlp, preferred_element_type=f32, precision=hi) + blp,
        0.0)                                             # (B, L)
    h = jnp.maximum(
        jnp.dot(noise, w1n, preferred_element_type=f32, precision=hi)
        + jnp.dot(lp, w1l, preferred_element_type=f32, precision=hi)
        + b1, 0.0)                                       # (B, A*C1); col = a*C1 + c

    # ---- h.view(B, C1, A, 1): wrapper-side column permutation makes this pure
    # layout plumbing - A static (B, C1) stores into a tiny VMEM scratch.
    for a in range(A):
        x_sc[a * B:(a + 1) * B, :] = h[:, a * C1:(a + 1) * C1]
    x = x_sc[...]                                        # (B*A, C1); row = a*B + b

    # ---- map1: ConvTranspose2d(C1, 256, (1,3)) on W=1 == one packed matmul ----
    h1_all = jnp.dot(x, w1c_ref[...], preferred_element_type=f32,
                     precision=hi)                       # (B*A, 3*256)
    # stack the 3 output-width branches along rows so map2/map3 run once
    h1 = jnp.concatenate(
        [h1_all[:, w * C_MID:(w + 1) * C_MID] for w in range(KW)], axis=0)
    h1 = jnp.maximum(h1 + b1c, 0.0)                      # (3*B*A, 256)

    # ---- map2 / map3: (1,1) transposed convs == channel matmuls ----
    h2 = jnp.maximum(
        jnp.dot(h1, w2c_ref[...], preferred_element_type=f32, precision=hi)
        + b2c, 0.0)                                      # (3*B*A, 512)
    h3 = jnp.maximum(
        jnp.dot(h2, w3c_ref[...], preferred_element_type=f32, precision=hi)
        + b3c, 0.0)                                      # (3*B*A, 256)

    # ---- map4 (256 -> 1): VPU multiply + lane reduction; sigmoid epilogue ----
    logits = jnp.sum(h3 * w4r, axis=-1, keepdims=True) + b4c
    o_ref[...] = 1.0 / (1.0 + jnp.exp(-logits))          # (3*B*A, 1)


# ------------------------- parameter packing (once) ------------------------

def pack_params(params, *, latent_dim, n_label_features, label_dim,
                gen_channels_1, n_atoms_total):
    """Permute l1 columns and pack the small params into two dense slabs."""
    Z, F, L = latent_dim, n_label_features, label_dim
    C1, A = gen_channels_1, n_atoms_total

    # new column a*C1 + c  <-  old (torch) column c*A + a
    j = np.arange(A * C1)
    perm = (j % C1) * A + (j // C1)
    w1 = jnp.concatenate([params["w1n"], params["w1l"]], axis=0)[:, perm]
    b1 = params["b1"][:, perm]

    r_wlp, r_w1n, r_w1l, rows = _head_rows(F, Z, L)
    width = max(L, C1 * A)
    head = jnp.zeros((rows, width), jnp.float32)
    head = head.at[r_wlp:r_wlp + F, :L].set(params["wlp"])
    head = head.at[r_w1n:r_w1n + Z, :C1 * A].set(w1[:Z])
    head = head.at[r_w1l:r_w1l + L, :C1 * A].set(w1[Z:])

    vw = max(L, C1 * A, C_MID, C_BIG)
    vec = jnp.zeros((8, vw), jnp.float32)
    vec = vec.at[0, :L].set(params["blp"][0])
    vec = vec.at[1, :C1 * A].set(b1[0])
    vec = vec.at[2, :C_MID].set(params["b1c"][0])
    vec = vec.at[3, :C_BIG].set(params["b2c"][0])
    vec = vec.at[4, :C_MID].set(params["b3c"][0])
    vec = vec.at[5, :C_MID].set(params["w4c"][:, 0])
    vec = vec.at[6, :1].set(params["b4c"][0])

    return {"head": head, "vec": vec,
            "w1c": params["w1c"], "w2c": params["w2c"], "w3c": params["w3c"]}


# ------------------------------- wrapper -----------------------------------

def generator_forward(noise, labels, packed, *, latent_dim, n_label_features,
                      label_dim, gen_channels_1, n_atoms_total):
    Z, F, L = latent_dim, n_label_features, label_dim
    C1, A = gen_channels_1, n_atoms_total
    B = noise.shape[0]
    n = B * A

    inp = jnp.concatenate(
        [noise.astype(jnp.float32), labels.astype(jnp.float32)], axis=1)

    kernel = functools.partial(_generator_kernel, Z=Z, F=F, L=L, C1=C1, A=A)

    flops = 2 * (B * F * L + B * Z * C1 * A + B * L * C1 * A
                 + n * C1 * KW * C_MID
                 + KW * n * C_MID * C_BIG + KW * n * C_BIG * C_MID
                 + KW * n * C_MID)
    bytes_accessed = 4 * (int(inp.size)
                          + sum(int(np.prod(v.shape)) for v in packed.values())
                          + KW * n)

    vmem = pl.BlockSpec(memory_space=pltpu.MemorySpace.VMEM)
    out = pl.pallas_call(
        kernel,
        out_shape=jax.ShapeDtypeStruct((KW * n, 1), jnp.float32),
        in_specs=[vmem] * 6,
        out_specs=vmem,
        scratch_shapes=[pltpu.VMEM((n, C1), jnp.float32)],
        cost_estimate=pl.CostEstimate(flops=flops, transcendentals=KW * n,
                                      bytes_accessed=bytes_accessed),
    )(inp, packed["head"], packed["vec"],
      packed["w1c"], packed["w2c"], packed["w3c"])

    # Kernel rows are ordered r = w*(B*A) + a*B + b -> NCHW (B, 1, A, 3):
    # a 48-element metadata reshape + tiny transpose in the wrapper.
    return out.reshape(KW, A, B).transpose(2, 1, 0)[:, None, :, :]


# -------------------- deterministic parameter init ------------------------

def init_params(key, *, latent_dim, label_dim, n_label_features,
                gen_channels_1, n_atoms_total):
    Z, L, F = latent_dim, label_dim, n_label_features
    C1, A = gen_channels_1, n_atoms_total
    ks = jax.random.split(key, 12)

    def u(k, shape, fan_in):
        b = 1.0 / float(fan_in) ** 0.5
        return jax.random.uniform(k, shape, jnp.float32, -b, b)

    p = {}
    # label_proj: Linear(F, L) -- stored transposed (F, L)
    p["wlp"] = u(ks[0], (F, L), F)
    p["blp"] = u(ks[1], (1, L), F)
    # l1: Linear(Z+L, C1*A) -- stored transposed, split into noise/label parts,
    # torch column order (c*A + a)
    w1 = u(ks[2], (Z + L, C1 * A), Z + L)
    p["w1n"], p["w1l"] = w1[:Z], w1[Z:]
    p["b1"] = u(ks[3], (1, C1 * A), Z + L)
    # map1: ConvTranspose2d(C1, 256, (1,3)) -- packed (C1, 3*256);
    # column block w corresponds to weight[:, :, 0, w]
    p["w1c"] = u(ks[4], (C1, KW * C_MID), C1 * KW)
    p["b1c"] = u(ks[5], (1, C_MID), C1 * KW)
    # map2 / map3 / map4: (1,1) transposed convs == channel matmuls
    p["w2c"] = u(ks[6], (C_MID, C_BIG), C_MID)
    p["b2c"] = u(ks[7], (1, C_BIG), C_MID)
    p["w3c"] = u(ks[8], (C_BIG, C_MID), C_BIG)
    p["b3c"] = u(ks[9], (1, C_MID), C_BIG)
    p["w4c"] = u(ks[10], (C_MID, 1), C_MID)
    p["b4c"] = u(ks[11], (1, 1), C_MID)
    return p


# --------------------------- pure-JAX reference ----------------------------

def reference_forward(noise, labels, params, *, gen_channels_1, n_atoms_total):
    B = noise.shape[0]
    C1, A = gen_channels_1, n_atoms_total
    with jax.default_matmul_precision("float32"):
        lp = jax.nn.relu(labels @ params["wlp"] + params["blp"])
        gi = jnp.concatenate([noise, lp], axis=1)
        w1 = jnp.concatenate([params["w1n"], params["w1l"]], axis=0)
        h = jax.nn.relu(gi @ w1 + params["b1"])
        h = h.reshape(B, C1, A, 1)                   # NCHW, same as torch .view
        hc = h[..., 0]                               # (B, C1, A)
        c_mid = params["b1c"].shape[-1]
        outs = []
        for w in range(KW):
            W = params["w1c"][:, w * c_mid:(w + 1) * c_mid]
            outs.append(jnp.einsum("bca,cd->bda", hc, W))
        h1 = jnp.stack(outs, axis=3) + params["b1c"].reshape(1, c_mid, 1, 1)
        h1 = jax.nn.relu(h1)                         # (B, 256, A, 3)

        def conv1x1(x, W, b):
            return jnp.einsum("bcaw,cd->bdaw", x, W) + b.reshape(1, -1, 1, 1)

        h2 = jax.nn.relu(conv1x1(h1, params["w2c"], params["b2c"]))
        h3 = jax.nn.relu(conv1x1(h2, params["w3c"], params["b3c"]))
        h4 = conv1x1(h3, params["w4c"], params["b4c"])
        return jax.nn.sigmoid(h4)                    # (B, 1, A, 3)


# --------------------------------- main ------------------------------------

if __name__ == "__main__":
    B = 2
    latent_dim = 16
    n_label_features = 4
    label_dim = 8
    gen_channels_1 = 8
    n_atoms_total = 8

    key = jax.random.PRNGKey(0)
    kp, kn, kl = jax.random.split(key, 3)
    params = init_params(kp, latent_dim=latent_dim, label_dim=label_dim,
                         n_label_features=n_label_features,
                         gen_channels_1=gen_channels_1,
                         n_atoms_total=n_atoms_total)
    packed = pack_params(params, latent_dim=latent_dim,
                         n_label_features=n_label_features,
                         label_dim=label_dim,
                         gen_channels_1=gen_channels_1,
                         n_atoms_total=n_atoms_total)
    noise = jax.random.normal(kn, (B, latent_dim), jnp.float32)
    labels = jax.random.normal(kl, (B, n_label_features), jnp.float32)

    pos = generator_forward(noise, labels, packed,
                            latent_dim=latent_dim,
                            n_label_features=n_label_features,
                            label_dim=label_dim,
                            gen_channels_1=gen_channels_1,
                            n_atoms_total=n_atoms_total)
    pos = jax.block_until_ready(pos)
    assert pos.shape == (B, 1, n_atoms_total, 3), pos.shape

    ref = jax.block_until_ready(
        reference_forward(noise, labels, params,
                          gen_channels_1=gen_channels_1,
                          n_atoms_total=n_atoms_total))
    max_err = float(jnp.max(jnp.abs(pos - ref)))
    assert jnp.allclose(pos, ref, rtol=1e-3, atol=1e-3), max_err

    print("KERNEL_OK")
</pallas_src>

<mosaic_0001>
module attributes {stable_mosaic.version = 11 : i64} {
  func.func @_generator_kernel(%arg0: memref<2x20xf32, #tpu.memory_space<vmem>>, %arg1: memref<32x64xf32, #tpu.memory_space<vmem>>, %arg2: memref<8x512xf32, #tpu.memory_space<vmem>>, %arg3: memref<8x768xf32, #tpu.memory_space<vmem>>, %arg4: memref<256x512xf32, #tpu.memory_space<vmem>>, %arg5: memref<512x256xf32, #tpu.memory_space<vmem>>, %arg6: memref<48x1xf32, #tpu.memory_space<vmem>>, %arg7: memref<16x8xf32, #tpu.memory_space<vmem>>) attributes {dimension_semantics = [], scalar_prefetch = 0 : i64, scratch_operands = 1 : i64, tpu.core_type = #tpu.core_type<tc>} {
    %c0 = arith.constant 0 : index
    %c0_0 = arith.constant 0 : index
    %0 = vector.load %arg0[%c0, %c0_0] : memref<2x20xf32, #tpu.memory_space<vmem>>, vector<2x20xf32>
    %1 = vector.extract_strided_slice %0 {offsets = [0, 0], sizes = [2, 16], strides = [1, 1]} : vector<2x20xf32> to vector<2x16xf32>
    %2 = vector.extract_strided_slice %0 {offsets = [0, 16], sizes = [2, 4], strides = [1, 1]} : vector<2x20xf32> to vector<2x4xf32>
    %c0_1 = arith.constant 0 : index
    %c0_2 = arith.constant 0 : index
    %3 = vector.load %arg1[%c0_1, %c0_2] : memref<32x64xf32, #tpu.memory_space<vmem>>, vector<4x8xf32>
    %c8 = arith.constant 8 : index
    %c0_3 = arith.constant 0 : index
    %4 = vector.load %arg1[%c8, %c0_3] : memref<32x64xf32, #tpu.memory_space<vmem>>, vector<16x64xf32>
    %c24 = arith.constant 24 : index
    %c0_4 = arith.constant 0 : index
    %5 = vector.load %arg1[%c24, %c0_4] : memref<32x64xf32, #tpu.memory_space<vmem>>, vector<8x64xf32>
    %c0_5 = arith.constant 0 : index
    %c0_6 = arith.constant 0 : index
    %6 = vector.load %arg2[%c0_5, %c0_6] : memref<8x512xf32, #tpu.memory_space<vmem>>, vector<1x8xf32>
    %c1 = arith.constant 1 : index
    %c0_7 = arith.constant 0 : index
    %7 = vector.load %arg2[%c1, %c0_7] : memref<8x512xf32, #tpu.memory_space<vmem>>, vector<1x64xf32>
    %c2 = arith.constant 2 : index
    %c0_8 = arith.constant 0 : index
    %8 = vector.load %arg2[%c2, %c0_8] : memref<8x512xf32, #tpu.memory_space<vmem>>, vector<1x256xf32>
    %c3 = arith.constant 3 : index
    %c0_9 = arith.constant 0 : index
    %9 = vector.load %arg2[%c3, %c0_9] : memref<8x512xf32, #tpu.memory_space<vmem>>, vector<1x512xf32>
    %c4 = arith.constant 4 : index
    %c0_10 = arith.constant 0 : index
    %10 = vector.load %arg2[%c4, %c0_10] : memref<8x512xf32, #tpu.memory_space<vmem>>, vector<1x256xf32>
    %c5 = arith.constant 5 : index
    %c0_11 = arith.constant 0 : index
    %11 = vector.load %arg2[%c5, %c0_11] : memref<8x512xf32, #tpu.memory_space<vmem>>, vector<1x256xf32>
    %c6 = arith.constant 6 : index
    %c0_12 = arith.constant 0 : index
    %12 = vector.load %arg2[%c6, %c0_12] : memref<8x512xf32, #tpu.memory_space<vmem>>, vector<1x1xf32>
    %cst = arith.constant dense<0.000000e+00> : vector<2x8xf32>
    %13 = tpu.matmul %2, %3, %cst {dimension_numbers = #tpu.dot_dimension_numbers<[1], [0], [0], [1], [0, 0, 1, 1], [], []>, precision = #tpu.contract_precision<fp32>} : vector<2x4xf32>, vector<4x8xf32>, vector<2x8xf32> -> vector<2x8xf32>
    %14 = vector.broadcast %6 : vector<1x8xf32> to vector<2x8xf32>
    %15 = arith.addf %13, %14 : vector<2x8xf32>
    %cst_13 = arith.constant 0.000000e+00 : f32
    %16 = vector.broadcast %cst_13 : f32 to vector<2x8xf32>
    %17 = arith.maximumf %15, %16 : vector<2x8xf32>
    %cst_14 = arith.constant dense<0.000000e+00> : vector<2x64xf32>
    %18 = tpu.matmul %1, %4, %cst_14 {dimension_numbers = #tpu.dot_dimension_numbers<[1], [0], [0], [1], [0, 0, 1, 1], [], []>, precision = #tpu.contract_precision<fp32>} : vector<2x16xf32>, vector<16x64xf32>, vector<2x64xf32> -> vector<2x64xf32>
    %cst_15 = arith.constant dense<0.000000e+00> : vector<2x64xf32>
    %19 = tpu.matmul %17, %5, %cst_15 {dimension_numbers = #tpu.dot_dimension_numbers<[1], [0], [0], [1], [0, 0, 1, 1], [], []>, precision = #tpu.contract_precision<fp32>} : vector<2x8xf32>, vector<8x64xf32>, vector<2x64xf32> -> vector<2x64xf32>
    %20 = arith.addf %18, %19 : vector<2x64xf32>
    %21 = vector.broadcast %7 : vector<1x64xf32> to vector<2x64xf32>
    %22 = arith.addf %20, %21 : vector<2x64xf32>
    %cst_16 = arith.constant 0.000000e+00 : f32
    %23 = vector.broadcast %cst_16 : f32 to vector<2x64xf32>
    %24 = arith.maximumf %22, %23 : vector<2x64xf32>
    %25 = vector.extract_strided_slice %24 {offsets = [0, 0], sizes = [2, 8], strides = [1, 1]} : vector<2x64xf32> to vector<2x8xf32>
    %c0_17 = arith.constant 0 : index
    %c0_18 = arith.constant 0 : index
    %26 = vector.load %arg7[%c0_17, %c0_18] : memref<16x8xf32, #tpu.memory_space<vmem>>, vector<2x8xf32>
    tpu.vector_store %arg7[%c0_17, %c0_18], %25 {strides = array<i32>} : memref<16x8xf32, #tpu.memory_space<vmem>>, vector<2x8xf32>,
    %27 = vector.extract_strided_slice %24 {offsets = [0, 8], sizes = [2, 8], strides = [1, 1]} : vector<2x64xf32> to vector<2x8xf32>
    %c2_19 = arith.constant 2 : index
    %c0_20 = arith.constant 0 : index
    %28 = vector.load %arg7[%c2_19, %c0_20] : memref<16x8xf32, #tpu.memory_space<vmem>>, vector<2x8xf32>
    tpu.vector_store %arg7[%c2_19, %c0_20], %27 {strides = array<i32>} : memref<16x8xf32, #tpu.memory_space<vmem>>, vector<2x8xf32>,
    %29 = vector.extract_strided_slice %24 {offsets = [0, 16], sizes = [2, 8], strides = [1, 1]} : vector<2x64xf32> to vector<2x8xf32>
    %c4_21 = arith.constant 4 : index
    %c0_22 = arith.constant 0 : index
    %30 = vector.load %arg7[%c4_21, %c0_22] : memref<16x8xf32, #tpu.memory_space<vmem>>, vector<2x8xf32>
    tpu.vector_store %arg7[%c4_21, %c0_22], %29 {strides = array<i32>} : memref<16x8xf32, #tpu.memory_space<vmem>>, vector<2x8xf32>,
    %31 = vector.extract_strided_slice %24 {offsets = [0, 24], sizes = [2, 8], strides = [1, 1]} : vector<2x64xf32> to vector<2x8xf32>
    %c6_23 = arith.constant 6 : index
    %c0_24 = arith.constant 0 : index
    %32 = vector.load %arg7[%c6_23, %c0_24] : memref<16x8xf32, #tpu.memory_space<vmem>>, vector<2x8xf32>
    tpu.vector_store %arg7[%c6_23, %c0_24], %31 {strides = array<i32>} : memref<16x8xf32, #tpu.memory_space<vmem>>, vector<2x8xf32>,
    %33 = vector.extract_strided_slice %24 {offsets = [0, 32], sizes = [2, 8], strides = [1, 1]} : vector<2x64xf32> to vector<2x8xf32>
    %c8_25 = arith.constant 8 : index
    %c0_26 = arith.constant 0 : index
    %34 = vector.load %arg7[%c8_25, %c0_26] : memref<16x8xf32, #tpu.memory_space<vmem>>, vector<2x8xf32>
    tpu.vector_store %arg7[%c8_25, %c0_26], %33 {strides = array<i32>} : memref<16x8xf32, #tpu.memory_space<vmem>>, vector<2x8xf32>,
    %35 = vector.extract_strided_slice %24 {offsets = [0, 40], sizes = [2, 8], strides = [1, 1]} : vector<2x64xf32> to vector<2x8xf32>
    %c10 = arith.constant 10 : index
    %c0_27 = arith.constant 0 : index
    %36 = vector.load %arg7[%c10, %c0_27] : memref<16x8xf32, #tpu.memory_space<vmem>>, vector<2x8xf32>
    tpu.vector_store %arg7[%c10, %c0_27], %35 {strides = array<i32>} : memref<16x8xf32, #tpu.memory_space<vmem>>, vector<2x8xf32>,
    %37 = vector.extract_strided_slice %24 {offsets = [0, 48], sizes = [2, 8], strides = [1, 1]} : vector<2x64xf32> to vector<2x8xf32>
    %c12 = arith.constant 12 : index
    %c0_28 = arith.constant 0 : index
    %38 = vector.load %arg7[%c12, %c0_28] : memref<16x8xf32, #tpu.memory_space<vmem>>, vector<2x8xf32>
    tpu.vector_store %arg7[%c12, %c0_28], %37 {strides = array<i32>} : memref<16x8xf32, #tpu.memory_space<vmem>>, vector<2x8xf32>,
    %39 = vector.extract_strided_slice %24 {offsets = [0, 56], sizes = [2, 8], strides = [1, 1]} : vector<2x64xf32> to vector<2x8xf32>
    %c14 = arith.constant 14 : index
    %c0_29 = arith.constant 0 : index
    %40 = vector.load %arg7[%c14, %c0_29] : memref<16x8xf32, #tpu.memory_space<vmem>>, vector<2x8xf32>
    tpu.vector_store %arg7[%c14, %c0_29], %39 {strides = array<i32>} : memref<16x8xf32, #tpu.memory_space<vmem>>, vector<2x8xf32>,
    %c0_30 = arith.constant 0 : index
    %c0_31 = arith.constant 0 : index
    %41 = vector.load %arg7[%c0_30, %c0_31] : memref<16x8xf32, #tpu.memory_space<vmem>>, vector<16x8xf32>
    %c0_32 = arith.constant 0 : index
    %c0_33 = arith.constant 0 : index
    %42 = vector.load %arg3[%c0_32, %c0_33] : memref<8x768xf32, #tpu.memory_space<vmem>>, vector<8x768xf32>
    %cst_34 = arith.constant dense<0.000000e+00> : vector<16x768xf32>
    %43 = tpu.matmul %41, %42, %cst_34 {dimension_numbers = #tpu.dot_dimension_numbers<[1], [0], [0], [1], [0, 0, 1, 1], [], []>, precision = #tpu.contract_precision<fp32>} : vector<16x8xf32>, vector<8x768xf32>, vector<16x768xf32> -> vector<16x768xf32>
    %44 = vector.extract_strided_slice %43 {offsets = [0, 0], sizes = [16, 256], strides = [1, 1]} : vector<16x768xf32> to vector<16x256xf32>
    %45 = vector.extract_strided_slice %43 {offsets = [0, 256], sizes = [16, 256], strides = [1, 1]} : vector<16x768xf32> to vector<16x256xf32>
    %46 = vector.extract_strided_slice %43 {offsets = [0, 512], sizes = [16, 256], strides = [1, 1]} : vector<16x768xf32> to vector<16x256xf32>
    %47 = tpu.concatenate %44, %45, %46 in 0 : vector<16x256xf32>, vector<16x256xf32>, vector<16x256xf32> -> vector<48x256xf32>
    %48 = vector.broadcast %8 : vector<1x256xf32> to vector<48x256xf32>
    %49 = arith.addf %47, %48 : vector<48x256xf32>
    %cst_35 = arith.constant 0.000000e+00 : f32
    %50 = vector.broadcast %cst_35 : f32 to vector<48x256xf32>
    %51 = arith.maximumf %49, %50 : vector<48x256xf32>
    %c0_36 = arith.constant 0 : index
    %c0_37 = arith.constant 0 : index
    %52 = vector.load %arg4[%c0_36, %c0_37] : memref<256x512xf32, #tpu.memory_space<vmem>>, vector<256x512xf32>
    %cst_38 = arith.constant dense<0.000000e+00> : vector<48x512xf32>
    %53 = tpu.matmul %51, %52, %cst_38 {dimension_numbers = #tpu.dot_dimension_numbers<[1], [0], [0], [1], [0, 0, 1, 1], [], []>, precision = #tpu.contract_precision<fp32>} : vector<48x256xf32>, vector<256x512xf32>, vector<48x512xf32> -> vector<48x512xf32>
    %54 = vector.broadcast %9 : vector<1x512xf32> to vector<48x512xf32>
    %55 = arith.addf %53, %54 : vector<48x512xf32>
    %cst_39 = arith.constant 0.000000e+00 : f32
    %56 = vector.broadcast %cst_39 : f32 to vector<48x512xf32>
    %57 = arith.maximumf %55, %56 : vector<48x512xf32>
    %c0_40 = arith.constant 0 : index
    %c0_41 = arith.constant 0 : index
    %58 = vector.load %arg5[%c0_40, %c0_41] : memref<512x256xf32, #tpu.memory_space<vmem>>, vector<512x256xf32>
    %cst_42 = arith.constant dense<0.000000e+00> : vector<48x256xf32>
    %59 = tpu.matmul %57, %58, %cst_42 {dimension_numbers = #tpu.dot_dimension_numbers<[1], [0], [0], [1], [0, 0, 1, 1], [], []>, precision = #tpu.contract_precision<fp32>} : vector<48x512xf32>, vector<512x256xf32>, vector<48x256xf32> -> vector<48x256xf32>
    %60 = vector.broadcast %10 : vector<1x256xf32> to vector<48x256xf32>
    %61 = arith.addf %59, %60 : vector<48x256xf32>
    %cst_43 = arith.constant 0.000000e+00 : f32
    %62 = vector.broadcast %cst_43 : f32 to vector<48x256xf32>
    %63 = arith.maximumf %61, %62 : vector<48x256xf32>
    %64 = vector.broadcast %11 : vector<1x256xf32> to vector<48x256xf32>
    %65 = arith.mulf %63, %64 : vector<48x256xf32>
    %cst_44 = arith.constant dense<0.000000e+00> : vector<48xf32>
    %66 = vector.multi_reduction <add>, %65, %cst_44 [1] : vector<48x256xf32> to vector<48xf32>
    %67 = vector.shape_cast %66 : vector<48xf32> to vector<48x1xf32>
    %68 = vector.broadcast %12 : vector<1x1xf32> to vector<48x1xf32>
    %69 = arith.addf %67, %68 : vector<48x1xf32>
    %cst_45 = arith.constant 0.000000e+00 : f32
    %70 = vector.broadcast %cst_45 : f32 to vector<48x1xf32>
    %71 = arith.subf %70, %69 : vector<48x1xf32>
    %72 = math.exp %71 : vector<48x1xf32>
    %cst_46 = arith.constant 1.000000e+00 : f32
    %73 = vector.broadcast %cst_46 : f32 to vector<48x1xf32>
    %74 = arith.addf %73, %72 : vector<48x1xf32>
    %cst_47 = arith.constant 1.000000e+00 : f32
    %75 = vector.broadcast %cst_47 : f32 to vector<48x1xf32>
    %76 = arith.divf %75, %74 : vector<48x1xf32>
    %c0_48 = arith.constant 0 : index
    %c0_49 = arith.constant 0 : index
    %77 = vector.load %arg6[%c0_48, %c0_49] : memref<48x1xf32, #tpu.memory_space<vmem>>, vector<48x1xf32>
    tpu.vector_store %arg6[%c0_48, %c0_49], %76 {strides = array<i32>} : memref<48x1xf32, #tpu.memory_space<vmem>>, vector<48x1xf32>,
    return
  }
}

</mosaic_0001>

<bundles_post_ra>
// kernel: tpu_custom_call.1
= control target key start
LH: loop header
LB: loop body
LE: loop exit
PB: predicated region body
PF: predicated region fallthrough
CT: control target
= control target key end

     0   :  { %11 = vsyncpa [#allocation4], 0  ;;  %s16879_s0 = inlined_call_operand.hbm [shape: f32[2,20], index: 0, kind: input, shape index: {}]   ;;  %s16880_s1 = inlined_call_operand.hbm [shape: f32[32,64], index: 1, kind: input, shape index: {}]   ;;  %s16881_s2 = inlined_call_operand.hbm [shape: f32[8,512], index: 2, kind: input, shape index: {}]   ;;  %s16882_s3 = inlined_call_operand.hbm [shape: f32[8,768], index: 3, kind: input, shape index: {}]   ;;  %s16883_s4 = inlined_call_operand.hbm [shape: f32[256,512], index: 4, kind: input, shape index: {}]   ;;  %s16884_s5 = inlined_call_operand.hbm [shape: f32[512,256], index: 5, kind: input, shape index: {}]   ;;  %s16885_s6 = inlined_call_operand.vmem [shape: f32[48,1], index: 6, kind: output, shape index: {}]  }
   0x1   :  { %12 = vsyncpa [#allocation6], 0 }
   0x2   :  { %13 = vsyncpa [#allocation9], 0 }
   0x3   :  { %14 = vsyncpa [#allocation12], 0  ;;  %s10224_s21 = smov [#allocation5]  }
   0x4   :  { %s30_s22 = sshll.u32 %s10224_s21, 4  ;;  %s31_s22 = int_to_ptr.vmem [resolvable:$true] %s30_s22 }
   0x5   :  { %s10104_s23 = scalar_lea.vmem %s31_s22, 512  ;;  %p10109_p1 = scmp.lt.s32.totalorder %s31_s22, %s31_s22 }
   0x6   :  { %p10105_p0 = scmp.ne.s32.totalorder %s31_s22, %s10104_s23  ;;  %p10110_p2 = scmp.lt.s32.totalorder %s10104_s23, %s10104_s23 }
   0x8   :  { %p10111_p3 = por %p10110_p2, %p10109_p1 }
   0xa   :  { %p10112_p4 = pnand %p10111_p3, %p10105_p0 }
   0xc   :  { %10115 = shalt.err (!%p10112_p4)
}
   0xd   :  { %s10225_s24 = smov 128   ;;  %s10226_s25 = smov 8  }
   0xe   :  { %36 = dma.hbm_to_vmem [thread:$0]  %s16880_s1, 512, %s31_s22, [#allocation6], %s10225_s24, %s10225_s24, %s10226_s25  }
   0xf   :  { %s10227_s28 = smov [#allocation8]   ;;  %s10228_s30 = smov [#allocation3]  }
  0x10   :  { %s53_s29 = sshll.u32 %s10227_s28, 4  ;;  %s21_s7 = sshll.u32 %s10228_s30, 4  ;;  %s54_s29 = int_to_ptr.vmem [resolvable:$true] %s53_s29  ;;  %s22_s7 = int_to_ptr.vmem [resolvable:$true] %s21_s7 }
  0x11   :  { %s10124_s8 = scalar_lea.vmem %s54_s29, 768  ;;  %p10129_p6 = scmp.lt.s32.totalorder %s54_s29, %s54_s29 }
  0x12   :  { %p10125_p5 = scmp.ne.s32.totalorder %s54_s29, %s10124_s8  ;;  %p10130_p7 = scmp.lt.s32.totalorder %s10124_s8, %s10124_s8 }
  0x14   :  { %p10131_p8 = por %p10130_p7, %p10129_p6 }
  0x16   :  { %p10132_p9 = pnand %p10131_p8, %p10125_p5 }
  0x18   :  { %10135 = shalt.err (!%p10132_p9)
}
  0x19   :  { %56 = dma.hbm_to_vmem [thread:$0]  %s16882_s3, 768, %s54_s29, [#allocation9]  }
  0x1a   :  { %s10144_s11 = scalar_lea.vmem %s22_s7, 32  ;;  %p10149_p11 = scmp.lt.s32.totalorder %s22_s7, %s22_s7 }
  0x1b   :  { %p10145_p10 = scmp.ne.s32.totalorder %s22_s7, %s10144_s11  ;;  %p10150_p12 = scmp.lt.s32.totalorder %s10144_s11, %s10144_s11 }
  0x1d   :  { %p10151_p13 = por %p10150_p12, %p10149_p11 }
  0x1f   :  { %p10152_p0 = pnand %p10151_p13, %p10145_p10 }
  0x21   :  { %10155 = shalt.err (!%p10152_p0)
}
  0x22   :  { %24 = dma.hbm_to_vmem [thread:$0]  %s16879_s0, 32, %s22_s7, [#allocation4]  }
  0x23   :  { %s10229_s13 = smov [#allocation7]   ;;  %s10230_s15 = smov [#allocation10]  }
  0x24   :  { %s43_s14 = sshll.u32 %s10229_s13, 4  ;;  %s62_s16 = sshll.u32 %s10230_s15, 4  ;;  %s44_s14 = int_to_ptr.vmem [resolvable:$true] %s43_s14  ;;  %s63_s16 = int_to_ptr.vmem [resolvable:$true] %s62_s16 }
  0x25   :  { %s10164_s17 = scalar_lea.vmem %s44_s14, 512  ;;  %p10169_p2 = scmp.lt.s32.totalorder %s44_s14, %s44_s14 }
  0x26   :  { %p10165_p1 = scmp.ne.s32.totalorder %s44_s14, %s10164_s17  ;;  %p10170_p3 = scmp.lt.s32.totalorder %s10164_s17, %s10164_s17 }
  0x28   :  { %p10171_p4 = por %p10170_p3, %p10169_p2 }
  0x2a   :  { %p10172_p5 = pnand %p10171_p4, %p10165_p1 }
  0x2c   :  { %10175 = shalt.err (!%p10172_p5)
}
  0x2d   :  { %46 = dma.hbm_to_vmem [thread:$0]  %s16881_s2, 512, %s44_s14, [#allocation6]  }
  0x2e   :  { %s10184_s19 = scalar_lea.vmem %s63_s16, 16384  ;;  %p10189_p7 = scmp.lt.s32.totalorder %s63_s16, %s63_s16 }
  0x2f   :  { %p10185_p6 = scmp.ne.s32.totalorder %s63_s16, %s10184_s19  ;;  %p10190_p8 = scmp.lt.s32.totalorder %s10184_s19, %s10184_s19 }
  0x31   :  { %p10191_p9 = por %p10190_p8, %p10189_p7 }
  0x33   :  { %p10192_p10 = pnand %p10191_p9, %p10185_p6 }
  0x35   :  { %10195 = shalt.err (!%p10192_p10)
}
  0x36   :  { %s10231_s0 = smov 512   ;;  %s10232_s20 = smov 32  }
  0x37   :  { %68 = dma.hbm_to_vmem [thread:$0]  %s16883_s4, 16384, %s63_s16, [#allocation9], %s10231_s0, %s10231_s0, %s10232_s20  }
  0x38   :  { %s10233_s23 = smov [#allocation11]  }
  0x39   :  { %s74_s24 = sshll.u32 %s10233_s23, 4  ;;  %s75_s24 = int_to_ptr.vmem [resolvable:$true] %s74_s24 }
  0x3a   :  { %s10204_s25 = scalar_lea.vmem %s75_s24, 16384  ;;  %p10209_p12 = scmp.lt.s32.totalorder %s75_s24, %s75_s24 }
  0x3b   :  { %p10205_p11 = scmp.ne.s32.totalorder %s75_s24, %s10204_s25  ;;  %p10210_p13 = scmp.lt.s32.totalorder %s10204_s25, %s10204_s25 }
  0x3d   :  { %p10211_p0 = por %p10210_p13, %p10209_p12 }
  0x3f   :  { %p10212_p1 = pnand %p10211_p0, %p10205_p11 }
  0x41   :  { %10215 = shalt.err (!%p10212_p1)
}
  0x42   :  { %s10234_s2 = smov 256   ;;  %s10235_s26 = smov 16  }
  0x43   :  { %80 = dma.hbm_to_vmem [thread:$0]  %s16884_s5, 16384, %s75_s24, [#allocation12], %s10234_s2, %s10234_s2, %s10235_s26  }
  0x44   :  { %10216 = dma.done.wait [#allocation4], 32  }
  0x45   :  { %10217 = vsyncadd [#allocation4], 4294967264 }
  0x46   :  { %10218 = dma.done.wait [#allocation6], 1024  }
  0x47   :  { %10219 = vsyncadd [#allocation6], 4294966272 }
  0x48   :  { %10220 = dma.done.wait [#allocation9], 17152  }
  0x49   :  { %10221 = vsyncadd [#allocation9], 4294950144 }
  0x4a   :  { %10222 = dma.done.wait [#allocation12], 16384  }
  0x4b   :  { %10223 = vsyncadd [#allocation12], 4294950912  ;;  %v16895_v0 = vmov 0.0   ;;  %vm10237_vm0 = vmmov 0   ;;  %vm121_vm1 = vcmask 1043456   ;;  %s10238_s4 = smov 112  }
  0x4c   :  { %9953 = vmatprep.subr.mxu1 %v16895_v0  ;;  %9948 = vmatprep.subr.mxu0 %v16895_v0  ;;  %v10304_v1 = vld [vmem:[#allocation3] sm:$0x3]  ;;  %v100_v2 = vld [vmem:[#allocation5] sm:$0xf]  ;;  %vm118_vm2 = vcmask 31744   ;;  %v102_v35 = vld [vmem:[#allocation5 + $0x10] sm:$0xff] }
  0x4d   :  { %9955 = vmatprep.mubr.msk.f32.mxu1 %vm10237_vm0, %v16895_v0  ;;  %9950 = vmatprep.mubr.msk.f32.mxu0 %vm10237_vm0, %v16895_v0  ;;  %v123_v3 = vsel %vm121_vm1, %v100_v2, 0  ;;  %v103_v16 = vld [vmem:[#allocation5 + $0x18] sm:$0xff]  ;;  %v104_v26 = vld [vmem:[#allocation7] ss:$0 sm:$0xff]  ;;  %v101_v38 = vld [vmem:[#allocation5 + $0x8] sm:$0xff]  ;;  %v10334_v40 = vand.u32 4294901760, %v102_v35 }
  0x4e   :  { %116 = vrot.lane.b32.xlu0 %v10304_v1, %s10238_s4  ;;  %v156_v4 = vand.u32 4294901760, %v123_v3  ;;  %v607_v17 = vand.u32 4294901760, %v103_v16  ;;  %v10336_v43 = vand.u32 4294901760, %v101_v38  ;;  %vm1022_vm3 = vcmask 130048   ;;  %s10239_s5 = smov 120   ;;  %s10240_s29 = smov 104  }
  0x4f   :  { %vm572_vm4 = vcmask 64512   ;;  %v10339_v45 = vsub.f32 %v102_v35, %v10334_v40  ;;  %v1023_v48 = vsel %vm1022_vm3, %v10304_v1, 0  ;;  %vm1486_vm5 = vcmask 58368   ;;  %s10241_s30 = smov 96   ;;  %s10242_s7 = smov 88  }
  0x50   :  { %v233_v5 = vsub.f32 %v123_v3, %v156_v4  ;;  %9949 = vmatpush3.msra.mxu0 %v156_v4  ;;  %v10326_v18 = vsub.f32 %v103_v16, %v607_v17  ;;  %v10342_v47 = vsub.f32 %v101_v38, %v10336_v43  ;;  %v10347_v52 = vand.u32 4294901760, %v1023_v48  ;;  %s10243_s8 = smov 80   ;;  %s10244_s9 = smov 72  }
  0x51   :  { %9958 = vmatprep.subr.mxu0 %v16895_v0  ;;  %v1133_v51 = vand.u32 4294901760, %v10339_v45  ;;  %vm9891_vm6 = vcmask 7168  }
  0x52   :  { %v234_v6 = vand.u32 4294901760, %v233_v5  ;;  %v685_v19 = vand.u32 4294901760, %v10326_v18  ;;  %v1140_v54 = vand.u32 4294901760, %v10342_v47  ;;  %v1093_v57 = vsub.f32 %v1023_v48, %v10347_v52 }
  0x53   :  { %v1134_v56 = vsub.f32 %v10339_v45, %v1133_v51 }
  0x54   :  { %v235_v7 = vsub.f32 %v233_v5, %v234_v6  ;;  %v686_v20 = vsub.f32 %v10326_v18, %v685_v19  ;;  %v1141_v59 = vsub.f32 %v10342_v47, %v1140_v54  ;;  %v1094_v62 = vand.u32 4294901760, %v1093_v57 }
  0x55   :  { %v1135_v61 = vand.u32 4294901760, %v1134_v56 }
  0x56   :  { %v236_v8 = vand.u32 4294901760, %v235_v7  ;;  %v687_v21 = vand.u32 4294901760, %v686_v20  ;;  %v1142_v63 = vand.u32 4294901760, %v1141_v59  ;;  %v1095_v1 = vsub.f32 %v1093_v57, %v1094_v62 }
  0x58   :  { %9954 = vmatpush3.msra.mxu1 %v236_v8  ;;  %v1096_v2 = vand.u32 4294901760, %v1095_v1 }
  0x59   :  { %9963 = vmatprep.subr.mxu1 %v16895_v0 }
  0xc0   :  { %v117_v9 = vpop.permute.xlu0 %116 }
  0xc1   :  { %v119_v10 = vsel %vm118_vm2, %v117_v9, 0 }
  0xc2   :  { %v191_v11 = vand.u32 4294901760, %v119_v10 }
  0xc4   :  { %v192_v12 = vsub.f32 %v119_v10, %v191_v11  ;;  %9956 = vmatmul.mubr.f32.vlgmr.msra.gmra.mxu1 %v191_v11 }
  0xc5   :  { %9964 = vmatpush3.msra.mxu1 %v156_v4  ;;  %9965 = vmatprep.mubr.msk.f32.mxu1 %vm10237_vm0, %v16895_v0 }
  0xc6   :  { %v193_v13 = vand.u32 4294901760, %v192_v12  ;;  %9973 = vmatprep.subr.mxu1 %v16895_v0 }
  0xc8   :  { %9966 = vmatmul.mubr.f32.vlgmr.msra.gmra.mxu1 %v193_v13  ;;  %v194_v14 = vsub.f32 %v192_v12, %v193_v13 }
  0xc9   :  { %9974 = vmatpush3.msra.mxu1 %v156_v4  ;;  %9975 = vmatprep.mubr.msk.f32.mxu1 %vm10237_vm0, %v16895_v0 }
  0xca   :  { %v195_v15 = vand.u32 4294901760, %v194_v14  ;;  %9983 = vmatprep.subr.mxu1 %v16895_v0 }
  0xcc   :  { %9951 = vmatmul.mubr.f32.vlgmr.msra.gmra.mxu0 %v195_v15  ;;  %9976 = vmatmul.mubr.f32.vlgmr.msra.gmra.mxu1 %v191_v11 }
  0xcd   :  { %9959 = vmatpush3.msra.mxu0 %v233_v5  ;;  %9960 = vmatprep.mubr.msk.f32.mxu0 %vm10237_vm0, %v16895_v0 }
  0xce   :  { %9968 = vmatprep.subr.mxu0 %v16895_v0  ;;  %9985 = vmatprep.mubr.msk.f32.mxu1 %vm10237_vm0, %v16895_v0 }
  0xcf   :  { %9984 = vmatpush3.msra.mxu1 %v687_v21 }
  0xd0   :  { %9961 = vmatmul.mubr.f32.vlgmr.msra.gmra.mxu0 %v192_v12  ;;  %9993 = vmatprep.subr.mxu1 %v16895_v0 }
  0xd1   :  { %9969 = vmatpush3.msra.mxu0 %v234_v6  ;;  %9970 = vmatprep.mubr.msk.f32.mxu0 %vm10237_vm0, %v16895_v0 }
  0xd2   :  { %9978 = vmatprep.subr.mxu0 %v16895_v0 }
  0xd4   :  { %9971 = vmatmul.mubr.f32.vlgmr.msra.gmra.mxu0 %v191_v11 }
  0xd5   :  { %9980 = vmatprep.mubr.msk.f32.mxu0 %vm10237_vm0, %v16895_v0  ;;  %9979 = vmatpush3.msra.mxu0 %v607_v17 }
  0xd6   :  { %9988 = vmatprep.subr.mxu0 %v16895_v0 }
 0x184   :  { %v273_v22 = vpop.f32.mrf.mxu1 }
 0x186   :  { %v9957_v23 = vpop.f32.mrf.mxu1 }
 0x188   :  { %v421_v24 = vpop.f32.mrf.mxu1 }
 0x18a   :  { %v9967_v25 = vpop.f32.mrf.mxu1 }
 0x18c   :  { %v197_v27 = vpop.f32.mrf.mxu0  ;;  %v567_v28 = vpop.f32.mrf.mxu1 }
 0x18d   :  { %v198_v29 = vadd.f32 %v197_v27, %v104_v26 }
 0x18e   :  { %v9952_v30 = vpop.f32.mrf.mxu0  ;;  %v9977_v31 = vpop.f32.mrf.mxu1 }
 0x18f   :  { %v274_v32 = vadd.f32 %v273_v22, %v198_v29 }
 0x190   :  { %v347_v33 = vpop.f32.mrf.mxu0 }
 0x191   :  { %v348_v34 = vadd.f32 %v347_v33, %v274_v32  ;;  %v1520_v32 = vld [vmem:[#allocation8 + $0x8] sm:$0xff] }
 0x192   :  { %v9962_v36 = vpop.f32.mrf.mxu0  ;;  %v10403_v33 = vand.u32 4294901760, %v1520_v32 }
 0x193   :  { %v422_v37 = vadd.f32 %v421_v24, %v348_v34  ;;  %v1519_v34 = vld [vmem:[#allocation8] sm:$0xff] }
 0x194   :  { %v495_v39 = vpop.f32.mrf.mxu0 }
 0x195   :  { %v496_v41 = vadd.f32 %v495_v39, %v422_v37  ;;  %v10405_v37 = vand.u32 4294901760, %v1519_v34  ;;  %v10408_v39 = vsub.f32 %v1520_v32, %v10403_v33 }
 0x196   :  { %v9972_v42 = vpop.f32.mrf.mxu0 }
 0x197   :  { %v568_v44 = vadd.f32 %v567_v28, %v496_v41 }
 0x199   :  { %v571_v46 = vmax.f32 %v568_v44, 0.0 }
 0x19b   :  { %v574_v49 = vsel %vm572_vm4, %v571_v46, 0 }
 0x19c   :  { %v642_v50 = vand.u32 4294901760, %v574_v49 }
 0x19e   :  { %v643_v53 = vsub.f32 %v574_v49, %v642_v50  ;;  %9986 = vmatmul.mubr.f32.vlgmr.msra.gmra.mxu1 %v642_v50 }
 0x19f   :  { %9994 = vmatpush3.msra.mxu1 %v607_v17  ;;  %9995 = vmatprep.mubr.msk.f32.mxu1 %vm10237_vm0, %v16895_v0 }
 0x1a0   :  { %v644_v55 = vand.u32 4294901760, %v643_v53  ;;  %10003 = vmatprep.subr.mxu1 %v16895_v0 }
 0x1a2   :  { %9996 = vmatmul.mubr.f32.vlgmr.msra.gmra.mxu1 %v644_v55  ;;  %v645_v58 = vsub.f32 %v643_v53, %v644_v55 }
 0x1a3   :  { %10004 = vmatpush3.msra.mxu1 %v607_v17  ;;  %10005 = vmatprep.mubr.msk.f32.mxu1 %vm10237_vm0, %v16895_v0 }
 0x1a4   :  { %v646_v60 = vand.u32 4294901760, %v645_v58  ;;  %10015 = vmatprep.subr.mxu1 %v16895_v0 }
 0x1a6   :  { %9981 = vmatmul.mubr.f32.vlgmr.msra.gmra.mxu0 %v646_v60  ;;  %10006 = vmatmul.mubr.f32.vlgmr.msra.gmra.mxu1 %v642_v50 }
 0x1a7   :  { %9989 = vmatpush3.msra.mxu0 %v10326_v18  ;;  %9990 = vmatprep.mubr.msk.f32.mxu0 %vm10237_vm0, %v16895_v0 }
 0x1a8   :  { %9998 = vmatprep.subr.mxu0 %v16895_v0  ;;  %10016 = vmatpush3.msra.mxu1 %v1135_v61 }
 0x1a9   :  { %10017 = vmatprep.subr.mxu1 %v16895_v0  ;;  %10019 = vmatprep.mubr.msk.f32.mxu1 %vm10237_vm0, %v16895_v0 }
 0x1aa   :  { %9991 = vmatmul.mubr.f32.vlgmr.msra.gmra.mxu0 %v643_v53  ;;  %10018 = vmatpush3.msra.mxu1 %v1142_v63 }
 0x1ab   :  { %9999 = vmatpush3.msra.mxu0 %v685_v19  ;;  %10000 = vmatprep.mubr.msk.f32.mxu0 %vm10237_vm0, %v16895_v0 }
 0x1ac   :  { %10008 = vmatprep.subr.mxu0 %v16895_v0  ;;  %10020 = vmatmul.mubr.f32.vlgmr.msra.gmra.mxu1 %v10347_v52 }
 0x1ad   :  { %10029 = vmatprep.subr.mxu1 %v16895_v0  ;;  %10033 = vmatprep.mubr.msk.f32.mxu1 %vm10237_vm0, %v16895_v0 }
 0x1ae   :  { %10001 = vmatmul.mubr.f32.vlgmr.msra.gmra.mxu0 %v642_v50  ;;  %10030 = vmatpush3.msra.mxu1 %v10334_v40 }
 0x1af   :  { %10009 = vmatpush3.msra.mxu0 %v10334_v40  ;;  %10012 = vmatprep.mubr.msk.f32.mxu0 %vm10237_vm0, %v16895_v0 }
 0x1b0   :  { %10010 = vmatprep.subr.mxu0 %v16895_v0  ;;  %10031 = vmatprep.subr.mxu1 %v16895_v0 }
 0x1b1   :  { %10011 = vmatpush3.msra.mxu0 %v10336_v43  ;;  %10032 = vmatpush3.msra.mxu1 %v10336_v43 }
 0x1b2   :  { %10022 = vmatprep.subr.mxu0 %v16895_v0  ;;  %10013 = vmatmul.mubr.f32.vlgmr.msra.gmra.mxu0 %v1096_v2 }
 0x1b3   :  { %10023 = vmatpush3.msra.mxu0 %v10339_v45  ;;  %10026 = vmatprep.mubr.msk.f32.mxu0 %vm10237_vm0, %v16895_v0  ;;  %v1652_v45 = vand.u32 4294901760, %v10408_v39 }
 0x1b4   :  { %10024 = vmatprep.subr.mxu0 %v16895_v0  ;;  %10034 = vmatmul.mubr.f32.vlgmr.msra.gmra.mxu1 %v1094_v62 }
 0x1b5   :  { %10025 = vmatpush3.msra.mxu0 %v10342_v47  ;;  %10043 = vmatprep.subr.mxu1 %v16895_v0  ;;  %v1653_v48 = vsub.f32 %v10408_v39, %v1652_v45 }
 0x1b6   :  { %10036 = vmatprep.subr.mxu0 %v16895_v0  ;;  %10027 = vmatmul.mubr.f32.vlgmr.msra.gmra.mxu0 %v1093_v57  ;;  %v1522_v57 = vld [vmem:[#allocation8 + $0x18] sm:$0xff] }
 0x1b7   :  { %10037 = vmatpush3.msra.mxu0 %v1133_v51  ;;  %10044 = vmatpush3.msra.mxu1 %v10334_v40  ;;  %v105_v40 = vld [vmem:[#allocation7 + $0x1] ss:$0 sm:$0xff]  ;;  %v1654_v51 = vand.u32 4294901760, %v1653_v48  ;;  %v10433_v60 = vand.u32 4294901760, %v1522_v57  ;;  %v3156_v48 = vld [vmem:[#allocation10 + $0x180] sm:$0xff] }
 0x1b8   :  { %10038 = vmatprep.subr.mxu0 %v16895_v0  ;;  %10045 = vmatprep.subr.mxu1 %v16895_v0 }
 0x1b9   :  { %10039 = vmatpush3.msra.mxu0 %v1140_v54  ;;  %10040 = vmatprep.mubr.msk.f32.mxu0 %vm10237_vm0, %v16895_v0  ;;  %v10440_v2 = vsub.f32 %v1522_v57, %v10433_v60  ;;  %v10583_v57 = vand.u32 4294901760, %v3156_v48 }
 0x1ba   :  { %10046 = vmatpush3.msra.mxu1 %v10336_v43  ;;  %10047 = vmatprep.mubr.msk.f32.mxu1 %vm10237_vm0, %v16895_v0  ;;  %v10412_v43 = vsub.f32 %v1519_v34, %v10405_v37  ;;  %v3168_v34 = vld [vmem:[#allocation10 + $0x1e0] sm:$0xff] }
 0x1bb   :  { %10041 = vmatmul.mubr.f32.vlgmr.msra.gmra.mxu0 %v10347_v52  ;;  %10048 = vmatmul.mubr.f32.vlgmr.msra.gmra.mxu1 %v10347_v52  ;;  %17936 = vst [vmem:[#allocation29_spill] sm:$0xff] %v10583_v57 }
 0x1bc   :  { %1694 = vmatprep.mubr.f32.mxu1 %v16895_v0  ;;  %1597 = vmatprep.mubr.f32.mxu0 %v16895_v0  ;;  %v1658_v46 = vand.u32 4294901760, %v10412_v43 }
 0x1bd   :  { %1562 = vmatprep.subr.mxu0 %v10403_v33  ;;  %1655 = vmatprep.subr.mxu1 %v1654_v51 }
 0x1be   :  { %1564 = vmatpush1.msra.mxu0 %v10405_v37  ;;  %v1659_v49 = vsub.f32 %v10412_v43, %v1658_v46 }
 0x1bf   :  { %1741 = vmatprep.subr.mxu0 %v10408_v39 }
 0x1c0   :  { %v1660_v52 = vand.u32 4294901760, %v1659_v49 }
 0x1c2   :  { %1661 = vmatpush1.msra.mxu1 %v1660_v52 }
 0x1c3   :  { %1825 = vmatprep.subr.mxu1 %v10403_v33 }
 0x25e   :  { %v724_v3 = vpop.f32.mrf.mxu1 }
 0x260   :  { %v9987_v4 = vpop.f32.mrf.mxu1 }
 0x262   :  { %v872_v5 = vpop.f32.mrf.mxu1 }
 0x264   :  { %v9997_v6 = vpop.f32.mrf.mxu1 }
 0x265   :  { %v2166_v6 = vand.u32 4294901760, %v10440_v2 }
 0x266   :  { %v648_v7 = vpop.f32.mrf.mxu0  ;;  %v1018_v8 = vpop.f32.mrf.mxu1 }
 0x267   :  { %v725_v11 = vadd.f32 %v724_v3, %v648_v7  ;;  %v1521_v3 = vld [vmem:[#allocation8 + $0x10] sm:$0xff] }
 0x268   :  { %v9982_v9 = vpop.f32.mrf.mxu0  ;;  %v10007_v10 = vpop.f32.mrf.mxu1  ;;  %v10453_v7 = vand.u32 4294901760, %v1521_v3 }
 0x26a   :  { %v798_v12 = vpop.f32.mrf.mxu0 }
 0x26b   :  { %v799_v13 = vadd.f32 %v798_v12, %v725_v11 }
 0x26c   :  { %v9992_v14 = vpop.f32.mrf.mxu0  ;;  %v1179_v15 = vpop.f32.mrf.mxu1 }
 0x26d   :  { %v873_v16 = vadd.f32 %v872_v5, %v799_v13  ;;  %v2167_v13 = vsub.f32 %v10440_v2, %v2166_v6  ;;  %v10466_v14 = vsub.f32 %v1521_v3, %v10453_v7  ;;  %v3145_v3 = vld [vmem:[#allocation10 + $0x128] sm:$0xff] }
 0x26e   :  { %v946_v17 = vpop.f32.mrf.mxu0  ;;  %v10021_v18 = vpop.f32.mrf.mxu1 }
 0x26f   :  { %v947_v19 = vadd.f32 %v946_v17, %v873_v16  ;;  %v2168_v17 = vand.u32 4294901760, %v2167_v13  ;;  %v2172_v18 = vand.u32 4294901760, %v10466_v14 }
 0x270   :  { %v10002_v20 = vpop.f32.mrf.mxu0 }
 0x271   :  { %v1019_v21 = vadd.f32 %v1018_v8, %v947_v19 }
 0x272   :  { %v1098_v22 = vpop.f32.mrf.mxu0 }
 0x273   :  { %v1099_v23 = vadd.f32 %v1098_v22, %v1019_v21  ;;  %v2173_v21 = vsub.f32 %v10466_v14, %v2172_v18  ;;  %v1524_v22 = vld [vmem:[#allocation8 + $0x28] sm:$0xff] }
 0x274   :  { %v10014_v24 = vpop.f32.mrf.mxu0  ;;  %v1330_v25 = vpop.f32.mrf.mxu1 }
 0x275   :  { %v1180_v26 = vadd.f32 %v1179_v15, %v1099_v23  ;;  %v2174_v23 = vand.u32 4294901760, %v2173_v21  ;;  %v10496_v24 = vand.u32 4294901760, %v1524_v22  ;;  %v10616_v21 = vand.u32 4294901760, %v3145_v3 }
 0x276   :  { %v1255_v27 = vpop.f32.mrf.mxu0  ;;  %v10035_v28 = vpop.f32.mrf.mxu1 }
 0x277   :  { %v1256_v29 = vadd.f32 %v1255_v27, %v1180_v26  ;;  %v1523_v26 = vld [vmem:[#allocation8 + $0x20] sm:$0xff]  ;;  %17944 = vst [vmem:[#allocation37_spill] sm:$0xff] %v10616_v21 }
 0x278   :  { %v10028_v30 = vpop.f32.mrf.mxu0  ;;  %v10513_v27 = vand.u32 4294901760, %v1523_v26 }
 0x279   :  { %v1331_v31 = vadd.f32 %v1330_v25, %v1256_v29  ;;  %v10507_v25 = vsub.f32 %v1524_v22, %v10496_v24 }
 0x27a   :  { %v10523_v29 = vsub.f32 %v1523_v26, %v10513_v27 }
 0x27b   :  { %v1407_v35 = vpop.f32.mrf.mxu0  ;;  %v1480_v36 = vpop.f32.mrf.mxu1  ;;  %v16894_v28 = vand.u32 4294901760, %v10507_v25 }
 0x27c   :  { %v1408_v38 = vadd.f32 %v1407_v35, %v1331_v31  ;;  %v16893_v31 = vand.u32 4294901760, %v10523_v29  ;;  %v3165_v35 = vld [vmem:[#allocation10 + $0x1c8] sm:$0xff] }
 0x27d   :  { %v10042_v41 = vpop.f32.mrf.mxu0  ;;  %v10049_v42 = vpop.f32.mrf.mxu1  ;;  %v2681_v30 = vsub.f32 %v10507_v25, %v16894_v28 }
 0x27e   :  { %v1481_v44 = vadd.f32 %v1480_v36, %v1408_v38  ;;  %v2687_v36 = vsub.f32 %v10523_v29, %v16893_v31  ;;  %v3161_v38 = vld [vmem:[#allocation10 + $0x1a8] sm:$0xff]  ;;  %v3160_v41 = vld [vmem:[#allocation10 + $0x1a0] sm:$0xff]  ;;  %v10552_v42 = vand.u32 4294901760, %v3165_v35 }
 0x27f   :  { %v2682_v32 = vand.u32 4294901760, %v2681_v30  ;;  %v3133_v31 = vld [vmem:[#allocation10 + $0xc8] sm:$0xff] }
 0x280   :  { %v1484_v47 = vadd.f32 %v1481_v44, %v105_v40  ;;  %v10548_v40 = vand.u32 4294901760, %v3168_v34  ;;  %17926 = vst [vmem:[#allocation19_spill] sm:$0xff] %v10552_v42  ;;  %v10558_v44 = vand.u32 4294901760, %v3161_v38  ;;  %v10571_v51 = vsub.f32 %v3165_v35, %v10552_v42 }
 0x282   :  { %v1485_v50 = vmax.f32 %v1484_v47, 0.0  ;;  %17925 = vst [vmem:[#allocation18_spill] sm:$0xff] %v10548_v40  ;;  %17928 = vst [vmem:[#allocation21_spill] sm:$0xff] %v10558_v44  ;;  %v10560_v47 = vand.u32 4294901760, %v3160_v41 }
 0x283   :  { %17932 = vst [vmem:[#allocation25_spill] sm:$0xff] %v10571_v51 }
 0x284   :  { %1493 = vrot.lane.b32.xlu1 %v1485_v50, %s10238_s4  ;;  %1489 = vrot.lane.b32.xlu0 %v1485_v50, %s10239_s5  ;;  %1487 = vst.msk [vmem:[#allocation2] sm:$0x3] %vm1486_vm5, %v1485_v50  ;;  %17929 = vst [vmem:[#allocation22_spill] sm:$0xff] %v10560_v47 }
 0x288   :  { %1497 = vrot.lane.b32.xlu1 %v1485_v50, %s10240_s29  ;;  %1501 = vrot.lane.b32.xlu0 %v1485_v50, %s10241_s30 }
 0x28c   :  { %1505 = vrot.lane.b32.xlu1 %v1485_v50, %s10242_s7  ;;  %1509 = vrot.lane.b32.xlu0 %v1485_v50, %s10243_s8 }
 0x290   :  { %1513 = vrot.lane.b32.xlu1 %v1485_v50, %s10244_s9  ;;  %v10566_v50 = vsub.f32 %v3168_v34, %v10548_v40 }
 0x292   :  { %17931 = vst [vmem:[#allocation24_spill] sm:$0xff] %v10566_v50 }
 0x2f6   :  { %v1494_v53 = vpop.permute.xlu1 %1493  ;;  %v1490_v54 = vpop.permute.xlu0 %1489 }
 0x2f7   :  { %1496 = vst.msk [vmem:[#allocation2 + $0x4] sm:$0x3] %vm1486_vm5, %v1494_v53  ;;  %1492 = vst.msk [vmem:[#allocation2 + $0x2] sm:$0x3] %vm1486_vm5, %v1490_v54  ;;  %v3153_v53 = vld [vmem:[#allocation10 + $0x168] sm:$0xff]  ;;  %v3152_v54 = vld [vmem:[#allocation10 + $0x160] sm:$0xff] }
 0x2fa   :  { %v1498_v55 = vpop.permute.xlu1 %1497  ;;  %v1502_v56 = vpop.permute.xlu0 %1501 }
 0x2fb   :  { %1500 = vst.msk [vmem:[#allocation2 + $0x6] sm:$0x3] %vm1486_vm5, %v1498_v55  ;;  %1504 = vst.msk [vmem:[#allocation2 + $0x8] sm:$0x3] %vm1486_vm5, %v1502_v56  ;;  %v10581_v56 = vsub.f32 %v3161_v38, %v10558_v44 }
 0x2fd   :  { %17935 = vst [vmem:[#allocation28_spill] sm:$0xff] %v10581_v56  ;;  %v16886_v13 = vand.u32 4294901760, %v10581_v56 }
 0x2fe   :  { %v1506_v58 = vpop.permute.xlu1 %1505  ;;  %v1510_v59 = vpop.permute.xlu0 %1509 }
 0x2ff   :  { %1508 = vst.msk [vmem:[#allocation2 + $0xa] sm:$0x3] %vm1486_vm5, %v1506_v58  ;;  %1512 = vst.msk [vmem:[#allocation2 + $0xc] sm:$0x3] %vm1486_vm5, %v1510_v59  ;;  %v3149_v58 = vld [vmem:[#allocation10 + $0x148] sm:$0xff]  ;;  %v10588_v59 = vsub.f32 %v3160_v41, %v10560_v47  ;;  %v10659_v41 = vsub.f32 %v10581_v56, %v16886_v13 }
 0x301   :  { %17937 = vst [vmem:[#allocation30_spill] sm:$0xff] %v10588_v59 }
 0x302   :  { %v1517_v61 = vld [vmem:[#allocation2] sm:$0xff]  ;;  %v1514_v62 = vpop.permute.xlu1 %1513 }
 0x303   :  { %v1526_v63 = vsel %vm572_vm4, %v1517_v61, 0  ;;  %1516 = vst.msk [vmem:[#allocation2 + $0xe] sm:$0x3] %vm1486_vm5, %v1514_v62  ;;  %v16890_v62 = vand.u32 4294901760, %v10566_v50 }
 0x304   :  { %v10437_v1 = vand.u32 4294901760, %v1526_v63 }
 0x305   :  { %v10628_v26 = vsub.f32 %v10566_v50, %v16890_v62  ;;  %v3136_v62 = vld [vmem:[#allocation10 + $0xe0] sm:$0xff] }
 0x306   :  { %1696 = vmatmul.mubr.f32.vlgmr.msra.gmra.mxu1 %v10437_v1  ;;  %v10444_v4 = vsub.f32 %v1526_v63, %v10437_v1  ;;  %v10594_v63 = vand.u32 4294901760, %v3153_v53  ;;  %v10726_v28 = vand.u32 4294901760, %v3136_v62  ;;  %v3120_v50 = vld [vmem:[#allocation10 + $0x60] sm:$0xff] }
 0x307   :  { %1701 = vmatprep.mubr.f32.mxu1 %v16895_v0  ;;  %1827 = vmatpush1.msra.mxu1 %v10405_v37 }
 0x308   :  { %v10449_v5 = vand.u32 4294901760, %v10444_v4  ;;  %1995 = vmatprep.subr.mxu1 %v10403_v33  ;;  %v3169_v33 = vld [vmem:[#allocation10 + $0x1e8] sm:$0xff]  ;;  %17938 = vst [vmem:[#allocation31_spill] sm:$0xff] %v10594_v63  ;;  %v10631_v30 = vsub.f32 %v3153_v53, %v10594_v63  ;;  %v10673_v53 = vsub.f32 %v3145_v3, %v10616_v21  ;;  %17958 = vst [vmem:[#allocation50_spill] sm:$0xff] %v10726_v28 }
 0x309   :  { %v10546_v39 = vand.u32 4294901760, %v3169_v33 }
 0x30a   :  { %v1518_v8 = vld [vmem:[#allocation2 + $0x8] sm:$0xff]  ;;  %v1601_v9 = vsub.f32 %v10444_v4, %v10449_v5  ;;  %17946 = vst [vmem:[#allocation39_spill] sm:$0xff] %v10631_v30  ;;  %17951 = vst [vmem:[#allocation44_spill] sm:$0xff] %v10673_v53 }
 0x30b   :  { %v1529_v10 = vsel %vm572_vm4, %v1518_v8, 0  ;;  %17924 = vst [vmem:[#allocation17_spill] sm:$0xff] %v10546_v39  ;;  %v10563_v49 = vsub.f32 %v3169_v33, %v10546_v39  ;;  %v3140_v33 = vld [vmem:[#allocation10 + $0x100] sm:$0xff] }
 0x30c   :  { %v10458_v11 = vand.u32 4294901760, %v1529_v10  ;;  %v10460_v12 = vand.u32 4294901760, %v1601_v9  ;;  %v10604_v9 = vand.u32 4294901760, %v3149_v58 }
 0x30d   :  { %17930 = vst [vmem:[#allocation23_spill] sm:$0xff] %v10563_v49  ;;  %v16891_v61 = vand.u32 4294901760, %v10563_v49 }
 0x30e   :  { %1603 = vmatmul.mubr.f32.vlgmr.msra.gmra.mxu0 %v10460_v12  ;;  %1703 = vmatmul.mubr.f32.gmra.mxu1 %v10458_v11  ;;  %v10471_v15 = vsub.f32 %v1529_v10, %v10458_v11  ;;  %17941 = vst [vmem:[#allocation34_spill] sm:$0xff] %v10604_v9 }
 0x30f   :  { %1860 = vmatprep.mubr.f32.mxu1 %v16895_v0  ;;  %1744 = vmatpush1.msra.mxu0 %v10412_v43 }
 0x310   :  { %1608 = vmatprep.mubr.f32.mxu0 %v16895_v0  ;;  %v10477_v16 = vand.u32 4294901760, %v10471_v15  ;;  %1912 = vmatprep.subr.mxu0 %v1652_v45  ;;  %v3157_v45 = vld [vmem:[#allocation10 + $0x188] sm:$0xff] }
 0x311   :  { %v10573_v52 = vand.u32 4294901760, %v3157_v45 }
 0x312   :  { %1864 = vmatmul.mubr.f32.vlgmr.msra.gmra.mxu1 %v10449_v5  ;;  %v1612_v19 = vsub.f32 %v10471_v15, %v10477_v16 }
 0x313   :  { %1869 = vmatprep.mubr.f32.mxu1 %v16895_v0  ;;  %1997 = vmatpush1.msra.mxu1 %v10405_v37  ;;  %v3164_v37 = vld [vmem:[#allocation10 + $0x1c0] sm:$0xff]  ;;  %17933 = vst [vmem:[#allocation26_spill] sm:$0xff] %v10573_v52  ;;  %v10602_v8 = vsub.f32 %v3157_v45, %v10573_v52 }
 0x314   :  { %v10487_v20 = vand.u32 4294901760, %v1612_v19  ;;  %2169 = vmatprep.subr.mxu1 %v2168_v17  ;;  %v10556_v43 = vand.u32 4294901760, %v3164_v37  ;;  %v16888_v19 = vand.u32 4294901760, %v10588_v59 }
 0x315   :  { %17940 = vst [vmem:[#allocation33_spill] sm:$0xff] %v10602_v8  ;;  %v16892_v35 = vand.u32 4294901760, %v10602_v8 }
 0x316   :  { %1614 = vmatmul.mubr.f32.gmra.mxu0 %v10487_v20  ;;  %1873 = vmatmul.mubr.f32.gmra.mxu1 %v10477_v16  ;;  %17927 = vst [vmem:[#allocation20_spill] sm:$0xff] %v10556_v43  ;;  %v10578_v55 = vsub.f32 %v3164_v37, %v10556_v43 }
 0x317   :  { %1777 = vmatprep.mubr.f32.mxu0 %v16895_v0  ;;  %2030 = vmatprep.mubr.f32.mxu1 %v16895_v0 }
 0x318   :  { %17934 = vst [vmem:[#allocation27_spill] sm:$0xff] %v10578_v55  ;;  %v16887_v10 = vand.u32 4294901760, %v10578_v55 }
 0x31a   :  { %1780 = vmatmul.mubr.f32.vlgmr.msra.gmra.mxu0 %v10444_v4  ;;  %2032 = vmatmul.mubr.f32.vlgmr.msra.gmra.mxu1 %v10437_v1  ;;  %v10654_v38 = vsub.f32 %v10578_v55, %v16887_v10  ;;  %v16900_v10 = vand.u32 4294901760, %v10631_v30  ;;  %v3124_v55 = vld [vmem:[#allocation10 + $0x80] sm:$0xff] }
 0x31b   :  { %1916 = vmatpush1.msra.mxu0 %v1658_v46  ;;  %1785 = vmatprep.mubr.f32.mxu0 %v16895_v0  ;;  %v2688_v46 = vand.u32 4294901760, %v2687_v36  ;;  %v10645_v36 = vsub.f32 %v3149_v58, %v10604_v9  ;;  %v10678_v58 = vand.u32 4294901760, %v3140_v33 }
 0x31c   :  { %2037 = vmatprep.mubr.f32.mxu1 %v16895_v0  ;;  %2175 = vmatpush1.msra.mxu1 %v2174_v23  ;;  %v10623_v23 = vsub.f32 %v10563_v49, %v16891_v61  ;;  %v3132_v61 = vld [vmem:[#allocation10 + $0xc0] sm:$0xff]  ;;  %v10717_v3 = vsub.f32 %v10631_v30, %v16900_v10  ;;  %v17965_v30 = vand.u32 4294901760, %v10673_v53 }
 0x31d   :  { %2076 = vmatprep.subr.mxu0 %v10433_v60  ;;  %2339 = vmatprep.subr.mxu1 %v10433_v60  ;;  %17948 = vst [vmem:[#allocation41_spill] sm:$0xff] %v10645_v36  ;;  %17953 = vst [vmem:[#allocation46_spill] sm:$0xff] %v10678_v58  ;;  %v3112_v49 = vld [vmem:[#allocation10 + $0x20] sm:$0xff] }
 0x31e   :  { %1788 = vmatmul.mubr.f32.gmra.mxu0 %v10471_v15  ;;  %2039 = vmatmul.mubr.f32.gmra.mxu1 %v10458_v11 }
 0x31f   :  { %1949 = vmatprep.mubr.f32.mxu0 %v16895_v0  ;;  %2208 = vmatprep.mubr.f32.mxu1 %v16895_v0 }
 0x322   :  { %1951 = vmatmul.mubr.f32.vlgmr.msra.gmra.mxu0 %v10437_v1  ;;  %2210 = vmatmul.mubr.f32.vlgmr.msra.gmra.mxu1 %v10437_v1 }
 0x323   :  { %1956 = vmatprep.mubr.f32.mxu0 %v16895_v0  ;;  %2215 = vmatprep.mubr.f32.mxu1 %v16895_v0 }
 0x324   :  { %2078 = vmatpush1.msra.mxu0 %v10453_v7  ;;  %2341 = vmatpush1.msra.mxu1 %v10453_v7 }
 0x325   :  { %2255 = vmatprep.subr.mxu0 %v10440_v2  ;;  %2509 = vmatprep.subr.mxu1 %v10433_v60  ;;  %v3148_v60 = vld [vmem:[#allocation10 + $0x140] sm:$0xff]  ;;  %v10596_v2 = vand.u32 4294901760, %v3152_v54 }
 0x326   :  { %1958 = vmatmul.mubr.f32.gmra.mxu0 %v10458_v11  ;;  %2217 = vmatmul.mubr.f32.gmra.mxu1 %v10458_v11  ;;  %v10613_v17 = vand.u32 4294901760, %v3148_v60 }
 0x327   :  { %2111 = vmatprep.mubr.f32.mxu0 %v16895_v0  ;;  %2374 = vmatprep.mubr.f32.mxu1 %v16895_v0  ;;  %17939 = vst [vmem:[#allocation32_spill] sm:$0xff] %v10596_v2 }
 0x328   :  { %17943 = vst [vmem:[#allocation36_spill] sm:$0xff] %v10613_v17 }
 0x32a   :  { %2117 = vmatmul.mubr.f32.vlgmr.msra.gmra.mxu0 %v10460_v12  ;;  %2378 = vmatmul.mubr.f32.vlgmr.msra.gmra.mxu1 %v10449_v5 }
 0x32b   :  { %2122 = vmatprep.mubr.f32.mxu0 %v16895_v0  ;;  %2383 = vmatprep.mubr.f32.mxu1 %v16895_v0 }
 0x32c   :  { %2258 = vmatpush1.msra.mxu0 %v10466_v14  ;;  %2511 = vmatpush1.msra.mxu1 %v10453_v7  ;;  %v16889_v7 = vand.u32 4294901760, %v10571_v51  ;;  %v10611_v14 = vsub.f32 %v3156_v48, %v10583_v57  ;;  %v10670_v48 = vsub.f32 %v10588_v59, %v16888_v19  ;;  %v3129_v19 = vld [vmem:[#allocation10 + $0xa8] sm:$0xff] }
 0x32d   :  { %2426 = vmatprep.subr.mxu0 %v2166_v6  ;;  %2683 = vmatprep.subr.mxu1 %v2682_v32  ;;  %v3144_v6 = vld [vmem:[#allocation10 + $0x120] sm:$0xff]  ;;  %v10634_v32 = vsub.f32 %v3152_v54, %v10596_v2  ;;  %v10749_v59 = vand.u32 4294901760, %v3129_v19 }
 0x32e   :  { %2128 = vmatmul.mubr.f32.gmra.mxu0 %v10487_v20  ;;  %2387 = vmatmul.mubr.f32.gmra.mxu1 %v10477_v16  ;;  %17942 = vst [vmem:[#allocation35_spill] sm:$0xff] %v10611_v14  ;;  %v10618_v22 = vand.u32 4294901760, %v3144_v6  ;;  %v10641_v34 = vsub.f32 %v10571_v51, %v16889_v7  ;;  %v16897_v45 = vand.u32 4294901760, %v10611_v14  ;;  %v3137_v7 = vld [vmem:[#allocation10 + $0xe8] sm:$0xff]  ;;  %v17968_v51 = vand.u32 4294901760, %v10507_v25 }
 0x32f   :  { %2291 = vmatprep.mubr.f32.mxu0 %v16895_v0  ;;  %2544 = vmatprep.mubr.f32.mxu1 %v16895_v0  ;;  %17947 = vst [vmem:[#allocation40_spill] sm:$0xff] %v10634_v32  ;;  %17964 = vst [vmem:[#allocation53_spill] sm:$0xff] %v10749_v59 }
 0x330   :  { %17945 = vst [vmem:[#allocation38_spill] sm:$0xff] %v10618_v22  ;;  %v10676_v54 = vsub.f32 %v3144_v6, %v10618_v22  ;;  %v10692_v6 = vsub.f32 %v10602_v8, %v16892_v35  ;;  %v10705_v35 = vsub.f32 %v10611_v14, %v16897_v45  ;;  %v17956_v45 = vand.u32 4294901760, %v10634_v32 }
 0x331   :  { %v17959_v14 = vand.u32 4294901760, %v10645_v36 }
 0x332   :  { %2294 = vmatmul.mubr.f32.vlgmr.msra.gmra.mxu0 %v10444_v4  ;;  %2546 = vmatmul.mubr.f32.vlgmr.msra.gmra.mxu1 %v10437_v1  ;;  %17952 = vst [vmem:[#allocation45_spill] sm:$0xff] %v10676_v54  ;;  %v10722_v13 = vsub.f32 %v10634_v32, %v17956_v45  ;;  %v10737_v45 = vand.u32 4294901760, %v3133_v31  ;;  %v17961_v32 = vmov 0.0   ;;  %v17966_v8 = vand.u32 4294901760, %v10676_v54 }
 0x333   :  { %2299 = vmatprep.mubr.f32.mxu0 %v16895_v0  ;;  %2551 = vmatprep.mubr.f32.mxu1 %v16895_v0  ;;  %v10734_v10 = vsub.f32 %v10645_v36, %v17959_v14  ;;  %v3125_v14 = vld [vmem:[#allocation10 + $0x88] sm:$0xff]  ;;  %v10756_v36 = vsub.f32 %v10673_v53, %v17965_v30  ;;  %v10774_v53 = vsub.f32 %v3136_v62, %v10726_v28  ;;  %v3108_v28 = vld [vmem:[#allocation10] sm:$0xff] }
 0x334   :  { %2430 = vmatpush1.msra.mxu0 %v2172_v18  ;;  %2689 = vmatpush1.msra.mxu1 %v2688_v46  ;;  %v3141_v18 = vld [vmem:[#allocation10 + $0x108] sm:$0xff]  ;;  %v10663_v46 = vsub.f32 %v3148_v60, %v10613_v17  ;;  %v3486_v60 = vand.u32 4294901760, %v10623_v23  ;;  %17960 = vst [vmem:[#allocation51_spill] sm:$0xff] %v10737_v45  ;;  %v10761_v56 = vsub.f32 %v10676_v54, %v17966_v8 }
 0x335   :  { %2590 = vmatprep.subr.mxu0 %v10496_v24  ;;  %2853 = vmatprep.subr.mxu1 %v10496_v24  ;;  %v10647_v37 = vand.u32 4294901760, %v3141_v18  ;;  %17970 = vst [vmem:[#allocation56_spill] sm:$0xff] %v10774_v53  ;;  %v3121_v8 = vld [vmem:[#allocation10 + $0x68] sm:$0xff]  ;;  %v10796_v62 = vsub.f32 %v3129_v19, %v10749_v59 }
 0x336   :  { %2302 = vmatmul.mubr.f32.gmra.mxu0 %v10471_v15  ;;  %2553 = vmatmul.mubr.f32.gmra.mxu1 %v10458_v11  ;;  %17950 = vst [vmem:[#allocation43_spill] sm:$0xff] %v10663_v46 }
 0x337   :  { %2463 = vmatprep.mubr.f32.mxu0 %v16895_v0  ;;  %2722 = vmatprep.mubr.f32.mxu1 %v16895_v0  ;;  %17949 = vst [vmem:[#allocation42_spill] sm:$0xff] %v10647_v37  ;;  %v10696_v23 = vsub.f32 %v3141_v18, %v10647_v37  ;;  %v10724_v18 = vand.u32 4294901760, %v3137_v7  ;;  %17975 = vst [vmem:[#allocation60_spill] sm:$0xff] %v10796_v62 }
 0x339   :  { %17954 = vst [vmem:[#allocation47_spill] sm:$0xff] %v10696_v23  ;;  %17957 = vst [vmem:[#allocation49_spill] sm:$0xff] %v10724_v18  ;;  %v10771_v30 = vsub.f32 %v3137_v7, %v10724_v18  ;;  %v10787_v7 = vand.u32 4294901760, %v3125_v14 }
 0x33a   :  { %2465 = vmatmul.mubr.f32.vlgmr.msra.gmra.mxu0 %v10437_v1  ;;  %2724 = vmatmul.mubr.f32.vlgmr.msra.gmra.mxu1 %v10437_v1 }
 0x33b   :  { %2470 = vmatprep.mubr.f32.mxu0 %v16895_v0  ;;  %2729 = vmatprep.mubr.f32.mxu1 %v16895_v0  ;;  %17969 = vst [vmem:[#allocation55_spill] sm:$0xff] %v10771_v30  ;;  %17973 = vst [vmem:[#allocation58_spill] sm:$0xff] %v10787_v7 }
 0x33c   :  { %2592 = vmatpush1.msra.mxu0 %v10513_v27  ;;  %2855 = vmatpush1.msra.mxu1 %v10513_v27 }
 0x33d   :  { %2769 = vmatprep.subr.mxu0 %v10507_v25  ;;  %3023 = vmatprep.subr.mxu1 %v10496_v24  ;;  %v3128_v24 = vld [vmem:[#allocation10 + $0xa0] sm:$0xff]  ;;  %v17971_v25 = vand.u32 4294901760, %v10696_v23 }
 0x33e   :  { %2472 = vmatmul.mubr.f32.gmra.mxu0 %v10458_v11  ;;  %2731 = vmatmul.mubr.f32.gmra.mxu1 %v10458_v11 }
 0x33f   :  { %2625 = vmatprep.mubr.f32.mxu0 %v16895_v0  ;;  %2888 = vmatprep.mubr.f32.mxu1 %v16895_v0  ;;  %v10712_v0 = vsub.f32 %v3140_v33, %v10678_v58  ;;  %v10747_v33 = vand.u32 4294901760, %v3132_v61 }
 0x341   :  { %17955 = vst [vmem:[#allocation48_spill] sm:$0xff] %v10712_v0  ;;  %17963 = vst [vmem:[#allocation52_spill] sm:$0xff] %v10747_v33 }
 0x342   :  { %2631 = vmatmul.mubr.f32.vlgmr.msra.gmra.mxu0 %v10460_v12  ;;  %2892 = vmatmul.mubr.f32.vlgmr.msra.gmra.mxu1 %v10449_v5  ;;  %v17962_v12 = vand.u32 4294901760, %v10663_v46 }
 0x343   :  { %2636 = vmatprep.mubr.f32.mxu0 %v17961_v32  ;;  %2897 = vmatprep.mubr.f32.mxu1 %v17961_v32 }
 0x344   :  { %v10745_v5 = vsub.f32 %v10663_v46, %v17962_v12  ;;  %2772 = vmatpush1.msra.mxu0 %v10523_v29  ;;  %3025 = vmatpush1.msra.mxu1 %v10513_v27  ;;  %v10764_v46 = vand.u32 4294901760, %v3128_v24  ;;  %v3117_v12 = vld [vmem:[#allocation10 + $0x48] sm:$0xff]  ;;  %v17977_v27 = vand.u32 4294901760, %v10712_v0 }
 0x345   :  { %2940 = vmatprep.subr.mxu0 %v17968_v51  ;;  %3487 = vmatprep.subr.mxu1 %v3486_v60  ;;  %v10782_v51 = vsub.f32 %v10696_v23, %v17971_v25  ;;  %v10785_v60 = vsub.f32 %v3133_v31, %v10737_v45  ;;  %v10798_v25 = vand.u32 4294901760, %v3124_v55  ;;  %v3113_v31 = vld [vmem:[#allocation10 + $0x28] sm:$0xff]  ;;  %v10861_v45 = vand.u32 4294901760, %v3112_v49 }
 0x346   :  { %17967 = vst [vmem:[#allocation54_spill] sm:$0xff] %v10764_v46  ;;  %2642 = vmatmul.mubr.f32.gmra.mxu0 %v10487_v20  ;;  %2901 = vmatmul.mubr.f32.gmra.mxu1 %v10477_v16  ;;  %v10793_v16 = vsub.f32 %v3132_v61, %v10747_v33  ;;  %v10804_v23 = vsub.f32 %v10712_v0, %v17977_v27  ;;  %v10809_v20 = vand.u32 4294901760, %v3121_v8  ;;  %v3116_v61 = vld [vmem:[#allocation10 + $0x40] sm:$0xff]  ;;  %v10814_v33 = vand.u32 4294901760, %v3120_v50 }
 0x347   :  { %17972 = vst [vmem:[#allocation57_spill] sm:$0xff] %v10785_v60  ;;  %2805 = vmatprep.mubr.f32.mxu0 %v17961_v32  ;;  %3058 = vmatprep.mubr.f32.mxu1 %v17961_v32  ;;  %17976 = vst [vmem:[#allocation61_spill] sm:$0xff] %v10798_v25  ;;  %v10807_v54 = vsub.f32 %v3128_v24, %v10764_v46  ;;  %v10821_v0 = vsub.f32 %v3125_v14, %v10787_v7  ;;  %v10823_v46 = vand.u32 4294901760, %v3117_v12  ;;  %v3109_v24 = vld [vmem:[#allocation10 + $0x8] sm:$0xff] }
 0x348   :  { %17974 = vst [vmem:[#allocation59_spill] sm:$0xff] %v10793_v16  ;;  %17979 = vst [vmem:[#allocation63_spill] sm:$0xff] %v10809_v20  ;;  %v10830_v19 = vsub.f32 %v3124_v55, %v10798_v25  ;;  %v10832_v27 = vand.u32 4294901760, %v3116_v61  ;;  %v17985_v14 = vand.u32 4294901760, %v10523_v29  ;;  %v17986_v7 = vand.u32 4294901760, %v10628_v26 }
 0x349   :  { %17978 = vst [vmem:[#allocation62_spill] sm:$0xff] %v10807_v54  ;;  %17980 = vst [vmem:[#allocation64_spill] sm:$0xff] %v10814_v33  ;;  %v10841_v59 = vsub.f32 %v3121_v8, %v10809_v20  ;;  %v17989_v55 = vand.u32 4294901760, %v10641_v34  ;;  %v17990_v29 = vand.u32 4294901760, %v10771_v30  ;;  %v17991_v26 = vand.u32 4294901760, %v10774_v53 }
 0x34a   :  { %2808 = vmatmul.mubr.f32.vlgmr.msra.gmra.mxu0 %v10444_v4  ;;  %3060 = vmatmul.mubr.f32.vlgmr.msra.gmra.mxu1 %v10437_v1  ;;  %17981 = vst [vmem:[#allocation65_spill] sm:$0xff] %v10821_v0  ;;  %17982 = vst [vmem:[#allocation66_spill] sm:$0xff] %v10823_v46  ;;  %v10843_v4 = vand.u32 4294901760, %v3113_v31  ;;  %v10859_v8 = vsub.f32 %v3120_v50, %v10814_v33  ;;  %v17994_v34 = vand.u32 4294901760, %v10785_v60  ;;  %v17997_v50 = vand.u32 4294901760, %v10654_v38 }
 0x34b   :  { %2813 = vmatprep.mubr.f32.mxu0 %v17961_v32  ;;  %3065 = vmatprep.mubr.f32.mxu1 %v17961_v32  ;;  %17983 = vst [vmem:[#allocation67_spill] sm:$0xff] %v10830_v19  ;;  %17984 = vst [vmem:[#allocation68_spill] sm:$0xff] %v10832_v27  ;;  %v18002_v38 = vand.u32 4294901760, %v10807_v54 }
 0x34c   :  { %2944 = vmatpush1.msra.mxu0 %v17985_v14  ;;  %3493 = vmatpush1.msra.mxu1 %v17986_v7  ;;  %17987 = vst [vmem:[#allocation69_spill] sm:$0xff] %v10841_v59  ;;  %17988 = vst [vmem:[#allocation70_spill] sm:$0xff] %v10843_v4  ;;  %v10851_v14 = vsub.f32 %v10771_v30, %v17990_v29  ;;  %v10856_v7 = vsub.f32 %v10774_v53, %v17991_v26  ;;  %v10874_v53 = vand.u32 4294901760, %v3109_v24 }
 0x34d   :  { %3499 = vmatprep.subr.mxu1 %v17989_v55  ;;  %3258 = vmatprep.subr.mxu0 %v10546_v39  ;;  %17992 = vst [vmem:[#allocation71_spill] sm:$0xff] %v10859_v8  ;;  %17993 = vst [vmem:[#allocation72_spill] sm:$0xff] %v10861_v45  ;;  %v10868_v55 = vsub.f32 %v10785_v60, %v17994_v34  ;;  %v10872_v26 = vsub.f32 %v3117_v12, %v10823_v46  ;;  %v17999_v34 = vand.u32 4294901760, %v10796_v62 }
 0x34e   :  { %2816 = vmatmul.mubr.f32.gmra.mxu0 %v10471_v15  ;;  %3067 = vmatmul.mubr.f32.gmra.mxu1 %v10458_v11  ;;  %17996 = vst [vmem:[#allocation74_spill] sm:$0xff] %v10874_v53  ;;  %v17998_v15 = vand.u32 4294901760, %v10793_v16  ;;  %v10891_v29 = vsub.f32 %v3116_v61, %v10832_v27  ;;  %v18001_v39 = vand.u32 4294901760, %v10659_v41  ;;  %v18005_v12 = vand.u32 4294901760, %v10670_v48  ;;  %v3232_v61 = vld [vmem:[#allocation10 + $0x3e0] sm:$0xff] }
 0x34f   :  { %17995 = vst [vmem:[#allocation73_spill] sm:$0xff] %v10872_v26  ;;  %2977 = vmatprep.mubr.f32.mxu0 %v17961_v32  ;;  %3505 = vmatpush1.msra.mxu1 %v17997_v50  ;;  %v10887_v60 = vsub.f32 %v10796_v62, %v17999_v34  ;;  %v10898_v50 = vsub.f32 %v10807_v54, %v18002_v38  ;;  %v10904_v34 = vand.u32 4294901760, %v3108_v28  ;;  %v3233_v62 = vld [vmem:[#allocation10 + $0x3e8] sm:$0xff]  ;;  %v18008_v54 = vand.u32 4294901760, %v10821_v0 }
 0x350   :  { %v10882_v30 = vsub.f32 %v10793_v16, %v17998_v15  ;;  %18000 = vst [vmem:[#allocation75_spill] sm:$0xff] %v10891_v29  ;;  %3511 = vmatprep.subr.mxu1 %v18001_v39  ;;  %v10902_v16 = vsub.f32 %v3113_v31, %v10843_v4  ;;  %v10912_v38 = vsub.f32 %v3112_v49, %v10861_v45  ;;  %v18007_v31 = vand.u32 4294901760, %v10692_v6 }
 0x351   :  { %18004 = vst [vmem:[#allocation77_spill] sm:$0xff] %v10904_v34  ;;  %3517 = vmatpush1.msra.mxu1 %v18005_v12  ;;  %v10921_v48 = vsub.f32 %v10821_v0, %v18008_v54  ;;  %v10925_v39 = vsub.f32 %v3109_v24, %v10874_v53  ;;  %v18011_v6 = vand.u32 4294901760, %v10830_v19  ;;  %v10937_v15 = vand.u32 4294901760, %v3233_v62  ;;  %v3229_v12 = vld [vmem:[#allocation10 + $0x3c8] sm:$0xff]  ;;  %v3228_v54 = vld [vmem:[#allocation10 + $0x3c0] sm:$0xff] }
 0x352   :  { %18003 = vst [vmem:[#allocation76_spill] sm:$0xff] %v10902_v16  ;;  %18006 = vst [vmem:[#allocation78_spill] sm:$0xff] %v10912_v38  ;;  %2979 = vmatmul.mubr.f32.vlgmr.msra.gmra.mxu0 %v10437_v1  ;;  %3523 = vmatprep.subr.mxu1 %v18007_v31  ;;  %v18010_v1 = vand.u32 4294901760, %v10705_v35  ;;  %v18013_v24 = vand.u32 4294901760, %v10717_v3  ;;  %v18014_v35 = vand.u32 4294901760, %v10841_v59  ;;  %v10950_v49 = vsub.f32 %v3108_v28, %v10904_v34 }
 0x353   :  { %18009 = vst [vmem:[#allocation79_spill] sm:$0xff] %v10925_v39  ;;  %2984 = vmatprep.mubr.f32.mxu0 %v17961_v32  ;;  %v10934_v31 = vsub.f32 %v10830_v19, %v18011_v6  ;;  %18012 = vst [vmem:[#allocation80_spill] sm:$0xff] %v10937_v15  ;;  %3260 = vmatpush1.msra.mxu0 %v10548_v40  ;;  %v18016_v41 = vand.u32 4294901760, %v10722_v13  ;;  %v3225_v6 = vld [vmem:[#allocation10 + $0x3a8] sm:$0xff]  ;;  %v18019_v28 = vand.u32 4294901760, %v10734_v10  ;;  %v18021_v19 = vand.u32 4294901760, %v10745_v5 }
 0x354   :  { %3529 = vmatpush1.msra.mxu1 %v18010_v1  ;;  %v10946_v1 = vsub.f32 %v10841_v59, %v18014_v35  ;;  %18015 = vst [vmem:[#allocation81_spill] sm:$0xff] %v10950_v49  ;;  %3262 = vmatprep.subr.mxu0 %v10552_v42  ;;  %v10962_v59 = vand.u32 4294901760, %v3232_v61  ;;  %v3224_v35 = vld [vmem:[#allocation10 + $0x3a0] sm:$0xff]  ;;  %v18022_v10 = vand.u32 4294901760, %v10891_v29  ;;  %v10988_v13 = vand.u32 4294901760, %v3228_v54 }
 0x355   :  { %3535 = vmatprep.subr.mxu1 %v18013_v24  ;;  %v18017_v24 = vand.u32 4294901760, %v10859_v8  ;;  %3264 = vmatpush1.msra.mxu0 %v10556_v43  ;;  %v18027_v0 = vand.u32 4294901760, %v10761_v56  ;;  %v18031_v56 = vand.u32 4294901760, %v10925_v39 }
 0x356   :  { %3541 = vmatpush1.msra.mxu1 %v18016_v41  ;;  %18018 = vst [vmem:[#allocation82_spill] sm:$0xff] %v10962_v59  ;;  %2986 = vmatmul.mubr.f32.gmra.mxu0 %v10458_v11  ;;  %v18020_v41 = vand.u32 4294901760, %v10872_v26  ;;  %18024 = vst [vmem:[#allocation84_spill] sm:$0xff] %v10988_v13 }
 0x357   :  { %v10959_v32 = vsub.f32 %v10859_v8, %v18017_v24  ;;  %3547 = vmatprep.subr.mxu1 %v18019_v28  ;;  %v10974_v8 = vand.u32 4294901760, %v3229_v12  ;;  %v10983_v28 = vsub.f32 %v10891_v29, %v18022_v10  ;;  %v3221_v24 = vld [vmem:[#allocation10 + $0x388] sm:$0xff]  ;;  %3266 = vmatprep.subr.mxu0 %v10558_v44  ;;  %v11000_v29 = vand.u32 4294901760, %v3225_v6 }
 0x358   :  { %v10971_v3 = vsub.f32 %v10872_v26, %v18020_v41  ;;  %3553 = vmatpush1.msra.mxu1 %v18021_v19  ;;  %v10986_v41 = vsub.f32 %v3233_v62, %v10937_v15  ;;  %v18025_v26 = vand.u32 4294901760, %v10756_v36  ;;  %v18026_v19 = vand.u32 4294901760, %v10902_v16  ;;  %v3220_v62 = vld [vmem:[#allocation10 + $0x380] sm:$0xff]  ;;  %3268 = vmatpush1.msra.mxu0 %v10560_v47  ;;  %v3217_v10 = vld [vmem:[#allocation10 + $0x368] sm:$0xff] }
 0x359   :  { %3270 = vmatprep.subr.mxu0 %v10573_v52  ;;  %v18030_v47 = vand.u32 4294901760, %v10782_v51  ;;  %v11023_v36 = vsub.f32 %v10925_v39, %v18031_v56  ;;  %v18033_v52 = vand.u32 4294901760, %v10804_v23  ;;  %v11038_v56 = vand.u32 4294901760, %v3220_v62  ;;  %v3213_v39 = vld [vmem:[#allocation10 + $0x348] sm:$0xff]  ;;  %v3212_v51 = vld [vmem:[#allocation10 + $0x340] sm:$0xff] }
 0x35a   :  { %18023 = vst [vmem:[#allocation83_spill] sm:$0xff] %v10986_v41  ;;  %3559 = vmatprep.subr.mxu1 %v18025_v26  ;;  %v10997_v11 = vsub.f32 %v10902_v16, %v18026_v19  ;;  %v18028_v26 = vand.u32 4294901760, %v10912_v38  ;;  %v11012_v19 = vsub.f32 %v3232_v61, %v10962_v59  ;;  %v11014_v16 = vand.u32 4294901760, %v3224_v35  ;;  %3272 = vmatpush1.msra.mxu0 %v10583_v57 }
 0x35b   :  { %3565 = vmatpush1.msra.mxu1 %v18027_v0  ;;  %v11028_v61 = vand.u32 4294901760, %v3221_v24  ;;  %v11036_v0 = vsub.f32 %v3228_v54, %v10988_v13  ;;  %3274 = vmatprep.subr.mxu0 %v10594_v63  ;;  %v18036_v23 = vand.u32 4294901760, %v10950_v49  ;;  %v11052_v54 = vand.u32 4294901760, %v3217_v10 }
 0x35c   :  { %v11009_v5 = vsub.f32 %v10912_v38, %v18028_v26  ;;  %18029 = vst [vmem:[#allocation85_spill] sm:$0xff] %v11012_v19  ;;  %3571 = vmatprep.subr.mxu1 %v18030_v47  ;;  %v11026_v26 = vsub.f32 %v3229_v12, %v10974_v8  ;;  %v3216_v38 = vld [vmem:[#allocation10 + $0x360] sm:$0xff]  ;;  %v18035_v12 = vand.u32 4294901760, %v10851_v14  ;;  %v11050_v47 = vsub.f32 %v3225_v6, %v11000_v29 }
 0x35d   :  { %3577 = vmatpush1.msra.mxu1 %v18033_v52  ;;  %18034 = vst [vmem:[#allocation87_spill] sm:$0xff] %v11036_v0  ;;  %v11047_v52 = vsub.f32 %v10950_v49, %v18036_v23  ;;  %3276 = vmatpush1.msra.mxu0 %v10596_v2  ;;  %v18038_v63 = vand.u32 4294901760, %v10856_v7  ;;  %v11060_v57 = vsub.f32 %v3224_v35, %v11014_v16  ;;  %v11062_v23 = vand.u32 4294901760, %v3216_v38  ;;  %v3209_v49 = vld [vmem:[#allocation10 + $0x328] sm:$0xff] }
 0x35e   :  { %18032 = vst [vmem:[#allocation86_spill] sm:$0xff] %v11026_v26  ;;  %3583 = vmatprep.subr.mxu1 %v18035_v12  ;;  %18037 = vst [vmem:[#allocation88_spill] sm:$0xff] %v11050_v47  ;;  %3278 = vmatprep.subr.mxu0 %v10604_v9  ;;  %v18040_v6 = vand.u32 4294901760, %v10868_v55  ;;  %v11072_v14 = vand.u32 4294901760, %v3213_v39  ;;  %v3208_v12 = vld [vmem:[#allocation10 + $0x320] sm:$0xff]  ;;  %v18042_v35 = vand.u32 4294901760, %v10882_v30  ;;  %v11084_v2 = vsub.f32 %v3220_v62, %v11038_v56 }
 0x35f   :  { %3589 = vmatpush1.msra.mxu1 %v18038_v63  ;;  %18039 = vst [vmem:[#allocation89_spill] sm:$0xff] %v11060_v57  ;;  %v11070_v63 = vsub.f32 %v3221_v24, %v11028_v61  ;;  %3280 = vmatpush1.msra.mxu0 %v10613_v17  ;;  %v18043_v9 = vand.u32 4294901760, %v10986_v41  ;;  %v11086_v24 = vand.u32 4294901760, %v3212_v51  ;;  %v3205_v7 = vld [vmem:[#allocation10 + $0x308] sm:$0xff]  ;;  %v18045_v17 = vand.u32 4294901760, %v10887_v60 }
 0x360   :  { %3595 = vmatprep.subr.mxu1 %v18040_v6  ;;  %18044 = vst [vmem:[#allocation91_spill] sm:$0xff] %v11084_v2  ;;  %3282 = vmatprep.subr.mxu0 %v10616_v21  ;;  %v18048_v62 = vand.u32 4294901760, %v10898_v50  ;;  %v18049_v6 = vand.u32 4294901760, %v11012_v19  ;;  %v11108_v60 = vsub.f32 %v3216_v38, %v11062_v23  ;;  %v11110_v30 = vand.u32 4294901760, %v3208_v12 }
 0x361   :  { %18041 = vst [vmem:[#allocation90_spill] sm:$0xff] %v11070_v63  ;;  %3601 = vmatpush1.msra.mxu1 %v18042_v35  ;;  %v11080_v55 = vsub.f32 %v10986_v41, %v18043_v9  ;;  %v11094_v9 = vsub.f32 %v3217_v10, %v11052_v54  ;;  %v11096_v41 = vand.u32 4294901760, %v3209_v49  ;;  %3284 = vmatpush1.msra.mxu0 %v10618_v22  ;;  %v3204_v10 = vld [vmem:[#allocation10 + $0x300] sm:$0xff]  ;;  %v18051_v35 = vand.u32 4294901760, %v10921_v48 }
 0x362   :  { %3607 = vmatprep.subr.mxu1 %v18045_v17  ;;  %v11104_v21 = vsub.f32 %v11012_v19, %v18049_v6  ;;  %18050 = vst [vmem:[#allocation94_spill] sm:$0xff] %v11108_v60  ;;  %3286 = vmatprep.subr.mxu0 %v10647_v37  ;;  %v18052_v50 = vand.u32 4294901760, %v11026_v26  ;;  %v11122_v17 = vsub.f32 %v3213_v39, %v11072_v14  ;;  %v11124_v38 = vand.u32 4294901760, %v3205_v7 }
 0x363   :  { %18046 = vst [vmem:[#allocation92_spill] sm:$0xff] %v11094_v9  ;;  %18047 = vst [vmem:[#allocation93_spill] sm:$0xff] %v11096_v41  ;;  %3613 = vmatpush1.msra.mxu1 %v18048_v62  ;;  %3288 = vmatpush1.msra.mxu0 %v10678_v58  ;;  %v18055_v19 = vand.u32 4294901760, %v10934_v31  ;;  %v3678_v48 = vand.u32 4294901760, %v11080_v55  ;;  %v11137_v6 = vsub.f32 %v3212_v51, %v11086_v24  ;;  %v18058_v39 = vand.u32 4294901760, %v10946_v1  ;;  %v18062_v51 = vld [vmem:[#allocation50_spill] sm:$0xff] }
 0x364   :  { %3619 = vmatprep.subr.mxu1 %v18051_v35  ;;  %v11118_v62 = vsub.f32 %v11026_v26, %v18052_v50  ;;  %18053 = vst [vmem:[#allocation95_spill] sm:$0xff] %v11122_v17  ;;  %18054 = vst [vmem:[#allocation96_spill] sm:$0xff] %v11124_v38  ;;  %v18056_v35 = vand.u32 4294901760, %v11036_v0  ;;  %3290 = vmatprep.subr.mxu0 %v10724_v18  ;;  %v18059_v31 = vand.u32 4294901760, %v11050_v47  ;;  %v3201_v50 = vld [vmem:[#allocation10 + $0x2e8] sm:$0xff]  ;;  %v18063_v26 = vand.u32 4294901760, %v10959_v32 }
 0x365   :  { %3625 = vmatpush1.msra.mxu1 %v18055_v19  ;;  %18057 = vst [vmem:[#allocation97_spill] sm:$0xff] %v11137_v6  ;;  %3292 = vmatpush1.msra.mxu0 %v18062_v51  ;;  %v3684_v1 = vand.u32 4294901760, %v11104_v21  ;;  %v18067_v18 = vand.u32 4294901760, %v10971_v3  ;;  %v3200_v55 = vld [vmem:[#allocation10 + $0x2e0] sm:$0xff]  ;;  %v18072_v3 = vand.u32 4294901760, %v11084_v2  ;;  %v18075_v51 = vand.u32 4294901760, %v10997_v11 }
 0x366   :  { %v11133_v37 = vsub.f32 %v11036_v0, %v18056_v35  ;;  %3631 = vmatprep.subr.mxu1 %v18058_v39  ;;  %v11145_v19 = vsub.f32 %v11050_v47, %v18059_v31  ;;  %v11149_v35 = vsub.f32 %v3209_v49, %v11096_v41  ;;  %v11151_v0 = vand.u32 4294901760, %v3204_v10  ;;  %v18066_v47 = vld [vmem:[#allocation51_spill] sm:$0xff] }
 0x367   :  { %3637 = vmatpush1.msra.mxu1 %v18063_v26  ;;  %v18064_v39 = vand.u32 4294901760, %v11060_v57  ;;  %v11164_v49 = vsub.f32 %v3208_v12, %v11110_v30  ;;  %3294 = vmatprep.subr.mxu0 %v18066_v47  ;;  %v3690_v32 = vand.u32 4294901760, %v11118_v62  ;;  %v18068_v26 = vand.u32 4294901760, %v11070_v63  ;;  %v18070_v12 = vld [vmem:[#allocation52_spill] sm:$0xff] }
 0x368   :  { %18060 = vst [vmem:[#allocation98_spill] sm:$0xff] %v11149_v35  ;;  %18061 = vst [vmem:[#allocation99_spill] sm:$0xff] %v11151_v0  ;;  %3643 = vmatprep.subr.mxu1 %v18067_v18  ;;  %3296 = vmatpush1.msra.mxu0 %v18070_v12  ;;  %v18071_v47 = vand.u32 4294901760, %v10983_v28  ;;  %v3696_v18 = vand.u32 4294901760, %v11133_v37  ;;  %v11186_v62 = vsub.f32 %v11084_v2, %v18072_v3  ;;  %v3702_v28 = vand.u32 4294901760, %v11145_v19  ;;  %v18078_v12 = vld [vmem:[#allocation54_spill] sm:$0xff] }
 0x369   :  { %v11160_v31 = vsub.f32 %v11060_v57, %v18064_v39  ;;  %18065 = vst [vmem:[#allocation100_spill] sm:$0xff] %v11164_v49  ;;  %v11173_v21 = vsub.f32 %v11070_v63, %v18068_v26  ;;  %v11177_v57 = vsub.f32 %v3205_v7, %v11124_v38  ;;  %v11189_v63 = vand.u32 4294901760, %v3201_v50  ;;  %v3197_v39 = vld [vmem:[#allocation10 + $0x2c8] sm:$0xff]  ;;  %v18074_v7 = vld [vmem:[#allocation53_spill] sm:$0xff] }
 0x36a   :  { %3649 = vmatpush1.msra.mxu1 %v18071_v47  ;;  %3298 = vmatprep.subr.mxu0 %v18074_v7  ;;  %v18076_v47 = vand.u32 4294901760, %v11094_v9  ;;  %v11202_v2 = vsub.f32 %v3204_v10, %v11151_v0  ;;  %v3196_v26 = vld [vmem:[#allocation10 + $0x2c0] sm:$0xff]  ;;  %v18079_v7 = vand.u32 4294901760, %v11009_v5  ;;  %v18080_v19 = vand.u32 4294901760, %v11108_v60  ;;  %v3193_v3 = vld [vmem:[#allocation10 + $0x2a8] sm:$0xff] }
 0x36b   :  { %18069 = vst [vmem:[#allocation101_spill] sm:$0xff] %v11177_v57  ;;  %18073 = vst [vmem:[#allocation102_spill] sm:$0xff] %v11189_v63  ;;  %3655 = vmatprep.subr.mxu1 %v18075_v51  ;;  %3300 = vmatpush1.msra.mxu0 %v18078_v12  ;;  %v3708_v11 = vand.u32 4294901760, %v11160_v31  ;;  %v18082_v10 = vld [vmem:[#allocation58_spill] sm:$0xff]  ;;  %v18083_v58 = vand.u32 4294901760, %v11023_v36  ;;  %v3714_v5 = vand.u32 4294901760, %v11173_v21 }
 0x36c   :  { %v11198_v37 = vsub.f32 %v11094_v9, %v18076_v47  ;;  %18077 = vst [vmem:[#allocation103_spill] sm:$0xff] %v11202_v2  ;;  %3661 = vmatpush1.msra.mxu1 %v18079_v7  ;;  %v11211_v51 = vsub.f32 %v11108_v60, %v18080_v19  ;;  %v11214_v9 = vand.u32 4294901760, %v3200_v55  ;;  %3302 = vmatprep.subr.mxu0 %v18082_v10  ;;  %v18084_v7 = vand.u32 4294901760, %v11122_v17  ;;  %v3192_v47 = vld [vmem:[#allocation10 + $0x2a0] sm:$0xff]  ;;  %v3189_v19 = vld [vmem:[#allocation10 + $0x288] sm:$0xff] }
 0x36d   :  { %3667 = vmatprep.subr.mxu1 %v18083_v58  ;;  %v11226_v60 = vand.u32 4294901760, %v3197_v39  ;;  %3304 = vmatpush1.msra.mxu0 %v10798_v25  ;;  %v18086_v12 = vand.u32 4294901760, %v11047_v52  ;;  %v3720_v36 = vand.u32 4294901760, %v11186_v62  ;;  %v18087_v58 = vand.u32 4294901760, %v11137_v6 }
 0x36e   :  { %18081 = vst [vmem:[#allocation104_spill] sm:$0xff] %v11214_v9  ;;  %v11223_v31 = vsub.f32 %v11122_v17, %v18084_v7  ;;  %v11238_v7 = vsub.f32 %v3201_v50, %v11189_v63  ;;  %v11240_v17 = vand.u32 4294901760, %v3196_v26  ;;  %3306 = vmatprep.subr.mxu0 %v10809_v20  ;;  %v3726_v25 = vand.u32 4294901760, %v11198_v37 }
 0x36f   :  { %18085 = vst [vmem:[#allocation105_spill] sm:$0xff] %v11226_v60  ;;  %3673 = vmatpush1.msra.mxu1 %v18086_v12  ;;  %v11235_v21 = vsub.f32 %v11137_v6, %v18087_v58  ;;  %v18090_v52 = vand.u32 4294901760, %v11149_v35  ;;  %v11250_v58 = vand.u32 4294901760, %v3193_v3  ;;  %v3188_v6 = vld [vmem:[#allocation10 + $0x280] sm:$0xff]  ;;  %3308 = vmatpush1.msra.mxu0 %v10814_v33  ;;  %v3732_v50 = vand.u32 4294901760, %v11211_v51 }
 0x370   :  { %18088 = vst [vmem:[#allocation106_spill] sm:$0xff] %v11238_v7  ;;  %18089 = vst [vmem:[#allocation107_spill] sm:$0xff] %v11240_v17  ;;  %3679 = vmatprep.subr.mxu1 %v3678_v48  ;;  %v18091_v20 = vand.u32 4294901760, %v11164_v49  ;;  %v11260_v37 = vsub.f32 %v3200_v55, %v11214_v9  ;;  %3310 = vmatprep.subr.mxu0 %v10823_v46  ;;  %v3738_v62 = vand.u32 4294901760, %v11223_v31  ;;  %v3184_v55 = vld [vmem:[#allocation10 + $0x260] sm:$0xff]  ;;  %v11282_v46 = vand.u32 4294901760, %v3188_v6 }
 0x371   :  { %v11247_v12 = vsub.f32 %v11149_v35, %v18090_v52  ;;  %3685 = vmatpush2.msra.mxu1 %v3684_v1  ;;  %v11262_v52 = vand.u32 4294901760, %v3192_v47  ;;  %v3185_v35 = vld [vmem:[#allocation10 + $0x268] sm:$0xff]  ;;  %v18094_v1 = vand.u32 4294901760, %v11177_v57  ;;  %v11272_v33 = vsub.f32 %v3197_v39, %v11226_v60  ;;  %3312 = vmatpush1.msra.mxu0 %v10832_v27 }
 0x372   :  { %v11257_v48 = vsub.f32 %v11164_v49, %v18091_v20  ;;  %18092 = vst [vmem:[#allocation108_spill] sm:$0xff] %v11260_v37  ;;  %3691 = vmatprep.subr.mxu1 %v3690_v32  ;;  %v11274_v20 = vand.u32 4294901760, %v3189_v19  ;;  %v3744_v49 = vand.u32 4294901760, %v11235_v21  ;;  %v11280_v31 = vsub.f32 %v3196_v26, %v11240_v17  ;;  %3314 = vmatprep.subr.mxu0 %v10843_v4  ;;  %v3180_v26 = vld [vmem:[#allocation10 + $0x240] sm:$0xff] }
 0x373   :  { %18093 = vst [vmem:[#allocation109_spill] sm:$0xff] %v11262_v52  ;;  %v11269_v51 = vsub.f32 %v11177_v57, %v18094_v1  ;;  %18095 = vst [vmem:[#allocation110_spill] sm:$0xff] %v11272_v33  ;;  %3697 = vmatpush2.msra.mxu1 %v3696_v18  ;;  %v3181_v1 = vld [vmem:[#allocation10 + $0x248] sm:$0xff]  ;;  %v3750_v39 = vand.u32 4294901760, %v11247_v12  ;;  %v18097_v57 = vand.u32 4294901760, %v11202_v2  ;;  %v11292_v18 = vsub.f32 %v3193_v3, %v11250_v58 }
 0x374   :  { %18096 = vst [vmem:[#allocation111_spill] sm:$0xff] %v11280_v31  ;;  %3703 = vmatprep.subr.mxu1 %v3702_v28  ;;  %v11294_v21 = vand.u32 4294901760, %v3185_v35  ;;  %3316 = vmatpush1.msra.mxu0 %v10861_v45  ;;  %v3756_v32 = vand.u32 4294901760, %v11257_v48  ;;  %v11300_v12 = vsub.f32 %v3192_v47, %v11262_v52  ;;  %v11302_v4 = vand.u32 4294901760, %v3184_v55  ;;  %v3176_v48 = vld [vmem:[#allocation10 + $0x220] sm:$0xff] }
 0x375   :  { %v11289_v27 = vsub.f32 %v11202_v2, %v18097_v57  ;;  %18098 = vst [vmem:[#allocation112_spill] sm:$0xff] %v11292_v18  ;;  %3709 = vmatpush2.msra.mxu1 %v3708_v11  ;;  %v3177_v57 = vld [vmem:[#allocation10 + $0x228] sm:$0xff]  ;;  %3318 = vmatprep.subr.mxu0 %v10874_v53  ;;  %v3762_v3 = vand.u32 4294901760, %v11269_v51  ;;  %v11308_v45 = vsub.f32 %v3189_v19, %v11274_v20  ;;  %v11310_v11 = vand.u32 4294901760, %v3181_v1 }
 0x376   :  { %18099 = vst [vmem:[#allocation113_spill] sm:$0xff] %v11294_v21  ;;  %18100 = vst [vmem:[#allocation114_spill] sm:$0xff] %v11300_v12  ;;  %3715 = vmatprep.subr.mxu1 %v3714_v5  ;;  %3320 = vmatpush1.msra.mxu0 %v10904_v34  ;;  %v18104_v47 = vand.u32 4294901760, %v11238_v7  ;;  %v11318_v5 = vsub.f32 %v3188_v6, %v11282_v46  ;;  %v11320_v51 = vand.u32 4294901760, %v3180_v26  ;;  %v3173_v2 = vld [vmem:[#allocation10 + $0x208] sm:$0xff]  ;;  %v11328_v10 = vand.u32 4294901760, %v3177_v57 }
 0x377   :  { %18101 = vst [vmem:[#allocation115_spill] sm:$0xff] %v11302_v4  ;;  %18102 = vst [vmem:[#allocation116_spill] sm:$0xff] %v11308_v45  ;;  %3721 = vmatpush2.msra.mxu1 %v3720_v36  ;;  %3322 = vmatprep.subr.mxu0 %v10937_v15  ;;  %v3768_v19 = vand.u32 4294901760, %v11289_v27  ;;  %v11326_v36 = vsub.f32 %v3185_v35, %v11294_v21  ;;  %v18109_v6 = vand.u32 4294901760, %v11260_v37  ;;  %v11338_v27 = vand.u32 4294901760, %v3176_v48 }
 0x378   :  { %18103 = vst [vmem:[#allocation117_spill] sm:$0xff] %v11310_v11  ;;  %v3773_v28 = vsub.f32 %v11238_v7, %v18104_v47  ;;  %18105 = vst [vmem:[#allocation118_spill] sm:$0xff] %v11318_v5  ;;  %3727 = vmatprep.subr.mxu1 %v3726_v25  ;;  %v3172_v47 = vld [vmem:[#allocation10 + $0x200] sm:$0xff]  ;;  %3324 = vmatpush2.msra.mxu0 %v10962_v59  ;;  %v11336_v25 = vsub.f32 %v3184_v55, %v11302_v4  ;;  %v18112_v35 = vand.u32 4294901760, %v11272_v33 }
 0x379   :  { %18106 = vst [vmem:[#allocation119_spill] sm:$0xff] %v11320_v51  ;;  %18107 = vst [vmem:[#allocation120_spill] sm:$0xff] %v11326_v36  ;;  %3733 = vmatpush2.msra.mxu1 %v3732_v50  ;;  %v3779_v53 = vsub.f32 %v11260_v37, %v18109_v6  ;;  %3326 = vmatprep.subr.mxu0 %v10974_v8  ;;  %v11346_v59 = vsub.f32 %v3181_v1, %v11310_v11  ;;  %v11348_v6 = vand.u32 4294901760, %v3173_v2 }
 0x37a   :  { %18108 = vst [vmem:[#allocation121_spill] sm:$0xff] %v11328_v10  ;;  %18110 = vst [vmem:[#allocation122_spill] sm:$0xff] %v11336_v25  ;;  %3739 = vmatprep.subr.mxu1 %v3738_v62  ;;  %v3785_v34 = vsub.f32 %v11272_v33, %v18112_v35  ;;  %3328 = vmatpush2.msra.mxu0 %v10988_v13  ;;  %v18115_v55 = vand.u32 4294901760, %v11280_v31  ;;  %v11356_v37 = vsub.f32 %v3180_v26, %v11320_v51 }
 0x37b   :  { %18111 = vst [vmem:[#allocation123_spill] sm:$0xff] %v11338_v27  ;;  %18113 = vst [vmem:[#allocation124_spill] sm:$0xff] %v11346_v59  ;;  %3745 = vmatpush2.msra.mxu1 %v3744_v49  ;;  %v11358_v35 = vand.u32 4294901760, %v3172_v47  ;;  %3330 = vmatprep.subr.mxu0 %v11000_v29  ;;  %v3774_v1 = vand.u32 4294901760, %v3773_v28  ;;  %v18118_v50 = vand.u32 4294901760, %v11292_v18  ;;  %v11366_v13 = vsub.f32 %v3177_v57, %v11328_v10 }
 0x37c   :  { %18114 = vst [vmem:[#allocation125_spill] sm:$0xff] %v11348_v6  ;;  %v3791_v7 = vsub.f32 %v11280_v31, %v18115_v55  ;;  %18116 = vst [vmem:[#allocation126_spill] sm:$0xff] %v11356_v37  ;;  %3751 = vmatprep.subr.mxu1 %v3750_v39  ;;  %3332 = vmatpush2.msra.mxu0 %v11014_v16  ;;  %v3780_v26 = vand.u32 4294901760, %v3779_v53  ;;  %v18120_v55 = vand.u32 4294901760, %v11300_v12  ;;  %v18122_v57 = vand.u32 4294901760, %v11308_v45 }
 0x37d   :  { %18117 = vst [vmem:[#allocation127_spill] sm:$0xff] %v11358_v35  ;;  %v3797_v33 = vsub.f32 %v11292_v18, %v18118_v50  ;;  %18119 = vst [vmem:[#allocation128_spill] sm:$0xff] %v11366_v13  ;;  %3757 = vmatpush2.msra.mxu1 %v3756_v32  ;;  %v11374_v28 = vsub.f32 %v3176_v48, %v11338_v27  ;;  %3334 = vmatprep.subr.mxu0 %v11028_v61  ;;  %v3786_v50 = vand.u32 4294901760, %v3785_v34 }
 0x37e   :  { %v3803_v62 = vsub.f32 %v11300_v12, %v18120_v55  ;;  %3763 = vmatprep.subr.mxu1 %v3762_v3  ;;  %v3809_v49 = vsub.f32 %v11308_v45, %v18122_v57  ;;  %v11382_v53 = vsub.f32 %v3173_v2, %v11348_v6  ;;  %3336 = vmatpush2.msra.mxu0 %v11038_v56  ;;  %v3792_v55 = vand.u32 4294901760, %v3791_v7  ;;  %v107_v12 = vld [vmem:[#allocation7 + $0x2] ss:$8 sm:$0x3] }
 0x37f   :  { %18121 = vst [vmem:[#allocation129_spill] sm:$0xff] %v11374_v28  ;;  %3769 = vmatpush2.msra.mxu1 %v3768_v19  ;;  %v18124_v48 = vand.u32 4294901760, %v11318_v5  ;;  %v11390_v34 = vsub.f32 %v3172_v47, %v11358_v35  ;;  %3338 = vmatprep.subr.mxu0 %v11052_v54  ;;  %v3798_v57 = vand.u32 4294901760, %v3797_v33  ;;  %v18126_v2 = vand.u32 4294901760, %v11326_v36 }
 0x380   :  { %18123 = vst [vmem:[#allocation130_spill] sm:$0xff] %v11382_v53  ;;  %3775 = vmatprep.subr.mxu1 %v3774_v1  ;;  %3340 = vmatpush2.msra.mxu0 %v11062_v23  ;;  %v3804_v7 = vand.u32 4294901760, %v3803_v62  ;;  %v3810_v33 = vand.u32 4294901760, %v3809_v49  ;;  %v18128_v1 = vand.u32 4294901760, %v11346_v59  ;;  %v18132_v47 = vand.u32 4294901760, %v11382_v53 }
 0x381   :  { %v3815_v39 = vsub.f32 %v11318_v5, %v18124_v48  ;;  %18125 = vst [vmem:[#allocation131_spill] sm:$0xff] %v11390_v34  ;;  %v3821_v32 = vsub.f32 %v11326_v36, %v18126_v2  ;;  %3781 = vmatpush2.msra.mxu1 %v3780_v26  ;;  %v18127_v48 = vand.u32 4294901760, %v11336_v25  ;;  %3342 = vmatprep.subr.mxu0 %v11072_v14  ;;  %v18129_v26 = vand.u32 4294901760, %v11356_v37 }
 0x382   :  { %3787 = vmatprep.subr.mxu1 %v3786_v50  ;;  %v3833_v2 = vsub.f32 %v11346_v59, %v18128_v1  ;;  %3344 = vmatpush2.msra.mxu0 %v11086_v24  ;;  %v18130_v50 = vand.u32 4294901760, %v11366_v13 }
 0x383   :  { %v3827_v3 = vsub.f32 %v11336_v25, %v18127_v48  ;;  %3793 = vmatpush2.msra.mxu1 %v3792_v55  ;;  %v3816_v62 = vand.u32 4294901760, %v3815_v39  ;;  %v3839_v48 = vsub.f32 %v11356_v37, %v18129_v26  ;;  %3346 = vmatprep.subr.mxu0 %v11096_v41  ;;  %v3822_v49 = vand.u32 4294901760, %v3821_v32 }
 0x384   :  { %3799 = vmatprep.subr.mxu1 %v3798_v57  ;;  %v3845_v1 = vsub.f32 %v11366_v13, %v18130_v50  ;;  %3348 = vmatpush2.msra.mxu0 %v11110_v30  ;;  %v18131_v39 = vand.u32 4294901760, %v11374_v28  ;;  %v3834_v26 = vand.u32 4294901760, %v3833_v2  ;;  %v3857_v32 = vsub.f32 %v11382_v53, %v18132_v47 }
 0x385   :  { %3805 = vmatpush2.msra.mxu1 %v3804_v7  ;;  %v3828_v19 = vand.u32 4294901760, %v3827_v3  ;;  %3350 = vmatprep.subr.mxu0 %v11124_v38  ;;  %v3840_v57 = vand.u32 4294901760, %v3839_v48  ;;  %v18133_v50 = vand.u32 4294901760, %v11390_v34 }
 0x386   :  { %v3851_v55 = vsub.f32 %v11374_v28, %v18131_v39  ;;  %3811 = vmatprep.subr.mxu1 %v3810_v33  ;;  %3352 = vmatpush2.msra.mxu0 %v11151_v0  ;;  %v3846_v7 = vand.u32 4294901760, %v3845_v1  ;;  %v3858_v47 = vand.u32 4294901760, %v3857_v32 }
 0x387   :  { %3817 = vmatpush2.msra.mxu1 %v3816_v62  ;;  %v3863_v3 = vsub.f32 %v11390_v34, %v18133_v50  ;;  %3354 = vmatprep.subr.mxu0 %v11189_v63  ;;  %v18135_v62 = vld [vmem:[#allocation23_spill] sm:$0xff] }
 0x388   :  { %3823 = vmatprep.subr.mxu1 %v3822_v49  ;;  %3356 = vmatpush2.msra.mxu0 %v11214_v9  ;;  %v3852_v33 = vand.u32 4294901760, %v3851_v55 }
 0x389   :  { %3829 = vmatpush2.msra.mxu1 %v3828_v19  ;;  %3358 = vmatprep.subr.mxu0 %v11226_v60  ;;  %v3864_v2 = vand.u32 4294901760, %v3863_v3  ;;  %v18134_v19 = vld [vmem:[#allocation17_spill] sm:$0xff] }
 0x38a   :  { %3835 = vmatprep.subr.mxu1 %v3834_v26  ;;  %3360 = vmatpush2.msra.mxu0 %v11240_v17 }
 0x38b   :  { %3841 = vmatpush2.msra.mxu1 %v3840_v57  ;;  %3362 = vmatprep.subr.mxu0 %v11250_v58 }
 0x38c   :  { %3847 = vmatprep.subr.mxu1 %v3846_v7  ;;  %3364 = vmatpush2.msra.mxu0 %v11262_v52  ;;  %v3074_v7 = vlaneseq }
 0x38d   :  { %3853 = vmatpush2.msra.mxu1 %v3852_v33  ;;  %3366 = vmatprep.subr.mxu0 %v11274_v20 }
 0x38e   :  { %3859 = vmatprep.subr.mxu1 %v3858_v47  ;;  %3368 = vmatpush2.msra.mxu0 %v11282_v46  ;;  %v11446_v28 = vshrl.u32 %v3074_v7, 7 }
 0x38f   :  { %3865 = vmatpush2.msra.mxu1 %v3864_v2  ;;  %3370 = vmatprep.subr.mxu0 %v11294_v21 }
 0x390   :  { %4169 = vmatprep.subr.mxu1 %v18134_v19  ;;  %3372 = vmatpush2.msra.mxu0 %v11302_v4  ;;  %18136 = vst [vmem:[#allocation132_spill] sm:$0xff] %v11446_v28  ;;  %v11449_v5 = vsub.s32 0, %v11446_v28 }
 0x391   :  { %3374 = vmatprep.subr.mxu0 %v11310_v11 }
 0x392   :  { %3376 = vmatpush2.msra.mxu0 %v11320_v51  ;;  %18137 = vst [vmem:[#allocation133_spill] sm:$0xff] %v11449_v5 }
 0x393   :  { %3378 = vmatprep.subr.mxu0 %v11328_v10 }
 0x394   :  { %3380 = vmatpush2.msra.mxu0 %v11338_v27 }
 0x395   :  { %3382 = vmatprep.subr.mxu0 %v11348_v6 }
 0x396   :  { %3384 = vmatpush2.msra.mxu0 %v11358_v35 }
 0x397   :  { %3917 = vmatprep.subr.mxu0 %v18135_v62 }
 0x3c6   :  { %v1697_v48 = vpop.f32.mrf.mxu1 }
 0x3c8   :  { %v1699_v49 = vpop.f32.mrf.mxu1 }
 0x3ce   :  { %v1704_v1 = vpop.f32.mrf.mxu1  ;;  %v1604_v39 = vpop.f32.mrf.mxu0 }
 0x3cf   :  { %v1698_v53 = vadd.f32 %v1697_v48, %v1604_v39  ;;  %v11452_v48 = vsub.s32 1, %v11446_v28 }
 0x3d0   :  { %v1706_v55 = vpop.f32.mrf.mxu1  ;;  %v1606_v32 = vpop.f32.mrf.mxu0 }
 0x3d1   :  { %v1700_v37 = vadd.f32 %v1699_v49, %v1606_v32  ;;  %18138 = vst [vmem:[#allocation134_spill] sm:$0xff] %v11452_v48  ;;  %v11455_v32 = vrot.slane %v107_v12, %v11449_v5  ;;  %v11458_v31 = vrot.slane %v107_v12, %v11452_v48 }
 0x3d2   :  { %v1865_v26 = vpop.f32.mrf.mxu1 }
 0x3d4   :  { %v1867_v57 = vpop.f32.mrf.mxu1 }
 0x3d6   :  { %v1615_v50 = vpop.f32.mrf.mxu0  ;;  %v1874_v3 = vpop.f32.mrf.mxu1 }
 0x3d7   :  { %v1705_v36 = vadd.f32 %v1704_v1, %v1615_v50 }
 0x3d8   :  { %v1617_v33 = vpop.f32.mrf.mxu0  ;;  %v1876_v47 = vpop.f32.mrf.mxu1 }
 0x3d9   :  { %v1707_v27 = vadd.f32 %v1706_v55, %v1617_v33 }
 0x3da   :  { %v1781_v2 = vpop.f32.mrf.mxu0  ;;  %v2033_v34 = vpop.f32.mrf.mxu1 }
 0x3db   :  { %v1782_v59 = vadd.f32 %v1781_v2, %v1698_v53 }
 0x3dc   :  { %v1783_v13 = vpop.f32.mrf.mxu0  ;;  %v2035_v62 = vpop.f32.mrf.mxu1 }
 0x3dd   :  { %v1784_v35 = vadd.f32 %v1783_v13, %v1700_v37  ;;  %v1866_v18 = vadd.f32 %v1865_v26, %v1782_v59 }
 0x3de   :  { %v1789_v25 = vpop.f32.mrf.mxu0  ;;  %v2040_v19 = vpop.f32.mrf.mxu1 }
 0x3df   :  { %v1790_v10 = vadd.f32 %v1789_v25, %v1705_v36  ;;  %v1868_v13 = vadd.f32 %v1867_v57, %v1784_v35 }
 0x3e0   :  { %v1791_v6 = vpop.f32.mrf.mxu0  ;;  %v2042_v45 = vpop.f32.mrf.mxu1 }
 0x3e1   :  { %v1792_v49 = vadd.f32 %v1791_v6, %v1707_v27  ;;  %v1875_v36 = vadd.f32 %v1874_v3, %v1790_v10 }
 0x3e2   :  { %v1952_v39 = vpop.f32.mrf.mxu0  ;;  %v2211_v7 = vpop.f32.mrf.mxu1 }
 0x3e3   :  { %v1953_v53 = vadd.f32 %v1952_v39, %v1866_v18  ;;  %v1877_v27 = vadd.f32 %v1876_v47, %v1792_v49 }
 0x3e4   :  { %v1954_v37 = vpop.f32.mrf.mxu0  ;;  %v2213_v1 = vpop.f32.mrf.mxu1 }
 0x3e5   :  { %v2034_v50 = vadd.f32 %v2033_v34, %v1953_v53  ;;  %v1955_v2 = vadd.f32 %v1954_v37, %v1868_v13 }
 0x3e6   :  { %v1959_v59 = vpop.f32.mrf.mxu0  ;;  %v2218_v25 = vpop.f32.mrf.mxu1 }
 0x3e7   :  { %v3084_v55 = vadd.f32 %v11455_v32, %v2034_v50  ;;  %v2036_v26 = vadd.f32 %v2035_v62, %v1955_v2  ;;  %v1960_v33 = vadd.f32 %v1959_v59, %v1875_v36 }
 0x3e8   :  { %v1961_v18 = vpop.f32.mrf.mxu0  ;;  %v2220_v6 = vpop.f32.mrf.mxu1 }
 0x3e9   :  { %v3096_v39 = vmax.f32 %v3084_v55, 0.0  ;;  %v3085_v35 = vadd.f32 %v11458_v31, %v2036_v26  ;;  %v2041_v57 = vadd.f32 %v2040_v19, %v1960_v33  ;;  %v1962_v28 = vadd.f32 %v1961_v18, %v1877_v27 }
 0x3ea   :  { %v2118_v34 = vpop.f32.mrf.mxu0  ;;  %v2379_v53 = vpop.f32.mrf.mxu1 }
 0x3eb   :  { %v11462_v13 = vand.u32 4294901760, %v3096_v39  ;;  %v3097_v12 = vmax.f32 %v3085_v35, 0.0  ;;  %v3086_v10 = vadd.f32 %v11455_v32, %v2041_v57  ;;  %v2043_v3 = vadd.f32 %v2042_v45, %v1962_v28 }
 0x3ec   :  { %v2120_v37 = vpop.f32.mrf.mxu0  ;;  %v11465_v50 = vpop.f32.mrf.mxu1 }
 0x3ed   :  { %18139 = vst [vmem:[#allocation135_spill] sm:$0xff] %v11462_v13  ;;  %v11468_v62 = vsub.f32 %v3096_v39, %v11462_v13  ;;  %v11470_v47 = vand.u32 4294901760, %v3097_v12  ;;  %v3098_v49 = vmax.f32 %v3086_v10, 0.0  ;;  %v3087_v19 = vadd.f32 %v11458_v31, %v2043_v3 }
 0x3ee   :  { %v2129_v2 = vpop.f32.mrf.mxu0  ;;  %v11473_v36 = vpop.f32.mrf.mxu1  ;;  %v2212_v3 = vadd.f32 %v2211_v7, %v2118_v34 }
 0x3ef   :  { %18140 = vst [vmem:[#allocation136_spill] sm:$0xff] %v11468_v62  ;;  %18141 = vst [vmem:[#allocation137_spill] sm:$0xff] %v11470_v47  ;;  %v11476_v59 = vand.u32 4294901760, %v11468_v62  ;;  %v11479_v55 = vsub.f32 %v3097_v12, %v11470_v47  ;;  %v11481_v45 = vand.u32 4294901760, %v3098_v49  ;;  %v3099_v28 = vmax.f32 %v3087_v19, 0.0  ;;  %3867 = vmatprep.mubr.f32.mxu1 %v11470_v47  ;;  %v18150_v47 = vld [vmem:[#allocation22_spill] sm:$0xff] }
 0x3f0   :  { %v2131_v26 = vpop.f32.mrf.mxu0  ;;  %v11484_v33 = vpop.f32.mrf.mxu1  ;;  %3869 = vmatmul.mubr.f32.vlgmr.msra.gmra.mxu1 %v11462_v13  ;;  %v2214_v13 = vadd.f32 %v2213_v1, %v2120_v37 }
 0x3f1   :  { %18142 = vst [vmem:[#allocation138_spill] sm:$0xff] %v11476_v59  ;;  %18143 = vst [vmem:[#allocation139_spill] sm:$0xff] %v11479_v55  ;;  %v11488_v27 = vsub.f32 %v3098_v49, %v11481_v45  ;;  %v11490_v18 = vand.u32 4294901760, %v3099_v28  ;;  %4171 = vmatpush1.msra.mxu1 %v10548_v40  ;;  %v11494_v39 = vand.u32 4294901760, %v11479_v55  ;;  %v3394_v12 = vsub.f32 %v11468_v62, %v11476_v59  ;;  %v18153_v62 = vld [vmem:[#allocation26_spill] sm:$0xff]  ;;  %v18155_v59 = vld [vmem:[#allocation29_spill] sm:$0xff] }
 0x3f2   :  { %18144 = vst [vmem:[#allocation140_spill] sm:$0xff] %v11481_v45  ;;  %4173 = vmatprep.subr.mxu1 %v10552_v42  ;;  %v2295_v35 = vpop.f32.mrf.mxu0  ;;  %v2547_v57 = vpop.f32.mrf.mxu1 }
 0x3f3   :  { %18145 = vst [vmem:[#allocation141_spill] sm:$0xff] %v11488_v27  ;;  %18146 = vst [vmem:[#allocation142_spill] sm:$0xff] %v11490_v18  ;;  %v11500_v10 = vsub.f32 %v3099_v28, %v11490_v18  ;;  %4175 = vmatpush1.msra.mxu1 %v10556_v43  ;;  %3875 = vmatprep.mubr.f32.mxu1 %v11490_v18  ;;  %v3388_v49 = vsub.f32 %v11479_v55, %v11494_v39  ;;  %v11507_v19 = vand.u32 4294901760, %v11488_v27 }
 0x3f4   :  { %18147 = vst [vmem:[#allocation143_spill] sm:$0xff] %v11494_v39  ;;  %4177 = vmatprep.subr.mxu1 %v10558_v44  ;;  %v2297_v48 = vpop.f32.mrf.mxu0  ;;  %v2549_v5 = vpop.f32.mrf.mxu1  ;;  %3877 = vmatmul.mubr.f32.gmra.mxu1 %v11481_v45  ;;  %v2296_v28 = vadd.f32 %v2295_v35, %v2212_v3  ;;  %v2219_v18 = vadd.f32 %v2218_v25, %v2129_v2  ;;  %v11518_v40 = vand.u32 4294901760, %v3394_v12  ;;  %v18156_v3 = vld [vmem:[#allocation31_spill] sm:$0xff] }
 0x3f5   :  { %18148 = vst [vmem:[#allocation144_spill] sm:$0xff] %v11500_v10  ;;  %18149 = vst [vmem:[#allocation145_spill] sm:$0xff] %v11507_v19  ;;  %4179 = vmatpush1.msra.mxu1 %v18150_v47  ;;  %v11512_v7 = vand.u32 4294901760, %v3388_v49  ;;  %v11515_v34 = vand.u32 4294901760, %v11500_v10  ;;  %v2298_v44 = vadd.f32 %v2297_v48, %v2214_v13  ;;  %v3410_v37 = vsub.f32 %v11488_v27, %v11507_v19  ;;  %v18157_v49 = vld [vmem:[#allocation24_spill] sm:$0xff] }
 0x3f6   :  { %4181 = vmatprep.subr.mxu1 %v18153_v62  ;;  %v2303_v43 = vpop.f32.mrf.mxu0  ;;  %v2554_v42 = vpop.f32.mrf.mxu1  ;;  %18154 = vst [vmem:[#allocation147_spill] sm:$0xff] %v11518_v40  ;;  %v2221_v35 = vadd.f32 %v2220_v6, %v2131_v26  ;;  %v18158_v48 = vld [vmem:[#allocation32_spill] sm:$0xff]  ;;  %v2380_v13 = vadd.f32 %v2379_v53, %v2296_v28 }
 0x3f7   :  { %18151 = vst [vmem:[#allocation22_spill] sm:$0xff] %v11512_v7  ;;  %18152 = vst [vmem:[#allocation146_spill] sm:$0xff] %v11515_v34  ;;  %4183 = vmatpush1.msra.mxu1 %v18155_v59  ;;  %3390 = vmatprep.mubr.f32.mxu0 %v11512_v7  ;;  %v3404_v1 = vsub.f32 %v11500_v10, %v11515_v34  ;;  %v2304_v12 = vadd.f32 %v2303_v43, %v2219_v18  ;;  %v18160_v10 = vld [vmem:[#allocation25_spill] sm:$0xff]  ;;  %v18161_v59 = vld [vmem:[#allocation34_spill] sm:$0xff]  ;;  %v11539_v18 = vand.u32 4294901760, %v3410_v37 }
 0x3f8   :  { %4185 = vmatprep.subr.mxu1 %v18156_v3  ;;  %v2305_v25 = vpop.f32.mrf.mxu0  ;;  %v2556_v2 = vpop.f32.mrf.mxu1  ;;  %3396 = vmatmul.mubr.f32.vlgmr.msra.gmra.mxu0 %v11518_v40  ;;  %v18162_v3 = vld [vmem:[#allocation27_spill] sm:$0xff]  ;;  %v18163_v40 = vld [vmem:[#allocation36_spill] sm:$0xff]  ;;  %v2382_v43 = vadd.f32 %v11465_v50, %v2298_v44 }
 0x3f9   :  { %3920 = vmatpush1.msra.mxu0 %v18157_v49  ;;  %4187 = vmatpush1.msra.mxu1 %v18158_v48  ;;  %v11530_v7 = vand.u32 4294901760, %v3404_v1  ;;  %v2306_v45 = vadd.f32 %v2305_v25, %v2221_v35  ;;  %18164 = vst [vmem:[#allocation149_spill] sm:$0xff] %v11539_v18  ;;  %v18165_v53 = vld [vmem:[#allocation28_spill] sm:$0xff]  ;;  %v18166_v25 = vld [vmem:[#allocation37_spill] sm:$0xff] }
 0x3fa   :  { %3923 = vmatprep.subr.mxu0 %v18160_v10  ;;  %4189 = vmatprep.subr.mxu1 %v18161_v59  ;;  %v2466_v6 = vpop.f32.mrf.mxu0  ;;  %v11534_v26 = vpop.f32.mrf.mxu1  ;;  %v18201_v10 = vld [vmem:[#allocation64_spill] sm:$0xff] }
 0x3fb   :  { %18159 = vst [vmem:[#allocation148_spill] sm:$0xff] %v11530_v7  ;;  %v2467_v27 = vadd.f32 %v2466_v6, %v2380_v13  ;;  %3926 = vmatpush1.msra.mxu0 %v18162_v3  ;;  %4191 = vmatpush1.msra.mxu1 %v18163_v40  ;;  %v2389_v13 = vadd.f32 %v11473_v36, %v2304_v12  ;;  %v18167_v6 = vld [vmem:[#allocation30_spill] sm:$0xff]  ;;  %v18196_v3 = vld [vmem:[#allocation63_spill] sm:$0xff]  ;;  %v18205_v62 = vld [vmem:[#allocation68_spill] sm:$0xff] }
 0x3fc   :  { %3406 = vmatprep.mubr.f32.mxu0 %v11530_v7  ;;  %3929 = vmatprep.subr.mxu0 %v18165_v53  ;;  %v2468_v28 = vpop.f32.mrf.mxu0  ;;  %v11543_v1 = vpop.f32.mrf.mxu1  ;;  %v2391_v37 = vadd.f32 %v11484_v33, %v2306_v45  ;;  %v18171_v36 = vld [vmem:[#allocation46_spill] sm:$0xff]  ;;  %v18172_v45 = vld [vmem:[#allocation39_spill] sm:$0xff]  ;;  %v18173_v33 = vld [vmem:[#allocation49_spill] sm:$0xff] }
 0x3fd   :  { %v2548_v35 = vadd.f32 %v2547_v57, %v2467_v27  ;;  %4193 = vmatprep.subr.mxu1 %v18166_v25  ;;  %v2469_v59 = vadd.f32 %v2468_v28, %v2382_v43  ;;  %3412 = vmatmul.mubr.f32.gmra.mxu0 %v11539_v18  ;;  %v18168_v27 = vld [vmem:[#allocation33_spill] sm:$0xff]  ;;  %v18169_v57 = vld [vmem:[#allocation42_spill] sm:$0xff]  ;;  %v18170_v28 = vld [vmem:[#allocation35_spill] sm:$0xff] }
 0x3fe   :  { %3932 = vmatpush1.msra.mxu0 %v18167_v6  ;;  %4195 = vmatpush1.msra.mxu1 %v10618_v22  ;;  %v2473_v44 = vpop.f32.mrf.mxu0  ;;  %v11550_v50 = vpop.f32.mrf.mxu1 }
 0x3ff   :  { %v3088_v7 = vadd.f32 %v11455_v32, %v2548_v35  ;;  %v2550_v53 = vadd.f32 %v2549_v5, %v2469_v59  ;;  %3935 = vmatprep.subr.mxu0 %v18168_v27  ;;  %4197 = vmatprep.subr.mxu1 %v18169_v57  ;;  %v2474_v43 = vadd.f32 %v2473_v44, %v2389_v13  ;;  %v18174_v59 = vld [vmem:[#allocation40_spill] sm:$0xff]  ;;  %v18175_v35 = vld [vmem:[#allocation50_spill] sm:$0xff]  ;;  %v18189_v27 = vld [vmem:[#allocation47_spill] sm:$0xff] }
 0x400   :  { %3938 = vmatpush1.msra.mxu0 %v18170_v28  ;;  %4199 = vmatpush1.msra.mxu1 %v18171_v36  ;;  %v2475_v12 = vpop.f32.mrf.mxu0  ;;  %v11558_v18 = vpop.f32.mrf.mxu1 }
 0x401   :  { %v3100_v22 = vmax.f32 %v3088_v7, 0.0  ;;  %v3089_v6 = vadd.f32 %v11458_v31, %v2550_v53  ;;  %v2555_v25 = vadd.f32 %v2554_v42, %v2474_v43  ;;  %3941 = vmatprep.subr.mxu0 %v18172_v45  ;;  %4201 = vmatprep.subr.mxu1 %v18173_v33  ;;  %v2476_v5 = vadd.f32 %v2475_v12, %v2391_v37  ;;  %v18177_v53 = vld [vmem:[#allocation41_spill] sm:$0xff]  ;;  %v18178_v42 = vld [vmem:[#allocation51_spill] sm:$0xff]  ;;  %v18180_v37 = vld [vmem:[#allocation52_spill] sm:$0xff] }
 0x402   :  { %3944 = vmatpush1.msra.mxu0 %v18174_v59  ;;  %4203 = vmatpush1.msra.mxu1 %v18175_v35  ;;  %v2632_v13 = vpop.f32.mrf.mxu0  ;;  %v11565_v44 = vpop.f32.mrf.mxu1  ;;  %v18179_v43 = vld [vmem:[#allocation43_spill] sm:$0xff] }
 0x403   :  { %v11567_v36 = vand.u32 4294901760, %v3100_v22  ;;  %v3101_v28 = vmax.f32 %v3089_v6, 0.0  ;;  %v3090_v7 = vadd.f32 %v11455_v32, %v2555_v25  ;;  %v2557_v57 = vadd.f32 %v2556_v2, %v2476_v5  ;;  %3947 = vmatprep.subr.mxu0 %v18177_v53  ;;  %4205 = vmatprep.subr.mxu1 %v18178_v42  ;;  %v18182_v6 = vld [vmem:[#allocation44_spill] sm:$0xff]  ;;  %v18183_v25 = vld [vmem:[#allocation53_spill] sm:$0xff] }
 0x404   :  { %3950 = vmatpush1.msra.mxu0 %v18179_v43  ;;  %4207 = vmatpush1.msra.mxu1 %v18180_v37  ;;  %v2634_v12 = vpop.f32.mrf.mxu0  ;;  %v11574_v59 = vpop.f32.mrf.mxu1  ;;  %v18185_v5 = vld [vmem:[#allocation45_spill] sm:$0xff]  ;;  %v18186_v43 = vld [vmem:[#allocation54_spill] sm:$0xff] }
 0x405   :  { %18176 = vst [vmem:[#allocation150_spill] sm:$0xff] %v11567_v36  ;;  %v11576_v35 = vand.u32 4294901760, %v3101_v28  ;;  %v3102_v33 = vmax.f32 %v3090_v7, 0.0  ;;  %v3091_v45 = vadd.f32 %v11458_v31, %v2557_v57  ;;  %3953 = vmatprep.subr.mxu0 %v18182_v6  ;;  %4209 = vmatprep.subr.mxu1 %v18183_v25  ;;  %v11582_v2 = vsub.f32 %v3100_v22, %v11567_v36  ;;  %v18190_v6 = vld [vmem:[#allocation58_spill] sm:$0xff]  ;;  %v18191_v25 = vld [vmem:[#allocation48_spill] sm:$0xff]  ;;  %v18192_v22 = vld [vmem:[#allocation61_spill] sm:$0xff] }
 0x406   :  { %3956 = vmatpush1.msra.mxu0 %v18185_v5  ;;  %4211 = vmatpush1.msra.mxu1 %v18186_v43  ;;  %v2643_v37 = vpop.f32.mrf.mxu0  ;;  %v11586_v42 = vpop.f32.mrf.mxu1  ;;  %v18194_v43 = vld [vmem:[#allocation55_spill] sm:$0xff]  ;;  %v2728_v48 = vadd.f32 %v11543_v1, %v2634_v12  ;;  %v18208_v1 = vld [vmem:[#allocation70_spill] sm:$0xff] }
 0x407   :  { %18181 = vst [vmem:[#allocation151_spill] sm:$0xff] %v11576_v35  ;;  %18184 = vst [vmem:[#allocation152_spill] sm:$0xff] %v11582_v2  ;;  %v11589_v53 = vsub.f32 %v3101_v28, %v11576_v35  ;;  %v11591_v7 = vand.u32 4294901760, %v3102_v33  ;;  %v3103_v57 = vmax.f32 %v3091_v45, 0.0  ;;  %3959 = vmatprep.subr.mxu0 %v18189_v27  ;;  %4213 = vmatprep.subr.mxu1 %v18190_v6 }
 0x408   :  { %3962 = vmatpush1.msra.mxu0 %v18191_v25  ;;  %4215 = vmatpush1.msra.mxu1 %v18192_v22  ;;  %v2645_v5 = vpop.f32.mrf.mxu0  ;;  %v2726_v45 = vadd.f32 %v11534_v26, %v2632_v13  ;;  %v2904_v27 = vpop.f32.mrf.mxu1  ;;  %v11608_v22 = vand.u32 4294901760, %v11582_v2  ;;  %v18202_v13 = vld [vmem:[#allocation57_spill] sm:$0xff] }
 0x409   :  { %18187 = vst [vmem:[#allocation153_spill] sm:$0xff] %v11589_v53  ;;  %18188 = vst [vmem:[#allocation154_spill] sm:$0xff] %v11591_v7  ;;  %v11597_v40 = vand.u32 4294901760, %v3103_v57  ;;  %3883 = vmatprep.mubr.f32.mxu1 %v11576_v35  ;;  %3965 = vmatprep.subr.mxu0 %v18194_v43  ;;  %v11602_v28 = vand.u32 4294901760, %v11589_v53  ;;  %v11611_v6 = vsub.f32 %v3102_v33, %v11591_v7  ;;  %v18200_v43 = vld [vmem:[#allocation56_spill] sm:$0xff]  ;;  %v18204_v33 = vld [vmem:[#allocation59_spill] sm:$0xff] }
 0x40a   :  { %4217 = vmatprep.subr.mxu1 %v18196_v3  ;;  %3885 = vmatmul.mubr.f32.gmra.mxu1 %v11567_v36  ;;  %v2809_v25 = vpop.f32.mrf.mxu0  ;;  %18197 = vst [vmem:[#allocation157_spill] sm:$0xff] %v11608_v22  ;;  %v18203_v36 = vld [vmem:[#allocation66_spill] sm:$0xff] }
 0x40b   :  { %18193 = vst [vmem:[#allocation155_spill] sm:$0xff] %v11597_v40  ;;  %18195 = vst [vmem:[#allocation156_spill] sm:$0xff] %v11602_v28  ;;  %v11614_v35 = vsub.f32 %v3103_v57, %v11597_v40  ;;  %3968 = vmatpush1.msra.mxu0 %v18200_v43  ;;  %4219 = vmatpush1.msra.mxu1 %v18201_v10  ;;  %v3420_v26 = vsub.f32 %v11589_v53, %v11602_v28  ;;  %v3061_v43 = vpop.f32.mrf.mxu1  ;;  %v18207_v10 = vld [vmem:[#allocation60_spill] sm:$0xff] }
 0x40c   :  { %18198 = vst [vmem:[#allocation158_spill] sm:$0xff] %v11611_v6  ;;  %3971 = vmatprep.subr.mxu0 %v18202_v13  ;;  %4221 = vmatprep.subr.mxu1 %v18203_v36  ;;  %v2811_v3 = vpop.f32.mrf.mxu0  ;;  %v2810_v49 = vadd.f32 %v2809_v25, %v2726_v45  ;;  %v3426_v36 = vsub.f32 %v11582_v2, %v11608_v22  ;;  %v11638_v45 = vand.u32 4294901760, %v11611_v6  ;;  %v18216_v2 = vld [vmem:[#allocation77_spill] sm:$0xff] }
 0x40d   :  { %18199 = vst [vmem:[#allocation159_spill] sm:$0xff] %v11614_v35  ;;  %3974 = vmatpush1.msra.mxu0 %v18204_v33  ;;  %4223 = vmatpush1.msra.mxu1 %v18205_v62  ;;  %v11626_v57 = vand.u32 4294901760, %v11614_v35  ;;  %v2733_v13 = vadd.f32 %v11550_v50, %v2643_v37  ;;  %v2812_v12 = vadd.f32 %v2811_v3, %v2728_v48  ;;  %v11635_v25 = vand.u32 4294901760, %v3420_v26  ;;  %v18211_v62 = vld [vmem:[#allocation62_spill] sm:$0xff]  ;;  %v18213_v37 = vld [vmem:[#allocation65_spill] sm:$0xff] }
 0x40e   :  { %3891 = vmatprep.mubr.f32.mxu1 %v11597_v40  ;;  %3977 = vmatprep.subr.mxu0 %v18207_v10  ;;  %v2817_v53 = vpop.f32.mrf.mxu0  ;;  %18210 = vst [vmem:[#allocation162_spill] sm:$0xff] %v11638_v45  ;;  %v2735_v40 = vadd.f32 %v11558_v18, %v2645_v5  ;;  %v18212_v10 = vld [vmem:[#allocation72_spill] sm:$0xff]  ;;  %v18214_v3 = vld [vmem:[#allocation74_spill] sm:$0xff]  ;;  %v2894_v26 = vadd.f32 %v11565_v44, %v2810_v49  ;;  %v11650_v5 = vand.u32 4294901760, %v3426_v36  ;;  %v18220_v36 = vld [vmem:[#allocation71_spill] sm:$0xff] }
 0x40f   :  { %18206 = vst [vmem:[#allocation160_spill] sm:$0xff] %v11626_v57  ;;  %4225 = vmatprep.subr.mxu1 %v18208_v1  ;;  %3893 = vmatmul.mubr.f32.gmra.mxu1 %v11591_v7  ;;  %18209 = vst [vmem:[#allocation161_spill] sm:$0xff] %v11635_v25  ;;  %v3436_v50 = vsub.f32 %v11614_v35, %v11626_v57  ;;  %v2818_v48 = vadd.f32 %v2817_v53, %v2733_v13  ;;  %v3063_v7 = vpop.f32.mrf.mxu1  ;;  %v18215_v1 = vld [vmem:[#allocation67_spill] sm:$0xff]  ;;  %v18221_v44 = vld [vmem:[#allocation82_spill] sm:$0xff] }
 0x410   :  { %3980 = vmatpush1.msra.mxu0 %v18211_v62  ;;  %4227 = vmatpush1.msra.mxu1 %v18212_v10  ;;  %v2819_v33 = vpop.f32.mrf.mxu0  ;;  %18217 = vst [vmem:[#allocation74_spill] sm:$0xff] %v11650_v5  ;;  %v18218_v62 = vld [vmem:[#allocation69_spill] sm:$0xff]  ;;  %v3442_v53 = vsub.f32 %v11611_v6, %v11638_v45 }
 0x411   :  { %3983 = vmatprep.subr.mxu0 %v18213_v37  ;;  %4229 = vmatprep.subr.mxu1 %v18214_v3  ;;  %v2820_v18 = vadd.f32 %v2819_v33, %v2735_v40  ;;  %v2896_v37 = vadd.f32 %v11574_v59, %v2812_v12  ;;  %v11659_v49 = vand.u32 4294901760, %v3436_v50  ;;  %v18222_v59 = vld [vmem:[#allocation73_spill] sm:$0xff]  ;;  %v18223_v50 = vld [vmem:[#allocation75_spill] sm:$0xff] }
 0x412   :  { %3986 = vmatpush1.msra.mxu0 %v18215_v1  ;;  %4231 = vmatpush1.msra.mxu1 %v18216_v2  ;;  %v2980_v10 = vpop.f32.mrf.mxu0 }
 0x413   :  { %3422 = vmatprep.mubr.f32.mxu0 %v11635_v25  ;;  %3989 = vmatprep.subr.mxu0 %v18218_v62  ;;  %v2981_v35 = vadd.f32 %v2980_v10, %v2894_v26  ;;  %18219 = vst [vmem:[#allocation67_spill] sm:$0xff] %v11659_v49  ;;  %v2903_v10 = vadd.f32 %v11586_v42, %v2818_v48  ;;  %v3068_v26 = vpop.f32.mrf.mxu1  ;;  %v11669_v62 = vand.u32 4294901760, %v3442_v53  ;;  %v18226_v42 = vld [vmem:[#allocation76_spill] sm:$0xff] }
 0x414   :  { %4233 = vmatprep.subr.mxu1 %v10937_v15  ;;  %3428 = vmatmul.mubr.f32.gmra.mxu0 %v11650_v5  ;;  %v2982_v40 = vpop.f32.mrf.mxu0  ;;  %v2905_v25 = vadd.f32 %v2904_v27, %v2820_v18  ;;  %v18224_v15 = vld [vmem:[#allocation84_spill] sm:$0xff] }
 0x415   :  { %3992 = vmatpush1.msra.mxu0 %v18220_v36  ;;  %4235 = vmatpush2.msra.mxu1 %v18221_v44  ;;  %v3062_v13 = vadd.f32 %v3061_v43, %v2981_v35  ;;  %v2983_v33 = vadd.f32 %v2982_v40, %v2896_v37  ;;  %18225 = vst [vmem:[#allocation77_spill] sm:$0xff] %v11669_v62  ;;  %v3070_v18 = vpop.f32.mrf.mxu1  ;;  %v18227_v40 = vld [vmem:[#allocation78_spill] sm:$0xff] }
 0x416   :  { %3995 = vmatprep.subr.mxu0 %v18222_v59  ;;  %4237 = vmatprep.subr.mxu1 %v10974_v8  ;;  %v2987_v12 = vpop.f32.mrf.mxu0 }
 0x417   :  { %v3092_v5 = vadd.f32 %v11455_v32, %v3062_v13  ;;  %3998 = vmatpush1.msra.mxu0 %v18223_v50  ;;  %4239 = vmatpush2.msra.mxu1 %v18224_v15  ;;  %v3064_v36 = vadd.f32 %v3063_v7, %v2983_v33  ;;  %v2988_v35 = vadd.f32 %v2987_v12, %v2903_v10  ;;  %v18228_v13 = vld [vmem:[#allocation79_spill] sm:$0xff]  ;;  %v18229_v12 = vld [vmem:[#allocation81_spill] sm:$0xff] }
 0x418   :  { %3438 = vmatprep.mubr.f32.mxu0 %v11659_v49  ;;  %4001 = vmatprep.subr.mxu0 %v18226_v42  ;;  %v2989_v43 = vpop.f32.mrf.mxu0 }
 0x419   :  { %4241 = vmatprep.subr.mxu1 %v11000_v29  ;;  %v3093_v37 = vadd.f32 %v11458_v31, %v3064_v36  ;;  %3444 = vmatmul.mubr.f32.gmra.mxu0 %v11669_v62  ;;  %v3069_v27 = vadd.f32 %v3068_v26, %v2988_v35  ;;  %v2990_v48 = vadd.f32 %v2989_v43, %v2905_v25  ;;  %v3104_v7 = vmax.f32 %v3092_v5, 0.0  ;;  %v18231_v25 = vld [vmem:[#allocation83_spill] sm:$0xff]  ;;  %v18232_v26 = vld [vmem:[#allocation85_spill] sm:$0xff] }
 0x41a   :  { %4004 = vmatpush1.msra.mxu0 %v18227_v40  ;;  %4243 = vmatpush2.msra.mxu1 %v11014_v16 }
 0x41b   :  { %v3105_v53 = vmax.f32 %v3093_v37, 0.0  ;;  %4007 = vmatprep.subr.mxu0 %v18228_v13  ;;  %4245 = vmatprep.subr.mxu1 %v11028_v61  ;;  %v3071_v33 = vadd.f32 %v3070_v18, %v2990_v48  ;;  %v3094_v10 = vadd.f32 %v11455_v32, %v3069_v27  ;;  %v11690_v35 = vand.u32 4294901760, %v3104_v7  ;;  %v18235_v37 = vld [vmem:[#allocation86_spill] sm:$0xff]  ;;  %v18236_v48 = vld [vmem:[#allocation87_spill] sm:$0xff]  ;;  %v18238_v18 = vld [vmem:[#allocation88_spill] sm:$0xff] }
 0x41c   :  { %4010 = vmatpush1.msra.mxu0 %v18229_v12  ;;  %4247 = vmatpush2.msra.mxu1 %v11038_v56 }
 0x41d   :  { %v11683_v36 = vand.u32 4294901760, %v3105_v53  ;;  %4013 = vmatprep.subr.mxu0 %v18231_v25  ;;  %4249 = vmatprep.subr.mxu1 %v11052_v54  ;;  %v3095_v5 = vadd.f32 %v11458_v31, %v3071_v33  ;;  %18233 = vst [vmem:[#allocation73_spill] sm:$0xff] %v11690_v35  ;;  %v3106_v27 = vmax.f32 %v3094_v10, 0.0  ;;  %v18239_v33 = vld [vmem:[#allocation89_spill] sm:$0xff] }
 0x41e   :  { %4016 = vmatpush2.msra.mxu0 %v18232_v26  ;;  %4251 = vmatpush2.msra.mxu1 %v11062_v23 }
 0x41f   :  { %18230 = vst [vmem:[#allocation82_spill] sm:$0xff] %v11683_v36  ;;  %v11693_v32 = vsub.f32 %v3105_v53, %v11683_v36  ;;  %v3107_v43 = vmax.f32 %v3095_v5, 0.0  ;;  %4019 = vmatprep.subr.mxu0 %v18235_v37  ;;  %4253 = vmatprep.subr.mxu1 %v11072_v14  ;;  %v11706_v53 = vsub.f32 %v3104_v7, %v11690_v35  ;;  %v18241_v5 = vld [vmem:[#allocation90_spill] sm:$0xff]  ;;  %v11713_v62 = vand.u32 4294901760, %v3106_v27  ;;  %v18246_v7 = vld [vmem:[#allocation92_spill] sm:$0xff] }
 0x420   :  { %4022 = vmatpush2.msra.mxu0 %v18236_v48  ;;  %4255 = vmatpush2.msra.mxu1 %v11086_v24 }
 0x421   :  { %18234 = vst [vmem:[#allocation75_spill] sm:$0xff] %v11693_v32  ;;  %v11699_v31 = vand.u32 4294901760, %v3107_v43  ;;  %4025 = vmatprep.subr.mxu0 %v18238_v18  ;;  %4257 = vmatprep.subr.mxu1 %v11096_v41  ;;  %18240 = vst [vmem:[#allocation76_spill] sm:$0xff] %v11706_v53  ;;  %v11711_v10 = vand.u32 4294901760, %v11693_v32  ;;  %v18245_v41 = vld [vmem:[#allocation91_spill] sm:$0xff] }
 0x422   :  { %4028 = vmatpush2.msra.mxu0 %v18239_v33  ;;  %4259 = vmatpush2.msra.mxu1 %v11110_v30  ;;  %18243 = vst [vmem:[#allocation79_spill] sm:$0xff] %v11713_v62 }
 0x423   :  { %18237 = vst [vmem:[#allocation84_spill] sm:$0xff] %v11699_v31  ;;  %4031 = vmatprep.subr.mxu0 %v18241_v5  ;;  %4261 = vmatprep.subr.mxu1 %v11124_v38  ;;  %18242 = vst [vmem:[#allocation78_spill] sm:$0xff] %v11711_v10  ;;  %v11716_v49 = vsub.f32 %v3107_v43, %v11699_v31  ;;  %v18247_v38 = vld [vmem:[#allocation94_spill] sm:$0xff]  ;;  %v3452_v43 = vsub.f32 %v11693_v32, %v11711_v10  ;;  %v11729_v5 = vand.u32 4294901760, %v11706_v53 }
 0x424   :  { %4034 = vmatpush2.msra.mxu0 %v18245_v41  ;;  %4263 = vmatpush2.msra.mxu1 %v11151_v0  ;;  %v11732_v0 = vsub.f32 %v3106_v27, %v11713_v62 }
 0x425   :  { %18244 = vst [vmem:[#allocation81_spill] sm:$0xff] %v11716_v49  ;;  %3899 = vmatprep.mubr.f32.mxu1 %v11683_v36  ;;  %4037 = vmatprep.subr.mxu0 %v18246_v7  ;;  %18248 = vst [vmem:[#allocation83_spill] sm:$0xff] %v11729_v5  ;;  %v18250_v36 = vld [vmem:[#allocation95_spill] sm:$0xff]  ;;  %v11745_v27 = vand.u32 4294901760, %v3452_v43 }
 0x426   :  { %4265 = vmatprep.subr.mxu1 %v11189_v63  ;;  %3901 = vmatmul.mubr.f32.gmra.mxu1 %v11690_v35  ;;  %18249 = vst [vmem:[#allocation85_spill] sm:$0xff] %v11732_v0  ;;  %v11737_v63 = vand.u32 4294901760, %v11716_v49  ;;  %v18252_v35 = vld [vmem:[#allocation97_spill] sm:$0xff]  ;;  %v18258_v43 = vld [vmem:[#allocation103_spill] sm:$0xff] }
 0x427   :  { %4040 = vmatpush2.msra.mxu0 %v18247_v38  ;;  %4267 = vmatpush2.msra.mxu1 %v11214_v9  ;;  %v18253_v9 = vld [vmem:[#allocation98_spill] sm:$0xff]  ;;  %18254 = vst [vmem:[#allocation87_spill] sm:$0xff] %v11745_v27 }
 0x428   :  { %4043 = vmatprep.subr.mxu0 %v18250_v36  ;;  %4269 = vmatprep.subr.mxu1 %v11226_v60  ;;  %18251 = vst [vmem:[#allocation86_spill] sm:$0xff] %v11737_v63  ;;  %v3458_v60 = vsub.f32 %v11706_v53, %v11729_v5  ;;  %v18255_v36 = vld [vmem:[#allocation100_spill] sm:$0xff] }
 0x429   :  { %4046 = vmatpush2.msra.mxu0 %v18252_v35  ;;  %4271 = vmatpush2.msra.mxu1 %v11240_v17  ;;  %v3468_v17 = vsub.f32 %v11716_v49, %v11737_v63 }
 0x42a   :  { %3907 = vmatprep.mubr.f32.mxu1 %v11699_v31  ;;  %4049 = vmatprep.subr.mxu0 %v18253_v9  ;;  %v11754_v31 = vand.u32 4294901760, %v11732_v0  ;;  %v18257_v9 = vld [vmem:[#allocation101_spill] sm:$0xff] }
 0x42b   :  { %4273 = vmatprep.subr.mxu1 %v11250_v58  ;;  %3909 = vmatmul.mubr.f32.gmra.mxu1 %v11713_v62  ;;  %v11762_v62 = vand.u32 4294901760, %v3458_v60  ;;  %v18264_v60 = vld [vmem:[#allocation111_spill] sm:$0xff] }
 0x42c   :  { %4052 = vmatpush2.msra.mxu0 %v18255_v36  ;;  %4275 = vmatpush2.msra.mxu1 %v11262_v52  ;;  %18256 = vst [vmem:[#allocation88_spill] sm:$0xff] %v11754_v31  ;;  %v18260_v52 = vld [vmem:[#allocation106_spill] sm:$0xff]  ;;  %v11766_v36 = vand.u32 4294901760, %v3468_v17 }
 0x42d   :  { %4055 = vmatprep.subr.mxu0 %v18257_v9  ;;  %4277 = vmatprep.subr.mxu1 %v11274_v20  ;;  %18259 = vst [vmem:[#allocation89_spill] sm:$0xff] %v11762_v62  ;;  %v3474_v9 = vsub.f32 %v11732_v0, %v11754_v31 }
 0x42e   :  { %4299 = vmatprep.mubr.f32.mxu1 %v11494_v39  ;;  %4058 = vmatpush2.msra.mxu0 %v18258_v43  ;;  %18261 = vst [vmem:[#allocation91_spill] sm:$0xff] %v11766_v36  ;;  %v18262_v39 = vld [vmem:[#allocation108_spill] sm:$0xff] }
 0x42f   :  { %4279 = vmatpush2.msra.mxu1 %v11282_v46  ;;  %3454 = vmatprep.mubr.f32.mxu0 %v11745_v27  ;;  %v18263_v27 = vld [vmem:[#allocation110_spill] sm:$0xff]  ;;  %v11778_v17 = vand.u32 4294901760, %v3474_v9  ;;  %v18273_v9 = vld [vmem:[#allocation127_spill] sm:$0xff] }
 0x430   :  { %4061 = vmatprep.subr.mxu0 %v18260_v52  ;;  %4281 = vmatprep.subr.mxu1 %v11294_v21  ;;  %v18266_v21 = vld [vmem:[#allocation112_spill] sm:$0xff]  ;;  %v18267_v52 = vld [vmem:[#allocation121_spill] sm:$0xff] }
 0x431   :  { %3460 = vmatmul.mubr.f32.gmra.mxu0 %v11762_v62  ;;  %4283 = vmatpush2.msra.mxu1 %v11302_v4  ;;  %18265 = vst [vmem:[#allocation92_spill] sm:$0xff] %v11778_v17  ;;  %v18268_v62 = vld [vmem:[#allocation123_spill] sm:$0xff]  ;;  %v18269_v4 = vld [vmem:[#allocation114_spill] sm:$0xff] }
 0x432   :  { %4064 = vmatpush2.msra.mxu0 %v18262_v39  ;;  %4285 = vmatprep.subr.mxu1 %v11310_v11  ;;  %v18270_v11 = vld [vmem:[#allocation116_spill] sm:$0xff] }
 0x433   :  { %4067 = vmatprep.subr.mxu0 %v18263_v27  ;;  %4287 = vmatpush2.msra.mxu1 %v11320_v51  ;;  %v18271_v51 = vld [vmem:[#allocation125_spill] sm:$0xff] }
 0x434   :  { %4070 = vmatpush2.msra.mxu0 %v18264_v60  ;;  %3470 = vmatprep.mubr.f32.mxu0 %v11766_v36  ;;  %v18272_v60 = vld [vmem:[#allocation118_spill] sm:$0xff]  ;;  %v18274_v36 = vld [vmem:[#allocation120_spill] sm:$0xff] }
 0x435   :  { %4073 = vmatprep.subr.mxu0 %v18266_v21  ;;  %4289 = vmatprep.subr.mxu1 %v18267_v52  ;;  %v18275_v21 = vld [vmem:[#allocation138_spill] sm:$0xff]  ;;  %v18276_v52 = vld [vmem:[#allocation17_spill] sm:$0xff] }
 0x436   :  { %3476 = vmatmul.mubr.f32.gmra.mxu0 %v11778_v17  ;;  %4291 = vmatpush2.msra.mxu1 %v18268_v62  ;;  %v18277_v17 = vld [vmem:[#allocation122_spill] sm:$0xff] }
 0x437   :  { %4076 = vmatpush2.msra.mxu0 %v18269_v4  ;;  %4109 = vmatprep.mubr.f32.mxu0 %v11479_v55  ;;  %v18278_v62 = vld [vmem:[#allocation18_spill] sm:$0xff]  ;;  %v18279_v55 = vld [vmem:[#allocation124_spill] sm:$0xff] }
 0x438   :  { %4079 = vmatprep.subr.mxu0 %v18270_v11  ;;  %4293 = vmatprep.subr.mxu1 %v18271_v51  ;;  %v18280_v11 = vld [vmem:[#allocation19_spill] sm:$0xff]  ;;  %v18281_v51 = vld [vmem:[#allocation126_spill] sm:$0xff] }
 0x439   :  { %4082 = vmatpush2.msra.mxu0 %v18272_v60  ;;  %4295 = vmatpush2.msra.mxu1 %v18273_v9  ;;  %v18282_v60 = vld [vmem:[#allocation20_spill] sm:$0xff] }
 0x43a   :  { %4085 = vmatprep.subr.mxu0 %v18274_v36  ;;  %4303 = vmatmul.mubr.f32.vlgmr.msra.gmra.mxu1 %v18275_v21  ;;  %v18283_v9 = vld [vmem:[#allocation128_spill] sm:$0xff]  ;;  %v18284_v21 = vld [vmem:[#allocation21_spill] sm:$0xff] }
 0x43b   :  { %4675 = vmatprep.subr.mxu1 %v18276_v52  ;;  %4088 = vmatpush2.msra.mxu0 %v18277_v17  ;;  %v18285_v52 = vld [vmem:[#allocation129_spill] sm:$0xff] }
 0x43c   :  { %4311 = vmatprep.mubr.f32.mxu1 %v11515_v34  ;;  %4677 = vmatpush1.msra.mxu1 %v18278_v62  ;;  %v18286_v62 = vld [vmem:[#allocation130_spill] sm:$0xff] }
 0x43d   :  { %4091 = vmatprep.subr.mxu0 %v18279_v55  ;;  %4679 = vmatprep.subr.mxu1 %v18280_v11  ;;  %v18287_v34 = vld [vmem:[#allocation26_spill] sm:$0xff]  ;;  %v18288_v11 = vld [vmem:[#allocation131_spill] sm:$0xff] }
 0x43e   :  { %4094 = vmatpush2.msra.mxu0 %v18281_v51  ;;  %4681 = vmatpush1.msra.mxu1 %v18282_v60  ;;  %v18289_v51 = vld [vmem:[#allocation29_spill] sm:$0xff]  ;;  %v18290_v60 = vld [vmem:[#allocation136_spill] sm:$0xff] }
 0x43f   :  { %4097 = vmatprep.subr.mxu0 %v18283_v9  ;;  %4315 = vmatmul.mubr.f32.gmra.mxu1 %v11507_v19  ;;  %v18291_v19 = vld [vmem:[#allocation23_spill] sm:$0xff] }
 0x440   :  { %4683 = vmatprep.subr.mxu1 %v18284_v21  ;;  %4100 = vmatpush2.msra.mxu0 %v18285_v52  ;;  %v18292_v21 = vand.u32 4294901760, %v18291_v19  ;;  %v18293_v52 = vld [vmem:[#allocation31_spill] sm:$0xff]  ;;  %v18303_v19 = vld [vmem:[#allocation36_spill] sm:$0xff] }
 0x441   :  { %4323 = vmatprep.mubr.f32.mxu1 %v11602_v28  ;;  %4685 = vmatpush1.msra.mxu1 %v18150_v47  ;;  %v18294_v28 = vld [vmem:[#allocation144_spill] sm:$0xff] }
 0x442   :  { %4103 = vmatprep.subr.mxu0 %v18286_v62  ;;  %4687 = vmatprep.subr.mxu1 %v18287_v34  ;;  %v18295_v47 = vld [vmem:[#allocation24_spill] sm:$0xff] }
 0x443   :  { %4106 = vmatpush2.msra.mxu0 %v18288_v11  ;;  %4689 = vmatpush1.msra.mxu1 %v18289_v51  ;;  %v18296_v62 = vand.u32 4294901760, %v18295_v47  ;;  %v18297_v34 = vld [vmem:[#allocation32_spill] sm:$0xff]  ;;  %v18298_v11 = vld [vmem:[#allocation25_spill] sm:$0xff] }
 0x444   :  { %4112 = vmatmul.mubr.f32.vlgmr.msra.gmra.mxu0 %v18290_v60  ;;  %4327 = vmatmul.mubr.f32.gmra.mxu1 %v11608_v22  ;;  %v18299_v51 = vand.u32 4294901760, %v18298_v11  ;;  %v18300_v60 = vld [vmem:[#allocation34_spill] sm:$0xff]  ;;  %v18301_v22 = vld [vmem:[#allocation27_spill] sm:$0xff]  ;;  %v18308_v47 = vld [vmem:[#allocation153_spill] sm:$0xff] }
 0x445   :  { %4372 = vmatprep.subr.mxu0 %v18292_v21  ;;  %4691 = vmatprep.subr.mxu1 %v18293_v52  ;;  %v18302_v9 = vand.u32 4294901760, %v18301_v22  ;;  %v18304_v52 = vld [vmem:[#allocation141_spill] sm:$0xff]  ;;  %v18305_v21 = vld [vmem:[#allocation28_spill] sm:$0xff]  ;;  %v18309_v11 = vld [vmem:[#allocation30_spill] sm:$0xff] }
 0x446   :  { %4119 = vmatprep.mubr.f32.mxu0 %v18294_v28  ;;  %4335 = vmatprep.mubr.f32.mxu1 %v11626_v57  ;;  %v18306_v57 = vand.u32 4294901760, %v18305_v21  ;;  %v18311_v22 = vld [vmem:[#allocation38_spill] sm:$0xff]  ;;  %v18318_v21 = vld [vmem:[#allocation152_spill] sm:$0xff] }
 0x447   :  { %4376 = vmatpush1.msra.mxu0 %v18296_v62  ;;  %4693 = vmatpush1.msra.mxu1 %v18297_v34  ;;  %v18307_v62 = vld [vmem:[#allocation37_spill] sm:$0xff]  ;;  %v18478_v28 = vld [vmem:[#allocation126_spill] sm:$0xff] }
 0x448   :  { %4380 = vmatprep.subr.mxu0 %v18299_v51  ;;  %4695 = vmatprep.subr.mxu1 %v18300_v60  ;;  %v18310_v60 = vand.u32 4294901760, %v18309_v11  ;;  %v18314_v51 = vld [vmem:[#allocation42_spill] sm:$0xff]  ;;  %v18321_v11 = vld [vmem:[#allocation49_spill] sm:$0xff] }
 0x449   :  { %4384 = vmatpush1.msra.mxu0 %v18302_v9  ;;  %4697 = vmatpush1.msra.mxu1 %v18303_v19  ;;  %v18312_v9 = vld [vmem:[#allocation33_spill] sm:$0xff]  ;;  %v18315_v19 = vld [vmem:[#allocation35_spill] sm:$0xff] }
 0x44a   :  { %4122 = vmatmul.mubr.f32.gmra.mxu0 %v18304_v52  ;;  %4339 = vmatmul.mubr.f32.gmra.mxu1 %v11638_v45  ;;  %v18313_v34 = vand.u32 4294901760, %v18312_v9  ;;  %v18316_v45 = vand.u32 4294901760, %v18315_v19  ;;  %v18328_v19 = vld [vmem:[#allocation51_spill] sm:$0xff] }
 0x44b   :  { %4388 = vmatprep.subr.mxu0 %v18306_v57  ;;  %4699 = vmatprep.subr.mxu1 %v18307_v62  ;;  %v18317_v57 = vld [vmem:[#allocation46_spill] sm:$0xff]  ;;  %v18319_v62 = vld [vmem:[#allocation39_spill] sm:$0xff] }
 0x44c   :  { %4129 = vmatprep.mubr.f32.mxu0 %v18308_v47  ;;  %4347 = vmatprep.mubr.f32.mxu1 %v11711_v10  ;;  %v18320_v10 = vand.u32 4294901760, %v18319_v62  ;;  %v18332_v62 = vld [vmem:[#allocation44_spill] sm:$0xff]  ;;  %v18472_v47 = vld [vmem:[#allocation142_spill] sm:$0xff] }
 0x44d   :  { %4392 = vmatpush1.msra.mxu0 %v18310_v60  ;;  %4701 = vmatpush1.msra.mxu1 %v18311_v22  ;;  %v18322_v60 = vld [vmem:[#allocation159_spill] sm:$0xff]  ;;  %v18323_v22 = vld [vmem:[#allocation40_spill] sm:$0xff] }
 0x44e   :  { %4396 = vmatprep.subr.mxu0 %v18313_v34  ;;  %4703 = vmatprep.subr.mxu1 %v18314_v51  ;;  %v18324_v9 = vand.u32 4294901760, %v18323_v22  ;;  %v18325_v34 = vld [vmem:[#allocation50_spill] sm:$0xff]  ;;  %v18334_v22 = vld [vmem:[#allocation53_spill] sm:$0xff] }
 0x44f   :  { %4400 = vmatpush1.msra.mxu0 %v18316_v45  ;;  %4705 = vmatpush1.msra.mxu1 %v18317_v57  ;;  %v18326_v45 = vld [vmem:[#allocation41_spill] sm:$0xff]  ;;  %v18329_v57 = vld [vmem:[#allocation43_spill] sm:$0xff] }
 0x450   :  { %4132 = vmatmul.mubr.f32.gmra.mxu0 %v18318_v21  ;;  %4351 = vmatmul.mubr.f32.gmra.mxu1 %v11729_v5  ;;  %v18327_v51 = vand.u32 4294901760, %v18326_v45  ;;  %v18330_v5 = vand.u32 4294901760, %v18329_v57  ;;  %v18337_v45 = vld [vmem:[#allocation54_spill] sm:$0xff]  ;;  %v3131_v21 = vld [vmem:[#allocation10 + $0xb8] sm:$0xff] }
 0x451   :  { %4404 = vmatprep.subr.mxu0 %v18320_v10  ;;  %4707 = vmatprep.subr.mxu1 %v18321_v11  ;;  %v18331_v10 = vld [vmem:[#allocation52_spill] sm:$0xff]  ;;  %v18333_v11 = vand.u32 4294901760, %v18332_v62  ;;  %v18341_v57 = vld [vmem:[#allocation58_spill] sm:$0xff]  ;;  %v18344_v62 = vld [vmem:[#allocation61_spill] sm:$0xff] }
 0x452   :  { %4139 = vmatprep.mubr.f32.mxu0 %v18322_v60  ;;  %4359 = vmatprep.mubr.f32.mxu1 %v11737_v63 }
 0x453   :  { %4408 = vmatpush1.msra.mxu0 %v18324_v9  ;;  %4709 = vmatpush1.msra.mxu1 %v18325_v34  ;;  %v18335_v9 = vld [vmem:[#allocation45_spill] sm:$0xff] }
 0x454   :  { %4412 = vmatprep.subr.mxu0 %v18327_v51  ;;  %4711 = vmatprep.subr.mxu1 %v18328_v19  ;;  %v18336_v34 = vand.u32 4294901760, %v18335_v9  ;;  %v18338_v51 = vld [vmem:[#allocation137_spill] sm:$0xff]  ;;  %v18347_v9 = vld [vmem:[#allocation63_spill] sm:$0xff] }
 0x455   :  { %4416 = vmatpush1.msra.mxu0 %v18330_v5  ;;  %4713 = vmatpush1.msra.mxu1 %v18331_v10  ;;  %v18339_v5 = vld [vmem:[#allocation47_spill] sm:$0xff]  ;;  %v18342_v10 = vld [vmem:[#allocation48_spill] sm:$0xff] }
 0x456   :  { %4142 = vmatmul.mubr.f32.gmra.mxu0 %v11611_v6  ;;  %4363 = vmatmul.mubr.f32.gmra.mxu1 %v11754_v31  ;;  %v18340_v19 = vand.u32 4294901760, %v18339_v5  ;;  %v18343_v31 = vand.u32 4294901760, %v18342_v10  ;;  %v18350_v5 = vld [vmem:[#allocation64_spill] sm:$0xff]  ;;  %v18354_v10 = vld [vmem:[#allocation59_spill] sm:$0xff] }
 0x457   :  { %4420 = vmatprep.subr.mxu0 %v18333_v11  ;;  %4715 = vmatprep.subr.mxu1 %v18334_v22  ;;  %v18345_v11 = vld [vmem:[#allocation55_spill] sm:$0xff] }
 0x458   :  { %4149 = vmatprep.mubr.f32.mxu0 %v11693_v32  ;;  %4424 = vmatpush1.msra.mxu0 %v18336_v34  ;;  %v18346_v22 = vand.u32 4294901760, %v18345_v11  ;;  %v18348_v34 = vld [vmem:[#allocation56_spill] sm:$0xff]  ;;  %v18462_v32 = vld [vmem:[#allocation127_spill] sm:$0xff] }
 0x459   :  { %4717 = vmatpush1.msra.mxu1 %v18337_v45  ;;  %4803 = vmatprep.mubr.f32.mxu1 %v18338_v51  ;;  %v18349_v45 = vand.u32 4294901760, %v18348_v34  ;;  %v18357_v11 = vld [vmem:[#allocation60_spill] sm:$0xff]  ;;  %v18360_v34 = vld [vmem:[#allocation62_spill] sm:$0xff]  ;;  %v3134_v6 = vld [vmem:[#allocation10 + $0xd0] sm:$0xff] }
 0x45a   :  { %4428 = vmatprep.subr.mxu0 %v18340_v19  ;;  %4719 = vmatprep.subr.mxu1 %v18341_v57  ;;  %v18351_v19 = vld [vmem:[#allocation57_spill] sm:$0xff] }
 0x45b   :  { %4432 = vmatpush1.msra.mxu0 %v18343_v31  ;;  %4721 = vmatpush1.msra.mxu1 %v18344_v62  ;;  %v18352_v57 = vand.u32 4294901760, %v18351_v19  ;;  %v18353_v31 = vld [vmem:[#allocation66_spill] sm:$0xff]  ;;  %v18355_v62 = vand.u32 4294901760, %v18354_v10  ;;  %v18363_v19 = vld [vmem:[#allocation65_spill] sm:$0xff] }
 0x45c   :  { %4152 = vmatmul.mubr.f32.gmra.mxu0 %v11706_v53  ;;  %4436 = vmatprep.subr.mxu0 %v18346_v22  ;;  %v18356_v53 = vld [vmem:[#allocation68_spill] sm:$0xff]  ;;  %v18358_v22 = vand.u32 4294901760, %v18357_v11  ;;  %v18369_v11 = vld [vmem:[#allocation71_spill] sm:$0xff] }
 0x45d   :  { %4723 = vmatprep.subr.mxu1 %v18347_v9  ;;  %4159 = vmatprep.mubr.f32.mxu0 %v11716_v49  ;;  %v18359_v9 = vld [vmem:[#allocation70_spill] sm:$0xff] }
 0x45e   :  { %4440 = vmatpush1.msra.mxu0 %v18349_v45  ;;  %4725 = vmatpush1.msra.mxu1 %v18350_v5  ;;  %v18361_v45 = vand.u32 4294901760, %v18360_v34  ;;  %v18362_v5 = vld [vmem:[#allocation72_spill] sm:$0xff]  ;;  %v18374_v34 = vand.u32 4294901760, %v18227_v40  ;;  %v3166_v40 = vld [vmem:[#allocation10 + $0x1d0] sm:$0xff]  ;;  %v18460_v49 = vld [vmem:[#allocation118_spill] sm:$0xff] }
 0x45f   :  { %4444 = vmatprep.subr.mxu0 %v18352_v57  ;;  %4727 = vmatprep.subr.mxu1 %v18353_v31  ;;  %v18364_v57 = vand.u32 4294901760, %v18363_v19  ;;  %v18366_v31 = vld [vmem:[#allocation69_spill] sm:$0xff]  ;;  %v18394_v19 = vld [vmem:[#allocation99_spill] sm:$0xff] }
 0x460   :  { %4448 = vmatpush1.msra.mxu0 %v18355_v62  ;;  %4729 = vmatpush1.msra.mxu1 %v18356_v53  ;;  %v18365_v53 = vand.u32 4294901760, %v18215_v1  ;;  %v18367_v10 = vand.u32 4294901760, %v18366_v31  ;;  %v18368_v62 = vld [vmem:[#allocation80_spill] sm:$0xff]  ;;  %v18372_v1 = vand.u32 4294901760, %v18223_v50 }
 0x461   :  { %4162 = vmatmul.mubr.f32.gmra.mxu0 %v11732_v0  ;;  %4452 = vmatprep.subr.mxu0 %v18358_v22  ;;  %v18370_v22 = vand.u32 4294901760, %v18369_v11  ;;  %v3167_v50 = vld [vmem:[#allocation10 + $0x1d8] sm:$0xff] }
 0x462   :  { %4731 = vmatprep.subr.mxu1 %v18359_v9  ;;  %4456 = vmatpush1.msra.mxu0 %v18361_v45  ;;  %v18371_v9 = vand.u32 4294901760, %v18222_v59  ;;  %v3170_v59 = vld [vmem:[#allocation10 + $0x1f0] sm:$0xff]  ;;  %v3155_v11 = vld [vmem:[#allocation10 + $0x178] sm:$0xff] }
 0x463   :  { %4626 = vmatprep.mubr.f32.mxu0 %v18338_v51  ;;  %4733 = vmatpush1.msra.mxu1 %v18362_v5  ;;  %v3162_v45 = vld [vmem:[#allocation10 + $0x1b0] sm:$0xff]  ;;  %v18393_v5 = vand.u32 4294901760, %v18245_v41  ;;  %v18399_v41 = vand.u32 4294901760, %v18247_v38  ;;  %v18407_v38 = vand.u32 4294901760, %v18252_v35 }
 0x464   :  { %4460 = vmatprep.subr.mxu0 %v18364_v57  ;;  %4735 = vmatprep.subr.mxu1 %v18214_v3  ;;  %v3171_v3 = vld [vmem:[#allocation10 + $0x1f8] sm:$0xff]  ;;  %v18395_v57 = vand.u32 4294901760, %v18246_v7 }
 0x465   :  { %4464 = vmatpush1.msra.mxu0 %v18365_v53  ;;  %4737 = vmatpush1.msra.mxu1 %v18216_v2  ;;  %v18373_v2 = vand.u32 4294901760, %v18226_v42  ;;  %v18382_v42 = vand.u32 4294901760, %v18236_v48  ;;  %v18396_v53 = vld [vmem:[#allocation102_spill] sm:$0xff] }
 0x466   :  { %4468 = vmatprep.subr.mxu0 %v18367_v10  ;;  %4739 = vmatprep.subr.mxu1 %v18368_v62  ;;  %v3158_v62 = vld [vmem:[#allocation10 + $0x190] sm:$0xff] }
 0x467   :  { %4472 = vmatpush1.msra.mxu0 %v18370_v22  ;;  %4741 = vmatpush2.msra.mxu1 %v18221_v44  ;;  %v18375_v44 = vand.u32 4294901760, %v18228_v13  ;;  %v18384_v13 = vand.u32 4294901760, %v18238_v18  ;;  %v11959_v18 = vand.u32 4294901760, %v3166_v40  ;;  %v18400_v22 = vld [vmem:[#allocation104_spill] sm:$0xff] }
 0x468   :  { %4476 = vmatprep.subr.mxu0 %v18371_v9  ;;  %4743 = vmatprep.subr.mxu1 %v10974_v8  ;;  %v18376_v8 = vand.u32 4294901760, %v18229_v12  ;;  %v11948_v12 = vand.u32 4294901760, %v3167_v50  ;;  %v11976_v9 = vand.u32 4294901760, %v3162_v45 }
 0x469   :  { %4480 = vmatpush1.msra.mxu0 %v18372_v1  ;;  %4745 = vmatpush2.msra.mxu1 %v18224_v15  ;;  %v11926_v15 = vand.u32 4294901760, %v3171_v3  ;;  %18392 = vst [vmem:[#allocation114_spill] sm:$0xff] %v11959_v18  ;;  %v3154_v1 = vld [vmem:[#allocation10 + $0x170] sm:$0xff] }
 0x46a   :  { %4484 = vmatprep.subr.mxu0 %v18373_v2  ;;  %4747 = vmatprep.subr.mxu1 %v11000_v29  ;;  %v18378_v29 = vand.u32 4294901760, %v18231_v25  ;;  %18386 = vst [vmem:[#allocation108_spill] sm:$0xff] %v11948_v12  ;;  %v3163_v25 = vld [vmem:[#allocation10 + $0x1b8] sm:$0xff]  ;;  %v11969_v31 = vsub.f32 %v3167_v50, %v11948_v12  ;;  %18401 = vst [vmem:[#allocation122_spill] sm:$0xff] %v11976_v9  ;;  %v18402_v2 = vld [vmem:[#allocation95_spill] sm:$0xff]  ;;  %v11995_v50 = vand.u32 4294901760, %v3158_v62 }
 0x46b   :  { %4488 = vmatpush1.msra.mxu0 %v18374_v34  ;;  %4749 = vmatpush2.msra.mxu1 %v11014_v16  ;;  %18377 = vst [vmem:[#allocation94_spill] sm:$0xff] %v11926_v15  ;;  %v18379_v16 = vand.u32 4294901760, %v18232_v26  ;;  %v18388_v26 = vld [vmem:[#allocation90_spill] sm:$0xff]  ;;  %v11971_v10 = vand.u32 4294901760, %v3163_v25  ;;  %v18403_v7 = vand.u32 4294901760, %v18402_v2 }
 0x46c   :  { %4492 = vmatprep.subr.mxu0 %v18375_v44  ;;  %4751 = vmatprep.subr.mxu1 %v11028_v61  ;;  %v18380_v61 = vand.u32 4294901760, %v18235_v37  ;;  %v18389_v37 = vand.u32 4294901760, %v18388_v26  ;;  %18397 = vst [vmem:[#allocation120_spill] sm:$0xff] %v11969_v31  ;;  %v11983_v44 = vsub.f32 %v3166_v40, %v11959_v18  ;;  %18409 = vst [vmem:[#allocation19_spill] sm:$0xff] %v11995_v50  ;;  %v18411_v40 = vld [vmem:[#allocation98_spill] sm:$0xff]  ;;  %v17179_v35 = vand.u32 4294901760, %v11969_v31 }
 0x46d   :  { %4496 = vmatpush1.msra.mxu0 %v18376_v8  ;;  %4753 = vmatpush2.msra.mxu1 %v11038_v56  ;;  %v11937_v56 = vand.u32 4294901760, %v3170_v59  ;;  %18398 = vst [vmem:[#allocation17_spill] sm:$0xff] %v11971_v10  ;;  %v3147_v26 = vld [vmem:[#allocation10 + $0x138] sm:$0xff] }
 0x46e   :  { %4500 = vmatprep.subr.mxu0 %v18378_v29  ;;  %4755 = vmatprep.subr.mxu1 %v11052_v54  ;;  %v11943_v54 = vsub.f32 %v3171_v3, %v11926_v15  ;;  %v18404_v3 = vld [vmem:[#allocation105_spill] sm:$0xff]  ;;  %18405 = vst [vmem:[#allocation18_spill] sm:$0xff] %v11983_v44  ;;  %v18408_v29 = vld [vmem:[#allocation107_spill] sm:$0xff] }
 0x46f   :  { %4504 = vmatpush2.msra.mxu0 %v18379_v16  ;;  %4757 = vmatpush2.msra.mxu1 %v11062_v23  ;;  %18381 = vst [vmem:[#allocation97_spill] sm:$0xff] %v11937_v56  ;;  %v18385_v23 = vld [vmem:[#allocation93_spill] sm:$0xff]  ;;  %v11957_v48 = vsub.f32 %v3170_v59, %v11937_v56  ;;  %v3151_v59 = vld [vmem:[#allocation10 + $0x158] sm:$0xff] }
 0x470   :  { %4508 = vmatprep.subr.mxu0 %v18380_v61  ;;  %4759 = vmatprep.subr.mxu1 %v11072_v14  ;;  %18383 = vst [vmem:[#allocation103_spill] sm:$0xff] %v11943_v54  ;;  %v18387_v14 = vand.u32 4294901760, %v18239_v33  ;;  %v17181_v33 = vand.u32 4294901760, %v11943_v54  ;;  %v11997_v61 = vand.u32 4294901760, %v3155_v11 }
 0x471   :  { %4512 = vmatpush2.msra.mxu0 %v18382_v42  ;;  %4761 = vmatpush2.msra.mxu1 %v11086_v24  ;;  %v18390_v24 = vld [vmem:[#allocation96_spill] sm:$0xff]  ;;  %18391 = vst [vmem:[#allocation110_spill] sm:$0xff] %v11957_v48  ;;  %v17180_v34 = vand.u32 4294901760, %v11957_v48  ;;  %v3150_v42 = vld [vmem:[#allocation10 + $0x150] sm:$0xff] }
 0x472   :  { %4516 = vmatprep.subr.mxu0 %v18384_v13  ;;  %4763 = vmatprep.subr.mxu1 %v18385_v23  ;;  %v11993_v16 = vsub.f32 %v11943_v54, %v17181_v33  ;;  %18410 = vst [vmem:[#allocation20_spill] sm:$0xff] %v11997_v61  ;;  %v18412_v13 = vand.u32 4294901760, %v18411_v40  ;;  %v12004_v23 = vsub.f32 %v3163_v25, %v11971_v10  ;;  %v18443_v33 = vld [vmem:[#allocation119_spill] sm:$0xff] }
 0x473   :  { %4520 = vmatpush2.msra.mxu0 %v18387_v14  ;;  %4765 = vmatpush2.msra.mxu1 %v11110_v30  ;;  %v3159_v30 = vld [vmem:[#allocation10 + $0x198] sm:$0xff]  ;;  %v12006_v14 = vand.u32 4294901760, %v3154_v1  ;;  %v12022_v25 = vsub.f32 %v11957_v48, %v17180_v34  ;;  %v12038_v40 = vsub.f32 %v3155_v11, %v11997_v61 }
 0x474   :  { %4524 = vmatprep.subr.mxu0 %v18389_v37  ;;  %4767 = vmatprep.subr.mxu1 %v18390_v24  ;;  %v11985_v8 = vand.u32 4294901760, %v3159_v30  ;;  %18413 = vst [vmem:[#allocation21_spill] sm:$0xff] %v12004_v23  ;;  %v18415_v37 = vld [vmem:[#allocation100_spill] sm:$0xff] }
 0x475   :  { %4528 = vmatpush2.msra.mxu0 %v18393_v5  ;;  %4769 = vmatpush2.msra.mxu1 %v18394_v19  ;;  %18414 = vst [vmem:[#allocation26_spill] sm:$0xff] %v12006_v14  ;;  %v18416_v24 = vand.u32 4294901760, %v18415_v37  ;;  %v18417_v5 = vld [vmem:[#allocation109_spill] sm:$0xff]  ;;  %v12012_v19 = vsub.f32 %v3162_v45, %v11976_v9  ;;  %v12028_v45 = vand.u32 4294901760, %v3150_v42  ;;  %18426 = vst [vmem:[#allocation25_spill] sm:$0xff] %v12038_v40  ;;  %v3139_v11 = vld [vmem:[#allocation10 + $0xf8] sm:$0xff] }
 0x476   :  { %4532 = vmatprep.subr.mxu0 %v18395_v57  ;;  %4771 = vmatprep.subr.mxu1 %v18396_v53  ;;  %18406 = vst [vmem:[#allocation124_spill] sm:$0xff] %v11985_v8  ;;  %v12014_v57 = vand.u32 4294901760, %v3151_v59  ;;  %v3146_v53 = vld [vmem:[#allocation10 + $0x130] sm:$0xff]  ;;  %v12026_v2 = vsub.f32 %v3159_v30, %v11985_v8  ;;  %v18428_v30 = vld [vmem:[#allocation106_spill] sm:$0xff] }
 0x477   :  { %4536 = vmatpush2.msra.mxu0 %v18399_v41  ;;  %4773 = vmatpush2.msra.mxu1 %v18400_v22  ;;  %18418 = vst [vmem:[#allocation29_spill] sm:$0xff] %v12012_v19  ;;  %v17182_v22 = vand.u32 4294901760, %v11983_v44  ;;  %18423 = vst [vmem:[#allocation24_spill] sm:$0xff] %v12028_v45  ;;  %v18429_v37 = vand.u32 4294901760, %v18428_v30 }
 0x478   :  { %4540 = vmatprep.subr.mxu0 %v18403_v7  ;;  %4775 = vmatprep.subr.mxu1 %v18404_v3  ;;  %18419 = vst [vmem:[#allocation23_spill] sm:$0xff] %v12014_v57  ;;  %18422 = vst [vmem:[#allocation31_spill] sm:$0xff] %v12026_v2  ;;  %v3143_v7 = vld [vmem:[#allocation10 + $0x118] sm:$0xff]  ;;  %v3142_v3 = vld [vmem:[#allocation10 + $0x110] sm:$0xff] }
 0x479   :  { %4544 = vmatpush2.msra.mxu0 %v18407_v38  ;;  %4777 = vmatpush2.msra.mxu1 %v18408_v29  ;;  %v18424_v38 = vand.u32 4294901760, %v18258_v43  ;;  %v12035_v29 = vsub.f32 %v3158_v62, %v11995_v50  ;;  %v12048_v43 = vsub.f32 %v11969_v31, %v17179_v35  ;;  %v12052_v62 = vsub.f32 %v3154_v1, %v12006_v14  ;;  %v3110_v31 = vld [vmem:[#allocation10 + $0x10] sm:$0xff] }
 0x47a   :  { %4548 = vmatprep.subr.mxu0 %v18412_v13  ;;  %4779 = vmatprep.subr.mxu1 %v11250_v58  ;;  %v18420_v58 = vld [vmem:[#allocation101_spill] sm:$0xff]  ;;  %v12040_v13 = vand.u32 4294901760, %v3147_v26  ;;  %v12063_v30 = vand.u32 4294901760, %v3143_v7  ;;  %v18438_v1 = vand.u32 4294901760, %v18263_v27  ;;  %v5086_v35 = vand.u32 4294901760, %v12022_v25  ;;  %v18451_v27 = vld [vmem:[#allocation123_spill] sm:$0xff] }
 0x47b   :  { %4552 = vmatpush2.msra.mxu0 %v18416_v24  ;;  %4781 = vmatpush2.msra.mxu1 %v18417_v5  ;;  %v18421_v41 = vand.u32 4294901760, %v18420_v58  ;;  %18425 = vst [vmem:[#allocation32_spill] sm:$0xff] %v12035_v29  ;;  %v18430_v24 = vld [vmem:[#allocation113_spill] sm:$0xff]  ;;  %18431 = vst [vmem:[#allocation27_spill] sm:$0xff] %v12052_v62  ;;  %v18433_v5 = vand.u32 4294901760, %v18262_v39  ;;  %v18434_v58 = vld [vmem:[#allocation115_spill] sm:$0xff]  ;;  %v12074_v39 = vsub.f32 %v11983_v44, %v17182_v22 }
 0x47c   :  { %4783 = vmatprep.subr.mxu1 %v11274_v20  ;;  %v5080_v20 = vand.u32 4294901760, %v11993_v16  ;;  %18427 = vst [vmem:[#allocation34_spill] sm:$0xff] %v12040_v13  ;;  %v12054_v16 = vand.u32 4294901760, %v3146_v53  ;;  %18436 = vst [vmem:[#allocation37_spill] sm:$0xff] %v12063_v30  ;;  %v12086_v25 = vsub.f32 %v3147_v26, %v12040_v13  ;;  %v3138_v22 = vld [vmem:[#allocation10 + $0xf0] sm:$0xff] }
 0x47d   :  { %4556 = vmatprep.subr.mxu0 %v18421_v41  ;;  %4785 = vmatpush2.msra.mxu1 %v11282_v46  ;;  %v17183_v46 = vand.u32 4294901760, %v12004_v23  ;;  %v18446_v41 = vld [vmem:[#allocation112_spill] sm:$0xff] }
 0x47e   :  { %4560 = vmatpush2.msra.mxu0 %v18424_v38  ;;  %4787 = vmatprep.subr.mxu1 %v18430_v24  ;;  %18432 = vst [vmem:[#allocation36_spill] sm:$0xff] %v12054_v16  ;;  %v12061_v38 = vsub.f32 %v3151_v59, %v12014_v57  ;;  %v18439_v24 = vld [vmem:[#allocation117_spill] sm:$0xff]  ;;  %v12078_v59 = vsub.f32 %v3150_v42, %v12028_v45  ;;  %18444 = vst [vmem:[#allocation33_spill] sm:$0xff] %v12086_v25 }
 0x47f   :  { %4564 = vmatprep.subr.mxu0 %v18429_v37  ;;  %4789 = vmatpush2.msra.mxu1 %v18434_v58  ;;  %v12065_v37 = vand.u32 4294901760, %v3142_v3  ;;  %v18441_v58 = vld [vmem:[#allocation111_spill] sm:$0xff]  ;;  %v18448_v42 = vld [vmem:[#allocation121_spill] sm:$0xff]  ;;  %v12101_v26 = vsub.f32 %v3146_v53, %v12054_v16  ;;  %v3135_v53 = vld [vmem:[#allocation10 + $0xd8] sm:$0xff] }
 0x480   :  { %4568 = vmatpush2.msra.mxu0 %v18433_v5  ;;  %18435 = vst [vmem:[#allocation28_spill] sm:$0xff] %v12061_v38  ;;  %4791 = vmatprep.subr.mxu1 %v18439_v24  ;;  %18440 = vst [vmem:[#allocation38_spill] sm:$0xff] %v12078_v59  ;;  %v18442_v34 = vand.u32 4294901760, %v18441_v58  ;;  %v12088_v24 = vand.u32 4294901760, %v3139_v11  ;;  %v18447_v5 = vand.u32 4294901760, %v18446_v41  ;;  %v5092_v58 = vand.u32 4294901760, %v12048_v43 }
 0x481   :  { %18437 = vst [vmem:[#allocation30_spill] sm:$0xff] %v12065_v37  ;;  %4572 = vmatprep.subr.mxu0 %v18438_v1  ;;  %4793 = vmatpush2.msra.mxu1 %v18443_v33  ;;  %v12097_v33 = vsub.f32 %v12004_v23, %v17183_v46  ;;  %18449 = vst [vmem:[#allocation35_spill] sm:$0xff] %v12101_v26  ;;  %v18450_v1 = vand.u32 4294901760, %v18269_v4  ;;  %v18452_v41 = vand.u32 4294901760, %v12012_v19  ;;  %v18457_v4 = vld [vmem:[#allocation125_spill] sm:$0xff]  ;;  %v12157_v60 = vand.u32 4294901760, %v3135_v53 }
 0x482   :  { %4576 = vmatpush2.msra.mxu0 %v18442_v34  ;;  %18445 = vst [vmem:[#allocation42_spill] sm:$0xff] %v12088_v24  ;;  %4795 = vmatprep.subr.mxu1 %v18448_v42  ;;  %v12113_v42 = vsub.f32 %v3143_v7, %v12063_v30  ;;  %v12116_v46 = vsub.f32 %v3142_v3, %v12065_v37  ;;  %v18455_v34 = vld [vmem:[#allocation116_spill] sm:$0xff]  ;;  %v12128_v7 = vand.u32 4294901760, %v3138_v22  ;;  %v18461_v3 = vand.u32 4294901760, %v18460_v49 }
 0x483   :  { %4580 = vmatprep.subr.mxu0 %v18447_v5  ;;  %4797 = vmatpush2.msra.mxu1 %v18451_v27  ;;  %v12109_v5 = vsub.f32 %v12012_v19, %v18452_v41  ;;  %v18456_v0 = vand.u32 4294901760, %v18455_v34  ;;  %v5098_v27 = vand.u32 4294901760, %v12074_v39  ;;  %v18464_v39 = vand.u32 4294901760, %v12038_v40  ;;  %18469 = vst [vmem:[#allocation50_spill] sm:$0xff] %v12157_v60  ;;  %v3114_v19 = vld [vmem:[#allocation10 + $0x30] sm:$0xff] }
 0x484   :  { %4584 = vmatpush2.msra.mxu0 %v18450_v1  ;;  %18453 = vst [vmem:[#allocation46_spill] sm:$0xff] %v12113_v42  ;;  %18454 = vst [vmem:[#allocation39_spill] sm:$0xff] %v12116_v46  ;;  %4799 = vmatprep.subr.mxu1 %v18457_v4  ;;  %v18458_v1 = vand.u32 4294901760, %v12026_v2  ;;  %v12145_v43 = vsub.f32 %v3139_v11, %v12088_v24  ;;  %v18466_v49 = vand.u32 4294901760, %v18274_v36  ;;  %v18470_v11 = vand.u32 4294901760, %v18277_v17 }
 0x485   :  { %4588 = vmatprep.subr.mxu0 %v18456_v0  ;;  %18459 = vst [vmem:[#allocation49_spill] sm:$0xff] %v12128_v7  ;;  %4801 = vmatpush2.msra.mxu1 %v18462_v32  ;;  %v18463_v0 = vand.u32 4294901760, %v12035_v29  ;;  %v12141_v4 = vsub.f32 %v12038_v40, %v18464_v39  ;;  %v18467_v32 = vld [vmem:[#allocation135_spill] sm:$0xff]  ;;  %v5110_v36 = vand.u32 4294901760, %v12109_v5  ;;  %v18473_v17 = vand.u32 4294901760, %v12078_v59 }
 0x486   :  { %v12125_v41 = vsub.f32 %v12026_v2, %v18458_v1  ;;  %4592 = vmatpush2.msra.mxu0 %v18461_v3  ;;  %18465 = vst [vmem:[#allocation40_spill] sm:$0xff] %v12145_v43  ;;  %4805 = vmatmul.mubr.f32.vlgmr.msra.gmra.mxu1 %v18467_v32  ;;  %v5104_v3 = vand.u32 4294901760, %v12097_v33  ;;  %v12177_v5 = vsub.f32 %v3138_v22, %v12128_v7  ;;  %v3130_v39 = vld [vmem:[#allocation10 + $0xb0] sm:$0xff]  ;;  %v18476_v33 = vand.u32 4294901760, %v18279_v55  ;;  %v3127_v22 = vld [vmem:[#allocation10 + $0x98] sm:$0xff] }
 0x487   :  { %v12136_v34 = vsub.f32 %v12035_v29, %v18463_v0  ;;  %4596 = vmatprep.subr.mxu0 %v18466_v49  ;;  %v18468_v0 = vand.u32 4294901760, %v12052_v62  ;;  %5081 = vmatprep.subr.mxu1 %v5080_v20  ;;  %v18471_v49 = vand.u32 4294901760, %v12061_v38  ;;  %v18493_v2 = vld [vmem:[#allocation151_spill] sm:$0xff] }
 0x488   :  { %4600 = vmatpush2.msra.mxu0 %v18470_v11  ;;  %4811 = vmatprep.mubr.f32.mxu1 %v18472_v47  ;;  %v5116_v20 = vand.u32 4294901760, %v12125_v41  ;;  %v12174_v11 = vsub.f32 %v12078_v59, %v18473_v17  ;;  %18474 = vst [vmem:[#allocation41_spill] sm:$0xff] %v12177_v5  ;;  %v18477_v41 = vand.u32 4294901760, %v12086_v25  ;;  %v18479_v59 = vand.u32 4294901760, %v18478_v28  ;;  %v18483_v17 = vld [vmem:[#allocation128_spill] sm:$0xff] }
 0x489   :  { %v12154_v63 = vsub.f32 %v12052_v62, %v18468_v0  ;;  %v12165_v1 = vsub.f32 %v12061_v38, %v18471_v49  ;;  %5087 = vmatpush1.msra.mxu1 %v5086_v35  ;;  %v12179_v49 = vand.u32 4294901760, %v3134_v6  ;;  %4604 = vmatprep.subr.mxu0 %v18476_v33  ;;  %v5122_v0 = vand.u32 4294901760, %v12136_v34  ;;  %v18485_v28 = vld [vmem:[#allocation140_spill] sm:$0xff]  ;;  %v3122_v62 = vld [vmem:[#allocation10 + $0x70] sm:$0xff] }
 0x48a   :  { %5093 = vmatprep.subr.mxu1 %v5092_v58  ;;  %v5128_v35 = vand.u32 4294901760, %v12141_v4  ;;  %v12188_v52 = vsub.f32 %v12086_v25, %v18477_v41  ;;  %4608 = vmatpush2.msra.mxu0 %v18479_v59  ;;  %v18480_v58 = vand.u32 4294901760, %v12101_v26  ;;  %v12200_v4 = vsub.f32 %v3135_v53, %v12157_v60  ;;  %v3126_v41 = vld [vmem:[#allocation10 + $0x90] sm:$0xff]  ;;  %v3123_v25 = vld [vmem:[#allocation10 + $0x78] sm:$0xff] }
 0x48b   :  { %18475 = vst [vmem:[#allocation51_spill] sm:$0xff] %v12179_v49  ;;  %5099 = vmatpush1.msra.mxu1 %v5098_v27  ;;  %v5134_v55 = vand.u32 4294901760, %v12154_v63  ;;  %v12202_v33 = vand.u32 4294901760, %v3131_v21  ;;  %v18484_v38 = vand.u32 4294901760, %v18483_v17  ;;  %v5140_v59 = vand.u32 4294901760, %v12165_v1  ;;  %v18489_v17 = vld [vmem:[#allocation129_spill] sm:$0xff] }
 0x48c   :  { %v12197_v34 = vsub.f32 %v12101_v26, %v18480_v58  ;;  %18481 = vst [vmem:[#allocation43_spill] sm:$0xff] %v12200_v4  ;;  %4813 = vmatmul.mubr.f32.gmra.mxu1 %v18485_v28  ;;  %v18486_v63 = vand.u32 4294901760, %v12113_v42  ;;  %v18487_v58 = vand.u32 4294901760, %v12116_v46  ;;  %v12218_v26 = vand.u32 4294901760, %v3130_v39  ;;  %5105 = vmatprep.subr.mxu1 %v5104_v3  ;;  %v3118_v1 = vld [vmem:[#allocation10 + $0x50] sm:$0xff] }
 0x48d   :  { %18482 = vst [vmem:[#allocation52_spill] sm:$0xff] %v12202_v33  ;;  %4612 = vmatprep.subr.mxu0 %v18484_v38  ;;  %v18490_v38 = vand.u32 4294901760, %v18489_v17  ;;  %v5146_v40 = vand.u32 4294901760, %v12174_v11  ;;  %v12225_v29 = vsub.f32 %v3134_v6, %v12179_v49  ;;  %4819 = vmatprep.mubr.f32.mxu1 %v18493_v2  ;;  %v18494_v3 = vand.u32 4294901760, %v12145_v43  ;;  %v18497_v6 = vld [vmem:[#allocation130_spill] sm:$0xff] }
 0x48e   :  { %v12211_v27 = vsub.f32 %v12113_v42, %v18486_v63  ;;  %v12216_v53 = vsub.f32 %v12116_v46, %v18487_v58  ;;  %18488 = vst [vmem:[#allocation44_spill] sm:$0xff] %v12218_v26  ;;  %v12227_v63 = vand.u32 4294901760, %v3127_v22  ;;  %v3119_v42 = vld [vmem:[#allocation10 + $0x58] sm:$0xff]  ;;  %5111 = vmatpush1.msra.mxu1 %v5110_v36  ;;  %v12238_v11 = vand.u32 4294901760, %v3123_v25 }
 0x48f   :  { %4616 = vmatpush2.msra.mxu0 %v18490_v38  ;;  %18491 = vst [vmem:[#allocation53_spill] sm:$0xff] %v12225_v29  ;;  %v12234_v17 = vsub.f32 %v12145_v43, %v18494_v3  ;;  %v12236_v38 = vand.u32 4294901760, %v3126_v41  ;;  %v18498_v46 = vand.u32 4294901760, %v18497_v6  ;;  %5117 = vmatprep.subr.mxu1 %v5116_v20  ;;  %v12245_v58 = vsub.f32 %v3131_v21, %v12202_v33  ;;  %v3115_v3 = vld [vmem:[#allocation10 + $0x38] sm:$0xff]  ;;  %v18501_v43 = vld [vmem:[#allocation131_spill] sm:$0xff]  ;;  %v18505_v21 = vld [vmem:[#allocation150_spill] sm:$0xff] }
 0x490   :  { %18492 = vst [vmem:[#allocation45_spill] sm:$0xff] %v12227_v63  ;;  %18496 = vst [vmem:[#allocation47_spill] sm:$0xff] %v12238_v11  ;;  %v12247_v23 = vand.u32 4294901760, %v3122_v62  ;;  %v18502_v44 = vand.u32 4294901760, %v18501_v43  ;;  %5123 = vmatpush1.msra.mxu1 %v5122_v0  ;;  %v12256_v20 = vand.u32 4294901760, %v3119_v42  ;;  %v18506_v36 = vand.u32 4294901760, %v12177_v5 }
 0x491   :  { %18495 = vst [vmem:[#allocation54_spill] sm:$0xff] %v12236_v38  ;;  %4620 = vmatprep.subr.mxu0 %v18498_v46  ;;  %18499 = vst [vmem:[#allocation58_spill] sm:$0xff] %v12245_v58  ;;  %v12254_v46 = vsub.f32 %v3130_v39, %v12218_v26  ;;  %4821 = vmatmul.mubr.f32.gmra.mxu1 %v18505_v21  ;;  %v12267_v0 = vsub.f32 %v3127_v22, %v12227_v63  ;;  %v12269_v6 = vand.u32 4294901760, %v3118_v1  ;;  %v3111_v39 = vld [vmem:[#allocation10 + $0x18] sm:$0xff]  ;;  %v18512_v22 = vld [vmem:[#allocation155_spill] sm:$0xff] }
 0x492   :  { %18500 = vst [vmem:[#allocation48_spill] sm:$0xff] %v12247_v23  ;;  %4624 = vmatpush2.msra.mxu0 %v18502_v44  ;;  %18504 = vst [vmem:[#allocation55_spill] sm:$0xff] %v12256_v20  ;;  %v12263_v43 = vsub.f32 %v12177_v5, %v18506_v36  ;;  %5129 = vmatprep.subr.mxu1 %v5128_v35  ;;  %v12274_v54 = vsub.f32 %v3126_v41, %v12236_v38  ;;  %v12279_v5 = vand.u32 4294901760, %v3115_v3 }
 0x493   :  { %18503 = vst [vmem:[#allocation61_spill] sm:$0xff] %v12254_v46  ;;  %4628 = vmatmul.mubr.f32.vlgmr.msra.gmra.mxu0 %v18467_v32  ;;  %18507 = vst [vmem:[#allocation63_spill] sm:$0xff] %v12267_v0  ;;  %4852 = vmatprep.subr.mxu0 %v11926_v15  ;;  %v12277_v36 = vsub.f32 %v3123_v25, %v12238_v11  ;;  %v18513_v44 = vand.u32 4294901760, %v12200_v4  ;;  %v12290_v48 = vsub.f32 %v3122_v62, %v12247_v23  ;;  %v3235_v25 = vld [vmem:[#allocation10 + $0x3f8] sm:$0xff] }
 0x494   :  { %18508 = vst [vmem:[#allocation56_spill] sm:$0xff] %v12269_v6  ;;  %18509 = vst [vmem:[#allocation64_spill] sm:$0xff] %v12274_v54  ;;  %4634 = vmatprep.mubr.f32.mxu0 %v18472_v47  ;;  %4827 = vmatprep.mubr.f32.mxu1 %v18512_v22  ;;  %v12292_v41 = vand.u32 4294901760, %v3114_v19  ;;  %v12297_v15 = vsub.f32 %v3119_v42, %v12256_v20  ;;  %v12299_v11 = vand.u32 4294901760, %v3111_v39  ;;  %v18519_v35 = vand.u32 4294901760, %v12225_v29 }
 0x495   :  { %18510 = vst [vmem:[#allocation57_spill] sm:$0xff] %v12277_v36  ;;  %18511 = vst [vmem:[#allocation66_spill] sm:$0xff] %v12279_v5  ;;  %v12286_v32 = vsub.f32 %v12200_v4, %v18513_v44  ;;  %4854 = vmatpush1.msra.mxu0 %v11937_v56  ;;  %5135 = vmatpush1.msra.mxu1 %v5134_v55  ;;  %v12301_v44 = vand.u32 4294901760, %v3110_v31  ;;  %v12312_v47 = vsub.f32 %v3118_v1, %v12269_v6  ;;  %v3234_v56 = vld [vmem:[#allocation10 + $0x3f0] sm:$0xff] }
 0x496   :  { %18514 = vst [vmem:[#allocation59_spill] sm:$0xff] %v12290_v48  ;;  %18515 = vst [vmem:[#allocation68_spill] sm:$0xff] %v12292_v41  ;;  %4856 = vmatprep.subr.mxu0 %v11948_v12  ;;  %5141 = vmatprep.subr.mxu1 %v5140_v59  ;;  %v12308_v4 = vsub.f32 %v12225_v29, %v18519_v35  ;;  %v12318_v59 = vsub.f32 %v3115_v3, %v12279_v5  ;;  %v12320_v62 = vand.u32 4294901760, %v3235_v25  ;;  %v18523_v35 = vld [vmem:[#allocation154_spill] sm:$0xff] }
 0x497   :  { %18516 = vst [vmem:[#allocation60_spill] sm:$0xff] %v12297_v15  ;;  %18517 = vst [vmem:[#allocation70_spill] sm:$0xff] %v12299_v11  ;;  %4858 = vmatpush1.msra.mxu0 %v11959_v18  ;;  %5147 = vmatpush1.msra.mxu1 %v5146_v40  ;;  %v18524_v55 = vand.u32 4294901760, %v12245_v58  ;;  %v12332_v12 = vsub.f32 %v3114_v19, %v12292_v41  ;;  %v18526_v3 = vand.u32 4294901760, %v12188_v52  ;;  %v18527_v29 = vand.u32 4294901760, %v12254_v46  ;;  %v3231_v19 = vld [vmem:[#allocation10 + $0x3d8] sm:$0xff] }
 0x498   :  { %18518 = vst [vmem:[#allocation62_spill] sm:$0xff] %v12301_v44  ;;  %18520 = vst [vmem:[#allocation72_spill] sm:$0xff] %v12312_v47  ;;  %4636 = vmatmul.mubr.f32.gmra.mxu0 %v18485_v28  ;;  %4829 = vmatmul.mubr.f32.gmra.mxu1 %v18523_v35  ;;  %v12347_v42 = vsub.f32 %v3110_v31, %v12301_v44  ;;  %v5194_v52 = vand.u32 4294901760, %v12308_v4  ;;  %v18533_v31 = vand.u32 4294901760, %v12197_v34  ;;  %v18535_v4 = vand.u32 4294901760, %v12277_v36  ;;  %v3218_v18 = vld [vmem:[#allocation10 + $0x370] sm:$0xff] }
 0x499   :  { %18521 = vst [vmem:[#allocation65_spill] sm:$0xff] %v12318_v59  ;;  %18522 = vst [vmem:[#allocation69_spill] sm:$0xff] %v12320_v62  ;;  %v12328_v40 = vsub.f32 %v12245_v58, %v18524_v55  ;;  %4860 = vmatprep.subr.mxu0 %v11971_v10  ;;  %5153 = vmatprep.subr.mxu1 %v18526_v3  ;;  %v12340_v28 = vsub.f32 %v12254_v46, %v18527_v29  ;;  %v18530_v58 = vld [vmem:[#allocation82_spill] sm:$0xff]  ;;  %v18531_v3 = vand.u32 4294901760, %v12267_v0 }
 0x49a   :  { %18525 = vst [vmem:[#allocation80_spill] sm:$0xff] %v12332_v12  ;;  %v12344_v55 = vsub.f32 %v3111_v39, %v12299_v11  ;;  %18529 = vst [vmem:[#allocation93_spill] sm:$0xff] %v12347_v42  ;;  %4642 = vmatprep.mubr.f32.mxu0 %v18493_v2  ;;  %4835 = vmatprep.mubr.f32.mxu1 %v18530_v58  ;;  %v12358_v46 = vand.u32 4294901760, %v3234_v56  ;;  %v18534_v39 = vand.u32 4294901760, %v12274_v54  ;;  %v18537_v34 = vand.u32 4294901760, %v12211_v27 }
 0x49b   :  { %v12355_v29 = vsub.f32 %v12267_v0, %v18531_v3  ;;  %4862 = vmatpush1.msra.mxu0 %v11976_v9  ;;  %5159 = vmatpush1.msra.mxu1 %v18533_v31  ;;  %v12371_v10 = vsub.f32 %v12277_v36, %v18535_v4  ;;  %v12375_v1 = vsub.f32 %v3235_v25, %v12320_v62  ;;  %v3230_v0 = vld [vmem:[#allocation10 + $0x3d0] sm:$0xff]  ;;  %v5200_v31 = vand.u32 4294901760, %v12328_v40  ;;  %v18542_v4 = vld [vmem:[#allocation73_spill] sm:$0xff] }
 0x49c   :  { %18528 = vst [vmem:[#allocation71_spill] sm:$0xff] %v12344_v55  ;;  %18532 = vst [vmem:[#allocation90_spill] sm:$0xff] %v12358_v46  ;;  %v12366_v2 = vsub.f32 %v12274_v54, %v18534_v39  ;;  %4864 = vmatprep.subr.mxu0 %v11985_v8  ;;  %5165 = vmatprep.subr.mxu1 %v18537_v34  ;;  %v18538_v39 = vand.u32 4294901760, %v12290_v48  ;;  %v12387_v36 = vand.u32 4294901760, %v3231_v19  ;;  %v18540_v25 = vand.u32 4294901760, %v12216_v53  ;;  %v3226_v34 = vld [vmem:[#allocation10 + $0x3b0] sm:$0xff] }
 0x49d   :  { %18536 = vst [vmem:[#allocation96_spill] sm:$0xff] %v12375_v1  ;;  %4866 = vmatpush1.msra.mxu0 %v11995_v50  ;;  %v18541_v27 = vand.u32 4294901760, %v12297_v15  ;;  %4837 = vmatmul.mubr.f32.gmra.mxu1 %v18542_v4  ;;  %v18543_v53 = vand.u32 4294901760, %v12312_v47  ;;  %v12409_v3 = vsub.f32 %v3234_v56, %v12358_v46  ;;  %v18548_v8 = vld [vmem:[#allocation84_spill] sm:$0xff]  ;;  %v18552_v56 = vand.u32 4294901760, %v12263_v43 }
 0x49e   :  { %v12384_v54 = vsub.f32 %v12290_v48, %v18538_v39  ;;  %18539 = vst [vmem:[#allocation99_spill] sm:$0xff] %v12387_v36  ;;  %5171 = vmatpush1.msra.mxu1 %v18540_v25  ;;  %v3227_v48 = vld [vmem:[#allocation10 + $0x3b8] sm:$0xff]  ;;  %4644 = vmatmul.mubr.f32.gmra.mxu0 %v18505_v21  ;;  %v18546_v39 = vand.u32 4294901760, %v12234_v17  ;;  %v18547_v21 = vand.u32 4294901760, %v12318_v59  ;;  %v18549_v17 = vand.u32 4294901760, %v12332_v12 }
 0x49f   :  { %v12396_v40 = vsub.f32 %v12297_v15, %v18541_v27  ;;  %v12406_v25 = vsub.f32 %v12312_v47, %v18543_v53  ;;  %18544 = vst [vmem:[#allocation102_spill] sm:$0xff] %v12409_v3  ;;  %v12411_v27 = vand.u32 4294901760, %v3230_v0  ;;  %4868 = vmatprep.subr.mxu0 %v11997_v61  ;;  %v3223_v47 = vld [vmem:[#allocation10 + $0x398] sm:$0xff]  ;;  %4650 = vmatprep.mubr.f32.mxu0 %v18512_v22  ;;  %v12435_v15 = vand.u32 4294901760, %v3227_v48  ;;  %v3214_v22 = vld [vmem:[#allocation10 + $0x350] sm:$0xff] }
 0x4a0   :  { %5177 = vmatprep.subr.mxu1 %v18546_v39  ;;  %v12421_v53 = vsub.f32 %v12318_v59, %v18547_v21  ;;  %4843 = vmatprep.mubr.f32.mxu1 %v18548_v8  ;;  %v12430_v39 = vsub.f32 %v12332_v12, %v18549_v17  ;;  %v12433_v50 = vsub.f32 %v3231_v19, %v12387_v36  ;;  %v3222_v21 = vld [vmem:[#allocation10 + $0x390] sm:$0xff]  ;;  %v3219_v59 = vld [vmem:[#allocation10 + $0x378] sm:$0xff]  ;;  %v18553_v61 = vand.u32 4294901760, %v12344_v55 }
 0x4a1   :  { %18545 = vst [vmem:[#allocation104_spill] sm:$0xff] %v12411_v27  ;;  %18551 = vst [vmem:[#allocation105_spill] sm:$0xff] %v12435_v15  ;;  %4870 = vmatpush1.msra.mxu0 %v12006_v14  ;;  %5183 = vmatpush1.msra.mxu1 %v18552_v56  ;;  %v18554_v17 = vand.u32 4294901760, %v12347_v42  ;;  %v12451_v12 = vand.u32 4294901760, %v3226_v34  ;;  %v18556_v43 = vand.u32 4294901760, %v12286_v32  ;;  %v3215_v14 = vld [vmem:[#allocation10 + $0x358] sm:$0xff] }
 0x4a2   :  { %18550 = vst [vmem:[#allocation95_spill] sm:$0xff] %v12433_v50  ;;  %v12444_v9 = vsub.f32 %v12344_v55, %v18553_v61  ;;  %4872 = vmatprep.subr.mxu0 %v12014_v57  ;;  %v12459_v61 = vsub.f32 %v3230_v0, %v12411_v27  ;;  %v12461_v55 = vand.u32 4294901760, %v3223_v47  ;;  %v12472_v56 = vand.u32 4294901760, %v3219_v59  ;;  %4652 = vmatmul.mubr.f32.gmra.mxu0 %v18523_v35  ;;  %v18561_v0 = vld [vmem:[#allocation79_spill] sm:$0xff] }
 0x4a3   :  { %v12449_v19 = vsub.f32 %v12347_v42, %v18554_v17  ;;  %18555 = vst [vmem:[#allocation107_spill] sm:$0xff] %v12451_v12  ;;  %5189 = vmatprep.subr.mxu1 %v18556_v43  ;;  %4874 = vmatpush1.msra.mxu0 %v12028_v45  ;;  %v18559_v42 = vand.u32 4294901760, %v12375_v1  ;;  %v12470_v43 = vand.u32 4294901760, %v3222_v21  ;;  %v12479_v17 = vsub.f32 %v3227_v48, %v12435_v15  ;;  %v3210_v57 = vld [vmem:[#allocation10 + $0x330] sm:$0xff] }
 0x4a4   :  { %18557 = vst [vmem:[#allocation98_spill] sm:$0xff] %v12459_v61  ;;  %18558 = vst [vmem:[#allocation100_spill] sm:$0xff] %v12461_v55  ;;  %5195 = vmatpush1.msra.mxu1 %v5194_v52  ;;  %v12481_v45 = vand.u32 4294901760, %v3218_v18  ;;  %4876 = vmatprep.subr.mxu0 %v12040_v13  ;;  %v12487_v35 = vsub.f32 %v3226_v34, %v12451_v12  ;;  %v12489_v36 = vand.u32 4294901760, %v3215_v14  ;;  %v18564_v48 = vand.u32 4294901760, %v12409_v3  ;;  %v3207_v34 = vld [vmem:[#allocation10 + $0x318] sm:$0xff] }
 0x4a5   :  { %v12468_v32 = vsub.f32 %v12375_v1, %v18559_v42  ;;  %18560 = vst [vmem:[#allocation109_spill] sm:$0xff] %v12470_v43  ;;  %4845 = vmatmul.mubr.f32.gmra.mxu1 %v18561_v0  ;;  %18562 = vst [vmem:[#allocation101_spill] sm:$0xff] %v12479_v17  ;;  %v3211_v42 = vld [vmem:[#allocation10 + $0x338] sm:$0xff]  ;;  %5201 = vmatprep.subr.mxu1 %v5200_v31  ;;  %v12500_v1 = vsub.f32 %v3223_v47, %v12461_v55  ;;  %v12502_v27 = vand.u32 4294901760, %v3214_v22  ;;  %v3206_v13 = vld [vmem:[#allocation10 + $0x310] sm:$0xff] }
 0x4a6   :  { %18563 = vst [vmem:[#allocation106_spill] sm:$0xff] %v12487_v35  ;;  %4658 = vmatprep.mubr.f32.mxu0 %v18530_v58  ;;  %4878 = vmatpush1.msra.mxu0 %v12054_v16  ;;  %v12496_v52 = vsub.f32 %v12409_v3, %v18564_v48  ;;  %v18566_v12 = vand.u32 4294901760, %v12340_v28  ;;  %v12509_v58 = vsub.f32 %v3222_v21, %v12470_v43  ;;  %v12514_v31 = vand.u32 4294901760, %v3211_v42 }
 0x4a7   :  { %18565 = vst [vmem:[#allocation113_spill] sm:$0xff] %v12500_v1  ;;  %5461 = vmatprep.mubr.f32.mxu1 %v18338_v51  ;;  %v12512_v48 = vsub.f32 %v3219_v59, %v12472_v56  ;;  %4880 = vmatprep.subr.mxu0 %v12063_v30  ;;  %v18570_v47 = vand.u32 4294901760, %v12355_v29  ;;  %v18571_v28 = vand.u32 4294901760, %v12433_v50  ;;  %v12526_v21 = vsub.f32 %v3218_v18, %v12481_v45  ;;  %v3203_v59 = vld [vmem:[#allocation10 + $0x2f8] sm:$0xff] }
 0x4a8   :  { %5207 = vmatpush1.msra.mxu1 %v18566_v12  ;;  %18567 = vst [vmem:[#allocation115_spill] sm:$0xff] %v12509_v58  ;;  %18569 = vst [vmem:[#allocation111_spill] sm:$0xff] %v12514_v31  ;;  %v12528_v51 = vand.u32 4294901760, %v3210_v57  ;;  %4882 = vmatpush1.msra.mxu0 %v12065_v37  ;;  %v18574_v3 = vand.u32 4294901760, %v12366_v2  ;;  %v18576_v16 = vand.u32 4294901760, %v12459_v61  ;;  %v18578_v29 = vand.u32 4294901760, %v12371_v10 }
 0x4a9   :  { %18568 = vst [vmem:[#allocation117_spill] sm:$0xff] %v12512_v48  ;;  %5213 = vmatprep.subr.mxu1 %v18570_v47  ;;  %v12522_v12 = vsub.f32 %v12433_v50, %v18571_v28  ;;  %18572 = vst [vmem:[#allocation119_spill] sm:$0xff] %v12526_v21  ;;  %v12535_v47 = vsub.f32 %v3215_v14, %v12489_v36  ;;  %v12537_v28 = vand.u32 4294901760, %v3207_v34  ;;  %v12539_v50 = vand.u32 4294901760, %v3206_v13 }
 0x4aa   :  { %18573 = vst [vmem:[#allocation112_spill] sm:$0xff] %v12528_v51  ;;  %5219 = vmatpush1.msra.mxu1 %v18574_v3  ;;  %4660 = vmatmul.mubr.f32.gmra.mxu0 %v18542_v4  ;;  %v12547_v2 = vsub.f32 %v12459_v61, %v18576_v16  ;;  %v12551_v14 = vsub.f32 %v3214_v22, %v12502_v27  ;;  %v12561_v37 = vand.u32 4294901760, %v3203_v59  ;;  %v3202_v16 = vld [vmem:[#allocation10 + $0x2f0] sm:$0xff]  ;;  %v18580_v22 = vand.u32 4294901760, %v12384_v54 }
 0x4ab   :  { %18575 = vst [vmem:[#allocation121_spill] sm:$0xff] %v12535_v47  ;;  %4884 = vmatprep.subr.mxu0 %v12088_v24  ;;  %5225 = vmatprep.subr.mxu1 %v18578_v29  ;;  %v12559_v18 = vsub.f32 %v3211_v42, %v12514_v31  ;;  %v18581_v29 = vand.u32 4294901760, %v12479_v17  ;;  %v12574_v42 = vsub.f32 %v3210_v57, %v12528_v51  ;;  %v18583_v4 = vand.u32 4294901760, %v12396_v40  ;;  %v3199_v57 = vld [vmem:[#allocation10 + $0x2d8] sm:$0xff] }
 0x4ac   :  { %18577 = vst [vmem:[#allocation123_spill] sm:$0xff] %v12551_v14  ;;  %4666 = vmatprep.mubr.f32.mxu0 %v18548_v8  ;;  %4886 = vmatpush1.msra.mxu0 %v12128_v7  ;;  %v18584_v54 = vand.u32 4294901760, %v12487_v35  ;;  %v12589_v24 = vsub.f32 %v3206_v13, %v12539_v50  ;;  %v18588_v40 = vand.u32 4294901760, %v12500_v1  ;;  %v18590_v13 = vand.u32 4294901760, %v12509_v58 }
 0x4ad   :  { %18579 = vst [vmem:[#allocation116_spill] sm:$0xff] %v12559_v18  ;;  %5231 = vmatpush1.msra.mxu1 %v18580_v22  ;;  %v12570_v3 = vsub.f32 %v12479_v17, %v18581_v29  ;;  %18582 = vst [vmem:[#allocation125_spill] sm:$0xff] %v12574_v42  ;;  %4888 = vmatprep.subr.mxu0 %v12157_v60  ;;  %v12586_v29 = vsub.f32 %v3207_v34, %v12537_v28  ;;  %v18587_v17 = vand.u32 4294901760, %v12406_v25 }
 0x4ae   :  { %5237 = vmatprep.subr.mxu1 %v18583_v4  ;;  %v12582_v22 = vsub.f32 %v12487_v35, %v18584_v54  ;;  %18586 = vst [vmem:[#allocation127_spill] sm:$0xff] %v12589_v24  ;;  %4890 = vmatpush1.msra.mxu0 %v12179_v49  ;;  %v5290_v4 = vand.u32 4294901760, %v12547_v2  ;;  %v12598_v54 = vsub.f32 %v12500_v1, %v18588_v40  ;;  %v12601_v34 = vand.u32 4294901760, %v3202_v16  ;;  %v3198_v1 = vld [vmem:[#allocation10 + $0x2d0] sm:$0xff]  ;;  %v18596_v40 = vld [vmem:[#allocation22_spill] sm:$0xff] }
 0x4af   :  { %18585 = vst [vmem:[#allocation118_spill] sm:$0xff] %v12586_v29  ;;  %5243 = vmatpush1.msra.mxu1 %v18587_v17  ;;  %4668 = vmatmul.mubr.f32.gmra.mxu0 %v18561_v0  ;;  %v12608_v25 = vsub.f32 %v12509_v58, %v18590_v13  ;;  %v18591_v17 = vand.u32 4294901760, %v12512_v48  ;;  %v12617_v10 = vsub.f32 %v3203_v59, %v12561_v37  ;;  %v18593_v35 = vand.u32 4294901760, %v12421_v53  ;;  %v3174_v0 = vld [vmem:[#allocation10 + $0x210] sm:$0xff] }
 0x4b0   :  { %18589 = vst [vmem:[#allocation126_spill] sm:$0xff] %v12601_v34  ;;  %4892 = vmatprep.subr.mxu0 %v12202_v33  ;;  %v5296_v61 = vand.u32 4294901760, %v12570_v3  ;;  %v18594_v13 = vand.u32 4294901760, %v12526_v21  ;;  %4984 = vmatprep.mubr.f32.mxu0 %v18596_v40  ;;  %v18597_v59 = vand.u32 4294901760, %v12430_v39  ;;  %v18598_v53 = vand.u32 4294901760, %v12535_v47 }
 0x4b1   :  { %v12613_v2 = vsub.f32 %v12512_v48, %v18591_v17  ;;  %18592 = vst [vmem:[#allocation128_spill] sm:$0xff] %v12617_v10  ;;  %5249 = vmatprep.subr.mxu1 %v18593_v35  ;;  %4894 = vmatpush1.msra.mxu0 %v12218_v26  ;;  %v12629_v48 = vand.u32 4294901760, %v3199_v57  ;;  %v5302_v35 = vand.u32 4294901760, %v12582_v22  ;;  %v18599_v17 = vand.u32 4294901760, %v12444_v9  ;;  %v3194_v26 = vld [vmem:[#allocation10 + $0x2b0] sm:$0xff] }
 0x4b2   :  { %v12626_v58 = vsub.f32 %v12526_v21, %v18594_v13  ;;  %5255 = vmatpush1.msra.mxu1 %v18597_v59  ;;  %v12638_v3 = vsub.f32 %v12535_v47, %v18598_v53  ;;  %v3195_v21 = vld [vmem:[#allocation10 + $0x2b8] sm:$0xff]  ;;  %4896 = vmatprep.subr.mxu0 %v12227_v63  ;;  %v5308_v39 = vand.u32 4294901760, %v12598_v54  ;;  %v18600_v40 = vand.u32 4294901760, %v12551_v14  ;;  %v18605_v47 = vld [vmem:[#allocation47_spill] sm:$0xff] }
 0x4b3   :  { %18595 = vst [vmem:[#allocation129_spill] sm:$0xff] %v12629_v48  ;;  %5261 = vmatprep.subr.mxu1 %v18599_v17  ;;  %v12652_v59 = vsub.f32 %v3202_v16, %v12601_v34  ;;  %v12654_v53 = vand.u32 4294901760, %v3198_v1  ;;  %4898 = vmatpush1.msra.mxu0 %v12236_v38  ;;  %v18603_v13 = vand.u32 4294901760, %v12449_v19  ;;  %v5314_v9 = vand.u32 4294901760, %v12608_v25  ;;  %v3187_v38 = vld [vmem:[#allocation10 + $0x278] sm:$0xff] }
 0x4b4   :  { %v12649_v22 = vsub.f32 %v12551_v14, %v18600_v40  ;;  %v18604_v17 = vand.u32 4294901760, %v12559_v18  ;;  %v3191_v14 = vld [vmem:[#allocation10 + $0x298] sm:$0xff]  ;;  %4900 = vmatprep.subr.mxu0 %v18605_v47  ;;  %v18606_v63 = vand.u32 4294901760, %v12468_v32  ;;  %v12677_v54 = vsub.f32 %v3199_v57, %v12629_v48 }
 0x4b5   :  { %18601 = vst [vmem:[#allocation130_spill] sm:$0xff] %v12652_v59  ;;  %18602 = vst [vmem:[#allocation131_spill] sm:$0xff] %v12654_v53  ;;  %5267 = vmatpush1.msra.mxu1 %v18603_v13  ;;  %v18607_v13 = vand.u32 4294901760, %v12574_v42  ;;  %v12681_v16 = vld [vmem:[#allocation7 + $0x3] ss:$8 sm:$0xf]  ;;  %4902 = vmatpush1.msra.mxu0 %v12247_v23 }
 0x4b6   :  { %v12664_v40 = vsub.f32 %v12559_v18, %v18604_v17  ;;  %5273 = vmatprep.subr.mxu1 %v18606_v63  ;;  %18608 = vst [vmem:[#allocation22_spill] sm:$0xff] %v12677_v54  ;;  %v12679_v17 = vand.u32 4294901760, %v3195_v21  ;;  %v3190_v18 = vld [vmem:[#allocation10 + $0x290] sm:$0xff]  ;;  %18609 = vst [vmem:[#allocation163_spill] sm:$0xff] %v12681_v16  ;;  %v18610_v32 = vand.u32 4294901760, %v12496_v52  ;;  %v18611_v19 = vand.u32 4294901760, %v12586_v29  ;;  %4904 = vmatprep.subr.mxu0 %v12256_v20 }
 0x4b7   :  { %v12674_v25 = vsub.f32 %v12574_v42, %v18607_v13  ;;  %v18612_v57 = vand.u32 4294901760, %v12589_v24  ;;  %v12697_v47 = vand.u32 4294901760, %v3194_v26  ;;  %v18614_v52 = vand.u32 4294901760, %v12522_v12  ;;  %v3186_v23 = vld [vmem:[#allocation10 + $0x270] sm:$0xff]  ;;  %4906 = vmatpush1.msra.mxu0 %v12269_v6  ;;  %v18618_v63 = vld [vmem:[#allocation133_spill] sm:$0xff] }
 0x4b8   :  { %5279 = vmatpush2.msra.mxu1 %v18610_v32  ;;  %v12690_v13 = vsub.f32 %v12586_v29, %v18611_v19  ;;  %v12705_v19 = vsub.f32 %v3198_v1, %v12654_v53  ;;  %v12707_v29 = vand.u32 4294901760, %v3191_v14  ;;  %v3183_v32 = vld [vmem:[#allocation10 + $0x258] sm:$0xff]  ;;  %v12720_v1 = vrot.slane %v12681_v16, %v18618_v63  ;;  %4908 = vmatprep.subr.mxu0 %v12279_v5 }
 0x4b9   :  { %v12695_v42 = vsub.f32 %v12589_v24, %v18612_v57  ;;  %18613 = vst [vmem:[#allocation164_spill] sm:$0xff] %v12697_v47  ;;  %5285 = vmatprep.subr.mxu1 %v18614_v52  ;;  %v18616_v24 = vand.u32 4294901760, %v12617_v10  ;;  %v12716_v52 = vand.u32 4294901760, %v3190_v18  ;;  %v5350_v6 = vand.u32 4294901760, %v12674_v25  ;;  %4910 = vmatpush1.msra.mxu0 %v12292_v41  ;;  %v3179_v25 = vld [vmem:[#allocation10 + $0x238] sm:$0xff]  ;;  %v3397_v41 = vpop.f32.mrf.mxu0 }
 0x4ba   :  { %18615 = vst [vmem:[#allocation165_spill] sm:$0xff] %v12705_v19  ;;  %5291 = vmatpush2.msra.mxu1 %v5290_v4  ;;  %v12726_v57 = vsub.f32 %v3195_v21, %v12679_v17  ;;  %v12728_v20 = vand.u32 4294901760, %v3187_v38  ;;  %v12734_v16 = vsub.f32 %v3194_v26, %v12697_v47  ;;  %v3870_v4 = vpop.f32.mrf.mxu1  ;;  %4912 = vmatprep.subr.mxu0 %v12299_v11  ;;  %v18622_v21 = vand.u32 4294901760, %v12652_v59  ;;  %v3178_v26 = vld [vmem:[#allocation10 + $0x230] sm:$0xff] }
 0x4bb   :  { %v12714_v12 = vsub.f32 %v12617_v10, %v18616_v24  ;;  %18617 = vst [vmem:[#allocation166_spill] sm:$0xff] %v12716_v52  ;;  %5297 = vmatprep.subr.mxu1 %v5296_v61  ;;  %v3182_v24 = vld [vmem:[#allocation10 + $0x250] sm:$0xff]  ;;  %v5356_v10 = vand.u32 4294901760, %v12690_v13  ;;  %v12736_v61 = vand.u32 4294901760, %v3186_v23  ;;  %v12746_v13 = vsub.f32 %v3191_v14, %v12707_v29  ;;  %4914 = vmatpush1.msra.mxu0 %v12301_v44  ;;  %v12770_v49 = vpop.f32.mrf.mxu0 }
 0x4bc   :  { %18619 = vst [vmem:[#allocation167_spill] sm:$0xff] %v12728_v20  ;;  %5303 = vmatpush2.msra.mxu1 %v5302_v35  ;;  %18620 = vst [vmem:[#allocation168_spill] sm:$0xff] %v12734_v16  ;;  %v12742_v5 = vsub.f32 %v12652_v59, %v18622_v21  ;;  %v12748_v63 = vand.u32 4294901760, %v3183_v32  ;;  %v12755_v33 = vand.u32 4294901760, %v3182_v24  ;;  %v3175_v21 = vld [vmem:[#allocation10 + $0x218] sm:$0xff]  ;;  %v3398_v35 = vadd.f32 %v3397_v41, %v12720_v1 }
 0x4bd   :  { %18621 = vst [vmem:[#allocation169_spill] sm:$0xff] %v12736_v61  ;;  %5309 = vmatprep.subr.mxu1 %v5308_v39  ;;  %v5368_v11 = vand.u32 4294901760, %v12714_v12  ;;  %v12753_v39 = vsub.f32 %v3190_v18, %v12716_v52  ;;  %4916 = vmatprep.subr.mxu0 %v12320_v62  ;;  %v18623_v14 = vand.u32 4294901760, %v12613_v2  ;;  %v18624_v59 = vand.u32 4294901760, %v12677_v54  ;;  %18625 = vst [vmem:[#allocation170_spill] sm:$0xff] %v12770_v49  ;;  %v18632_v2 = vld [vmem:[#allocation104_spill] sm:$0xff] }
 0x4be   :  { %5315 = vmatpush2.msra.mxu1 %v5314_v9  ;;  %v12766_v12 = vsub.f32 %v3187_v38, %v12728_v20  ;;  %v12768_v18 = vand.u32 4294901760, %v3179_v25  ;;  %4918 = vmatpush2.msra.mxu0 %v12358_v46  ;;  %v18626_v41 = vand.u32 4294901760, %v12626_v58  ;;  %v12781_v9 = vpop.f32.mrf.mxu1  ;;  %v12783_v38 = vadd.f32 %v3870_v4, %v3398_v35 }
 0x4bf   :  { %5321 = vmatprep.subr.mxu1 %v18623_v14  ;;  %v5379_v44 = vsub.f32 %v12677_v54, %v18624_v59  ;;  %v12777_v14 = vsub.f32 %v3186_v23, %v12736_v61  ;;  %v12779_v59 = vand.u32 4294901760, %v3178_v26  ;;  %18627 = vst [vmem:[#allocation171_spill] sm:$0xff] %v12781_v9  ;;  %v18629_v54 = vld [vmem:[#allocation99_spill] sm:$0xff]  ;;  %v18630_v49 = vand.u32 4294901760, %v12638_v3 }
 0x4c0   :  { %5327 = vmatpush2.msra.mxu1 %v18626_v41  ;;  %18628 = vst [vmem:[#allocation172_spill] sm:$0xff] %v12783_v38  ;;  %4920 = vmatprep.subr.mxu0 %v18629_v54  ;;  %v5374_v46 = vand.u32 4294901760, %v12742_v5  ;;  %v12791_v41 = vsub.f32 %v3183_v32, %v12748_v63  ;;  %v12793_v23 = vand.u32 4294901760, %v3175_v21  ;;  %v18633_v9 = vand.u32 4294901760, %v12649_v22  ;;  %v3413_v32 = vpop.f32.mrf.mxu0 }
 0x4c1   :  { %5333 = vmatprep.subr.mxu1 %v18630_v49  ;;  %4922 = vmatpush2.msra.mxu0 %v18632_v2  ;;  %v18634_v4 = vand.u32 4294901760, %v12705_v19  ;;  %v12803_v5 = vsub.f32 %v3182_v24, %v12755_v33  ;;  %v12805_v3 = vand.u32 4294901760, %v3174_v0  ;;  %v18635_v58 = vand.u32 4294901760, %v12664_v40  ;;  %v18637_v49 = vld [vmem:[#allocation107_spill] sm:$0xff] }
 0x4c2   :  { %18631 = vst [vmem:[#allocation173_spill] sm:$0xff] %v12793_v23  ;;  %5339 = vmatpush2.msra.mxu1 %v18633_v9  ;;  %4924 = vmatprep.subr.mxu0 %v12435_v15  ;;  %v18636_v22 = vand.u32 4294901760, %v12726_v57  ;;  %v3414_v24 = vadd.f32 %v3413_v32, %v12720_v1  ;;  %v18638_v15 = vand.u32 4294901760, %v12734_v16  ;;  %v12824_v2 = vsub.f32 %v3178_v26, %v12779_v59 }
 0x4c3   :  { %v5385_v35 = vsub.f32 %v12705_v19, %v18634_v4  ;;  %5345 = vmatprep.subr.mxu1 %v18635_v58  ;;  %v12815_v4 = vsub.f32 %v3179_v25, %v12768_v18  ;;  %4926 = vmatpush2.msra.mxu0 %v18637_v49  ;;  %v5380_v19 = vand.u32 4294901760, %v5379_v44  ;;  %v18639_v25 = vand.u32 4294901760, %v12746_v13 }
 0x4c4   :  { %v5391_v9 = vsub.f32 %v12726_v57, %v18636_v22  ;;  %5351 = vmatpush2.msra.mxu1 %v5350_v6  ;;  %v5397_v40 = vsub.f32 %v12734_v16, %v18638_v15  ;;  %v3878_v22 = vpop.f32.mrf.mxu1  ;;  %4928 = vmatprep.subr.mxu0 %v12461_v55  ;;  %v17375_v6 = vand.u32 4294901760, %v12791_v41  ;;  %v12832_v44 = vsub.f32 %v3175_v21, %v12793_v23 }
 0x4c5   :  { %5357 = vmatprep.subr.mxu1 %v5356_v10  ;;  %v5403_v32 = vsub.f32 %v12746_v13, %v18639_v25  ;;  %v12834_v38 = vadd.f32 %v3878_v22, %v3414_v24  ;;  %4930 = vmatpush2.msra.mxu0 %v12470_v43  ;;  %v18641_v15 = vand.u32 4294901760, %v12695_v42  ;;  %v5386_v26 = vand.u32 4294901760, %v5385_v35 }
 0x4c6   :  { %18640 = vst [vmem:[#allocation174_spill] sm:$0xff] %v12832_v44  ;;  %v18642_v58 = vand.u32 4294901760, %v12753_v39  ;;  %v17380_v16 = vand.u32 4294901760, %v12803_v5  ;;  %v12844_v25 = vsub.f32 %v3174_v0, %v12805_v3  ;;  %4932 = vmatprep.subr.mxu0 %v12472_v56  ;;  %v5392_v21 = vand.u32 4294901760, %v5391_v9 }
 0x4c7   :  { %5363 = vmatpush2.msra.mxu1 %v18641_v15  ;;  %v18644_v24 = vand.u32 4294901760, %v12766_v12  ;;  %v17379_v42 = vand.u32 4294901760, %v12815_v4  ;;  %4934 = vmatpush2.msra.mxu0 %v12481_v45  ;;  %v5398_v35 = vand.u32 4294901760, %v5397_v40  ;;  %v17378_v0 = vand.u32 4294901760, %v12824_v2 }
 0x4c8   :  { %v5409_v10 = vsub.f32 %v12753_v39, %v18642_v58  ;;  %18643 = vst [vmem:[#allocation175_spill] sm:$0xff] %v12844_v25  ;;  %5369 = vmatprep.subr.mxu1 %v5368_v11  ;;  %v18645_v58 = vand.u32 4294901760, %v12777_v14  ;;  %4936 = vmatprep.subr.mxu0 %v12489_v36  ;;  %v5404_v11 = vand.u32 4294901760, %v5403_v32  ;;  %v5427_v9 = vsub.f32 %v12791_v41, %v17375_v6 }
 0x4c9   :  { %v5415_v22 = vsub.f32 %v12766_v12, %v18644_v24  ;;  %5375 = vmatpush2.msra.mxu1 %v5374_v46  ;;  %v17377_v24 = vand.u32 4294901760, %v12832_v44  ;;  %4938 = vmatpush2.msra.mxu0 %v12502_v27  ;;  %v5433_v40 = vsub.f32 %v12803_v5, %v17380_v16  ;;  %v5439_v32 = vsub.f32 %v12815_v4, %v17379_v42  ;;  %v18658_v42 = vld [vmem:[#allocation151_spill] sm:$0xff] }
 0x4ca   :  { %v5421_v15 = vsub.f32 %v12777_v14, %v18645_v58  ;;  %5381 = vmatprep.subr.mxu1 %v5380_v19  ;;  %v5410_v46 = vand.u32 4294901760, %v5409_v10  ;;  %v17376_v58 = vand.u32 4294901760, %v12844_v25  ;;  %4940 = vmatprep.subr.mxu0 %v12514_v31  ;;  %v5428_v10 = vand.u32 4294901760, %v5427_v9 }
 0x4cb   :  { %5387 = vmatpush2.msra.mxu1 %v5386_v26  ;;  %v5416_v19 = vand.u32 4294901760, %v5415_v22  ;;  %4942 = vmatpush2.msra.mxu0 %v12528_v51  ;;  %v5445_v26 = vsub.f32 %v12824_v2, %v17378_v0  ;;  %v5434_v22 = vand.u32 4294901760, %v5433_v40  ;;  %v18647_v40 = vld [vmem:[#allocation135_spill] sm:$0xff]  ;;  %v18657_v0 = vld [vmem:[#allocation17_spill] sm:$0xff] }
 0x4cc   :  { %5393 = vmatprep.subr.mxu1 %v5392_v21  ;;  %v5422_v6 = vand.u32 4294901760, %v5421_v15  ;;  %4944 = vmatprep.subr.mxu0 %v12537_v28  ;;  %v5451_v21 = vsub.f32 %v12832_v44, %v17377_v24  ;;  %v5440_v15 = vand.u32 4294901760, %v5439_v32  ;;  %v18649_v32 = vld [vmem:[#allocation94_spill] sm:$0xff]  ;;  %v18671_v44 = vld [vmem:[#allocation23_spill] sm:$0xff] }
 0x4cd   :  { %5399 = vmatpush2.msra.mxu1 %v5398_v35  ;;  %4946 = vmatpush2.msra.mxu0 %v12539_v50  ;;  %v5457_v35 = vsub.f32 %v12844_v25, %v17376_v58  ;;  %v18667_v25 = vld [vmem:[#allocation155_spill] sm:$0xff] }
 0x4ce   :  { %5405 = vmatprep.subr.mxu1 %v5404_v11  ;;  %4948 = vmatprep.subr.mxu0 %v12561_v37  ;;  %v5446_v11 = vand.u32 4294901760, %v5445_v26  ;;  %v5452_v9 = vand.u32 4294901760, %v5451_v21  ;;  %v18651_v21 = vld [vmem:[#allocation97_spill] sm:$0xff] }
 0x4cf   :  { %5411 = vmatpush2.msra.mxu1 %v5410_v46  ;;  %4950 = vmatpush2.msra.mxu0 %v12601_v34  ;;  %v5458_v46 = vand.u32 4294901760, %v5457_v35  ;;  %v18652_v35 = vld [vmem:[#allocation108_spill] sm:$0xff] }
 0x4d0   :  { %5417 = vmatprep.subr.mxu1 %v5416_v19  ;;  %4952 = vmatprep.subr.mxu0 %v12629_v48  ;;  %v12894_v19 = vpop.f32.mrf.mxu0 }
 0x4d1   :  { %5423 = vmatpush2.msra.mxu1 %v5422_v6  ;;  %4954 = vmatpush2.msra.mxu0 %v12654_v53  ;;  %v12890_v6 = vpop.f32.mrf.mxu1  ;;  %18648 = vst [vmem:[#allocation177_spill] sm:$0xff] %v12894_v19  ;;  %v18666_v19 = vld [vmem:[#allocation148_spill] sm:$0xff] }
 0x4d2   :  { %5429 = vmatprep.subr.mxu1 %v5428_v10  ;;  %4956 = vmatprep.subr.mxu0 %v12679_v17  ;;  %18646 = vst [vmem:[#allocation176_spill] sm:$0xff] %v12890_v6  ;;  %v18650_v10 = vld [vmem:[#allocation142_spill] sm:$0xff] }
 0x4d3   :  { %5435 = vmatpush2.msra.mxu1 %v5434_v22  ;;  %4958 = vmatpush2.msra.mxu0 %v12697_v47  ;;  %v3886_v26 = vpop.f32.mrf.mxu1 }
 0x4d4   :  { %5441 = vmatprep.subr.mxu1 %v5440_v15  ;;  %4960 = vmatprep.subr.mxu0 %v12707_v29  ;;  %v3429_v22 = vpop.f32.mrf.mxu0 }
 0x4d5   :  { %5447 = vmatpush2.msra.mxu1 %v5446_v11  ;;  %4962 = vmatpush2.msra.mxu0 %v12716_v52  ;;  %v3430_v15 = vadd.f32 %v3429_v22, %v12720_v1  ;;  %v18653_v11 = vld [vmem:[#allocation114_spill] sm:$0xff]  ;;  %v12909_v58 = vpop.f32.mrf.mxu1 }
 0x4d6   :  { %5453 = vmatprep.subr.mxu1 %v5452_v9  ;;  %4964 = vmatprep.subr.mxu0 %v12728_v20  ;;  %v12905_v9 = vpop.f32.mrf.mxu0  ;;  %18656 = vst [vmem:[#allocation97_spill] sm:$0xff] %v12909_v58  ;;  %v18659_v22 = vld [vmem:[#allocation122_spill] sm:$0xff] }
 0x4d7   :  { %5459 = vmatpush2.msra.mxu1 %v5458_v46  ;;  %4966 = vmatpush2.msra.mxu0 %v12736_v61  ;;  %18654 = vst [vmem:[#allocation94_spill] sm:$0xff] %v12905_v9  ;;  %v18655_v46 = vld [vmem:[#allocation140_spill] sm:$0xff]  ;;  %v12911_v24 = vadd.f32 %v3886_v26, %v3430_v15  ;;  %v3894_v26 = vpop.f32.mrf.mxu1  ;;  %v18662_v15 = vld [vmem:[#allocation147_spill] sm:$0xff]  ;;  %v18663_v58 = vld [vmem:[#allocation150_spill] sm:$0xff] }
 0x4d8   :  { %5463 = vmatmul.mubr.f32.vlgmr.msra.gmra.mxu1 %v18647_v40  ;;  %5763 = vmatprep.subr.mxu1 %v18649_v32  ;;  %v18665_v9 = vld [vmem:[#allocation20_spill] sm:$0xff] }
 0x4d9   :  { %5469 = vmatprep.mubr.f32.mxu1 %v18650_v10  ;;  %5765 = vmatpush1.msra.mxu1 %v18651_v21  ;;  %v3445_v16 = vpop.f32.mrf.mxu0  ;;  %v18660_v10 = vld [vmem:[#allocation124_spill] sm:$0xff] }
 0x4da   :  { %4968 = vmatprep.subr.mxu0 %v12748_v63  ;;  %5767 = vmatprep.subr.mxu1 %v18652_v35  ;;  %v3446_v40 = vadd.f32 %v3445_v16, %v12720_v1  ;;  %v18668_v16 = vld [vmem:[#allocation110_spill] sm:$0xff] }
 0x4db   :  { %4970 = vmatpush2.msra.mxu0 %v12755_v33  ;;  %5769 = vmatpush1.msra.mxu1 %v18653_v11 }
 0x4dc   :  { %4972 = vmatprep.subr.mxu0 %v12768_v18  ;;  %5471 = vmatmul.mubr.f32.gmra.mxu1 %v18655_v46  ;;  %v18661_v46 = vld [vmem:[#allocation19_spill] sm:$0xff]  ;;  %v12924_v6 = vadd.f32 %v3894_v26, %v3446_v40  ;;  %v18673_v40 = vld [vmem:[#allocation24_spill] sm:$0xff]  ;;  %v18674_v26 = vld [vmem:[#allocation149_spill] sm:$0xff] }
 0x4dd   :  { %5771 = vmatprep.subr.mxu1 %v18657_v0  ;;  %4974 = vmatpush2.msra.mxu0 %v12779_v59 }
 0x4de   :  { %5477 = vmatprep.mubr.f32.mxu1 %v18658_v42  ;;  %5773 = vmatpush1.msra.mxu1 %v18659_v22  ;;  %v18664_v42 = vld [vmem:[#allocation103_spill] sm:$0xff] }
 0x4df   :  { %4976 = vmatprep.subr.mxu0 %v12793_v23  ;;  %5775 = vmatprep.subr.mxu1 %v18660_v10  ;;  %v18669_v10 = vld [vmem:[#allocation26_spill] sm:$0xff] }
 0x4e0   :  { %4978 = vmatpush2.msra.mxu0 %v12805_v3  ;;  %5777 = vmatpush1.msra.mxu1 %v18661_v46  ;;  %v18670_v46 = vld [vmem:[#allocation120_spill] sm:$0xff] }
 0x4e1   :  { %4990 = vmatmul.mubr.f32.vlgmr.msra.gmra.mxu0 %v18662_v15  ;;  %5479 = vmatmul.mubr.f32.gmra.mxu1 %v18663_v58  ;;  %v18672_v15 = vld [vmem:[#allocation18_spill] sm:$0xff] }
 0x4e2   :  { %5511 = vmatprep.subr.mxu0 %v18664_v42  ;;  %5779 = vmatprep.subr.mxu1 %v18665_v9  ;;  %v18675_v58 = vld [vmem:[#allocation154_spill] sm:$0xff]  ;;  %v18676_v9 = vld [vmem:[#allocation21_spill] sm:$0xff] }
 0x4e3   :  { %5000 = vmatprep.mubr.f32.mxu0 %v18666_v19  ;;  %5485 = vmatprep.mubr.f32.mxu1 %v18667_v25  ;;  %v18677_v19 = vld [vmem:[#allocation34_spill] sm:$0xff]  ;;  %v18678_v25 = vld [vmem:[#allocation161_spill] sm:$0xff] }
 0x4e4   :  { %5514 = vmatpush1.msra.mxu0 %v18668_v16  ;;  %5781 = vmatpush1.msra.mxu1 %v18669_v10  ;;  %v18679_v16 = vld [vmem:[#allocation82_spill] sm:$0xff]  ;;  %v18680_v10 = vld [vmem:[#allocation29_spill] sm:$0xff] }
 0x4e5   :  { %5517 = vmatprep.subr.mxu0 %v18670_v46  ;;  %5783 = vmatprep.subr.mxu1 %v18671_v44  ;;  %v18681_v46 = vld [vmem:[#allocation36_spill] sm:$0xff]  ;;  %v18682_v44 = vld [vmem:[#allocation31_spill] sm:$0xff] }
 0x4e6   :  { %5520 = vmatpush1.msra.mxu0 %v18672_v15  ;;  %5785 = vmatpush1.msra.mxu1 %v18673_v40  ;;  %v18683_v40 = vld [vmem:[#allocation32_spill] sm:$0xff] }
 0x4e7   :  { %5006 = vmatmul.mubr.f32.gmra.mxu0 %v18674_v26  ;;  %5487 = vmatmul.mubr.f32.gmra.mxu1 %v18675_v58  ;;  %v18684_v26 = vld [vmem:[#allocation30_spill] sm:$0xff] }
 0x4e8   :  { %5523 = vmatprep.subr.mxu0 %v18676_v9  ;;  %5787 = vmatprep.subr.mxu1 %v18677_v19  ;;  %v18685_v58 = vld [vmem:[#allocation74_spill] sm:$0xff]  ;;  %v18686_v9 = vld [vmem:[#allocation73_spill] sm:$0xff] }
 0x4e9   :  { %5016 = vmatprep.mubr.f32.mxu0 %v18678_v25  ;;  %5493 = vmatprep.mubr.f32.mxu1 %v18679_v16  ;;  %v18687_v19 = vld [vmem:[#allocation25_spill] sm:$0xff]  ;;  %v18688_v25 = vld [vmem:[#allocation42_spill] sm:$0xff]  ;;  %v18689_v16 = vld [vmem:[#allocation67_spill] sm:$0xff] }
 0x4ea   :  { %5526 = vmatpush1.msra.mxu0 %v18680_v10  ;;  %5789 = vmatpush1.msra.mxu1 %v18681_v46  ;;  %v18690_v46 = vld [vmem:[#allocation27_spill] sm:$0xff] }
 0x4eb   :  { %5529 = vmatprep.subr.mxu0 %v18682_v44  ;;  %5791 = vmatprep.subr.mxu1 %v12063_v30  ;;  %v12956_v30 = vpop.f32.mrf.mxu1  ;;  %v18713_v44 = vld [vmem:[#allocation91_spill] sm:$0xff] }
 0x4ec   :  { %5532 = vmatpush1.msra.mxu0 %v18683_v40  ;;  %5793 = vmatpush1.msra.mxu1 %v18684_v26  ;;  %18691 = vst [vmem:[#allocation108_spill] sm:$0xff] %v12956_v30  ;;  %v18692_v40 = vld [vmem:[#allocation28_spill] sm:$0xff]  ;;  %v18700_v30 = vld [vmem:[#allocation87_spill] sm:$0xff] }
 0x4ed   :  { %5022 = vmatmul.mubr.f32.gmra.mxu0 %v18685_v58  ;;  %5495 = vmatmul.mubr.f32.gmra.mxu1 %v18686_v9  ;;  %v18693_v58 = vld [vmem:[#allocation38_spill] sm:$0xff]  ;;  %v18694_v9 = vld [vmem:[#allocation51_spill] sm:$0xff] }
 0x4ee   :  { %5535 = vmatprep.subr.mxu0 %v18687_v19  ;;  %5795 = vmatprep.subr.mxu1 %v18688_v25  ;;  %v3902_v19 = vpop.f32.mrf.mxu1  ;;  %v18695_v25 = vld [vmem:[#allocation77_spill] sm:$0xff]  ;;  %v18716_v10 = vld [vmem:[#allocation43_spill] sm:$0xff] }
 0x4ef   :  { %5032 = vmatprep.mubr.f32.mxu0 %v18689_v16  ;;  %5501 = vmatprep.mubr.f32.mxu1 %v18548_v8  ;;  %v18696_v16 = vld [vmem:[#allocation79_spill] sm:$0xff]  ;;  %v18697_v8 = vld [vmem:[#allocation33_spill] sm:$0xff] }
 0x4f0   :  { %5538 = vmatpush1.msra.mxu0 %v18690_v46  ;;  %5797 = vmatpush1.msra.mxu1 %v12128_v7  ;;  %v18698_v46 = vld [vmem:[#allocation52_spill] sm:$0xff]  ;;  %v12966_v7 = vpop.f32.mrf.mxu0 }
 0x4f1   :  { %5541 = vmatprep.subr.mxu0 %v18692_v40  ;;  %5799 = vmatprep.subr.mxu1 %v12157_v60  ;;  %18699 = vst [vmem:[#allocation114_spill] sm:$0xff] %v12966_v7  ;;  %v18701_v40 = vld [vmem:[#allocation35_spill] sm:$0xff]  ;;  %v18702_v60 = vld [vmem:[#allocation44_spill] sm:$0xff]  ;;  %v18708_v7 = vld [vmem:[#allocation54_spill] sm:$0xff] }
 0x4f2   :  { %5544 = vmatpush1.msra.mxu0 %v18693_v58  ;;  %5801 = vmatpush1.msra.mxu1 %v18694_v9  ;;  %v18703_v58 = vld [vmem:[#allocation143_spill] sm:$0xff]  ;;  %v12972_v9 = vpop.f32.mrf.mxu1  ;;  %v3461_v26 = vpop.f32.mrf.mxu0 }
 0x4f3   :  { %5038 = vmatmul.mubr.f32.gmra.mxu0 %v18695_v25  ;;  %5503 = vmatmul.mubr.f32.gmra.mxu1 %v18696_v16  ;;  %18704 = vst [vmem:[#allocation17_spill] sm:$0xff] %v12972_v9  ;;  %v18705_v25 = vld [vmem:[#allocation46_spill] sm:$0xff]  ;;  %v18706_v16 = vld [vmem:[#allocation45_spill] sm:$0xff]  ;;  %v18712_v9 = vld [vmem:[#allocation47_spill] sm:$0xff] }
 0x4f4   :  { %5547 = vmatprep.subr.mxu0 %v18697_v8  ;;  %5803 = vmatprep.subr.mxu1 %v18698_v46  ;;  %v3462_v8 = vadd.f32 %v3461_v26, %v12720_v1  ;;  %v18707_v46 = vld [vmem:[#allocation39_spill] sm:$0xff]  ;;  %v18715_v26 = vld [vmem:[#allocation48_spill] sm:$0xff] }
 0x4f5   :  { %5048 = vmatprep.mubr.f32.mxu0 %v18700_v30  ;;  %5550 = vmatpush1.msra.mxu0 %v18701_v40  ;;  %v12979_v30 = vpop.f32.mrf.mxu0  ;;  %v18710_v40 = vld [vmem:[#allocation89_spill] sm:$0xff] }
 0x4f6   :  { %5805 = vmatpush1.msra.mxu1 %v18702_v60  ;;  %5893 = vmatprep.mubr.f32.mxu1 %v18703_v58  ;;  %18709 = vst [vmem:[#allocation122_spill] sm:$0xff] %v12979_v30  ;;  %v18711_v60 = vld [vmem:[#allocation40_spill] sm:$0xff]  ;;  %v12983_v58 = vadd.f32 %v3902_v19, %v3462_v8  ;;  %v18718_v30 = vld [vmem:[#allocation53_spill] sm:$0xff] }
 0x4f7   :  { %5553 = vmatprep.subr.mxu0 %v18705_v25  ;;  %5807 = vmatprep.subr.mxu1 %v18706_v16  ;;  %v3910_v25 = vpop.f32.mrf.mxu1  ;;  %v18714_v16 = vld [vmem:[#allocation41_spill] sm:$0xff]  ;;  %v18719_v8 = vld [vmem:[#allocation56_spill] sm:$0xff] }
 0x4f8   :  { %5556 = vmatpush1.msra.mxu0 %v18707_v46  ;;  %5809 = vmatpush1.msra.mxu1 %v18708_v7  ;;  %v3477_v46 = vpop.f32.mrf.mxu0  ;;  %v18717_v7 = vld [vmem:[#allocation55_spill] sm:$0xff]  ;;  %v18720_v19 = vld [vmem:[#allocation92_spill] sm:$0xff] }
 0x4f9   :  { %5054 = vmatmul.mubr.f32.gmra.mxu0 %v18710_v40  ;;  %5559 = vmatprep.subr.mxu0 %v18711_v60  ;;  %v3478_v40 = vadd.f32 %v3477_v46, %v12720_v1  ;;  %v18724_v60 = vld [vmem:[#allocation61_spill] sm:$0xff]  ;;  %v18727_v46 = vld [vmem:[#allocation63_spill] sm:$0xff] }
 0x4fa   :  { %5811 = vmatprep.subr.mxu1 %v18712_v9  ;;  %5064 = vmatprep.mubr.f32.mxu0 %v18713_v44  ;;  %v18721_v9 = vld [vmem:[#allocation58_spill] sm:$0xff]  ;;  %v12996_v44 = vpop.f32.mrf.mxu1 }
 0x4fb   :  { %5562 = vmatpush1.msra.mxu0 %v18714_v16  ;;  %5813 = vmatpush1.msra.mxu1 %v18715_v26  ;;  %18722 = vst [vmem:[#allocation147_spill] sm:$0xff] %v12996_v44  ;;  %v12998_v16 = vadd.f32 %v3910_v25, %v3478_v40  ;;  %v18723_v26 = vld [vmem:[#allocation66_spill] sm:$0xff]  ;;  %v18731_v44 = vld [vmem:[#allocation57_spill] sm:$0xff]  ;;  %v18732_v25 = vld [vmem:[#allocation59_spill] sm:$0xff] }
 0x4fc   :  { %5565 = vmatprep.subr.mxu0 %v18716_v10  ;;  %5815 = vmatprep.subr.mxu1 %v18717_v7  ;;  %v18725_v10 = vld [vmem:[#allocation139_spill] sm:$0xff]  ;;  %v18726_v7 = vld [vmem:[#allocation68_spill] sm:$0xff]  ;;  %v4304_v1 = vpop.f32.mrf.mxu1  ;;  %v18733_v40 = vld [vmem:[#allocation90_spill] sm:$0xff] }
 0x4fd   :  { %5568 = vmatpush1.msra.mxu0 %v18718_v30  ;;  %5817 = vmatpush1.msra.mxu1 %v18719_v8  ;;  %v18728_v8 = vld [vmem:[#allocation70_spill] sm:$0xff] }
 0x4fe   :  { %5070 = vmatmul.mubr.f32.gmra.mxu0 %v18720_v19  ;;  %5571 = vmatprep.subr.mxu0 %v18721_v9  ;;  %v18729_v19 = vld [vmem:[#allocation64_spill] sm:$0xff]  ;;  %v18730_v9 = vld [vmem:[#allocation62_spill] sm:$0xff] }
 0x4ff   :  { %5819 = vmatprep.subr.mxu1 %v18723_v26  ;;  %5574 = vmatpush1.msra.mxu0 %v18724_v60 }
 0x500   :  { %5703 = vmatprep.mubr.f32.mxu0 %v18725_v10  ;;  %5821 = vmatpush1.msra.mxu1 %v18726_v7  ;;  %v13012_v10 = vpop.f32.mrf.mxu1  ;;  %v18735_v7 = vld [vmem:[#allocation60_spill] sm:$0xff] }
 0x501   :  { %5577 = vmatprep.subr.mxu0 %v18727_v46  ;;  %5823 = vmatprep.subr.mxu1 %v18728_v8  ;;  %18734 = vst [vmem:[#allocation103_spill] sm:$0xff] %v13012_v10  ;;  %v18736_v46 = vld [vmem:[#allocation72_spill] sm:$0xff]  ;;  %v18742_v10 = vld [vmem:[#allocation71_spill] sm:$0xff] }
 0x502   :  { %5580 = vmatpush1.msra.mxu0 %v18729_v19  ;;  %5825 = vmatpush1.msra.mxu1 %v18730_v9  ;;  %v18737_v8 = vld [vmem:[#allocation104_spill] sm:$0xff]  ;;  %v18738_v19 = vld [vmem:[#allocation65_spill] sm:$0xff] }
 0x503   :  { %5583 = vmatprep.subr.mxu0 %v18731_v44  ;;  %5827 = vmatprep.subr.mxu1 %v12320_v62  ;;  %v18739_v9 = vld [vmem:[#allocation105_spill] sm:$0xff]  ;;  %v13020_v44 = vpop.f32.mrf.mxu0  ;;  %v18741_v62 = vld [vmem:[#allocation80_spill] sm:$0xff] }
 0x504   :  { %5586 = vmatpush1.msra.mxu0 %v18732_v25  ;;  %5829 = vmatpush2.msra.mxu1 %v18733_v40  ;;  %18740 = vst [vmem:[#allocation148_spill] sm:$0xff] %v13020_v44  ;;  %v4316_v40 = vpop.f32.mrf.mxu1 }
 0x505   :  { %5589 = vmatprep.subr.mxu0 %v18735_v7  ;;  %5831 = vmatprep.subr.mxu1 %v18629_v54  ;;  %v4113_v54 = vpop.f32.mrf.mxu0  ;;  %v18743_v7 = vld [vmem:[#allocation93_spill] sm:$0xff] }
 0x506   :  { %5592 = vmatpush1.msra.mxu0 %v18736_v46  ;;  %5833 = vmatpush2.msra.mxu1 %v18737_v8  ;;  %v18744_v8 = vld [vmem:[#allocation172_spill] sm:$0xff] }
 0x507   :  { %5595 = vmatprep.subr.mxu0 %v18738_v19  ;;  %5835 = vmatprep.subr.mxu1 %v18739_v9  ;;  %v4114_v19 = vadd.f32 %v4113_v54, %v18744_v8  ;;  %v18745_v46 = vld [vmem:[#allocation96_spill] sm:$0xff]  ;;  %v13031_v44 = vpop.f32.mrf.mxu0  ;;  %v18752_v54 = vld [vmem:[#allocation101_spill] sm:$0xff] }
 0x508   :  { %5598 = vmatpush1.msra.mxu0 %v18741_v62  ;;  %5837 = vmatpush2.msra.mxu1 %v18637_v49  ;;  %18746 = vst [vmem:[#allocation18_spill] sm:$0xff] %v13031_v44  ;;  %v18747_v62 = vld [vmem:[#allocation102_spill] sm:$0xff]  ;;  %v18750_v49 = vld [vmem:[#allocation95_spill] sm:$0xff] }
 0x509   :  { %5601 = vmatprep.subr.mxu0 %v18742_v10  ;;  %5839 = vmatprep.subr.mxu1 %v12461_v55  ;;  %v13035_v10 = vpop.f32.mrf.mxu1  ;;  %v13037_v55 = vadd.f32 %v4304_v1, %v4114_v19  ;;  %v18753_v44 = vld [vmem:[#allocation106_spill] sm:$0xff]  ;;  %v18754_v19 = vld [vmem:[#allocation113_spill] sm:$0xff] }
 0x50a   :  { %5604 = vmatpush1.msra.mxu0 %v18743_v7  ;;  %5841 = vmatpush2.msra.mxu1 %v12470_v43  ;;  %18748 = vst [vmem:[#allocation149_spill] sm:$0xff] %v13035_v10  ;;  %v18751_v43 = vld [vmem:[#allocation98_spill] sm:$0xff]  ;;  %v4123_v8 = vpop.f32.mrf.mxu0 }
 0x50b   :  { %5607 = vmatprep.subr.mxu0 %v18745_v46  ;;  %5843 = vmatprep.subr.mxu1 %v12472_v56  ;;  %18749 = vst [vmem:[#allocation161_spill] sm:$0xff] %v13037_v55  ;;  %v4328_v10 = vpop.f32.mrf.mxu1  ;;  %v4124_v1 = vadd.f32 %v4123_v8, %v12834_v38  ;;  %v18761_v8 = vld [vmem:[#allocation121_spill] sm:$0xff] }
 0x50c   :  { %5610 = vmatpush2.msra.mxu0 %v18747_v62  ;;  %5845 = vmatpush2.msra.mxu1 %v12481_v45  ;;  %v13050_v55 = vpop.f32.mrf.mxu0 }
 0x50d   :  { %5613 = vmatprep.subr.mxu0 %v18750_v49  ;;  %5847 = vmatprep.subr.mxu1 %v12489_v36  ;;  %18755 = vst [vmem:[#allocation74_spill] sm:$0xff] %v13050_v55  ;;  %v13060_v38 = vpop.f32.mrf.mxu1 }
 0x50e   :  { %5616 = vmatpush2.msra.mxu0 %v18751_v43  ;;  %5849 = vmatpush2.msra.mxu1 %v12502_v27  ;;  %v18756_v43 = vld [vmem:[#allocation115_spill] sm:$0xff]  ;;  %18760 = vst [vmem:[#allocation77_spill] sm:$0xff] %v13060_v38 }
 0x50f   :  { %5619 = vmatprep.subr.mxu0 %v18752_v54  ;;  %5851 = vmatprep.subr.mxu1 %v12514_v31  ;;  %v13054_v54 = vadd.f32 %v4316_v40, %v4124_v1  ;;  %v18758_v31 = vld [vmem:[#allocation117_spill] sm:$0xff]  ;;  %v18763_v1 = vld [vmem:[#allocation116_spill] sm:$0xff]  ;;  %v4340_v38 = vpop.f32.mrf.mxu1 }
 0x510   :  { %5622 = vmatpush2.msra.mxu0 %v18753_v44  ;;  %5853 = vmatpush2.msra.mxu1 %v12528_v51  ;;  %v18759_v51 = vld [vmem:[#allocation119_spill] sm:$0xff]  ;;  %v4133_v55 = vpop.f32.mrf.mxu0 }
 0x511   :  { %5625 = vmatprep.subr.mxu0 %v18754_v19  ;;  %5855 = vmatprep.subr.mxu1 %v12537_v28  ;;  %18757 = vst [vmem:[#allocation67_spill] sm:$0xff] %v13054_v54  ;;  %v4134_v40 = vadd.f32 %v4133_v55, %v12911_v24  ;;  %v18769_v55 = vld [vmem:[#allocation128_spill] sm:$0xff] }
 0x512   :  { %5628 = vmatpush2.msra.mxu0 %v18756_v43  ;;  %5857 = vmatpush2.msra.mxu1 %v12539_v50  ;;  %v18762_v43 = vld [vmem:[#allocation123_spill] sm:$0xff]  ;;  %v13069_v54 = vpop.f32.mrf.mxu0 }
 0x513   :  { %5631 = vmatprep.subr.mxu0 %v18758_v31  ;;  %5859 = vmatprep.subr.mxu1 %v12561_v37  ;;  %18764 = vst [vmem:[#allocation87_spill] sm:$0xff] %v13069_v54  ;;  %v18770_v54 = vld [vmem:[#allocation130_spill] sm:$0xff] }
 0x514   :  { %5634 = vmatpush2.msra.mxu0 %v18759_v51  ;;  %5861 = vmatpush2.msra.mxu1 %v12601_v34  ;;  %v18765_v34 = vld [vmem:[#allocation125_spill] sm:$0xff] }
 0x515   :  { %5637 = vmatprep.subr.mxu0 %v18761_v8  ;;  %5863 = vmatprep.subr.mxu1 %v12629_v48  ;;  %v13073_v8 = vadd.f32 %v4328_v10, %v4134_v40  ;;  %v18767_v48 = vld [vmem:[#allocation118_spill] sm:$0xff] }
 0x516   :  { %5640 = vmatpush2.msra.mxu0 %v18762_v43  ;;  %5865 = vmatpush2.msra.mxu1 %v12654_v53  ;;  %v18768_v53 = vld [vmem:[#allocation127_spill] sm:$0xff]  ;;  %v4143_v24 = vpop.f32.mrf.mxu0  ;;  %v18772_v40 = vld [vmem:[#allocation22_spill] sm:$0xff] }
 0x517   :  { %5643 = vmatprep.subr.mxu0 %v18763_v1  ;;  %5867 = vmatprep.subr.mxu1 %v12679_v17  ;;  %18766 = vst [vmem:[#allocation143_spill] sm:$0xff] %v13073_v8  ;;  %v4144_v10 = vadd.f32 %v4143_v24, %v12924_v6 }
 0x518   :  { %5646 = vmatpush2.msra.mxu0 %v18765_v34  ;;  %5869 = vmatpush2.msra.mxu1 %v12697_v47  ;;  %v13083_v47 = vpop.f32.mrf.mxu1  ;;  %v13088_v8 = vpop.f32.mrf.mxu0 }
 0x519   :  { %5649 = vmatprep.subr.mxu0 %v18767_v48  ;;  %5871 = vmatprep.subr.mxu1 %v12707_v29  ;;  %18771 = vst [vmem:[#allocation89_spill] sm:$0xff] %v13083_v47  ;;  %18773 = vst [vmem:[#allocation91_spill] sm:$0xff] %v13088_v8 }
 0x51a   :  { %5652 = vmatpush2.msra.mxu0 %v18768_v53  ;;  %5873 = vmatpush2.msra.mxu1 %v12716_v52  ;;  %v18774_v52 = vld [vmem:[#allocation165_spill] sm:$0xff]  ;;  %v4352_v6 = vpop.f32.mrf.mxu1 }
 0x51b   :  { %5655 = vmatprep.subr.mxu0 %v18769_v55  ;;  %5875 = vmatprep.subr.mxu1 %v12728_v20  ;;  %v13092_v20 = vadd.f32 %v4340_v38, %v4144_v10  ;;  %v18777_v10 = vld [vmem:[#allocation138_spill] sm:$0xff] }
 0x51c   :  { %5658 = vmatpush2.msra.mxu0 %v18770_v54  ;;  %5877 = vmatpush2.msra.mxu1 %v12736_v61  ;;  %v18776_v61 = vld [vmem:[#allocation168_spill] sm:$0xff]  ;;  %v4153_v24 = vpop.f32.mrf.mxu0  ;;  %v13109_v47 = vpop.f32.mrf.mxu1 }
 0x51d   :  { %5661 = vmatprep.subr.mxu0 %v18772_v40  ;;  %5879 = vmatprep.subr.mxu1 %v12748_v63  ;;  %18775 = vst [vmem:[#allocation53_spill] sm:$0xff] %v13092_v20  ;;  %v4154_v38 = vadd.f32 %v4153_v24, %v12983_v58  ;;  %18779 = vst [vmem:[#allocation66_spill] sm:$0xff] %v13109_v47  ;;  %v18782_v24 = vld [vmem:[#allocation145_spill] sm:$0xff] }
 0x51e   :  { %5664 = vmatpush2.msra.mxu0 %v18774_v52  ;;  %5881 = vmatpush2.msra.mxu1 %v12755_v33  ;;  %v13105_v20 = vpop.f32.mrf.mxu0 }
 0x51f   :  { %5667 = vmatprep.subr.mxu0 %v12726_v57  ;;  %5883 = vmatprep.subr.mxu1 %v12768_v18  ;;  %18778 = vst [vmem:[#allocation92_spill] sm:$0xff] %v13105_v20  ;;  %v13111_v8 = vadd.f32 %v4352_v6, %v4154_v38  ;;  %v4364_v6 = vpop.f32.mrf.mxu1  ;;  %v18788_v38 = vld [vmem:[#allocation19_spill] sm:$0xff] }
 0x520   :  { %5670 = vmatpush2.msra.mxu0 %v18776_v61  ;;  %5885 = vmatpush2.msra.mxu1 %v12779_v59 }
 0x521   :  { %5673 = vmatprep.subr.mxu0 %v12746_v13  ;;  %5887 = vmatprep.subr.mxu1 %v12793_v23  ;;  %18780 = vst [vmem:[#allocation61_spill] sm:$0xff] %v13111_v8  ;;  %v18781_v23 = vld [vmem:[#allocation146_spill] sm:$0xff]  ;;  %v4163_v58 = vpop.f32.mrf.mxu0 }
 0x522   :  { %5676 = vmatpush2.msra.mxu0 %v12753_v39  ;;  %5889 = vmatpush2.msra.mxu1 %v12805_v3 }
 0x523   :  { %5679 = vmatprep.subr.mxu0 %v12766_v12  ;;  %5897 = vmatmul.mubr.f32.vlgmr.msra.gmra.mxu1 %v18777_v10  ;;  %v18789_v10 = vld [vmem:[#allocation136_spill] sm:$0xff] }
 0x524   :  { %6269 = vmatprep.subr.mxu1 %v18649_v32  ;;  %5682 = vmatpush2.msra.mxu0 %v12777_v14  ;;  %v4164_v32 = vadd.f32 %v4163_v58, %v12998_v16  ;;  %v18787_v16 = vld [vmem:[#allocation175_spill] sm:$0xff]  ;;  %v18790_v58 = vld [vmem:[#allocation157_spill] sm:$0xff] }
 0x525   :  { %5905 = vmatprep.mubr.f32.mxu1 %v18781_v23  ;;  %6271 = vmatpush1.msra.mxu1 %v18651_v21  ;;  %v18784_v21 = vld [vmem:[#allocation156_spill] sm:$0xff] }
 0x526   :  { %5685 = vmatprep.subr.mxu0 %v12791_v41  ;;  %6273 = vmatprep.subr.mxu1 %v18652_v35  ;;  %v13124_v23 = vadd.f32 %v4364_v6, %v4164_v32  ;;  %v18785_v35 = vld [vmem:[#allocation174_spill] sm:$0xff]  ;;  %v18792_v32 = vld [vmem:[#allocation20_spill] sm:$0xff] }
 0x527   :  { %5688 = vmatpush2.msra.mxu0 %v12803_v5  ;;  %6275 = vmatpush1.msra.mxu1 %v18653_v11  ;;  %v18786_v11 = vld [vmem:[#allocation124_spill] sm:$0xff]  ;;  %v18795_v6 = vld [vmem:[#allocation110_spill] sm:$0xff] }
 0x528   :  { %5691 = vmatprep.subr.mxu0 %v12815_v4  ;;  %5909 = vmatmul.mubr.f32.gmra.mxu1 %v18782_v24  ;;  %18783 = vst [vmem:[#allocation139_spill] sm:$0xff] %v13124_v23  ;;  %v18793_v24 = vld [vmem:[#allocation144_spill] sm:$0xff] }
 0x529   :  { %6277 = vmatprep.subr.mxu1 %v18657_v0  ;;  %5694 = vmatpush2.msra.mxu0 %v12824_v2  ;;  %v18791_v0 = vand.u32 4294901760, %v18664_v42  ;;  %v18798_v23 = vld [vmem:[#allocation120_spill] sm:$0xff] }
 0x52a   :  { %5917 = vmatprep.mubr.f32.mxu1 %v18784_v21  ;;  %6279 = vmatpush1.msra.mxu1 %v18659_v22  ;;  %v18794_v22 = vld [vmem:[#allocation160_spill] sm:$0xff]  ;;  %v18796_v21 = vand.u32 4294901760, %v18795_v6  ;;  %v18807_v6 = vld [vmem:[#allocation34_spill] sm:$0xff] }
 0x52b   :  { %5697 = vmatprep.subr.mxu0 %v18785_v35  ;;  %6281 = vmatprep.subr.mxu1 %v18786_v11  ;;  %v18797_v11 = vld [vmem:[#allocation26_spill] sm:$0xff]  ;;  %v18802_v42 = vld [vmem:[#allocation24_spill] sm:$0xff] }
 0x52c   :  { %5700 = vmatpush2.msra.mxu0 %v18787_v16  ;;  %6283 = vmatpush1.msra.mxu1 %v18788_v38  ;;  %v18799_v38 = vand.u32 4294901760, %v18798_v23  ;;  %v18809_v23 = vld [vmem:[#allocation78_spill] sm:$0xff]  ;;  %v18907_v16 = vand.u32 4294901760, %v18745_v46 }
 0x52d   :  { %5706 = vmatmul.mubr.f32.vlgmr.msra.gmra.mxu0 %v18789_v10  ;;  %5921 = vmatmul.mubr.f32.gmra.mxu1 %v18790_v58  ;;  %v18800_v10 = vld [vmem:[#allocation23_spill] sm:$0xff]  ;;  %v18801_v58 = vand.u32 4294901760, %v18672_v15  ;;  %v18812_v15 = vld [vmem:[#allocation36_spill] sm:$0xff] }
 0x52e   :  { %5966 = vmatprep.subr.mxu0 %v18791_v0  ;;  %6285 = vmatprep.subr.mxu1 %v18792_v32  ;;  %v18803_v0 = vld [vmem:[#allocation141_spill] sm:$0xff]  ;;  %v18804_v32 = vld [vmem:[#allocation162_spill] sm:$0xff] }
 0x52f   :  { %5713 = vmatprep.mubr.f32.mxu0 %v18793_v24  ;;  %5929 = vmatprep.mubr.f32.mxu1 %v18794_v22  ;;  %v18805_v24 = vld [vmem:[#allocation21_spill] sm:$0xff] }
 0x530   :  { %5970 = vmatpush1.msra.mxu0 %v18796_v21  ;;  %6287 = vmatpush1.msra.mxu1 %v18797_v11  ;;  %v18806_v22 = vand.u32 4294901760, %v18805_v24  ;;  %v18808_v21 = vld [vmem:[#allocation153_spill] sm:$0xff]  ;;  %v18818_v24 = vld [vmem:[#allocation30_spill] sm:$0xff] }
 0x531   :  { %5974 = vmatprep.subr.mxu0 %v18799_v38  ;;  %6289 = vmatprep.subr.mxu1 %v18800_v10  ;;  %v18810_v11 = vld [vmem:[#allocation29_spill] sm:$0xff]  ;;  %v18813_v10 = vld [vmem:[#allocation31_spill] sm:$0xff] }
 0x532   :  { %5978 = vmatpush1.msra.mxu0 %v18801_v58  ;;  %6291 = vmatpush1.msra.mxu1 %v18802_v42  ;;  %v18811_v38 = vand.u32 4294901760, %v18810_v11  ;;  %v18814_v58 = vand.u32 4294901760, %v18813_v10  ;;  %v18815_v42 = vld [vmem:[#allocation37_spill] sm:$0xff]  ;;  %v18823_v11 = vld [vmem:[#allocation42_spill] sm:$0xff]  ;;  %v18826_v10 = vld [vmem:[#allocation27_spill] sm:$0xff] }
 0x533   :  { %5716 = vmatmul.mubr.f32.gmra.mxu0 %v18803_v0  ;;  %5933 = vmatmul.mubr.f32.gmra.mxu1 %v18804_v32  ;;  %v18816_v0 = vld [vmem:[#allocation32_spill] sm:$0xff] }
 0x534   :  { %5982 = vmatprep.subr.mxu0 %v18806_v22  ;;  %6293 = vmatprep.subr.mxu1 %v18807_v6  ;;  %v18817_v32 = vand.u32 4294901760, %v18816_v0  ;;  %v18819_v22 = vld [vmem:[#allocation152_spill] sm:$0xff]  ;;  %v18820_v6 = vld [vmem:[#allocation83_spill] sm:$0xff] }
 0x535   :  { %5723 = vmatprep.mubr.f32.mxu0 %v18808_v21  ;;  %5941 = vmatprep.mubr.f32.mxu1 %v18809_v23  ;;  %v18821_v21 = vld [vmem:[#allocation25_spill] sm:$0xff]  ;;  %v18829_v0 = vld [vmem:[#allocation28_spill] sm:$0xff] }
 0x536   :  { %5986 = vmatpush1.msra.mxu0 %v18811_v38  ;;  %6295 = vmatpush1.msra.mxu1 %v18812_v15  ;;  %v18822_v23 = vand.u32 4294901760, %v18821_v21  ;;  %v18824_v38 = vld [vmem:[#allocation159_spill] sm:$0xff]  ;;  %v18825_v15 = vld [vmem:[#allocation86_spill] sm:$0xff] }
 0x537   :  { %5990 = vmatprep.subr.mxu0 %v18814_v58  ;;  %6297 = vmatprep.subr.mxu1 %v18815_v42  ;;  %v18827_v58 = vand.u32 4294901760, %v18826_v10  ;;  %v18828_v42 = vld [vmem:[#allocation49_spill] sm:$0xff]  ;;  %v18834_v21 = vld [vmem:[#allocation51_spill] sm:$0xff]  ;;  %v18839_v10 = vld [vmem:[#allocation52_spill] sm:$0xff] }
 0x538   :  { %5994 = vmatpush1.msra.mxu0 %v18817_v32  ;;  %6299 = vmatpush1.msra.mxu1 %v18818_v24  ;;  %v18830_v32 = vand.u32 4294901760, %v18829_v0  ;;  %v18831_v24 = vld [vmem:[#allocation50_spill] sm:$0xff] }
 0x539   :  { %5726 = vmatmul.mubr.f32.gmra.mxu0 %v18819_v22  ;;  %5945 = vmatmul.mubr.f32.gmra.mxu1 %v18820_v6  ;;  %v18832_v22 = vld [vmem:[#allocation38_spill] sm:$0xff] }
 0x53a   :  { %5998 = vmatprep.subr.mxu0 %v18822_v23  ;;  %6301 = vmatprep.subr.mxu1 %v18823_v11  ;;  %v18833_v6 = vand.u32 4294901760, %v18832_v22  ;;  %v18835_v23 = vld [vmem:[#allocation158_spill] sm:$0xff]  ;;  %v18836_v11 = vld [vmem:[#allocation88_spill] sm:$0xff] }
 0x53b   :  { %5733 = vmatprep.mubr.f32.mxu0 %v18824_v38  ;;  %5953 = vmatprep.mubr.f32.mxu1 %v18825_v15  ;;  %v18837_v38 = vld [vmem:[#allocation33_spill] sm:$0xff]  ;;  %v18845_v22 = vld [vmem:[#allocation46_spill] sm:$0xff] }
 0x53c   :  { %6002 = vmatpush1.msra.mxu0 %v18827_v58  ;;  %6303 = vmatpush1.msra.mxu1 %v18828_v42  ;;  %v18838_v15 = vand.u32 4294901760, %v18837_v38  ;;  %v18840_v58 = vld [vmem:[#allocation75_spill] sm:$0xff]  ;;  %v18850_v38 = vld [vmem:[#allocation54_spill] sm:$0xff] }
 0x53d   :  { %6006 = vmatprep.subr.mxu0 %v18830_v32  ;;  %6305 = vmatprep.subr.mxu1 %v18831_v24  ;;  %v18841_v42 = vld [vmem:[#allocation35_spill] sm:$0xff]  ;;  %v18843_v32 = vld [vmem:[#allocation44_spill] sm:$0xff]  ;;  %v18844_v24 = vld [vmem:[#allocation137_spill] sm:$0xff] }
 0x53e   :  { %6010 = vmatpush1.msra.mxu0 %v18833_v6  ;;  %6307 = vmatpush1.msra.mxu1 %v18834_v21  ;;  %v18842_v0 = vand.u32 4294901760, %v18841_v42  ;;  %v18846_v6 = vand.u32 4294901760, %v18845_v22  ;;  %v18847_v21 = vld [vmem:[#allocation45_spill] sm:$0xff]  ;;  %v18854_v42 = vld [vmem:[#allocation47_spill] sm:$0xff]  ;;  %v18858_v22 = vld [vmem:[#allocation48_spill] sm:$0xff] }
 0x53f   :  { %5736 = vmatmul.mubr.f32.gmra.mxu0 %v18835_v23  ;;  %5957 = vmatmul.mubr.f32.gmra.mxu1 %v18836_v11  ;;  %v18848_v23 = vld [vmem:[#allocation39_spill] sm:$0xff] }
 0x540   :  { %6014 = vmatprep.subr.mxu0 %v18838_v15  ;;  %6309 = vmatprep.subr.mxu1 %v18839_v10  ;;  %v18849_v11 = vand.u32 4294901760, %v18848_v23  ;;  %v18851_v15 = vld [vmem:[#allocation76_spill] sm:$0xff]  ;;  %v18861_v23 = vld [vmem:[#allocation55_spill] sm:$0xff] }
 0x541   :  { %5743 = vmatprep.mubr.f32.mxu0 %v18840_v58  ;;  %6018 = vmatpush1.msra.mxu0 %v18842_v0  ;;  %v18852_v10 = vld [vmem:[#allocation40_spill] sm:$0xff]  ;;  %v18855_v0 = vld [vmem:[#allocation81_spill] sm:$0xff] }
 0x542   :  { %6311 = vmatpush1.msra.mxu1 %v18843_v32  ;;  %6397 = vmatprep.mubr.f32.mxu1 %v18844_v24  ;;  %v18853_v58 = vand.u32 4294901760, %v18852_v10  ;;  %v18856_v32 = vld [vmem:[#allocation41_spill] sm:$0xff]  ;;  %v18865_v10 = vld [vmem:[#allocation58_spill] sm:$0xff] }
 0x543   :  { %6022 = vmatprep.subr.mxu0 %v18846_v6  ;;  %6313 = vmatprep.subr.mxu1 %v18847_v21  ;;  %v18857_v8 = vand.u32 4294901760, %v18856_v32  ;;  %v18859_v6 = vld [vmem:[#allocation43_spill] sm:$0xff] }
 0x544   :  { %6026 = vmatpush1.msra.mxu0 %v18849_v11  ;;  %6315 = vmatpush1.msra.mxu1 %v18850_v38  ;;  %v18860_v21 = vand.u32 4294901760, %v18859_v6  ;;  %v18862_v11 = vand.u32 4294901760, %v18718_v30  ;;  %v18863_v38 = vld [vmem:[#allocation56_spill] sm:$0xff]  ;;  %v18871_v30 = vld [vmem:[#allocation70_spill] sm:$0xff] }
 0x545   :  { %5746 = vmatmul.mubr.f32.gmra.mxu0 %v18851_v15  ;;  %6030 = vmatprep.subr.mxu0 %v18853_v58  ;;  %v18864_v15 = vld [vmem:[#allocation85_spill] sm:$0xff]  ;;  %v18866_v58 = vand.u32 4294901760, %v18865_v10  ;;  %v6498_v10 = vld [vmem:[#allocation11 + $0xe8] sm:$0xff] }
 0x546   :  { %6317 = vmatprep.subr.mxu1 %v18854_v42  ;;  %5753 = vmatprep.mubr.f32.mxu0 %v18855_v0  ;;  %v18868_v42 = vld [vmem:[#allocation68_spill] sm:$0xff]  ;;  %v18869_v0 = vld [vmem:[#allocation63_spill] sm:$0xff] }
 0x547   :  { %6034 = vmatpush1.msra.mxu0 %v18857_v8  ;;  %6319 = vmatpush1.msra.mxu1 %v18858_v22  ;;  %v18867_v8 = vand.u32 4294901760, %v18724_v60  ;;  %v18870_v32 = vand.u32 4294901760, %v18869_v0  ;;  %v18872_v22 = vld [vmem:[#allocation64_spill] sm:$0xff] }
 0x548   :  { %6038 = vmatprep.subr.mxu0 %v18860_v21  ;;  %6321 = vmatprep.subr.mxu1 %v18861_v23  ;;  %v18873_v6 = vand.u32 4294901760, %v18872_v22  ;;  %v18874_v21 = vld [vmem:[#allocation62_spill] sm:$0xff]  ;;  %v18875_v23 = vld [vmem:[#allocation57_spill] sm:$0xff]  ;;  %v6500_v60 = vld [vmem:[#allocation11 + $0xf8] sm:$0xff] }
 0x549   :  { %6042 = vmatpush1.msra.mxu0 %v18862_v11  ;;  %6323 = vmatpush1.msra.mxu1 %v18863_v38  ;;  %v18876_v11 = vand.u32 4294901760, %v18875_v23  ;;  %v6499_v38 = vld [vmem:[#allocation11 + $0xf0] sm:$0xff]  ;;  %v18883_v0 = vld [vmem:[#allocation72_spill] sm:$0xff]  ;;  %v13236_v22 = vand.u32 4294901760, %v6500_v60  ;;  %v18888_v23 = vld [vmem:[#allocation65_spill] sm:$0xff] }
 0x54a   :  { %5756 = vmatmul.mubr.f32.gmra.mxu0 %v18864_v15  ;;  %6046 = vmatprep.subr.mxu0 %v18866_v58  ;;  %v18879_v15 = vld [vmem:[#allocation90_spill] sm:$0xff]  ;;  %v18880_v58 = vld [vmem:[#allocation60_spill] sm:$0xff] }
 0x54b   :  { %6325 = vmatprep.subr.mxu1 %v18723_v26  ;;  %6050 = vmatpush1.msra.mxu0 %v18867_v8  ;;  %v18877_v26 = vld [vmem:[#allocation69_spill] sm:$0xff]  ;;  %v18881_v8 = vand.u32 4294901760, %v18880_v58  ;;  %18886 = vst [vmem:[#allocation59_spill] sm:$0xff] %v13236_v22 }
 0x54c   :  { %6220 = vmatprep.mubr.f32.mxu0 %v18844_v24  ;;  %6327 = vmatpush1.msra.mxu1 %v18868_v42  ;;  %v18878_v24 = vand.u32 4294901760, %v18732_v25  ;;  %v18882_v42 = vld [vmem:[#allocation99_spill] sm:$0xff]  ;;  %v6496_v25 = vld [vmem:[#allocation11 + $0xd8] sm:$0xff] }
 0x54d   :  { %6054 = vmatprep.subr.mxu0 %v18870_v32  ;;  %6329 = vmatprep.subr.mxu1 %v18871_v30  ;;  %v18884_v32 = vand.u32 4294901760, %v18883_v0  ;;  %v18885_v30 = vld [vmem:[#allocation104_spill] sm:$0xff]  ;;  %v13253_v47 = vand.u32 4294901760, %v6496_v25 }
 0x54e   :  { %6058 = vmatpush1.msra.mxu0 %v18873_v6  ;;  %6331 = vmatpush1.msra.mxu1 %v18874_v21  ;;  %v13238_v6 = vand.u32 4294901760, %v6499_v38  ;;  %v6497_v21 = vld [vmem:[#allocation11 + $0xe0] sm:$0xff] }
 0x54f   :  { %6062 = vmatprep.subr.mxu0 %v18876_v11  ;;  %6333 = vmatprep.subr.mxu1 %v18877_v26  ;;  %v18889_v11 = vand.u32 4294901760, %v18888_v23  ;;  %v13243_v26 = vand.u32 4294901760, %v6498_v10  ;;  %18898 = vst [vmem:[#allocation96_spill] sm:$0xff] %v13253_v47  ;;  %v6494_v23 = vld [vmem:[#allocation11 + $0xc8] sm:$0xff] }
 0x550   :  { %6066 = vmatpush1.msra.mxu0 %v18878_v24  ;;  %6335 = vmatpush2.msra.mxu1 %v18879_v15  ;;  %18887 = vst [vmem:[#allocation105_spill] sm:$0xff] %v13238_v6  ;;  %v6495_v24 = vld [vmem:[#allocation11 + $0xd0] sm:$0xff]  ;;  %v18891_v15 = vld [vmem:[#allocation80_spill] sm:$0xff] }
 0x551   :  { %6070 = vmatprep.subr.mxu0 %v18881_v8  ;;  %6337 = vmatprep.subr.mxu1 %v18882_v42  ;;  %18890 = vst [vmem:[#allocation93_spill] sm:$0xff] %v13243_v26  ;;  %v18892_v58 = vand.u32 4294901760, %v18891_v15  ;;  %v18893_v8 = vld [vmem:[#allocation107_spill] sm:$0xff]  ;;  %v13259_v15 = vsub.f32 %v6500_v60, %v13236_v22  ;;  %v6492_v60 = vld [vmem:[#allocation11 + $0xb8] sm:$0xff] }
 0x552   :  { %6074 = vmatpush1.msra.mxu0 %v18884_v32  ;;  %6339 = vmatpush2.msra.mxu1 %v18885_v30  ;;  %v18894_v42 = vld [vmem:[#allocation71_spill] sm:$0xff]  ;;  %v18896_v32 = vld [vmem:[#allocation100_spill] sm:$0xff]  ;;  %v13251_v30 = vand.u32 4294901760, %v6497_v21 }
 0x553   :  { %6078 = vmatprep.subr.mxu0 %v18889_v11  ;;  %6341 = vmatprep.subr.mxu1 %v18739_v9  ;;  %v18895_v0 = vand.u32 4294901760, %v18894_v42  ;;  %v18899_v9 = vand.u32 4294901760, %v18743_v7  ;;  %v18900_v11 = vld [vmem:[#allocation109_spill] sm:$0xff]  ;;  %18901 = vst [vmem:[#allocation102_spill] sm:$0xff] %v13259_v15  ;;  %v13274_v7 = vsub.f32 %v6498_v10, %v13243_v26  ;;  %v6491_v10 = vld [vmem:[#allocation11 + $0xb0] sm:$0xff] }
 0x554   :  { %6082 = vmatpush1.msra.mxu0 %v18892_v58  ;;  %6343 = vmatpush2.msra.mxu1 %v18893_v8  ;;  %18897 = vst [vmem:[#allocation172_spill] sm:$0xff] %v13251_v30  ;;  %v13262_v58 = vsub.f32 %v6499_v38, %v13238_v6  ;;  %v13264_v8 = vand.u32 4294901760, %v6495_v24  ;;  %v6493_v42 = vld [vmem:[#allocation11 + $0xc0] sm:$0xff]  ;;  %v13279_v38 = vand.u32 4294901760, %v6494_v23  ;;  %v13285_v46 = vsub.f32 %v6497_v21, %v13251_v30 }
 0x555   :  { %6086 = vmatprep.subr.mxu0 %v18895_v0  ;;  %6345 = vmatprep.subr.mxu1 %v18896_v32  ;;  %v18904_v0 = vld [vmem:[#allocation134_spill] sm:$0xff]  ;;  %v18905_v32 = vld [vmem:[#allocation163_spill] sm:$0xff]  ;;  %18908 = vst [vmem:[#allocation117_spill] sm:$0xff] %v13274_v7  ;;  %v13300_v21 = vand.u32 4294901760, %v6492_v60  ;;  %v13318_v30 = vand.u32 4294901760, %v6491_v10 }
 0x556   :  { %6090 = vmatpush1.msra.mxu0 %v18899_v9  ;;  %6347 = vmatpush2.msra.mxu1 %v18900_v11  ;;  %18902 = vst [vmem:[#allocation95_spill] sm:$0xff] %v13262_v58  ;;  %18903 = vst [vmem:[#allocation106_spill] sm:$0xff] %v13264_v8  ;;  %v13268_v20 = vrot.slane %v18905_v32, %v18904_v0  ;;  %v18909_v9 = vand.u32 4294901760, %v18747_v62  ;;  %v18911_v11 = vand.u32 4294901760, %v18750_v49  ;;  %v18915_v62 = vld [vmem:[#allocation98_spill] sm:$0xff] }
 0x557   :  { %6094 = vmatprep.subr.mxu0 %v18907_v16  ;;  %6349 = vmatprep.subr.mxu1 %v12472_v56  ;;  %18910 = vst [vmem:[#allocation119_spill] sm:$0xff] %v13279_v38  ;;  %18912 = vst [vmem:[#allocation123_spill] sm:$0xff] %v13285_v46  ;;  %v13288_v56 = vsub.f32 %v6496_v25, %v13253_v47  ;;  %v13290_v16 = vand.u32 4294901760, %v6493_v42  ;;  %v18916_v32 = vand.u32 4294901760, %v18915_v62  ;;  %v18919_v25 = vld [vmem:[#allocation170_spill] sm:$0xff]  ;;  %v18921_v47 = vld [vmem:[#allocation101_spill] sm:$0xff] }
 0x558   :  { %18906 = vst [vmem:[#allocation113_spill] sm:$0xff] %v13268_v20  ;;  %6098 = vmatpush2.msra.mxu0 %v18909_v9  ;;  %6351 = vmatpush2.msra.mxu1 %v12481_v45  ;;  %18918 = vst [vmem:[#allocation127_spill] sm:$0xff] %v13300_v21  ;;  %v3400_v9 = vadd.f32 %v18919_v25, %v13268_v20  ;;  %v18922_v62 = vand.u32 4294901760, %v18921_v47  ;;  %v18924_v49 = vld [vmem:[#allocation94_spill] sm:$0xff]  ;;  %v13316_v25 = vsub.f32 %v6494_v23, %v13279_v38  ;;  %v6489_v23 = vld [vmem:[#allocation11 + $0xa0] sm:$0xff] }
 0x559   :  { %6102 = vmatprep.subr.mxu0 %v18911_v11  ;;  %6353 = vmatprep.subr.mxu1 %v12489_v36  ;;  %18913 = vst [vmem:[#allocation116_spill] sm:$0xff] %v13288_v56  ;;  %18914 = vst [vmem:[#allocation125_spill] sm:$0xff] %v13290_v16  ;;  %v13298_v36 = vsub.f32 %v6495_v24, %v13264_v8  ;;  %v18920_v11 = vld [vmem:[#allocation177_spill] sm:$0xff]  ;;  %v3432_v45 = vadd.f32 %v18924_v49, %v13268_v20  ;;  %v18925_v24 = vand.u32 4294901760, %v18753_v44  ;;  %v18926_v8 = vld [vmem:[#allocation112_spill] sm:$0xff] }
 0x55a   :  { %6106 = vmatpush2.msra.mxu0 %v18916_v32  ;;  %6355 = vmatpush2.msra.mxu1 %v12502_v27  ;;  %v3416_v0 = vadd.f32 %v18920_v11, %v13268_v20  ;;  %v18923_v32 = vld [vmem:[#allocation111_spill] sm:$0xff]  ;;  %18927 = vst [vmem:[#allocation128_spill] sm:$0xff] %v13316_v25  ;;  %18928 = vst [vmem:[#allocation130_spill] sm:$0xff] %v13318_v30  ;;  %v6490_v11 = vld [vmem:[#allocation11 + $0xa8] sm:$0xff] }
 0x55b   :  { %18917 = vst [vmem:[#allocation118_spill] sm:$0xff] %v13298_v36  ;;  %6110 = vmatprep.subr.mxu0 %v18922_v62  ;;  %6357 = vmatprep.subr.mxu1 %v18923_v32  ;;  %v18929_v47 = vld [vmem:[#allocation114_spill] sm:$0xff]  ;;  %v18930_v32 = vand.u32 4294901760, %v18754_v19  ;;  %v18937_v49 = vld [vmem:[#allocation171_spill] sm:$0xff]  ;;  %v13361_v44 = vand.u32 4294901760, %v6490_v11 }
 0x55c   :  { %6114 = vmatpush2.msra.mxu0 %v18925_v24  ;;  %6359 = vmatpush2.msra.mxu1 %v18926_v8  ;;  %v3448_v62 = vadd.f32 %v18929_v47, %v13268_v20  ;;  %v13328_v8 = vsub.f32 %v6493_v42, %v13290_v16  ;;  %v18932_v24 = vld [vmem:[#allocation115_spill] sm:$0xff]  ;;  %v18934_v47 = vand.u32 4294901760, %v13259_v15  ;;  %v13345_v42 = vsub.f32 %v6492_v60, %v13300_v21  ;;  %v18942_v60 = vld [vmem:[#allocation97_spill] sm:$0xff] }
 0x55d   :  { %6118 = vmatprep.subr.mxu0 %v18930_v32  ;;  %6361 = vmatprep.subr.mxu1 %v12537_v28  ;;  %v18933_v27 = vand.u32 4294901760, %v18932_v24  ;;  %v18935_v28 = vand.u32 4294901760, %v13262_v58  ;;  %v13348_v24 = vadd.f32 %v18937_v49, %v3400_v9  ;;  %v18939_v16 = vand.u32 4294901760, %v18758_v31  ;;  %18941 = vst [vmem:[#allocation168_spill] sm:$0xff] %v13361_v44  ;;  %v6488_v49 = vld [vmem:[#allocation11 + $0x98] sm:$0xff] }
 0x55e   :  { %18931 = vst [vmem:[#allocation22_spill] sm:$0xff] %v13328_v8  ;;  %6363 = vmatpush2.msra.mxu1 %v12539_v50  ;;  %v13336_v19 = vsub.f32 %v13259_v15, %v18934_v47  ;;  %18936 = vst [vmem:[#allocation165_spill] sm:$0xff] %v13345_v42  ;;  %v18940_v47 = vand.u32 4294901760, %v13274_v7  ;;  %v18944_v9 = vand.u32 4294901760, %v18759_v51  ;;  %v18950_v15 = vld [vmem:[#allocation121_spill] sm:$0xff]  ;;  %v18953_v51 = vand.u32 4294901760, %v13285_v46 }
 0x55f   :  { %6122 = vmatpush2.msra.mxu0 %v18933_v27  ;;  %v13341_v32 = vsub.f32 %v13262_v58, %v18935_v28  ;;  %v18938_v27 = vld [vmem:[#allocation176_spill] sm:$0xff]  ;;  %6365 = vmatprep.subr.mxu1 %v12561_v37  ;;  %v13364_v58 = vadd.f32 %v18942_v60, %v3432_v45  ;;  %v13373_v37 = vand.u32 4294901760, %v6489_v23  ;;  %v18951_v45 = vand.u32 4294901760, %v18950_v15  ;;  %v18952_v60 = vld [vmem:[#allocation129_spill] sm:$0xff]  ;;  %v18956_v15 = vld [vmem:[#allocation131_spill] sm:$0xff] }
 0x560   :  { %v13351_v50 = vadd.f32 %v18938_v27, %v3416_v0  ;;  %6126 = vmatprep.subr.mxu0 %v18939_v16  ;;  %v13359_v28 = vsub.f32 %v13274_v7, %v18940_v47  ;;  %v18945_v0 = vld [vmem:[#allocation126_spill] sm:$0xff]  ;;  %v13371_v16 = vsub.f32 %v6491_v10, %v13318_v30  ;;  %v6487_v27 = vld [vmem:[#allocation11 + $0x90] sm:$0xff]  ;;  %v18948_v47 = vld [vmem:[#allocation108_spill] sm:$0xff]  ;;  %v18954_v10 = vand.u32 4294901760, %v13288_v56 }
 0x561   :  { %18943 = vst [vmem:[#allocation138_spill] sm:$0xff] %v13364_v58  ;;  %6130 = vmatpush2.msra.mxu0 %v18944_v9  ;;  %6367 = vmatpush2.msra.mxu1 %v18945_v0  ;;  %18947 = vst [vmem:[#allocation145_spill] sm:$0xff] %v13373_v37  ;;  %v13376_v7 = vadd.f32 %v18948_v47, %v3448_v62  ;;  %v13384_v9 = vsub.f32 %v13285_v46, %v18953_v51  ;;  %v6486_v30 = vld [vmem:[#allocation11 + $0x88] sm:$0xff]  ;;  %v18955_v62 = vand.u32 4294901760, %v18762_v43  ;;  %v6484_v47 = vld [vmem:[#allocation11 + $0x78] sm:$0xff] }
 0x562   :  { %18946 = vst [vmem:[#allocation146_spill] sm:$0xff] %v13371_v16  ;;  %6134 = vmatprep.subr.mxu0 %v18951_v45  ;;  %6369 = vmatprep.subr.mxu1 %v18952_v60  ;;  %v13389_v0 = vsub.f32 %v13288_v56, %v18954_v10  ;;  %v18957_v60 = vand.u32 4294901760, %v13298_v36  ;;  %v6485_v56 = vld [vmem:[#allocation11 + $0x80] sm:$0xff]  ;;  %v18958_v31 = vand.u32 4294901760, %v18763_v1  ;;  %v13412_v45 = vand.u32 4294901760, %v6487_v27  ;;  %v18963_v10 = vld [vmem:[#allocation164_spill] sm:$0xff] }
 0x563   :  { %18949 = vst [vmem:[#allocation156_spill] sm:$0xff] %v13376_v7  ;;  %6138 = vmatpush2.msra.mxu0 %v18955_v62  ;;  %6371 = vmatpush2.msra.mxu1 %v18956_v15  ;;  %v13408_v62 = vsub.f32 %v6490_v11, %v13361_v44  ;;  %v13410_v15 = vand.u32 4294901760, %v6488_v49  ;;  %v18964_v1 = vand.u32 4294901760, %v13316_v25  ;;  %v13424_v11 = vsub.f32 %v6489_v23, %v13373_v37  ;;  %v6482_v46 = vld [vmem:[#allocation11 + $0x68] sm:$0xff]  ;;  %v13453_v37 = vpop.f32.mrf.mxu1  ;;  %v18982_v58 = vld [vmem:[#allocation169_spill] sm:$0xff] }
 0x564   :  { %v13400_v51 = vsub.f32 %v13298_v36, %v18957_v60  ;;  %6142 = vmatprep.subr.mxu0 %v18958_v31  ;;  %6373 = vmatprep.subr.mxu1 %v12679_v17  ;;  %18961 = vst [vmem:[#allocation19_spill] sm:$0xff] %v13412_v45  ;;  %v6483_v60 = vld [vmem:[#allocation11 + $0x70] sm:$0xff]  ;;  %v18962_v36 = vand.u32 4294901760, %v18765_v34  ;;  %v13426_v43 = vand.u32 4294901760, %v6486_v30  ;;  %v18967_v7 = vand.u32 4294901760, %v18767_v48  ;;  %18975 = vst [vmem:[#allocation110_spill] sm:$0xff] %v13453_v37 }
 0x565   :  { %18959 = vst [vmem:[#allocation174_spill] sm:$0xff] %v13408_v62  ;;  %18960 = vst [vmem:[#allocation124_spill] sm:$0xff] %v13410_v15  ;;  %6375 = vmatpush2.msra.mxu1 %v18963_v10  ;;  %v13420_v17 = vsub.f32 %v13316_v25, %v18964_v1  ;;  %v18968_v10 = vand.u32 4294901760, %v13328_v8  ;;  %v13438_v31 = vand.u32 4294901760, %v6485_v56  ;;  %v18970_v23 = vand.u32 4294901760, %v18768_v53  ;;  %v18971_v25 = vld [vmem:[#allocation166_spill] sm:$0xff] }
 0x566   :  { %6146 = vmatpush2.msra.mxu0 %v18962_v36  ;;  %18965 = vst [vmem:[#allocation136_spill] sm:$0xff] %v13424_v11  ;;  %18966 = vst [vmem:[#allocation157_spill] sm:$0xff] %v13426_v43  ;;  %6377 = vmatprep.subr.mxu1 %v12707_v29  ;;  %v18972_v29 = vand.u32 4294901760, %v13345_v42  ;;  %v13449_v36 = vand.u32 4294901760, %v6484_v47  ;;  %v13451_v34 = vand.u32 4294901760, %v6483_v60  ;;  %v18976_v53 = vand.u32 4294901760, %v18769_v55 }
 0x567   :  { %6150 = vmatprep.subr.mxu0 %v18967_v7  ;;  %v13436_v1 = vsub.f32 %v13328_v8, %v18968_v10  ;;  %18969 = vst [vmem:[#allocation20_spill] sm:$0xff] %v13438_v31  ;;  %6379 = vmatpush2.msra.mxu1 %v18971_v25  ;;  %v6481_v10 = vld [vmem:[#allocation11 + $0x60] sm:$0xff]  ;;  %v6480_v8 = vld [vmem:[#allocation11 + $0x58] sm:$0xff]  ;;  %v13460_v48 = vsub.f32 %v6488_v49, %v13410_v15  ;;  %v18981_v44 = vand.u32 4294901760, %v18770_v54  ;;  %v13483_v54 = vpop.f32.mrf.mxu1  ;;  %v6479_v49 = vld [vmem:[#allocation11 + $0x50] sm:$0xff]  ;;  %v18994_v37 = vand.u32 4294901760, %v12726_v57 }
 0x568   :  { %6154 = vmatpush2.msra.mxu0 %v18970_v23  ;;  %v13447_v7 = vsub.f32 %v13345_v42, %v18972_v29  ;;  %18973 = vst [vmem:[#allocation144_spill] sm:$0xff] %v13449_v36  ;;  %18974 = vst [vmem:[#allocation160_spill] sm:$0xff] %v13451_v34  ;;  %v18977_v23 = vld [vmem:[#allocation167_spill] sm:$0xff]  ;;  %v13463_v29 = vsub.f32 %v6487_v27, %v13412_v45  ;;  %v13465_v42 = vand.u32 4294901760, %v6482_v46  ;;  %v18985_v27 = vand.u32 4294901760, %v18772_v40 }
 0x569   :  { %6158 = vmatprep.subr.mxu0 %v18976_v53  ;;  %6381 = vmatprep.subr.mxu1 %v18977_v23  ;;  %18978 = vst [vmem:[#allocation26_spill] sm:$0xff] %v13460_v48  ;;  %v18983_v53 = vand.u32 4294901760, %v13371_v16  ;;  %v13478_v25 = vsub.f32 %v6486_v30, %v13426_v43  ;;  %18986 = vst [vmem:[#allocation141_spill] sm:$0xff] %v13483_v54  ;;  %v13489_v55 = vand.u32 4294901760, %v6481_v10  ;;  %v18990_v30 = vld [vmem:[#allocation122_spill] sm:$0xff]  ;;  %v18991_v40 = vand.u32 4294901760, %v18774_v52 }
 0x56a   :  { %18979 = vst [vmem:[#allocation120_spill] sm:$0xff] %v13463_v29  ;;  %18980 = vst [vmem:[#allocation23_spill] sm:$0xff] %v13465_v42  ;;  %6162 = vmatpush2.msra.mxu0 %v18981_v44  ;;  %6383 = vmatpush2.msra.mxu1 %v18982_v58  ;;  %v13487_v44 = vsub.f32 %v6485_v56, %v13438_v31  ;;  %v13503_v56 = vsub.f32 %v6483_v60, %v13451_v34  ;;  %v6478_v58 = vld [vmem:[#allocation11 + $0x48] sm:$0xff]  ;;  %v6477_v60 = vld [vmem:[#allocation11 + $0x40] sm:$0xff] }
 0x56b   :  { %v13474_v23 = vsub.f32 %v13371_v16, %v18983_v53  ;;  %18984 = vst [vmem:[#allocation24_spill] sm:$0xff] %v13478_v25  ;;  %6166 = vmatprep.subr.mxu0 %v18985_v27  ;;  %6385 = vmatprep.subr.mxu1 %v12748_v63  ;;  %18988 = vst [vmem:[#allocation21_spill] sm:$0xff] %v13489_v55  ;;  %v13491_v53 = vand.u32 4294901760, %v6480_v8  ;;  %v3464_v16 = vadd.f32 %v18990_v30, %v13268_v20 }
 0x56c   :  { %18987 = vst [vmem:[#allocation162_spill] sm:$0xff] %v13487_v44  ;;  %6170 = vmatpush2.msra.mxu0 %v18991_v40  ;;  %6387 = vmatpush2.msra.mxu1 %v12755_v33  ;;  %v13500_v27 = vsub.f32 %v6484_v47, %v13449_v36  ;;  %18993 = vst [vmem:[#allocation78_spill] sm:$0xff] %v13503_v56  ;;  %v18995_v30 = vand.u32 4294901760, %v13408_v62  ;;  %v13516_v47 = vsub.f32 %v6482_v46, %v13465_v42  ;;  %v19001_v40 = vld [vmem:[#allocation173_spill] sm:$0xff] }
 0x56d   :  { %18989 = vst [vmem:[#allocation34_spill] sm:$0xff] %v13491_v53  ;;  %6174 = vmatprep.subr.mxu0 %v18994_v37  ;;  %6389 = vmatprep.subr.mxu1 %v12768_v18  ;;  %v18997_v63 = vand.u32 4294901760, %v18776_v61  ;;  %v18998_v18 = vand.u32 4294901760, %v13424_v11  ;;  %v13528_v33 = vand.u32 4294901760, %v6479_v49  ;;  %v19000_v46 = vand.u32 4294901760, %v12746_v13  ;;  %v13533_v61 = vpop.f32.mrf.mxu1 }
 0x56e   :  { %18992 = vst [vmem:[#allocation153_spill] sm:$0xff] %v13500_v27  ;;  %v13511_v52 = vsub.f32 %v13408_v62, %v18995_v30  ;;  %18996 = vst [vmem:[#allocation29_spill] sm:$0xff] %v13516_v47  ;;  %6391 = vmatpush2.msra.mxu1 %v12779_v59  ;;  %v13540_v57 = vsub.f32 %v6480_v8, %v13491_v53  ;;  %v6476_v30 = vld [vmem:[#allocation11 + $0x38] sm:$0xff]  ;;  %v19007_v13 = vand.u32 4294901760, %v12753_v39  ;;  %v19009_v8 = vand.u32 4294901760, %v12766_v12  ;;  %v19010_v59 = vld [vmem:[#allocation135_spill] sm:$0xff] }
 0x56f   :  { %6178 = vmatpush2.msra.mxu0 %v18997_v63  ;;  %v13525_v37 = vsub.f32 %v13424_v11, %v18998_v18  ;;  %18999 = vst [vmem:[#allocation36_spill] sm:$0xff] %v13528_v33  ;;  %6393 = vmatprep.subr.mxu1 %v19001_v40  ;;  %v13537_v63 = vsub.f32 %v6481_v10, %v13489_v55  ;;  %v13542_v18 = vand.u32 4294901760, %v6478_v58  ;;  %v19005_v11 = vld [vmem:[#allocation17_spill] sm:$0xff]  ;;  %v13552_v10 = vand.u32 4294901760, %v6477_v60 }
 0x570   :  { %6182 = vmatprep.subr.mxu0 %v19000_v46  ;;  %19003 = vst [vmem:[#allocation37_spill] sm:$0xff] %v13540_v57  ;;  %v13545_v62 = vadd.f32 %v19005_v11, %v3464_v16  ;;  %6395 = vmatpush2.msra.mxu1 %v12805_v3  ;;  %v19011_v16 = vand.u32 4294901760, %v13460_v48  ;;  %v19012_v3 = vand.u32 4294901760, %v13463_v29  ;;  %v6475_v46 = vld [vmem:[#allocation11 + $0x30] sm:$0xff]  ;;  %v19013_v12 = vand.u32 4294901760, %v13336_v19  ;;  %v19019_v19 = vld [vmem:[#allocation142_spill] sm:$0xff] }
 0x571   :  { %19002 = vst [vmem:[#allocation31_spill] sm:$0xff] %v13537_v63  ;;  %19004 = vst [vmem:[#allocation32_spill] sm:$0xff] %v13542_v18  ;;  %6186 = vmatpush2.msra.mxu0 %v19007_v13  ;;  %6399 = vmatmul.mubr.f32.vlgmr.msra.gmra.mxu1 %v19010_v59  ;;  %v19015_v40 = vand.u32 4294901760, %v13478_v25  ;;  %v6474_v13 = vld [vmem:[#allocation11 + $0x28] sm:$0xff]  ;;  %v13616_v20 = vsub.f32 %v6477_v60, %v13552_v10 }
 0x572   :  { %19006 = vst [vmem:[#allocation30_spill] sm:$0xff] %v13545_v62  ;;  %19008 = vst [vmem:[#allocation152_spill] sm:$0xff] %v13552_v10  ;;  %6190 = vmatprep.subr.mxu0 %v19009_v8  ;;  %v13561_v39 = vsub.f32 %v13460_v48, %v19011_v16  ;;  %v13566_v11 = vsub.f32 %v13463_v29, %v19012_v3  ;;  %6838 = vmatprep.subr.mxu1 %v19013_v12  ;;  %v19014_v8 = vand.u32 4294901760, %v12777_v14  ;;  %v13584_v29 = vpop.f32.mrf.mxu0  ;;  %v13589_v12 = vpop.f32.mrf.mxu1 }
 0x573   :  { %v13577_v16 = vsub.f32 %v13478_v25, %v19015_v40  ;;  %v13580_v48 = vsub.f32 %v6479_v49, %v13528_v33  ;;  %v13582_v3 = vand.u32 4294901760, %v6476_v30  ;;  %19018 = vst [vmem:[#allocation42_spill] sm:$0xff] %v13584_v29  ;;  %6405 = vmatprep.mubr.f32.mxu1 %v19019_v19  ;;  %v19020_v14 = vand.u32 4294901760, %v13341_v32  ;;  %19021 = vst [vmem:[#allocation159_spill] sm:$0xff] %v13589_v12 }
 0x574   :  { %6194 = vmatpush2.msra.mxu0 %v19014_v8  ;;  %v19022_v8 = vand.u32 4294901760, %v13487_v44  ;;  %v13599_v25 = vsub.f32 %v6478_v58, %v13542_v18  ;;  %v19024_v29 = vand.u32 4294901760, %v12791_v41  ;;  %v19025_v32 = vand.u32 4294901760, %v13359_v28  ;;  %19028 = vst [vmem:[#allocation27_spill] sm:$0xff] %v13616_v20 }
 0x575   :  { %19016 = vst [vmem:[#allocation83_spill] sm:$0xff] %v13580_v48  ;;  %19017 = vst [vmem:[#allocation25_spill] sm:$0xff] %v13582_v3  ;;  %6844 = vmatpush1.msra.mxu1 %v19020_v14  ;;  %v19026_v14 = vand.u32 4294901760, %v13500_v27  ;;  %v13618_v58 = vand.u32 4294901760, %v6475_v46  ;;  %v19030_v41 = vand.u32 4294901760, %v12803_v5  ;;  %v19031_v28 = vand.u32 4294901760, %v13384_v9 }
 0x576   :  { %v13594_v40 = vsub.f32 %v13487_v44, %v19022_v8  ;;  %19023 = vst [vmem:[#allocation86_spill] sm:$0xff] %v13599_v25  ;;  %6198 = vmatprep.subr.mxu0 %v19024_v29  ;;  %6850 = vmatprep.subr.mxu1 %v19025_v32  ;;  %v19027_v8 = vand.u32 4294901760, %v13503_v56  ;;  %v13624_v29 = vpop.f32.mrf.mxu0  ;;  %v13633_v60 = vand.u32 4294901760, %v6474_v13  ;;  %v19037_v9 = vld [vmem:[#allocation140_spill] sm:$0xff]  ;;  %v6473_v44 = vld [vmem:[#allocation11 + $0x20] sm:$0xff]  ;;  %v19040_v12 = vand.u32 4294901760, %v12824_v2 }
 0x577   :  { %v13608_v62 = vsub.f32 %v13500_v27, %v19026_v14  ;;  %19029 = vst [vmem:[#allocation49_spill] sm:$0xff] %v13618_v58  ;;  %6202 = vmatpush2.msra.mxu0 %v19030_v41  ;;  %6856 = vmatpush1.msra.mxu1 %v19031_v28  ;;  %19032 = vst [vmem:[#allocation28_spill] sm:$0xff] %v13624_v29  ;;  %v19035_v27 = vld [vmem:[#allocation18_spill] sm:$0xff]  ;;  %v19036_v41 = vand.u32 4294901760, %v12815_v4  ;;  %v13643_v14 = vsub.f32 %v6476_v30, %v13582_v3  ;;  %v19044_v32 = vld [vmem:[#allocation151_spill] sm:$0xff] }
 0x578   :  { %v13613_v49 = vsub.f32 %v13503_v56, %v19027_v8  ;;  %v19033_v8 = vand.u32 4294901760, %v13516_v47  ;;  %19034 = vst [vmem:[#allocation50_spill] sm:$0xff] %v13633_v60  ;;  %v4116_v5 = vadd.f32 %v19035_v27, %v13348_v24  ;;  %6407 = vmatmul.mubr.f32.gmra.mxu1 %v19037_v9  ;;  %v13649_v24 = vpop.f32.mrf.mxu1  ;;  %v19042_v27 = vand.u32 4294901760, %v13537_v63  ;;  %v19065_v3 = vld [vmem:[#allocation155_spill] sm:$0xff] }
 0x579   :  { %6206 = vmatprep.subr.mxu0 %v19036_v41  ;;  %19038 = vst [vmem:[#allocation38_spill] sm:$0xff] %v13643_v14  ;;  %19041 = vst [vmem:[#allocation51_spill] sm:$0xff] %v13649_v24  ;;  %v19043_v30 = vand.u32 4294901760, %v13540_v57  ;;  %6413 = vmatprep.mubr.f32.mxu1 %v19044_v32  ;;  %v19045_v2 = vand.u32 4294901760, %v13400_v51  ;;  %v6470_v24 = vld [vmem:[#allocation11 + $0x8] sm:$0xff] }
 0x57a   :  { %v13631_v56 = vsub.f32 %v13516_v47, %v19033_v8  ;;  %v6472_v8 = vld [vmem:[#allocation11 + $0x18] sm:$0xff]  ;;  %v19039_v47 = vand.u32 4294901760, %v13389_v0  ;;  %6210 = vmatpush2.msra.mxu0 %v19040_v12  ;;  %v13655_v41 = vsub.f32 %v13537_v63, %v19042_v27  ;;  %v13670_v63 = vsub.f32 %v6475_v46, %v13618_v58  ;;  %v6469_v27 = vld [vmem:[#allocation11] sm:$0xff]  ;;  %v19052_v46 = vld [vmem:[#allocation175_spill] sm:$0xff]  ;;  %v13697_v58 = vpop.f32.mrf.mxu1 }
 0x57b   :  { %v13660_v28 = vsub.f32 %v13540_v57, %v19043_v30  ;;  %v19047_v30 = vand.u32 4294901760, %v18785_v35  ;;  %v19048_v0 = vand.u32 4294901760, %v13420_v17  ;;  %v4631_v57 = vpop.f32.mrf.mxu0  ;;  %v13680_v12 = vand.u32 4294901760, %v6473_v44  ;;  %19058 = vst [vmem:[#allocation35_spill] sm:$0xff] %v13697_v58 }
 0x57c   :  { %6862 = vmatprep.subr.mxu1 %v19039_v47  ;;  %v6471_v47 = vld [vmem:[#allocation11 + $0x10] sm:$0xff]  ;;  %19046 = vst [vmem:[#allocation158_spill] sm:$0xff] %v13670_v63  ;;  %v13682_v4 = vand.u32 4294901760, %v6472_v8  ;;  %v19053_v54 = vand.u32 4294901760, %v19052_v46  ;;  %v19054_v35 = vand.u32 4294901760, %v13436_v1  ;;  %v19060_v46 = vand.u32 4294901760, %v13599_v25 }
 0x57d   :  { %6868 = vmatpush1.msra.mxu1 %v19045_v2  ;;  %6214 = vmatprep.subr.mxu0 %v19047_v30  ;;  %v13678_v2 = vsub.f32 %v6474_v13, %v13633_v60  ;;  %19050 = vst [vmem:[#allocation33_spill] sm:$0xff] %v13680_v12  ;;  %v19055_v30 = vld [vmem:[#allocation103_spill] sm:$0xff]  ;;  %v13695_v29 = vand.u32 4294901760, %v6471_v47  ;;  %v6532_v60 = vld [vmem:[#allocation11 + $0x1f8] sm:$0xff]  ;;  %v19062_v13 = vand.u32 4294901760, %v13447_v7  ;;  %v13719_v58 = vand.u32 4294901760, %v6469_v27 }
 0x57e   :  { %6874 = vmatprep.subr.mxu1 %v19048_v0  ;;  %19051 = vst [vmem:[#allocation52_spill] sm:$0xff] %v13682_v4  ;;  %6218 = vmatpush2.msra.mxu0 %v19053_v54  ;;  %v4307_v17 = vadd.f32 %v19055_v30, %v4116_v5  ;;  %v19056_v0 = vand.u32 4294901760, %v13580_v48  ;;  %v19059_v54 = vld [vmem:[#allocation150_spill] sm:$0xff]  ;;  %v13708_v30 = vand.u32 4294901760, %v6470_v24  ;;  %v19071_v5 = vand.u32 4294901760, %v13643_v14 }
 0x57f   :  { %19049 = vst [vmem:[#allocation88_spill] sm:$0xff] %v13678_v2  ;;  %6880 = vmatpush1.msra.mxu1 %v19054_v35  ;;  %19057 = vst [vmem:[#allocation75_spill] sm:$0xff] %v13695_v29  ;;  %6222 = vmatmul.mubr.f32.vlgmr.msra.gmra.mxu0 %v19010_v59  ;;  %v13706_v35 = vsub.f32 %v13599_v25, %v19060_v46  ;;  %v6530_v46 = vld [vmem:[#allocation11 + $0x1e8] sm:$0xff]  ;;  %v6529_v25 = vld [vmem:[#allocation11 + $0x1e0] sm:$0xff] }
 0x580   :  { %v13692_v51 = vsub.f32 %v13580_v48, %v19056_v0  ;;  %6415 = vmatmul.mubr.f32.gmra.mxu1 %v19059_v54  ;;  %19061 = vst [vmem:[#allocation44_spill] sm:$0xff] %v13708_v30  ;;  %v6531_v0 = vld [vmem:[#allocation11 + $0x1f0] sm:$0xff]  ;;  %6609 = vmatprep.subr.mxu0 %v13236_v22  ;;  %v4632_v59 = vadd.f32 %v4631_v57, %v4307_v17  ;;  %v19063_v48 = vand.u32 4294901760, %v13616_v20  ;;  %19064 = vst [vmem:[#allocation137_spill] sm:$0xff] %v13719_v58  ;;  %v13723_v22 = vpop.f32.mrf.mxu0 }
 0x581   :  { %6886 = vmatprep.subr.mxu1 %v19062_v13  ;;  %6228 = vmatprep.mubr.f32.mxu0 %v19019_v19  ;;  %19066 = vst [vmem:[#allocation46_spill] sm:$0xff] %v13723_v22  ;;  %v13727_v57 = vsub.f32 %v6473_v44, %v13680_v12  ;;  %v13732_v17 = vand.u32 4294901760, %v6532_v60  ;;  %v19070_v13 = vand.u32 4294901760, %v13474_v23  ;;  %v13744_v44 = vsub.f32 %v6471_v47, %v13695_v29  ;;  %v6528_v47 = vld [vmem:[#allocation11 + $0x1d8] sm:$0xff] }
 0x582   :  { %v13716_v1 = vsub.f32 %v13616_v20, %v19063_v48  ;;  %6421 = vmatprep.mubr.f32.mxu1 %v19065_v3  ;;  %v13730_v48 = vsub.f32 %v6472_v8, %v13682_v4  ;;  %6611 = vmatpush1.msra.mxu0 %v13238_v6  ;;  %v13741_v20 = vsub.f32 %v13643_v14, %v19071_v5  ;;  %v13746_v7 = vand.u32 4294901760, %v6531_v0  ;;  %v13748_v8 = vpop.f32.mrf.mxu1  ;;  %v19079_v22 = vld [vmem:[#allocation172_spill] sm:$0xff] }
 0x583   :  { %19067 = vst [vmem:[#allocation45_spill] sm:$0xff] %v13727_v57  ;;  %19069 = vst [vmem:[#allocation54_spill] sm:$0xff] %v13732_v17  ;;  %6892 = vmatpush1.msra.mxu1 %v19070_v13  ;;  %6613 = vmatprep.subr.mxu0 %v13243_v26  ;;  %v19075_v6 = vand.u32 4294901760, %v13511_v52  ;;  %v13755_v13 = vsub.f32 %v6470_v24, %v13708_v30  ;;  %v13757_v19 = vand.u32 4294901760, %v6530_v46  ;;  %v13759_v5 = vand.u32 4294901760, %v6529_v25 }
 0x584   :  { %19068 = vst [vmem:[#allocation39_spill] sm:$0xff] %v13730_v48  ;;  %19072 = vst [vmem:[#allocation76_spill] sm:$0xff] %v13744_v44  ;;  %v13762_v14 = vadd.f32 %v13533_v61, %v4632_v59  ;;  %6615 = vmatpush1.msra.mxu0 %v19079_v22  ;;  %v19080_v26 = vand.u32 4294901760, %v13525_v37  ;;  %v19081_v52 = vand.u32 4294901760, %v13670_v63  ;;  %v13774_v23 = vsub.f32 %v6469_v27, %v13719_v58  ;;  %v19083_v61 = vld [vmem:[#allocation154_spill] sm:$0xff]  ;;  %v13778_v59 = vpop.f32.mrf.mxu0  ;;  %v19087_v27 = vld [vmem:[#allocation96_spill] sm:$0xff] }
 0x585   :  { %19073 = vst [vmem:[#allocation40_spill] sm:$0xff] %v13746_v7  ;;  %19074 = vst [vmem:[#allocation47_spill] sm:$0xff] %v13748_v8  ;;  %6898 = vmatprep.subr.mxu1 %v19075_v6  ;;  %v6527_v8 = vld [vmem:[#allocation11 + $0x1d0] sm:$0xff]  ;;  %6230 = vmatmul.mubr.f32.gmra.mxu0 %v19037_v9  ;;  %v19085_v37 = vand.u32 4294901760, %v13678_v2  ;;  %v19088_v9 = vand.u32 4294901760, %v13561_v39  ;;  %v13796_v58 = vsub.f32 %v6531_v0, %v13746_v7  ;;  %v13800_v6 = vpop.f32.mrf.mxu1  ;;  %v6526_v0 = vld [vmem:[#allocation11 + $0x1c8] sm:$0xff] }
 0x586   :  { %19076 = vst [vmem:[#allocation81_spill] sm:$0xff] %v13755_v13  ;;  %19077 = vst [vmem:[#allocation41_spill] sm:$0xff] %v13757_v19  ;;  %6904 = vmatpush1.msra.mxu1 %v19080_v26  ;;  %v13771_v24 = vsub.f32 %v13670_v63, %v19081_v52  ;;  %v13788_v63 = vsub.f32 %v6532_v60, %v13732_v17  ;;  %6617 = vmatprep.subr.mxu0 %v19087_v27  ;;  %v19092_v60 = vld [vmem:[#allocation82_spill] sm:$0xff]  ;;  %v13811_v22 = vand.u32 4294901760, %v6527_v8  ;;  %v19109_v52 = vld [vmem:[#allocation73_spill] sm:$0xff] }
 0x587   :  { %19078 = vst [vmem:[#allocation48_spill] sm:$0xff] %v13759_v5  ;;  %19082 = vst [vmem:[#allocation43_spill] sm:$0xff] %v13774_v23  ;;  %6423 = vmatmul.mubr.f32.gmra.mxu1 %v19083_v61  ;;  %v13783_v26 = vsub.f32 %v13678_v2, %v19085_v37  ;;  %6910 = vmatprep.subr.mxu1 %v19088_v9  ;;  %v13798_v37 = vand.u32 4294901760, %v6528_v47  ;;  %v13806_v39 = vsub.f32 %v6530_v46, %v13757_v19  ;;  %v6525_v46 = vld [vmem:[#allocation11 + $0x1c0] sm:$0xff] }
 0x588   :  { %19084 = vst [vmem:[#allocation55_spill] sm:$0xff] %v13778_v59  ;;  %19086 = vst [vmem:[#allocation56_spill] sm:$0xff] %v13788_v63  ;;  %6236 = vmatprep.mubr.f32.mxu0 %v19044_v32  ;;  %6429 = vmatprep.mubr.f32.mxu1 %v19092_v60  ;;  %v13809_v9 = vsub.f32 %v6529_v25, %v13759_v5  ;;  %v19096_v59 = vld [vmem:[#allocation74_spill] sm:$0xff]  ;;  %v6446_v27 = vmax.f32 %v13762_v14, 0.0  ;;  %v19098_v32 = vand.u32 4294901760, %v13566_v11  ;;  %v19099_v25 = vand.u32 4294901760, %v13577_v16  ;;  %v13824_v5 = vpop.f32.mrf.mxu0 }
 0x589   :  { %19089 = vst [vmem:[#allocation85_spill] sm:$0xff] %v13796_v58  ;;  %19090 = vst [vmem:[#allocation58_spill] sm:$0xff] %v13798_v37  ;;  %v4126_v2 = vadd.f32 %v19096_v59, %v13351_v50  ;;  %v19101_v14 = vand.u32 4294901760, %v13727_v57  ;;  %v19102_v11 = vand.u32 4294901760, %v13730_v48  ;;  %v19104_v16 = vand.u32 4294901760, %v13594_v40  ;;  %6238 = vmatmul.mubr.f32.gmra.mxu0 %v19059_v54 }
 0x58a   :  { %19091 = vst [vmem:[#allocation68_spill] sm:$0xff] %v13800_v6  ;;  %19093 = vst [vmem:[#allocation63_spill] sm:$0xff] %v13806_v39  ;;  %v19097_v6 = vld [vmem:[#allocation106_spill] sm:$0xff]  ;;  %6916 = vmatpush1.msra.mxu1 %v19098_v32  ;;  %v19110_v40 = vand.u32 4294901760, %v13755_v13  ;;  %v19115_v54 = vand.u32 4294901760, %v13608_v62  ;;  %6244 = vmatprep.mubr.f32.mxu0 %v19065_v3  ;;  %v19130_v3 = vand.u32 4294901760, %v13806_v39 }
 0x58b   :  { %19094 = vst [vmem:[#allocation70_spill] sm:$0xff] %v13809_v9  ;;  %19095 = vst [vmem:[#allocation64_spill] sm:$0xff] %v13811_v22  ;;  %6619 = vmatpush1.msra.mxu0 %v19097_v6  ;;  %6922 = vmatprep.subr.mxu1 %v19099_v25  ;;  %v13830_v59 = vsub.f32 %v13727_v57, %v19101_v14  ;;  %v13835_v32 = vsub.f32 %v13730_v48, %v19102_v11  ;;  %v19105_v25 = vand.u32 4294901760, %v13744_v44  ;;  %v13852_v48 = vpop.f32.mrf.mxu1  ;;  %v19118_v14 = vld [vmem:[#allocation138_spill] sm:$0xff] }
 0x58c   :  { %6621 = vmatprep.subr.mxu0 %v13279_v38  ;;  %19100 = vst [vmem:[#allocation62_spill] sm:$0xff] %v13824_v5  ;;  %v19103_v38 = vld [vmem:[#allocation125_spill] sm:$0xff]  ;;  %6928 = vmatpush1.msra.mxu1 %v19104_v16  ;;  %v13848_v57 = vsub.f32 %v6528_v47, %v13798_v37  ;;  %v13850_v11 = vand.u32 4294901760, %v6526_v0  ;;  %19108 = vst [vmem:[#allocation90_spill] sm:$0xff] %v13852_v48  ;;  %v13859_v16 = vsub.f32 %v13755_v13, %v19110_v40  ;;  %v19120_v5 = vld [vmem:[#allocation84_spill] sm:$0xff] }
 0x58d   :  { %6623 = vmatpush1.msra.mxu0 %v19103_v38  ;;  %v13844_v50 = vsub.f32 %v13744_v44, %v19105_v25  ;;  %6431 = vmatmul.mubr.f32.gmra.mxu1 %v19109_v52  ;;  %v13864_v47 = vsub.f32 %v6527_v8, %v13811_v22  ;;  %v13866_v44 = vand.u32 4294901760, %v6446_v27  ;;  %v19113_v38 = vld [vmem:[#allocation149_spill] sm:$0xff]  ;;  %v19116_v40 = vand.u32 4294901760, %v13774_v23  ;;  %v19119_v8 = vld [vmem:[#allocation87_spill] sm:$0xff]  ;;  %v13907_v22 = vpop.f32.mrf.mxu1 }
 0x58e   :  { %19106 = vst [vmem:[#allocation57_spill] sm:$0xff] %v13848_v57  ;;  %19107 = vst [vmem:[#allocation69_spill] sm:$0xff] %v13850_v11  ;;  %v13869_v6 = vadd.f32 %v19113_v38, %v4126_v2  ;;  %6625 = vmatprep.subr.mxu0 %v13300_v21  ;;  %6934 = vmatprep.subr.mxu1 %v19115_v54  ;;  %v13879_v25 = vand.u32 4294901760, %v6525_v46  ;;  %v4136_v48 = vadd.f32 %v19119_v8, %v19118_v14  ;;  %v13885_v38 = vpop.f32.mrf.mxu0  ;;  %v19123_v21 = vld [vmem:[#allocation130_spill] sm:$0xff] }
 0x58f   :  { %19111 = vst [vmem:[#allocation60_spill] sm:$0xff] %v13864_v47  ;;  %19112 = vst [vmem:[#allocation99_spill] sm:$0xff] %v13866_v44  ;;  %v13877_v13 = vsub.f32 %v13774_v23, %v19116_v40  ;;  %6437 = vmatprep.mubr.f32.mxu1 %v19120_v5  ;;  %v19122_v54 = vand.u32 4294901760, %v13788_v63  ;;  %v6524_v23 = vld [vmem:[#allocation11 + $0x1b8] sm:$0xff]  ;;  %6627 = vmatpush1.msra.mxu0 %v19123_v21  ;;  %v19124_v14 = vand.u32 4294901760, %v13613_v49  ;;  %v19125_v8 = vand.u32 4294901760, %v13796_v58  ;;  %v13962_v37 = vpop.f32.mrf.mxu1 }
 0x590   :  { %19114 = vst [vmem:[#allocation72_spill] sm:$0xff] %v13869_v6  ;;  %19117 = vst [vmem:[#allocation104_spill] sm:$0xff] %v13879_v25  ;;  %v13905_v2 = vsub.f32 %v6526_v0, %v13850_v11  ;;  %v19128_v21 = vld [vmem:[#allocation168_spill] sm:$0xff]  ;;  %v19129_v49 = vand.u32 4294901760, %v13631_v56  ;;  %v19131_v62 = vand.u32 4294901760, %v13809_v9  ;;  %v19134_v56 = vand.u32 4294901760, %v13655_v41  ;;  %6246 = vmatmul.mubr.f32.gmra.mxu0 %v19083_v61 }
 0x591   :  { %19121 = vst [vmem:[#allocation65_spill] sm:$0xff] %v13885_v38  ;;  %v13892_v40 = vsub.f32 %v13788_v63, %v19122_v54  ;;  %6940 = vmatpush1.msra.mxu1 %v19124_v14  ;;  %v13901_v38 = vsub.f32 %v13796_v58, %v19125_v8  ;;  %v6523_v54 = vld [vmem:[#allocation11 + $0x1b0] sm:$0xff]  ;;  %v6522_v63 = vld [vmem:[#allocation11 + $0x1a8] sm:$0xff]  ;;  %19127 = vst [vmem:[#allocation107_spill] sm:$0xff] %v13907_v22  ;;  %6629 = vmatprep.subr.mxu0 %v19128_v21  ;;  %v13934_v14 = vand.u32 4294901760, %v6524_v23  ;;  %v13939_v58 = vpop.f32.mrf.mxu0 }
 0x592   :  { %19126 = vst [vmem:[#allocation80_spill] sm:$0xff] %v13905_v2  ;;  %6946 = vmatprep.subr.mxu1 %v19129_v49  ;;  %v13916_v8 = vsub.f32 %v13806_v39, %v19130_v3  ;;  %v13921_v0 = vsub.f32 %v13809_v9, %v19131_v62  ;;  %v13925_v22 = vsub.f32 %v6446_v27, %v13866_v44  ;;  %v19133_v21 = vld [vmem:[#allocation145_spill] sm:$0xff]  ;;  %19138 = vst [vmem:[#allocation163_spill] sm:$0xff] %v13939_v58  ;;  %v19139_v27 = vld [vmem:[#allocation79_spill] sm:$0xff] }
 0x593   :  { %6631 = vmatpush1.msra.mxu0 %v19133_v21  ;;  %6952 = vmatpush1.msra.mxu1 %v19134_v56  ;;  %v13932_v3 = vsub.f32 %v6525_v46, %v13879_v25  ;;  %v6521_v39 = vld [vmem:[#allocation11 + $0x1a0] sm:$0xff]  ;;  %v13944_v56 = vand.u32 4294901760, %v6523_v54  ;;  %v13946_v49 = vand.u32 4294901760, %v6522_v63  ;;  %v6520_v46 = vld [vmem:[#allocation11 + $0x198] sm:$0xff]  ;;  %v19142_v25 = vld [vmem:[#allocation91_spill] sm:$0xff]  ;;  %19146 = vst [vmem:[#allocation177_spill] sm:$0xff] %v13962_v37  ;;  %v14013_v37 = vpop.f32.mrf.mxu1 }
 0x594   :  { %19132 = vst [vmem:[#allocation71_spill] sm:$0xff] %v13925_v22  ;;  %v19136_v62 = vld [vmem:[#allocation77_spill] sm:$0xff]  ;;  %6439 = vmatmul.mubr.f32.gmra.mxu1 %v19139_v27  ;;  %v19141_v21 = vld [vmem:[#allocation156_spill] sm:$0xff]  ;;  %6633 = vmatprep.subr.mxu0 %v13410_v15  ;;  %v6518_v6 = vld [vmem:[#allocation11 + $0x188] sm:$0xff]  ;;  %v13985_v15 = vpop.f32.mrf.mxu0 }
 0x595   :  { %19135 = vst [vmem:[#allocation100_spill] sm:$0xff] %v13932_v3  ;;  %v13937_v9 = vadd.f32 %v19136_v62, %v4136_v48  ;;  %19140 = vst [vmem:[#allocation98_spill] sm:$0xff] %v13946_v49  ;;  %v13950_v11 = vadd.f32 %v19142_v25, %v19141_v21  ;;  %v19144_v48 = vand.u32 4294901760, %v13660_v28  ;;  %v19145_v62 = vand.u32 4294901760, %v13848_v57  ;;  %6252 = vmatprep.mubr.f32.mxu0 %v19092_v60  ;;  %v6517_v61 = vld [vmem:[#allocation11 + $0x180] sm:$0xff]  ;;  %v6516_v58 = vld [vmem:[#allocation11 + $0x178] sm:$0xff] }
 0x596   :  { %6635 = vmatpush1.msra.mxu0 %v13412_v45  ;;  %v19147_v25 = vand.u32 4294901760, %v13864_v47  ;;  %7218 = vmatprep.mubr.f32.mxu1 %v13866_v44  ;;  %v13981_v28 = vsub.f32 %v6524_v23, %v13934_v14  ;;  %v13983_v45 = vand.u32 4294901760, %v6520_v46  ;;  %19152 = vst [vmem:[#allocation112_spill] sm:$0xff] %v13985_v15  ;;  %v13994_v60 = vsub.f32 %v6522_v63, %v13946_v49 }
 0x597   :  { %19137 = vst [vmem:[#allocation109_spill] sm:$0xff] %v13937_v9  ;;  %19143 = vst [vmem:[#allocation170_spill] sm:$0xff] %v13950_v11  ;;  %6958 = vmatprep.subr.mxu1 %v19144_v48  ;;  %v13959_v41 = vsub.f32 %v13848_v57, %v19145_v62  ;;  %v6519_v9 = vld [vmem:[#allocation11 + $0x190] sm:$0xff]  ;;  %v13973_v62 = vand.u32 4294901760, %v6521_v39  ;;  %v19149_v57 = vand.u32 4294901760, %v13692_v51  ;;  %6637 = vmatprep.subr.mxu0 %v13426_v43  ;;  %v19153_v51 = vand.u32 4294901760, %v13706_v35 }
 0x598   :  { %v13971_v48 = vsub.f32 %v13864_v47, %v19147_v25  ;;  %19150 = vst [vmem:[#allocation111_spill] sm:$0xff] %v13981_v28  ;;  %19151 = vst [vmem:[#allocation94_spill] sm:$0xff] %v13983_v45  ;;  %v6515_v25 = vld [vmem:[#allocation11 + $0x170] sm:$0xff]  ;;  %v6514_v47 = vld [vmem:[#allocation11 + $0x168] sm:$0xff]  ;;  %v13996_v21 = vand.u32 4294901760, %v6519_v9  ;;  %v13998_v23 = vand.u32 4294901760, %v6518_v6  ;;  %6639 = vmatpush1.msra.mxu0 %v13438_v31  ;;  %v14038_v15 = vsub.f32 %v6520_v46, %v13983_v45 }
 0x599   :  { %19148 = vst [vmem:[#allocation101_spill] sm:$0xff] %v13973_v62  ;;  %6964 = vmatpush1.msra.mxu1 %v19149_v57  ;;  %v13991_v57 = vsub.f32 %v6523_v54, %v13944_v56  ;;  %19155 = vst [vmem:[#allocation115_spill] sm:$0xff] %v13994_v60  ;;  %v19158_v44 = vand.u32 4294901760, %v13716_v1  ;;  %v19159_v35 = vand.u32 4294901760, %v13905_v2  ;;  %v14009_v54 = vand.u32 4294901760, %v6517_v61  ;;  %6254 = vmatmul.mubr.f32.gmra.mxu0 %v19109_v52  ;;  %v6512_v11 = vld [vmem:[#allocation11 + $0x158] sm:$0xff] }
 0x59a   :  { %6970 = vmatprep.subr.mxu1 %v19153_v51  ;;  %19156 = vst [vmem:[#allocation171_spill] sm:$0xff] %v13996_v21  ;;  %19157 = vst [vmem:[#allocation176_spill] sm:$0xff] %v13998_v23  ;;  %v14011_v63 = vand.u32 4294901760, %v6516_v58  ;;  %6641 = vmatprep.subr.mxu0 %v13449_v36  ;;  %v14021_v43 = vand.u32 4294901760, %v6515_v25  ;;  %v14023_v31 = vand.u32 4294901760, %v6514_v47  ;;  %v19168_v36 = vand.u32 4294901760, %v13932_v3 }
 0x59b   :  { %19154 = vst [vmem:[#allocation114_spill] sm:$0xff] %v13991_v57  ;;  %6976 = vmatpush1.msra.mxu1 %v19158_v44  ;;  %v14007_v51 = vsub.f32 %v13905_v2, %v19159_v35  ;;  %19160 = vst [vmem:[#allocation97_spill] sm:$0xff] %v14009_v54  ;;  %v14019_v44 = vsub.f32 %v6521_v39, %v13973_v62  ;;  %v6513_v35 = vld [vmem:[#allocation11 + $0x160] sm:$0xff]  ;;  %v19166_v2 = vand.u32 4294901760, %v13741_v20  ;;  %6260 = vmatprep.mubr.f32.mxu0 %v19120_v5  ;;  %v14040_v62 = vpop.f32.mrf.mxu0 }
 0x59c   :  { %19161 = vst [vmem:[#allocation126_spill] sm:$0xff] %v14011_v63  ;;  %19162 = vst [vmem:[#allocation108_spill] sm:$0xff] %v14013_v37  ;;  %v19167_v37 = vand.u32 4294901760, %v13925_v22  ;;  %v14034_v1 = vsub.f32 %v13932_v3, %v19168_v36  ;;  %6643 = vmatpush1.msra.mxu0 %v13451_v34  ;;  %v19170_v20 = vand.u32 4294901760, %v13771_v24  ;;  %v14048_v36 = vsub.f32 %v6519_v9, %v13996_v21  ;;  %v14065_v9 = vpop.f32.mrf.mxu1 }
 0x59d   :  { %19163 = vst [vmem:[#allocation121_spill] sm:$0xff] %v14019_v44  ;;  %19164 = vst [vmem:[#allocation129_spill] sm:$0xff] %v14021_v43  ;;  %6982 = vmatprep.subr.mxu1 %v19166_v2  ;;  %v14051_v2 = vsub.f32 %v6518_v6, %v13998_v23  ;;  %6645 = vmatprep.subr.mxu0 %v13465_v42  ;;  %v19173_v46 = vand.u32 4294901760, %v13783_v26  ;;  %v14058_v24 = vsub.f32 %v6517_v61, %v14009_v54  ;;  %v14088_v26 = vpop.f32.mrf.mxu0  ;;  %v6503_v42 = vld [vmem:[#allocation11 + $0x110] sm:$0xff] }
 0x59e   :  { %19165 = vst [vmem:[#allocation131_spill] sm:$0xff] %v14023_v31  ;;  %v6739_v52 = vsub.f32 %v13925_v22, %v19167_v37  ;;  %19169 = vst [vmem:[#allocation164_spill] sm:$0xff] %v14038_v15  ;;  %6988 = vmatpush1.msra.mxu1 %v19170_v20  ;;  %v14061_v20 = vsub.f32 %v6516_v58, %v14011_v63  ;;  %v14063_v37 = vand.u32 4294901760, %v6513_v35  ;;  %6647 = vmatpush1.msra.mxu0 %v13489_v55  ;;  %v6511_v58 = vld [vmem:[#allocation11 + $0x150] sm:$0xff] }
 0x59f   :  { %19171 = vst [vmem:[#allocation166_spill] sm:$0xff] %v14048_v36  ;;  %19172 = vst [vmem:[#allocation167_spill] sm:$0xff] %v14051_v2  ;;  %6994 = vmatprep.subr.mxu1 %v19173_v46  ;;  %v19178_v6 = vand.u32 4294901760, %v13830_v59  ;;  %v14072_v46 = vsub.f32 %v6515_v25, %v14021_v43  ;;  %v14075_v61 = vsub.f32 %v6514_v47, %v14023_v31  ;;  %v14077_v39 = vand.u32 4294901760, %v6512_v11 }
 0x5a0   :  { %19174 = vst [vmem:[#allocation169_spill] sm:$0xff] %v14058_v24  ;;  %19175 = vst [vmem:[#allocation122_spill] sm:$0xff] %v14061_v20  ;;  %6262 = vmatmul.mubr.f32.gmra.mxu0 %v19139_v27  ;;  %6649 = vmatprep.subr.mxu0 %v13491_v53  ;;  %v6740_v5 = vand.u32 4294901760, %v6739_v52  ;;  %v19182_v59 = vand.u32 4294901760, %v13981_v28  ;;  %v19183_v47 = vand.u32 4294901760, %v13835_v32  ;;  %v19184_v27 = vand.u32 4294901760, %v13991_v57  ;;  %v14105_v53 = vpop.f32.mrf.mxu1 }
 0x5a1   :  { %19176 = vst [vmem:[#allocation173_spill] sm:$0xff] %v14063_v37  ;;  %19177 = vst [vmem:[#allocation17_spill] sm:$0xff] %v14065_v9  ;;  %7000 = vmatpush1.msra.mxu1 %v19178_v6  ;;  %6651 = vmatpush1.msra.mxu0 %v13528_v33  ;;  %v19185_v3 = vand.u32 4294901760, %v13994_v60  ;;  %v19186_v32 = vand.u32 4294901760, %v13844_v50  ;;  %v19189_v25 = vand.u32 4294901760, %v13859_v16  ;;  %v19201_v33 = vld [vmem:[#allocation49_spill] sm:$0xff] }
 0x5a2   :  { %19179 = vst [vmem:[#allocation135_spill] sm:$0xff] %v14072_v46  ;;  %19180 = vst [vmem:[#allocation142_spill] sm:$0xff] %v14075_v61  ;;  %v14085_v6 = vsub.f32 %v13981_v28, %v19182_v59  ;;  %7006 = vmatprep.subr.mxu1 %v19183_v47  ;;  %v14096_v52 = vsub.f32 %v13991_v57, %v19184_v27  ;;  %v6510_v28 = vld [vmem:[#allocation11 + $0x148] sm:$0xff]  ;;  %6741 = vmatprep.mubr.f32.mxu0 %v6740_v5  ;;  %v19190_v59 = vand.u32 4294901760, %v14019_v44  ;;  %v14140_v50 = vpop.f32.mrf.mxu1 }
 0x5a3   :  { %19181 = vst [vmem:[#allocation18_spill] sm:$0xff] %v14077_v39  ;;  %v14101_v22 = vsub.f32 %v13994_v60, %v19185_v3  ;;  %7012 = vmatpush1.msra.mxu1 %v19186_v32  ;;  %v14112_v57 = vsub.f32 %v6513_v35, %v14063_v37  ;;  %v14114_v3 = vand.u32 4294901760, %v6511_v58  ;;  %6653 = vmatprep.subr.mxu0 %v13542_v18  ;;  %v19192_v35 = vand.u32 4294901760, %v13877_v13  ;;  %v19195_v32 = vld [vmem:[#allocation132_spill] sm:$0xff]  ;;  %v19197_v60 = vld [vmem:[#allocation25_spill] sm:$0xff] }
 0x5a4   :  { %7018 = vmatprep.subr.mxu1 %v19189_v25  ;;  %v14122_v5 = vsub.f32 %v14019_v44, %v19190_v59  ;;  %v14127_v27 = vsub.f32 %v6512_v11, %v14077_v39  ;;  %6655 = vmatpush1.msra.mxu0 %v13552_v10  ;;  %v19193_v25 = vand.u32 4294901760, %v14038_v15  ;;  %v14138_v59 = vand.u32 4294901760, %v6510_v28  ;;  %19194 = vst [vmem:[#allocation103_spill] sm:$0xff] %v14140_v50  ;;  %v14143_v11 = vpop.f32.mrf.mxu0  ;;  %v6509_v18 = vld [vmem:[#allocation11 + $0x140] sm:$0xff] }
 0x5a5   :  { %19187 = vst [vmem:[#allocation140_spill] sm:$0xff] %v14112_v57  ;;  %19188 = vst [vmem:[#allocation151_spill] sm:$0xff] %v14114_v3  ;;  %7024 = vmatpush1.msra.mxu1 %v19192_v35  ;;  %v3247_v44 = vsub.s32 2, %v19195_v32  ;;  %6657 = vmatprep.subr.mxu0 %v19197_v60  ;;  %v19198_v13 = vand.u32 4294901760, %v13892_v40  ;;  %v19200_v50 = vand.u32 4294901760, %v14051_v2  ;;  %v19202_v40 = vand.u32 4294901760, %v13901_v38 }
 0x5a6   :  { %19191 = vst [vmem:[#allocation175_spill] sm:$0xff] %v14127_v27  ;;  %v14136_v47 = vsub.f32 %v14038_v15, %v19193_v25  ;;  %19196 = vst [vmem:[#allocation150_spill] sm:$0xff] %v14143_v11  ;;  %v19199_v25 = vand.u32 4294901760, %v14048_v36  ;;  %6659 = vmatpush1.msra.mxu0 %v19201_v33  ;;  %v19204_v35 = vand.u32 4294901760, %v14061_v20  ;;  %v6507_v33 = vld [vmem:[#allocation11 + $0x130] sm:$0xff]  ;;  %v19206_v60 = vld [vmem:[#allocation50_spill] sm:$0xff] }
 0x5a7   :  { %7030 = vmatprep.subr.mxu1 %v19198_v13  ;;  %v14158_v10 = vsub.f32 %v14051_v2, %v19200_v50  ;;  %v19203_v13 = vand.u32 4294901760, %v14058_v24  ;;  %v14175_v50 = vsub.f32 %v6511_v58, %v14114_v3  ;;  %v6508_v2 = vld [vmem:[#allocation11 + $0x138] sm:$0xff]  ;;  %6661 = vmatprep.subr.mxu0 %v19206_v60  ;;  %v19207_v38 = vand.u32 4294901760, %v13916_v8  ;;  %v14208_v58 = vpop.f32.mrf.mxu0  ;;  %v19230_v11 = vld [vmem:[#allocation161_spill] sm:$0xff] }
 0x5a8   :  { %v14153_v15 = vsub.f32 %v14048_v36, %v19199_v25  ;;  %7036 = vmatpush2.msra.mxu1 %v19202_v40  ;;  %v14171_v25 = vsub.f32 %v14061_v20, %v19204_v35  ;;  %v19209_v35 = vand.u32 4294901760, %v14075_v61  ;;  %6663 = vmatpush1.msra.mxu0 %v13680_v12  ;;  %v19210_v20 = vand.u32 4294901760, %v13921_v0  ;;  %v14203_v60 = vld [vmem:[#allocation7 + $0x3] ss:$8 sm:$0xf]  ;;  %19212 = vst [vmem:[#allocation82_spill] sm:$0xff] %v14208_v58 }
 0x5a9   :  { %v14166_v16 = vsub.f32 %v14058_v24, %v19203_v13  ;;  %19205 = vst [vmem:[#allocation155_spill] sm:$0xff] %v14175_v50  ;;  %7042 = vmatprep.subr.mxu1 %v19207_v38  ;;  %v19208_v13 = vand.u32 4294901760, %v14072_v46  ;;  %v14197_v38 = vsub.f32 %v6510_v28, %v14138_v59  ;;  %v14199_v40 = vand.u32 4294901760, %v6509_v18  ;;  %6665 = vmatprep.subr.mxu0 %v13682_v4  ;;  %v6505_v12 = vld [vmem:[#allocation11 + $0x120] sm:$0xff]  ;;  %v6504_v28 = vld [vmem:[#allocation11 + $0x118] sm:$0xff] }
 0x5aa   :  { %v14189_v36 = vsub.f32 %v14075_v61, %v19209_v35  ;;  %7048 = vmatpush2.msra.mxu1 %v19210_v20  ;;  %v14206_v35 = vrot.slane %v14203_v60, %v3247_v44  ;;  %v19213_v0 = vand.u32 4294901760, %v13959_v41  ;;  %v14215_v8 = vand.u32 4294901760, %v6508_v2  ;;  %6667 = vmatpush1.msra.mxu0 %v13695_v29  ;;  %v19219_v20 = vld [vmem:[#allocation137_spill] sm:$0xff]  ;;  %v19231_v58 = vld [vmem:[#allocation28_spill] sm:$0xff] }
 0x5ab   :  { %v14184_v24 = vsub.f32 %v14072_v46, %v19208_v13  ;;  %19211 = vst [vmem:[#allocation154_spill] sm:$0xff] %v14197_v38  ;;  %v6506_v13 = vld [vmem:[#allocation11 + $0x128] sm:$0xff]  ;;  %v14201_v46 = vpop.f32.mrf.mxu1  ;;  %v14217_v61 = vand.u32 4294901760, %v6507_v33  ;;  %v19215_v44 = vand.u32 4294901760, %v13971_v48  ;;  %v19216_v41 = vand.u32 4294901760, %v14112_v57  ;;  %6669 = vmatprep.subr.mxu0 %v13708_v30  ;;  %v6501_v30 = vld [vmem:[#allocation11 + $0x100] sm:$0xff] }
 0x5ac   :  { %7054 = vmatprep.subr.mxu1 %v19213_v0  ;;  %v19217_v29 = vand.u32 4294901760, %v14007_v51  ;;  %v19218_v4 = vand.u32 4294901760, %v14127_v27  ;;  %6671 = vmatpush1.msra.mxu0 %v19219_v20  ;;  %v19220_v34 = vand.u32 4294901760, %v14034_v1  ;;  %v14249_v48 = vand.u32 4294901760, %v6505_v12 }
 0x5ad   :  { %19214 = vst [vmem:[#allocation74_spill] sm:$0xff] %v14217_v61  ;;  %7060 = vmatpush2.msra.mxu1 %v19215_v44  ;;  %v14227_v0 = vsub.f32 %v14112_v57, %v19216_v41  ;;  %v14240_v41 = vand.u32 4294901760, %v6506_v13  ;;  %v4991_v57 = vpop.f32.mrf.mxu0  ;;  %v6502_v44 = vld [vmem:[#allocation11 + $0x108] sm:$0xff]  ;;  %v14251_v9 = vpop.f32.mrf.mxu1  ;;  %6673 = vmatprep.subr.mxu0 %v13732_v17  ;;  %v14261_v1 = vsub.f32 %v6507_v33, %v14217_v61  ;;  %v14265_v51 = vand.u32 4294901760, %v6503_v42 }
 0x5ae   :  { %7066 = vmatprep.subr.mxu1 %v19217_v29  ;;  %v14238_v55 = vsub.f32 %v14127_v27, %v19218_v4  ;;  %v14247_v29 = vsub.f32 %v6509_v18, %v14199_v40  ;;  %19222 = vst [vmem:[#allocation149_spill] sm:$0xff] %v14249_v48  ;;  %v4992_v4 = vadd.f32 %v4991_v57, %v14206_v35  ;;  %v19223_v27 = vand.u32 4294901760, %v14085_v6 }
 0x5af   :  { %7072 = vmatpush2.msra.mxu1 %v19220_v34  ;;  %v14258_v34 = vsub.f32 %v6508_v2, %v14215_v8  ;;  %19225 = vst [vmem:[#allocation87_spill] sm:$0xff] %v14261_v1  ;;  %v14263_v18 = vand.u32 4294901760, %v6504_v28  ;;  %v14267_v20 = vpop.f32.mrf.mxu0  ;;  %6675 = vmatpush2.msra.mxu0 %v13746_v7  ;;  %v19227_v57 = vand.u32 4294901760, %v14096_v52  ;;  %v3251_v33 = vsub.s32 3, %v19195_v32 }
 0x5b0   :  { %19221 = vst [vmem:[#allocation73_spill] sm:$0xff] %v14247_v29  ;;  %7078 = vmatprep.subr.mxu1 %v19223_v27  ;;  %19226 = vst [vmem:[#allocation84_spill] sm:$0xff] %v14267_v20  ;;  %v19228_v27 = vand.u32 4294901760, %v14175_v50  ;;  %v14280_v17 = vadd.f32 %v14105_v53, %v4992_v4  ;;  %v4630_v20 = vadd.f32 %v19231_v58, %v19230_v11  ;;  %6677 = vmatprep.subr.mxu0 %v13757_v19  ;;  %v14307_v4 = vpop.f32.mrf.mxu1  ;;  %v19244_v19 = vld [vmem:[#allocation64_spill] sm:$0xff] }
 0x5b1   :  { %19224 = vst [vmem:[#allocation138_spill] sm:$0xff] %v14258_v34  ;;  %7084 = vmatpush2.msra.mxu1 %v19227_v57  ;;  %v19232_v52 = vand.u32 4294901760, %v14101_v22  ;;  %v14288_v57 = vsub.f32 %v6506_v13, %v14240_v41  ;;  %v14290_v6 = vand.u32 4294901760, %v6502_v44  ;;  %v19235_v53 = vand.u32 4294901760, %v14122_v5  ;;  %v5007_v22 = vpop.f32.mrf.mxu0 }
 0x5b2   :  { %v14276_v2 = vsub.f32 %v14175_v50, %v19228_v27  ;;  %19229 = vst [vmem:[#allocation77_spill] sm:$0xff] %v14280_v17  ;;  %v14292_v27 = vand.u32 4294901760, %v6501_v30  ;;  %v19234_v50 = vld [vmem:[#allocation48_spill] sm:$0xff]  ;;  %v7149_v32 = vand.u32 4294901760, %v14238_v55  ;;  %v19236_v11 = vand.u32 4294901760, %v14197_v38  ;;  %v19247_v55 = vld [vmem:[#allocation141_spill] sm:$0xff] }
 0x5b3   :  { %7090 = vmatprep.subr.mxu1 %v19232_v52  ;;  %19233 = vst [vmem:[#allocation79_spill] sm:$0xff] %v14288_v57  ;;  %6679 = vmatpush2.msra.mxu0 %v19234_v50  ;;  %v14305_v13 = vsub.f32 %v6505_v12, %v14249_v48  ;;  %v19238_v52 = vld [vmem:[#allocation58_spill] sm:$0xff]  ;;  %v19239_v17 = vand.u32 4294901760, %v14136_v47  ;;  %v19242_v12 = vld [vmem:[#allocation72_spill] sm:$0xff]  ;;  %v14327_v47 = vrot.slane %v14203_v60, %v3251_v33  ;;  %v19249_v7 = vand.u32 4294901760, %v14158_v10  ;;  %v5009_v60 = vpop.f32.mrf.mxu0 }
 0x5b4   :  { %7096 = vmatpush2.msra.mxu1 %v19235_v53  ;;  %v14301_v58 = vsub.f32 %v14197_v38, %v19236_v11  ;;  %6681 = vmatprep.subr.mxu0 %v19238_v52  ;;  %v14315_v53 = vsub.f32 %v6504_v28, %v14263_v18  ;;  %v14318_v11 = vsub.f32 %v6503_v42, %v14265_v51  ;;  %v19243_v38 = vld [vmem:[#allocation55_spill] sm:$0xff]  ;;  %v19245_v52 = vand.u32 4294901760, %v14153_v15  ;;  %v19248_v42 = vld [vmem:[#allocation69_spill] sm:$0xff]  ;;  %v19252_v33 = vld [vmem:[#allocation104_spill] sm:$0xff] }
 0x5b5   :  { %19237 = vst [vmem:[#allocation156_spill] sm:$0xff] %v14305_v13  ;;  %7102 = vmatprep.subr.mxu1 %v19239_v17  ;;  %v4640_v50 = vadd.f32 %v19243_v38, %v19242_v12  ;;  %6683 = vmatpush2.msra.mxu0 %v19244_v19  ;;  %v7155_v17 = vand.u32 4294901760, %v14276_v2  ;;  %19246 = vst [vmem:[#allocation161_spill] sm:$0xff] %v14327_v47  ;;  %v5008_v28 = vadd.f32 %v5007_v22, %v14206_v35  ;;  %v19259_v38 = vld [vmem:[#allocation67_spill] sm:$0xff] }
 0x5b6   :  { %19240 = vst [vmem:[#allocation91_spill] sm:$0xff] %v14315_v53  ;;  %19241 = vst [vmem:[#allocation132_spill] sm:$0xff] %v14318_v11  ;;  %7108 = vmatpush2.msra.mxu1 %v19245_v52  ;;  %v14331_v5 = vadd.f32 %v19247_v55, %v4630_v20  ;;  %6685 = vmatprep.subr.mxu0 %v19248_v42  ;;  %v14338_v15 = vsub.f32 %v6502_v44, %v14290_v6  ;;  %v19253_v22 = vand.u32 4294901760, %v14166_v16 }
 0x5b7   :  { %7114 = vmatprep.subr.mxu1 %v19249_v7  ;;  %v14341_v2 = vsub.f32 %v6501_v30, %v14292_v27  ;;  %6687 = vmatpush2.msra.mxu0 %v19252_v33  ;;  %v19254_v20 = vand.u32 4294901760, %v14247_v29  ;;  %v5482_v7 = vpop.f32.mrf.mxu1  ;;  %v5010_v55 = vadd.f32 %v5009_v60, %v14327_v47  ;;  %v14352_v44 = vadd.f32 %v14201_v46, %v5008_v28  ;;  %v19260_v46 = vld [vmem:[#allocation46_spill] sm:$0xff] }
 0x5b8   :  { %19250 = vst [vmem:[#allocation28_spill] sm:$0xff] %v14338_v15  ;;  %7120 = vmatpush2.msra.mxu1 %v19253_v22  ;;  %6689 = vmatprep.subr.mxu0 %v13934_v14  ;;  %v19256_v30 = vand.u32 4294901760, %v14171_v25  ;;  %v19257_v16 = vand.u32 4294901760, %v14258_v34  ;;  %v19258_v22 = vand.u32 4294901760, %v14261_v1  ;;  %v4638_v28 = vadd.f32 %v19260_v46, %v19259_v38  ;;  %v5023_v46 = vpop.f32.mrf.mxu0 }
 0x5b9   :  { %19251 = vst [vmem:[#allocation72_spill] sm:$0xff] %v14341_v2  ;;  %v7166_v52 = vsub.f32 %v14247_v29, %v19254_v20  ;;  %19255 = vst [vmem:[#allocation55_spill] sm:$0xff] %v14352_v44  ;;  %v19261_v29 = vld [vmem:[#allocation51_spill] sm:$0xff]  ;;  %6691 = vmatpush2.msra.mxu0 %v13944_v56  ;;  %v19262_v25 = vand.u32 4294901760, %v14184_v24  ;;  %v19264_v60 = vand.u32 4294901760, %v14189_v36  ;;  %v19270_v36 = vand.u32 4294901760, %v14305_v13 }
 0x5ba   :  { %7126 = vmatprep.subr.mxu1 %v19256_v30  ;;  %v7172_v12 = vsub.f32 %v14258_v34, %v19257_v16  ;;  %v7178_v20 = vsub.f32 %v14261_v1, %v19258_v22  ;;  %v14368_v44 = vadd.f32 %v19261_v29, %v4640_v50  ;;  %v7161_v30 = vand.u32 4294901760, %v14301_v58  ;;  %6693 = vmatprep.subr.mxu0 %v13946_v49  ;;  %v19266_v58 = vld [vmem:[#allocation109_spill] sm:$0xff]  ;;  %v19284_v34 = vld [vmem:[#allocation92_spill] sm:$0xff] }
 0x5bb   :  { %7132 = vmatpush2.msra.mxu1 %v19262_v25  ;;  %v14375_v16 = vadd.f32 %v14251_v9, %v5010_v55  ;;  %v6445_v22 = vmax.f32 %v14331_v5, 0.0  ;;  %v19265_v50 = vand.u32 4294901760, %v14288_v57  ;;  %v19267_v25 = vld [vmem:[#allocation65_spill] sm:$0xff]  ;;  %v19269_v5 = vand.u32 4294901760, %v14227_v0 }
 0x5bc   :  { %7138 = vmatprep.subr.mxu1 %v19264_v60  ;;  %v4648_v9 = vadd.f32 %v19267_v25, %v19266_v58  ;;  %v19268_v55 = vld [vmem:[#allocation101_spill] sm:$0xff]  ;;  %v7167_v10 = vand.u32 4294901760, %v7166_v52  ;;  %v7190_v60 = vsub.f32 %v14305_v13, %v19270_v36  ;;  %v7173_v24 = vand.u32 4294901760, %v7172_v12  ;;  %v19282_v13 = vld [vmem:[#allocation148_spill] sm:$0xff] }
 0x5bd   :  { %19263 = vst [vmem:[#allocation141_spill] sm:$0xff] %v14375_v16  ;;  %v7184_v29 = vsub.f32 %v14288_v57, %v19265_v50  ;;  %6695 = vmatpush2.msra.mxu0 %v19268_v55  ;;  %7144 = vmatpush2.msra.mxu1 %v19269_v5  ;;  %v5488_v16 = vpop.f32.mrf.mxu1  ;;  %v5024_v50 = vadd.f32 %v5023_v46, %v14206_v35  ;;  %v7179_v38 = vand.u32 4294901760, %v7178_v20  ;;  %v19271_v58 = vand.u32 4294901760, %v14315_v53  ;;  %v5025_v5 = vpop.f32.mrf.mxu0  ;;  %v19273_v57 = vld [vmem:[#allocation159_spill] sm:$0xff] }
 0x5be   :  { %6697 = vmatprep.subr.mxu0 %v13983_v45  ;;  %7150 = vmatprep.subr.mxu1 %v7149_v32  ;;  %v19272_v0 = vand.u32 4294901760, %v14318_v11  ;;  %v14403_v1 = vadd.f32 %v19273_v57, %v4638_v28  ;;  %v6450_v36 = vmax.f32 %v14368_v44, 0.0  ;;  %v5026_v32 = vadd.f32 %v5025_v5, %v14327_v47 }
 0x5bf   :  { %v7196_v25 = vsub.f32 %v14315_v53, %v19271_v58  ;;  %6699 = vmatpush2.msra.mxu0 %v13996_v21  ;;  %7156 = vmatpush2.msra.mxu1 %v7155_v17  ;;  %v14409_v12 = vadd.f32 %v14307_v4, %v5024_v50  ;;  %v14411_v20 = vand.u32 4294901760, %v6445_v22  ;;  %v7185_v46 = vand.u32 4294901760, %v7184_v29  ;;  %v19278_v17 = vld [vmem:[#allocation143_spill] sm:$0xff]  ;;  %v19281_v53 = vld [vmem:[#allocation113_spill] sm:$0xff] }
 0x5c0   :  { %v7202_v52 = vsub.f32 %v14318_v11, %v19272_v0  ;;  %6701 = vmatprep.subr.mxu0 %v13998_v23  ;;  %7162 = vmatprep.subr.mxu1 %v7161_v30  ;;  %v19276_v58 = vand.u32 4294901760, %v14338_v15  ;;  %v19277_v44 = vand.u32 4294901760, %v14341_v2  ;;  %v19279_v0 = vld [vmem:[#allocation62_spill] sm:$0xff]  ;;  %v19280_v11 = vld [vmem:[#allocation47_spill] sm:$0xff]  ;;  %v7191_v50 = vand.u32 4294901760, %v7190_v60  ;;  %v5490_v30 = vpop.f32.mrf.mxu1 }
 0x5c1   :  { %19274 = vst [vmem:[#allocation67_spill] sm:$0xff] %v14409_v12  ;;  %19275 = vst [vmem:[#allocation46_spill] sm:$0xff] %v14411_v20  ;;  %v4646_v5 = vadd.f32 %v19279_v0, %v19278_v17  ;;  %v14423_v4 = vadd.f32 %v19280_v11, %v4648_v9  ;;  %6703 = vmatpush2.msra.mxu0 %v14009_v54  ;;  %7168 = vmatpush2.msra.mxu1 %v7167_v10  ;;  %v7197_v11 = vand.u32 4294901760, %v7196_v25  ;;  %v5039_v9 = vpop.f32.mrf.mxu0 }
 0x5c2   :  { %v7208_v57 = vsub.f32 %v14338_v15, %v19276_v58  ;;  %v7214_v28 = vsub.f32 %v14341_v2, %v19277_v44  ;;  %v14426_v29 = vadd.f32 %v5482_v7, %v5026_v32  ;;  %v3480_v58 = vadd.f32 %v19282_v13, %v19281_v53  ;;  %v19283_v15 = vld [vmem:[#allocation30_spill] sm:$0xff]  ;;  %v19286_v2 = vld [vmem:[#allocation89_spill] sm:$0xff]  ;;  %6705 = vmatprep.subr.mxu0 %v14011_v63  ;;  %v19288_v53 = vld [vmem:[#allocation112_spill] sm:$0xff] }
 0x5c3   :  { %v4156_v12 = vadd.f32 %v19284_v34, %v19283_v15  ;;  %v19285_v44 = vld [vmem:[#allocation170_spill] sm:$0xff]  ;;  %7174 = vmatprep.subr.mxu1 %v7173_v24  ;;  %v6449_v10 = vmax.f32 %v14403_v1, 0.0  ;;  %v14436_v60 = vand.u32 4294901760, %v6450_v36  ;;  %6707 = vmatpush2.msra.mxu0 %v14021_v43  ;;  %v7203_v7 = vand.u32 4294901760, %v7202_v52  ;;  %v5041_v25 = vpop.f32.mrf.mxu0  ;;  %v19289_v1 = vld [vmem:[#allocation35_spill] sm:$0xff] }
 0x5c4   :  { %v4343_v23 = vadd.f32 %v19286_v2, %v19285_v44  ;;  %7180 = vmatpush2.msra.mxu1 %v7179_v38  ;;  %v5040_v13 = vadd.f32 %v5039_v9, %v14206_v35  ;;  %v14441_v34 = vsub.f32 %v6445_v22, %v14411_v20  ;;  %6709 = vmatprep.subr.mxu0 %v14023_v31  ;;  %v7209_v2 = vand.u32 4294901760, %v7208_v57  ;;  %v5496_v38 = vpop.f32.mrf.mxu1  ;;  %v19294_v44 = vld [vmem:[#allocation53_spill] sm:$0xff]  ;;  %v19295_v9 = vld [vmem:[#allocation163_spill] sm:$0xff] }
 0x5c5   :  { %19287 = vst [vmem:[#allocation51_spill] sm:$0xff] %v14436_v60  ;;  %7186 = vmatprep.subr.mxu1 %v7185_v46  ;;  %v7215_v24 = vand.u32 4294901760, %v7214_v28  ;;  %v14446_v32 = vadd.f32 %v19289_v1, %v4646_v5  ;;  %v6454_v17 = vmax.f32 %v14423_v4, 0.0  ;;  %6711 = vmatpush2.msra.mxu0 %v14063_v37  ;;  %v5042_v22 = vadd.f32 %v5041_v25, %v14327_v47  ;;  %v19292_v28 = vld [vmem:[#allocation66_spill] sm:$0xff] }
 0x5c6   :  { %v4656_v15 = vadd.f32 %v19288_v53, %v4343_v23  ;;  %7192 = vmatpush2.msra.mxu1 %v7191_v50  ;;  %v14451_v52 = vadd.f32 %v5488_v16, %v5040_v13  ;;  %v19290_v23 = vld [vmem:[#allocation147_spill] sm:$0xff]  ;;  %6713 = vmatprep.subr.mxu0 %v14077_v39  ;;  %v14455_v46 = vand.u32 4294901760, %v6449_v10  ;;  %v14458_v57 = vsub.f32 %v6450_v36, %v14436_v60  ;;  %v19293_v50 = vld [vmem:[#allocation42_spill] sm:$0xff]  ;;  %v5055_v36 = vpop.f32.mrf.mxu0 }
 0x5c7   :  { %v3913_v0 = vadd.f32 %v19290_v23, %v3480_v58  ;;  %7198 = vmatprep.subr.mxu1 %v7197_v11  ;;  %v4355_v5 = vadd.f32 %v19292_v28, %v4156_v12  ;;  %6715 = vmatpush2.msra.mxu0 %v14114_v3  ;;  %v14462_v4 = vadd.f32 %v5490_v30, %v5042_v22  ;;  %v19296_v13 = vld [vmem:[#allocation90_spill] sm:$0xff]  ;;  %v17621_v11 = vand.u32 4294901760, %v14441_v34  ;;  %v5498_v30 = vpop.f32.mrf.mxu1  ;;  %v19298_v22 = vld [vmem:[#allocation59_spill] sm:$0xff] }
 0x5c8   :  { %19291 = vst [vmem:[#allocation109_spill] sm:$0xff] %v14455_v46  ;;  %7204 = vmatpush2.msra.mxu1 %v7203_v7  ;;  %v4654_v58 = vadd.f32 %v19295_v9, %v19294_v44  ;;  %v14468_v53 = vadd.f32 %v19296_v13, %v4656_v15  ;;  %6717 = vmatprep.subr.mxu0 %v14138_v59  ;;  %v6453_v12 = vmax.f32 %v14446_v32, 0.0  ;;  %v14473_v25 = vand.u32 4294901760, %v6454_v17  ;;  %v5057_v15 = vpop.f32.mrf.mxu0  ;;  %v19307_v32 = vld [vmem:[#allocation82_spill] sm:$0xff] }
 0x5c9   :  { %v4166_v16 = vadd.f32 %v19293_v50, %v3913_v0  ;;  %7210 = vmatprep.subr.mxu1 %v7209_v2  ;;  %6719 = vmatpush2.msra.mxu0 %v14199_v40  ;;  %v5056_v7 = vadd.f32 %v5055_v36, %v14206_v35  ;;  %v4664_v1 = vadd.f32 %v14088_v26, %v4355_v5  ;;  %v19299_v0 = vld [vmem:[#allocation68_spill] sm:$0xff]  ;;  %v19300_v5 = vld [vmem:[#allocation110_spill] sm:$0xff]  ;;  %v5504_v13 = vpop.f32.mrf.mxu1  ;;  %v19304_v36 = vld [vmem:[#allocation61_spill] sm:$0xff] }
 0x5ca   :  { %19297 = vst [vmem:[#allocation65_spill] sm:$0xff] %v14473_v25  ;;  %7216 = vmatpush2.msra.mxu1 %v7215_v24  ;;  %6721 = vmatprep.subr.mxu0 %v14215_v8  ;;  %v14481_v2 = vsub.f32 %v6449_v10, %v14455_v46  ;;  %v5058_v24 = vadd.f32 %v5057_v15, %v14327_v47  ;;  %v6458_v28 = vmax.f32 %v14468_v53, 0.0  ;;  %v19301_v10 = vld [vmem:[#allocation105_spill] sm:$0xff]  ;;  %v14499_v9 = vand.u32 4294901760, %v6453_v12  ;;  %v5071_v53 = vpop.f32.mrf.mxu0 }
 0x5cb   :  { %7220 = vmatmul.mubr.f32.vlgmr.msra.gmra.mxu1 %v14411_v20  ;;  %7520 = vmatprep.subr.mxu1 %v19298_v22  ;;  %v14487_v23 = vadd.f32 %v5496_v38, %v5056_v7  ;;  %v14490_v26 = vadd.f32 %v19299_v0, %v4654_v58  ;;  %v4367_v50 = vadd.f32 %v19300_v5, %v4166_v16  ;;  %v19303_v58 = vld [vmem:[#allocation93_spill] sm:$0xff]  ;;  %v19306_v5 = vld [vmem:[#allocation172_spill] sm:$0xff] }
 0x5cc   :  { %6723 = vmatpush2.msra.mxu0 %v14217_v61  ;;  %7226 = vmatprep.mubr.f32.mxu1 %v14436_v60  ;;  %v6745_v44 = vsub.f32 %v14441_v34, %v17621_v11  ;;  %19302 = vst [vmem:[#allocation159_spill] sm:$0xff] %v14499_v9  ;;  %v14502_v38 = vsub.f32 %v6454_v17, %v14473_v25  ;;  %v19305_v15 = vld [vmem:[#allocation177_spill] sm:$0xff]  ;;  %v5506_v11 = vpop.f32.mrf.mxu1 }
 0x5cd   :  { %7522 = vmatpush1.msra.mxu1 %v19301_v10  ;;  %6725 = vmatprep.subr.mxu0 %v14240_v41  ;;  %v14506_v16 = vadd.f32 %v5498_v30, %v5058_v24  ;;  %v4662_v7 = vadd.f32 %v14040_v62, %v19304_v36  ;;  %v4841_v0 = vadd.f32 %v19305_v15, %v4664_v1  ;;  %v19308_v30 = vand.u32 4294901760, %v14458_v57  ;;  %v5073_v24 = vpop.f32.mrf.mxu0  ;;  %v19310_v15 = vld [vmem:[#allocation96_spill] sm:$0xff] }
 0x5ce   :  { %7524 = vmatprep.subr.mxu1 %v19303_v58  ;;  %6727 = vmatpush2.msra.mxu0 %v14249_v48  ;;  %v5072_v17 = vadd.f32 %v5071_v53, %v14206_v35  ;;  %v4672_v60 = vadd.f32 %v19307_v32, %v4367_v50  ;;  %v6457_v1 = vmax.f32 %v14490_v26, 0.0  ;;  %v14522_v36 = vand.u32 4294901760, %v6458_v28  ;;  %v19313_v26 = vld [vmem:[#allocation107_spill] sm:$0xff] }
 0x5cf   :  { %7526 = vmatpush1.msra.mxu1 %v19306_v5  ;;  %6729 = vmatprep.subr.mxu0 %v14263_v18  ;;  %v6755_v62 = vsub.f32 %v14458_v57, %v19308_v30  ;;  %v5074_v35 = vadd.f32 %v5073_v24, %v14327_v47  ;;  %v6746_v50 = vand.u32 4294901760, %v6745_v44  ;;  %v14530_v53 = vsub.f32 %v6453_v12, %v14499_v9  ;;  %v19312_v30 = vld [vmem:[#allocation106_spill] sm:$0xff]  ;;  %v19315_v44 = vld [vmem:[#allocation139_spill] sm:$0xff]  ;;  %v19317_v47 = vld [vmem:[#allocation17_spill] sm:$0xff] }
 0x5d0   :  { %7228 = vmatmul.mubr.f32.gmra.mxu1 %v14455_v46  ;;  %19309 = vst [vmem:[#allocation143_spill] sm:$0xff] %v14522_v36  ;;  %7528 = vmatprep.subr.mxu1 %v19310_v15  ;;  %v14527_v32 = vadd.f32 %v5504_v13, %v5072_v17  ;;  %v4839_v46 = vadd.f32 %v19313_v26, %v4662_v7  ;;  %v6462_v20 = vmax.f32 %v4841_v0, 0.0  ;;  %v19314_v15 = vld [vmem:[#allocation119_spill] sm:$0xff]  ;;  %v17635_v24 = vand.u32 4294901760, %v14502_v38  ;;  %v19316_v17 = vld [vmem:[#allocation150_spill] sm:$0xff] }
 0x5d1   :  { %6731 = vmatpush2.msra.mxu0 %v14265_v51  ;;  %7234 = vmatprep.mubr.f32.mxu1 %v14473_v25  ;;  %v14538_v13 = vadd.f32 %v5506_v11, %v5074_v35  ;;  %v4670_v12 = vadd.f32 %v19316_v17, %v19315_v44  ;;  %v19318_v25 = vld [vmem:[#allocation125_spill] sm:$0xff]  ;;  %v14548_v7 = vsub.f32 %v6458_v28, %v14522_v36  ;;  %v6756_v0 = vand.u32 4294901760, %v6755_v62  ;;  %v19321_v26 = vld [vmem:[#allocation102_spill] sm:$0xff]  ;;  %v19324_v62 = vld [vmem:[#allocation108_spill] sm:$0xff] }
 0x5d2   :  { %19311 = vst [vmem:[#allocation62_spill] sm:$0xff] %v14527_v32  ;;  %7530 = vmatpush1.msra.mxu1 %v19312_v30  ;;  %6733 = vmatprep.subr.mxu0 %v14290_v6  ;;  %v4849_v32 = vadd.f32 %v19317_v47, %v4672_v60  ;;  %v14545_v30 = vand.u32 4294901760, %v6457_v1  ;;  %v19320_v11 = vand.u32 4294901760, %v14481_v2  ;;  %v19322_v47 = vld [vmem:[#allocation127_spill] sm:$0xff]  ;;  %v6461_v44 = vmax.f32 %v4839_v46, 0.0  ;;  %v19327_v46 = vld [vmem:[#allocation117_spill] sm:$0xff] }
 0x5d3   :  { %7532 = vmatprep.subr.mxu1 %v19314_v15  ;;  %6735 = vmatpush2.msra.mxu0 %v14292_v27  ;;  %v14557_v17 = vand.u32 4294901760, %v6462_v20  ;;  %v6771_v28 = vsub.f32 %v14502_v38, %v17635_v24  ;;  %v19328_v60 = vld [vmem:[#allocation168_spill] sm:$0xff]  ;;  %v19330_v24 = vld [vmem:[#allocation145_spill] sm:$0xff] }
 0x5d4   :  { %7534 = vmatpush1.msra.mxu1 %v19318_v25  ;;  %19319 = vst [vmem:[#allocation47_spill] sm:$0xff] %v14545_v30  ;;  %6747 = vmatmul.mubr.f32.vlgmr.msra.gmra.mxu0 %v6746_v50  ;;  %v6761_v35 = vsub.f32 %v14481_v2, %v19320_v11  ;;  %v4847_v50 = vadd.f32 %v19324_v62, %v4670_v12  ;;  %v19325_v11 = vld [vmem:[#allocation95_spill] sm:$0xff]  ;;  %v14574_v12 = vand.u32 4294901760, %v6461_v44  ;;  %v19332_v62 = vand.u32 4294901760, %v14530_v53 }
 0x5d5   :  { %7236 = vmatmul.mubr.f32.gmra.mxu1 %v14499_v9  ;;  %7268 = vmatprep.subr.mxu0 %v19321_v26  ;;  %19323 = vst [vmem:[#allocation113_spill] sm:$0xff] %v14557_v17  ;;  %v6466_v9 = vmax.f32 %v4849_v32, 0.0  ;;  %v19326_v26 = vld [vmem:[#allocation130_spill] sm:$0xff]  ;;  %v19329_v25 = vld [vmem:[#allocation123_spill] sm:$0xff]  ;;  %v14577_v32 = vsub.f32 %v6462_v20, %v14557_v17  ;;  %v19336_v20 = vand.u32 4294901760, %v14548_v7 }
 0x5d6   :  { %7536 = vmatprep.subr.mxu1 %v19322_v47  ;;  %6757 = vmatprep.mubr.f32.mxu0 %v6756_v0  ;;  %v14567_v47 = vsub.f32 %v6457_v1, %v14545_v30  ;;  %v6762_v0 = vand.u32 4294901760, %v6761_v35  ;;  %19331 = vst [vmem:[#allocation148_spill] sm:$0xff] %v14574_v12  ;;  %v6772_v1 = vand.u32 4294901760, %v6771_v28  ;;  %v6465_v35 = vmax.f32 %v4847_v50, 0.0 }
 0x5d7   :  { %7242 = vmatprep.mubr.f32.mxu1 %v14522_v36  ;;  %7271 = vmatpush1.msra.mxu0 %v19325_v11  ;;  %v19334_v36 = vld [vmem:[#allocation116_spill] sm:$0xff]  ;;  %v6787_v28 = vsub.f32 %v14548_v7, %v19336_v20  ;;  %v14595_v50 = vsub.f32 %v6461_v44, %v14574_v12  ;;  %v19343_v20 = vld [vmem:[#allocation22_spill] sm:$0xff] }
 0x5d8   :  { %7538 = vmatpush1.msra.mxu1 %v19326_v26  ;;  %7274 = vmatprep.subr.mxu0 %v19327_v46  ;;  %v14583_v46 = vand.u32 4294901760, %v6466_v9 }
 0x5d9   :  { %7540 = vmatprep.subr.mxu1 %v19328_v60  ;;  %7277 = vmatpush1.msra.mxu0 %v19329_v25  ;;  %v6777_v60 = vsub.f32 %v14530_v53, %v19332_v62  ;;  %v19335_v25 = vld [vmem:[#allocation124_spill] sm:$0xff]  ;;  %19339 = vst [vmem:[#allocation92_spill] sm:$0xff] %v14595_v50  ;;  %v6788_v44 = vand.u32 4294901760, %v6787_v28  ;;  %v19349_v28 = vld [vmem:[#allocation146_spill] sm:$0xff] }
 0x5da   :  { %7542 = vmatpush1.msra.mxu1 %v19330_v24  ;;  %6763 = vmatmul.mubr.f32.gmra.mxu0 %v6762_v0  ;;  %19333 = vst [vmem:[#allocation30_spill] sm:$0xff] %v14583_v46  ;;  %v19337_v0 = vld [vmem:[#allocation118_spill] sm:$0xff]  ;;  %v19340_v62 = vld [vmem:[#allocation128_spill] sm:$0xff]  ;;  %v14600_v24 = vand.u32 4294901760, %v6465_v35 }
 0x5db   :  { %7244 = vmatmul.mubr.f32.gmra.mxu1 %v14545_v30  ;;  %7280 = vmatprep.subr.mxu0 %v19334_v36  ;;  %v19338_v30 = vld [vmem:[#allocation19_spill] sm:$0xff]  ;;  %v19341_v36 = vld [vmem:[#allocation157_spill] sm:$0xff] }
 0x5dc   :  { %7544 = vmatprep.subr.mxu1 %v19335_v25  ;;  %6773 = vmatprep.mubr.f32.mxu0 %v6772_v1  ;;  %v6778_v25 = vand.u32 4294901760, %v6777_v60  ;;  %19342 = vst [vmem:[#allocation170_spill] sm:$0xff] %v14600_v24  ;;  %v19346_v60 = vld [vmem:[#allocation165_spill] sm:$0xff]  ;;  %v19347_v1 = vld [vmem:[#allocation144_spill] sm:$0xff] }
 0x5dd   :  { %7250 = vmatprep.mubr.f32.mxu1 %v14557_v17  ;;  %7283 = vmatpush1.msra.mxu0 %v19337_v0  ;;  %v14603_v17 = vsub.f32 %v6466_v9, %v14583_v46  ;;  %v19344_v0 = vld [vmem:[#allocation20_spill] sm:$0xff]  ;;  %v19348_v9 = vand.u32 4294901760, %v14577_v32 }
 0x5de   :  { %7546 = vmatpush1.msra.mxu1 %v19338_v30  ;;  %7286 = vmatprep.subr.mxu0 %v19340_v62  ;;  %v19345_v62 = vand.u32 4294901760, %v14567_v47  ;;  %v19353_v30 = vld [vmem:[#allocation136_spill] sm:$0xff] }
 0x5df   :  { %7548 = vmatprep.subr.mxu1 %v19341_v36  ;;  %7289 = vmatpush1.msra.mxu0 %v19343_v20 }
 0x5e0   :  { %7550 = vmatpush1.msra.mxu1 %v19344_v0  ;;  %6779 = vmatmul.mubr.f32.gmra.mxu0 %v6778_v25  ;;  %v6793_v36 = vsub.f32 %v14567_v47, %v19345_v62  ;;  %v6803_v25 = vsub.f32 %v14577_v32, %v19348_v9  ;;  %v19350_v0 = vld [vmem:[#allocation160_spill] sm:$0xff]  ;;  %v19355_v9 = vand.u32 4294901760, %v14595_v50  ;;  %v19356_v62 = vld [vmem:[#allocation26_spill] sm:$0xff] }
 0x5e1   :  { %7252 = vmatmul.mubr.f32.gmra.mxu1 %v14574_v12  ;;  %7292 = vmatprep.subr.mxu0 %v19346_v60  ;;  %v14619_v12 = vsub.f32 %v6465_v35, %v14600_v24  ;;  %v19351_v60 = vld [vmem:[#allocation174_spill] sm:$0xff] }
 0x5e2   :  { %7552 = vmatprep.subr.mxu1 %v19347_v1  ;;  %6789 = vmatprep.mubr.f32.mxu0 %v6788_v44  ;;  %v19352_v1 = vld [vmem:[#allocation23_spill] sm:$0xff]  ;;  %v6794_v44 = vand.u32 4294901760, %v6793_v36  ;;  %v6804_v35 = vand.u32 4294901760, %v6803_v25  ;;  %v19358_v36 = vand.u32 4294901760, %v14603_v17 }
 0x5e3   :  { %7258 = vmatprep.mubr.f32.mxu1 %v14583_v46  ;;  %7295 = vmatpush1.msra.mxu0 %v19349_v28  ;;  %v19354_v46 = vld [vmem:[#allocation21_spill] sm:$0xff]  ;;  %v6809_v28 = vsub.f32 %v14595_v50, %v19355_v9  ;;  %v19361_v25 = vld [vmem:[#allocation71_spill] sm:$0xff]  ;;  %v19364_v9 = vld [vmem:[#allocation32_spill] sm:$0xff] }
 0x5e4   :  { %7554 = vmatpush1.msra.mxu1 %v19350_v0  ;;  %7298 = vmatprep.subr.mxu0 %v19351_v60  ;;  %v19357_v60 = vld [vmem:[#allocation34_spill] sm:$0xff] }
 0x5e5   :  { %7556 = vmatprep.subr.mxu1 %v19352_v1  ;;  %7301 = vmatpush1.msra.mxu0 %v19353_v30  ;;  %v6819_v30 = vsub.f32 %v14603_v17, %v19358_v36  ;;  %v19363_v1 = vld [vmem:[#allocation24_spill] sm:$0xff]  ;;  %v6810_v0 = vand.u32 4294901760, %v6809_v28  ;;  %v19367_v36 = vand.u32 4294901760, %v14619_v12  ;;  %v19372_v28 = vld [vmem:[#allocation29_spill] sm:$0xff] }
 0x5e6   :  { %7558 = vmatpush1.msra.mxu1 %v19354_v46  ;;  %6795 = vmatmul.mubr.f32.gmra.mxu0 %v6794_v44  ;;  %v19359_v46 = vld [vmem:[#allocation120_spill] sm:$0xff] }
 0x5e7   :  { %7260 = vmatmul.mubr.f32.gmra.mxu1 %v14600_v24  ;;  %7304 = vmatprep.subr.mxu0 %v19356_v62  ;;  %v19360_v44 = vld [vmem:[#allocation36_spill] sm:$0xff]  ;;  %v19362_v24 = vand.u32 4294901760, %v19361_v25  ;;  %v19365_v62 = vld [vmem:[#allocation162_spill] sm:$0xff]  ;;  %v6820_v50 = vand.u32 4294901760, %v6819_v30  ;;  %v19374_v30 = vld [vmem:[#allocation31_spill] sm:$0xff] }
 0x5e8   :  { %7560 = vmatprep.subr.mxu1 %v19357_v60  ;;  %6805 = vmatprep.mubr.f32.mxu0 %v6804_v35  ;;  %v19366_v60 = vld [vmem:[#allocation152_spill] sm:$0xff]  ;;  %v6825_v35 = vsub.f32 %v14619_v12, %v19367_v36 }
 0x5e9   :  { %7307 = vmatpush1.msra.mxu0 %v19359_v46  ;;  %7562 = vmatpush1.msra.mxu1 %v19360_v44  ;;  %v19368_v46 = vld [vmem:[#allocation153_spill] sm:$0xff]  ;;  %v19377_v36 = vld [vmem:[#allocation52_spill] sm:$0xff] }
 0x5ea   :  { %7650 = vmatprep.mubr.f32.mxu1 %v19362_v24  ;;  %7310 = vmatprep.subr.mxu0 %v19363_v1  ;;  %v19369_v44 = vld [vmem:[#allocation25_spill] sm:$0xff]  ;;  %v19370_v24 = vld [vmem:[#allocation78_spill] sm:$0xff] }
 0x5eb   :  { %7564 = vmatprep.subr.mxu1 %v19364_v9  ;;  %7313 = vmatpush1.msra.mxu0 %v19365_v62  ;;  %v19371_v1 = vld [vmem:[#allocation49_spill] sm:$0xff]  ;;  %v19373_v62 = vld [vmem:[#allocation50_spill] sm:$0xff] }
 0x5ec   :  { %7566 = vmatpush1.msra.mxu1 %v19366_v60  ;;  %6811 = vmatmul.mubr.f32.gmra.mxu0 %v6810_v0  ;;  %v6826_v60 = vand.u32 4294901760, %v6825_v35  ;;  %v19375_v9 = vld [vmem:[#allocation33_spill] sm:$0xff]  ;;  %v19382_v35 = vld [vmem:[#allocation27_spill] sm:$0xff] }
 0x5ed   :  { %7316 = vmatprep.subr.mxu0 %v19368_v46  ;;  %7568 = vmatprep.subr.mxu1 %v19369_v44  ;;  %v19376_v0 = vld [vmem:[#allocation37_spill] sm:$0xff]  ;;  %v19378_v44 = vld [vmem:[#allocation83_spill] sm:$0xff] }
 0x5ee   :  { %6821 = vmatprep.mubr.f32.mxu0 %v6820_v50  ;;  %7319 = vmatpush1.msra.mxu0 %v19370_v24  ;;  %v5898_v50 = vpop.f32.mrf.mxu1 }
 0x5ef   :  { %7570 = vmatpush1.msra.mxu1 %v19371_v1  ;;  %7322 = vmatprep.subr.mxu0 %v19372_v28  ;;  %v19379_v1 = vld [vmem:[#allocation75_spill] sm:$0xff]  ;;  %v19380_v28 = vld [vmem:[#allocation86_spill] sm:$0xff] }
 0x5f0   :  { %7572 = vmatprep.subr.mxu1 %v19373_v62  ;;  %7325 = vmatpush1.msra.mxu0 %v19374_v30  ;;  %v19381_v62 = vld [vmem:[#allocation44_spill] sm:$0xff]  ;;  %v19383_v30 = vld [vmem:[#allocation137_spill] sm:$0xff] }
 0x5f1   :  { %7574 = vmatpush1.msra.mxu1 %v19375_v9  ;;  %6827 = vmatmul.mubr.f32.gmra.mxu0 %v6826_v60  ;;  %v14666_v60 = vpop.f32.mrf.mxu1  ;;  %v19388_v9 = vld [vmem:[#allocation40_spill] sm:$0xff] }
 0x5f2   :  { %7328 = vmatprep.subr.mxu0 %v19376_v0  ;;  %7576 = vmatprep.subr.mxu1 %v19377_v36  ;;  %19384 = vst [vmem:[#allocation89_spill] sm:$0xff] %v14666_v60  ;;  %v19385_v0 = vld [vmem:[#allocation38_spill] sm:$0xff] }
 0x5f3   :  { %7331 = vmatpush1.msra.mxu0 %v19378_v44  ;;  %7460 = vmatprep.mubr.f32.mxu0 %v19361_v25  ;;  %v19386_v36 = vld [vmem:[#allocation54_spill] sm:$0xff]  ;;  %v19389_v25 = vld [vmem:[#allocation88_spill] sm:$0xff] }
 0x5f4   :  { %7578 = vmatpush1.msra.mxu1 %v19379_v1  ;;  %7334 = vmatprep.subr.mxu0 %v19380_v28  ;;  %v19387_v44 = vld [vmem:[#allocation158_spill] sm:$0xff]  ;;  %v19390_v1 = vld [vmem:[#allocation41_spill] sm:$0xff] }
 0x5f5   :  { %7580 = vmatprep.subr.mxu1 %v19381_v62  ;;  %7337 = vmatpush1.msra.mxu0 %v19382_v35  ;;  %v19391_v28 = vld [vmem:[#allocation45_spill] sm:$0xff]  ;;  %v19392_v62 = vld [vmem:[#allocation48_spill] sm:$0xff]  ;;  %v5910_v35 = vpop.f32.mrf.mxu1  ;;  %v19394_v60 = vld [vmem:[#allocation58_spill] sm:$0xff] }
 0x5f6   :  { %7582 = vmatpush1.msra.mxu1 %v19383_v30  ;;  %7340 = vmatprep.subr.mxu0 %v19385_v0  ;;  %v19393_v30 = vld [vmem:[#allocation39_spill] sm:$0xff]  ;;  %v19395_v0 = vld [vmem:[#allocation76_spill] sm:$0xff] }
 0x5f7   :  { %7584 = vmatprep.subr.mxu1 %v19386_v36  ;;  %7343 = vmatpush1.msra.mxu0 %v19387_v44  ;;  %v19396_v44 = vld [vmem:[#allocation81_spill] sm:$0xff] }
 0x5f8   :  { %7586 = vmatpush2.msra.mxu1 %v19388_v9  ;;  %7346 = vmatprep.subr.mxu0 %v19389_v25  ;;  %v5707_v25 = vpop.f32.mrf.mxu0  ;;  %v19397_v9 = vld [vmem:[#allocation43_spill] sm:$0xff] }
 0x5f9   :  { %7588 = vmatprep.subr.mxu1 %v19390_v1  ;;  %7349 = vmatpush1.msra.mxu0 %v19391_v28  ;;  %v14684_v28 = vpop.f32.mrf.mxu1 }
 0x5fa   :  { %7590 = vmatpush2.msra.mxu1 %v19392_v62  ;;  %7352 = vmatprep.subr.mxu0 %v19393_v30  ;;  %19398 = vst [vmem:[#allocation112_spill] sm:$0xff] %v14684_v28  ;;  %v19399_v62 = vld [vmem:[#allocation77_spill] sm:$0xff]  ;;  %v19400_v30 = vld [vmem:[#allocation56_spill] sm:$0xff] }
 0x5fb   :  { %7592 = vmatprep.subr.mxu1 %v19394_v60  ;;  %7355 = vmatpush1.msra.mxu0 %v19395_v0  ;;  %v5708_v1 = vadd.f32 %v5707_v25, %v19399_v62  ;;  %v14689_v0 = vpop.f32.mrf.mxu0  ;;  %v5922_v62 = vpop.f32.mrf.mxu1  ;;  %v19406_v25 = vld [vmem:[#allocation57_spill] sm:$0xff] }
 0x5fc   :  { %7594 = vmatpush2.msra.mxu1 %v19244_v19  ;;  %7358 = vmatprep.subr.mxu0 %v19396_v44  ;;  %19401 = vst [vmem:[#allocation35_spill] sm:$0xff] %v14689_v0  ;;  %v19402_v19 = vld [vmem:[#allocation85_spill] sm:$0xff]  ;;  %v19404_v44 = vld [vmem:[#allocation63_spill] sm:$0xff]  ;;  %v19407_v0 = vld [vmem:[#allocation60_spill] sm:$0xff] }
 0x5fd   :  { %7596 = vmatprep.subr.mxu1 %v19248_v42  ;;  %7361 = vmatpush1.msra.mxu0 %v19397_v9  ;;  %v14693_v42 = vadd.f32 %v5898_v50, %v5708_v1  ;;  %v5717_v28 = vpop.f32.mrf.mxu0  ;;  %v19408_v1 = vld [vmem:[#allocation55_spill] sm:$0xff] }
 0x5fe   :  { %7598 = vmatpush2.msra.mxu1 %v19252_v33  ;;  %7364 = vmatprep.subr.mxu0 %v19400_v30  ;;  %v19405_v33 = vld [vmem:[#allocation70_spill] sm:$0xff]  ;;  %v5718_v50 = vadd.f32 %v5717_v28, %v19408_v1  ;;  %v19416_v28 = vld [vmem:[#allocation115_spill] sm:$0xff] }
 0x5ff   :  { %7600 = vmatprep.subr.mxu1 %v13934_v14  ;;  %7367 = vmatpush2.msra.mxu0 %v19402_v19  ;;  %19403 = vst [vmem:[#allocation147_spill] sm:$0xff] %v14693_v42  ;;  %v19409_v42 = vld [vmem:[#allocation80_spill] sm:$0xff] }
 0x600   :  { %7602 = vmatpush2.msra.mxu1 %v13944_v56  ;;  %7370 = vmatprep.subr.mxu0 %v19404_v44  ;;  %v19410_v44 = vld [vmem:[#allocation176_spill] sm:$0xff] }
 0x601   :  { %7604 = vmatprep.subr.mxu1 %v13946_v49  ;;  %7373 = vmatpush2.msra.mxu0 %v19405_v33  ;;  %v14706_v49 = vpop.f32.mrf.mxu0  ;;  %v19412_v33 = vld [vmem:[#allocation100_spill] sm:$0xff] }
 0x602   :  { %7606 = vmatpush2.msra.mxu1 %v19268_v55  ;;  %7376 = vmatprep.subr.mxu0 %v19406_v25  ;;  %19411 = vst [vmem:[#allocation66_spill] sm:$0xff] %v14706_v49  ;;  %v5924_v25 = vpop.f32.mrf.mxu1  ;;  %v14710_v55 = vadd.f32 %v5910_v35, %v5718_v50  ;;  %v19417_v49 = vld [vmem:[#allocation121_spill] sm:$0xff]  ;;  %v19418_v35 = vld [vmem:[#allocation67_spill] sm:$0xff] }
 0x603   :  { %7608 = vmatprep.subr.mxu1 %v13983_v45  ;;  %7379 = vmatpush2.msra.mxu0 %v19407_v0  ;;  %v19414_v45 = vld [vmem:[#allocation111_spill] sm:$0xff]  ;;  %v5727_v1 = vpop.f32.mrf.mxu0 }
 0x604   :  { %7610 = vmatpush2.msra.mxu1 %v13996_v21  ;;  %7382 = vmatprep.subr.mxu0 %v19409_v42  ;;  %19413 = vst [vmem:[#allocation42_spill] sm:$0xff] %v14710_v55  ;;  %v19415_v21 = vld [vmem:[#allocation114_spill] sm:$0xff]  ;;  %v5728_v50 = vadd.f32 %v5727_v1, %v19418_v35  ;;  %v19419_v55 = vld [vmem:[#allocation164_spill] sm:$0xff] }
 0x605   :  { %7612 = vmatprep.subr.mxu1 %v19410_v44  ;;  %7385 = vmatpush2.msra.mxu0 %v19412_v33 }
 0x606   :  { %7614 = vmatpush2.msra.mxu1 %v14009_v54  ;;  %7388 = vmatprep.subr.mxu0 %v19414_v45  ;;  %v5934_v54 = vpop.f32.mrf.mxu1 }
 0x607   :  { %7616 = vmatprep.subr.mxu1 %v14011_v63  ;;  %7391 = vmatpush2.msra.mxu0 %v19415_v21  ;;  %v5729_v63 = vpop.f32.mrf.mxu0  ;;  %v19420_v21 = vld [vmem:[#allocation166_spill] sm:$0xff] }
 0x608   :  { %7618 = vmatpush2.msra.mxu1 %v14021_v43  ;;  %7394 = vmatprep.subr.mxu0 %v19416_v28  ;;  %v5730_v28 = vadd.f32 %v5729_v63, %v14426_v29  ;;  %v19422_v43 = vld [vmem:[#allocation167_spill] sm:$0xff]  ;;  %v5936_v1 = vpop.f32.mrf.mxu1  ;;  %v19427_v29 = vld [vmem:[#allocation142_spill] sm:$0xff] }
 0x609   :  { %7620 = vmatprep.subr.mxu1 %v14023_v31  ;;  %7397 = vmatpush2.msra.mxu0 %v19417_v49  ;;  %v14726_v31 = vadd.f32 %v5922_v62, %v5728_v50  ;;  %v19428_v50 = vld [vmem:[#allocation140_spill] sm:$0xff] }
 0x60a   :  { %7622 = vmatpush2.msra.mxu1 %v14063_v37  ;;  %7400 = vmatprep.subr.mxu0 %v19419_v55  ;;  %v19423_v37 = vld [vmem:[#allocation169_spill] sm:$0xff]  ;;  %v14732_v35 = vadd.f32 %v5924_v25, %v5730_v28  ;;  %v5946_v25 = vpop.f32.mrf.mxu1 }
 0x60b   :  { %7624 = vmatprep.subr.mxu1 %v14077_v39  ;;  %7403 = vmatpush2.msra.mxu0 %v19420_v21  ;;  %19421 = vst [vmem:[#allocation53_spill] sm:$0xff] %v14726_v31  ;;  %v19425_v39 = vld [vmem:[#allocation122_spill] sm:$0xff]  ;;  %v19426_v21 = vld [vmem:[#allocation135_spill] sm:$0xff] }
 0x60c   :  { %7626 = vmatpush2.msra.mxu1 %v14114_v3  ;;  %7406 = vmatprep.subr.mxu0 %v19422_v43  ;;  %19424 = vst [vmem:[#allocation163_spill] sm:$0xff] %v14732_v35  ;;  %v5737_v3 = vpop.f32.mrf.mxu0  ;;  %v19430_v35 = vld [vmem:[#allocation175_spill] sm:$0xff] }
 0x60d   :  { %7628 = vmatprep.subr.mxu1 %v14138_v59  ;;  %7409 = vmatpush2.msra.mxu0 %v19423_v37  ;;  %v5738_v63 = vadd.f32 %v5737_v3, %v14451_v52  ;;  %v19433_v52 = vld [vmem:[#allocation154_spill] sm:$0xff] }
 0x60e   :  { %7630 = vmatpush2.msra.mxu1 %v14199_v40  ;;  %7412 = vmatprep.subr.mxu0 %v19425_v39  ;;  %v5739_v62 = vpop.f32.mrf.mxu0 }
 0x60f   :  { %7632 = vmatprep.subr.mxu1 %v14215_v8  ;;  %7415 = vmatpush2.msra.mxu0 %v19426_v21  ;;  %v5740_v28 = vadd.f32 %v5739_v62, %v14462_v4  ;;  %v14744_v31 = vadd.f32 %v5934_v54, %v5738_v63  ;;  %v5948_v54 = vpop.f32.mrf.mxu1  ;;  %v19435_v63 = vld [vmem:[#allocation138_spill] sm:$0xff]  ;;  %v19436_v62 = vand.u32 4294901760, %v14441_v34 }
 0x610   :  { %7634 = vmatpush2.msra.mxu1 %v14217_v61  ;;  %7418 = vmatprep.subr.mxu0 %v19427_v29  ;;  %v19431_v61 = vld [vmem:[#allocation155_spill] sm:$0xff] }
 0x611   :  { %7636 = vmatprep.subr.mxu1 %v14240_v41  ;;  %7421 = vmatpush2.msra.mxu0 %v19428_v50  ;;  %19429 = vst [vmem:[#allocation90_spill] sm:$0xff] %v14744_v31  ;;  %v14750_v3 = vadd.f32 %v5936_v1, %v5740_v28  ;;  %v19434_v50 = vld [vmem:[#allocation73_spill] sm:$0xff]  ;;  %v19437_v1 = vld [vmem:[#allocation87_spill] sm:$0xff] }
 0x612   :  { %7638 = vmatpush2.msra.mxu1 %v14249_v48  ;;  %7424 = vmatprep.subr.mxu0 %v19430_v35  ;;  %v5747_v48 = vpop.f32.mrf.mxu0 }
 0x613   :  { %7640 = vmatprep.subr.mxu1 %v14263_v18  ;;  %7427 = vmatpush2.msra.mxu0 %v19431_v61  ;;  %19432 = vst [vmem:[#allocation59_spill] sm:$0xff] %v14750_v3  ;;  %v5748_v4 = vadd.f32 %v5747_v48, %v14487_v23  ;;  %v19440_v48 = vld [vmem:[#allocation79_spill] sm:$0xff]  ;;  %v5958_v23 = vpop.f32.mrf.mxu1 }
 0x614   :  { %7642 = vmatpush2.msra.mxu1 %v14265_v51  ;;  %7430 = vmatprep.subr.mxu0 %v19433_v52  ;;  %v5749_v31 = vpop.f32.mrf.mxu0 }
 0x615   :  { %7644 = vmatprep.subr.mxu1 %v14290_v6  ;;  %7433 = vmatpush2.msra.mxu0 %v19434_v50  ;;  %v5750_v28 = vadd.f32 %v5749_v31, %v14506_v16  ;;  %v14763_v3 = vadd.f32 %v5946_v25, %v5748_v4  ;;  %v19439_v50 = vand.u32 4294901760, %v14458_v57  ;;  %v19443_v31 = vld [vmem:[#allocation62_spill] sm:$0xff]  ;;  %v19444_v25 = vld [vmem:[#allocation91_spill] sm:$0xff]  ;;  %v19446_v4 = vld [vmem:[#allocation96_spill] sm:$0xff] }
 0x616   :  { %7646 = vmatpush2.msra.mxu1 %v14292_v27  ;;  %7436 = vmatprep.subr.mxu0 %v19435_v63 }
 0x617   :  { %7654 = vmatmul.mubr.f32.vlgmr.msra.gmra.mxu1 %v19436_v62  ;;  %8026 = vmatprep.subr.mxu1 %v19298_v22  ;;  %19438 = vst [vmem:[#allocation68_spill] sm:$0xff] %v14763_v3  ;;  %v5757_v62 = vpop.f32.mrf.mxu0  ;;  %v14770_v63 = vadd.f32 %v5948_v54, %v5750_v28  ;;  %v19442_v22 = vld [vmem:[#allocation156_spill] sm:$0xff]  ;;  %v19449_v28 = vand.u32 4294901760, %v14502_v38 }
 0x618   :  { %7439 = vmatpush2.msra.mxu0 %v19437_v1  ;;  %7662 = vmatprep.mubr.f32.mxu1 %v19439_v50  ;;  %v5758_v16 = vadd.f32 %v5757_v62, %v19443_v31  ;;  %v19445_v50 = vand.u32 4294901760, %v14481_v2  ;;  %v19447_v3 = vld [vmem:[#allocation132_spill] sm:$0xff]  ;;  %v5960_v62 = vpop.f32.mrf.mxu1 }
 0x619   :  { %8028 = vmatpush1.msra.mxu1 %v19301_v10  ;;  %7442 = vmatprep.subr.mxu0 %v19440_v48  ;;  %19441 = vst [vmem:[#allocation110_spill] sm:$0xff] %v14770_v63  ;;  %v5759_v10 = vpop.f32.mrf.mxu0  ;;  %v19451_v31 = vld [vmem:[#allocation28_spill] sm:$0xff] }
 0x61a   :  { %8030 = vmatprep.subr.mxu1 %v19303_v58  ;;  %7445 = vmatpush2.msra.mxu0 %v19442_v22  ;;  %v5760_v58 = vadd.f32 %v5759_v10, %v14538_v13  ;;  %v14781_v54 = vadd.f32 %v5958_v23, %v5758_v16  ;;  %v19453_v63 = vld [vmem:[#allocation72_spill] sm:$0xff]  ;;  %v19455_v13 = vand.u32 4294901760, %v14530_v53  ;;  %v19456_v23 = vld [vmem:[#allocation102_spill] sm:$0xff]  ;;  %v19458_v10 = vld [vmem:[#allocation127_spill] sm:$0xff] }
 0x61b   :  { %8032 = vmatpush1.msra.mxu1 %v19306_v5  ;;  %7448 = vmatprep.subr.mxu0 %v19444_v25  ;;  %v19450_v5 = vld [vmem:[#allocation106_spill] sm:$0xff]  ;;  %v19457_v16 = vand.u32 4294901760, %v19456_v23  ;;  %v19468_v23 = vld [vmem:[#allocation116_spill] sm:$0xff] }
 0x61c   :  { %7666 = vmatmul.mubr.f32.gmra.mxu1 %v19445_v50  ;;  %8034 = vmatprep.subr.mxu1 %v19446_v4  ;;  %19448 = vst [vmem:[#allocation105_spill] sm:$0xff] %v14781_v54  ;;  %v14788_v50 = vadd.f32 %v5960_v62, %v5760_v58  ;;  %v19454_v4 = vld [vmem:[#allocation125_spill] sm:$0xff]  ;;  %v19460_v58 = vand.u32 4294901760, %v19325_v11  ;;  %v19464_v62 = vld [vmem:[#allocation123_spill] sm:$0xff]  ;;  %v19469_v11 = vand.u32 4294901760, %v19468_v23  ;;  %v19484_v23 = vld [vmem:[#allocation144_spill] sm:$0xff] }
 0x61d   :  { %7451 = vmatpush2.msra.mxu0 %v19447_v3  ;;  %7674 = vmatprep.mubr.f32.mxu1 %v19449_v28  ;;  %v19461_v28 = vld [vmem:[#allocation117_spill] sm:$0xff]  ;;  %v19608_v54 = vld [vmem:[#allocation151_spill] sm:$0xff] }
 0x61e   :  { %8036 = vmatpush1.msra.mxu1 %v19450_v5  ;;  %7454 = vmatprep.subr.mxu0 %v19451_v31  ;;  %19452 = vst [vmem:[#allocation93_spill] sm:$0xff] %v14788_v50  ;;  %v19463_v5 = vld [vmem:[#allocation168_spill] sm:$0xff]  ;;  %v19612_v50 = vand.u32 4294901760, %v19422_v43 }
 0x61f   :  { %8038 = vmatprep.subr.mxu1 %v19314_v15  ;;  %7457 = vmatpush2.msra.mxu0 %v19453_v63  ;;  %v19459_v15 = vand.u32 4294901760, %v14548_v7 }
 0x620   :  { %8040 = vmatpush1.msra.mxu1 %v19454_v4  ;;  %7463 = vmatmul.mubr.f32.vlgmr.msra.gmra.mxu0 %v14441_v34  ;;  %v19462_v34 = vand.u32 4294901760, %v19461_v28  ;;  %v19465_v4 = vand.u32 4294901760, %v19464_v62  ;;  %v19475_v28 = vld [vmem:[#allocation128_spill] sm:$0xff] }
 0x621   :  { %7678 = vmatmul.mubr.f32.gmra.mxu1 %v19455_v13  ;;  %7723 = vmatprep.subr.mxu0 %v19457_v16  ;;  %v19466_v13 = vld [vmem:[#allocation145_spill] sm:$0xff]  ;;  %v19470_v16 = vld [vmem:[#allocation124_spill] sm:$0xff] }
 0x622   :  { %8042 = vmatprep.subr.mxu1 %v19458_v10  ;;  %7470 = vmatprep.mubr.f32.mxu0 %v14458_v57  ;;  %v19467_v57 = vand.u32 4294901760, %v14567_v47  ;;  %v19472_v10 = vld [vmem:[#allocation118_spill] sm:$0xff]  ;;  %v19479_v62 = vld [vmem:[#allocation20_spill] sm:$0xff] }
 0x623   :  { %7686 = vmatprep.mubr.f32.mxu1 %v19459_v15  ;;  %7727 = vmatpush1.msra.mxu0 %v19460_v58  ;;  %v19473_v15 = vand.u32 4294901760, %v19472_v10  ;;  %v19474_v58 = vld [vmem:[#allocation19_spill] sm:$0xff]  ;;  %v19489_v10 = vld [vmem:[#allocation174_spill] sm:$0xff] }
 0x624   :  { %8044 = vmatpush1.msra.mxu1 %v19326_v26  ;;  %7731 = vmatprep.subr.mxu0 %v19462_v34  ;;  %v19471_v26 = vand.u32 4294901760, %v14577_v32  ;;  %v19477_v34 = vld [vmem:[#allocation157_spill] sm:$0xff] }
 0x625   :  { %8046 = vmatprep.subr.mxu1 %v19463_v5  ;;  %7735 = vmatpush1.msra.mxu0 %v19465_v4  ;;  %v19478_v5 = vand.u32 4294901760, %v19343_v20 }
 0x626   :  { %8048 = vmatpush1.msra.mxu1 %v19466_v13  ;;  %7473 = vmatmul.mubr.f32.gmra.mxu0 %v14481_v2  ;;  %v19476_v2 = vand.u32 4294901760, %v19475_v28  ;;  %v19482_v13 = vld [vmem:[#allocation165_spill] sm:$0xff] }
 0x627   :  { %7690 = vmatmul.mubr.f32.gmra.mxu1 %v19467_v57  ;;  %7739 = vmatprep.subr.mxu0 %v19469_v11  ;;  %v19483_v57 = vand.u32 4294901760, %v19482_v13  ;;  %v19485_v11 = vand.u32 4294901760, %v14603_v17 }
 0x628   :  { %8050 = vmatprep.subr.mxu1 %v19470_v16  ;;  %7480 = vmatprep.mubr.f32.mxu0 %v14502_v38  ;;  %v19480_v38 = vld [vmem:[#allocation92_spill] sm:$0xff]  ;;  %v19486_v16 = vld [vmem:[#allocation146_spill] sm:$0xff] }
 0x629   :  { %7698 = vmatprep.mubr.f32.mxu1 %v19471_v26  ;;  %7743 = vmatpush1.msra.mxu0 %v19473_v15  ;;  %v19481_v4 = vand.u32 4294901760, %v19480_v38  ;;  %v19487_v20 = vand.u32 4294901760, %v19486_v16  ;;  %v19488_v26 = vld [vmem:[#allocation160_spill] sm:$0xff]  ;;  %v19491_v15 = vld [vmem:[#allocation23_spill] sm:$0xff] }
 0x62a   :  { %8052 = vmatpush1.msra.mxu1 %v19474_v58  ;;  %7747 = vmatprep.subr.mxu0 %v19476_v2  ;;  %v19492_v58 = vld [vmem:[#allocation136_spill] sm:$0xff]  ;;  %v19494_v2 = vld [vmem:[#allocation21_spill] sm:$0xff] }
 0x62b   :  { %8054 = vmatprep.subr.mxu1 %v19477_v34  ;;  %7751 = vmatpush1.msra.mxu0 %v19478_v5  ;;  %v19493_v28 = vand.u32 4294901760, %v19492_v58  ;;  %v19496_v34 = vld [vmem:[#allocation26_spill] sm:$0xff]  ;;  %v19512_v58 = vld [vmem:[#allocation49_spill] sm:$0xff] }
 0x62c   :  { %8056 = vmatpush1.msra.mxu1 %v19479_v62  ;;  %7483 = vmatmul.mubr.f32.gmra.mxu0 %v14530_v53  ;;  %v19490_v53 = vand.u32 4294901760, %v19489_v10  ;;  %v19497_v5 = vand.u32 4294901760, %v19496_v34  ;;  %v19498_v62 = vld [vmem:[#allocation34_spill] sm:$0xff]  ;;  %v19508_v10 = vld [vmem:[#allocation152_spill] sm:$0xff]  ;;  %v19516_v34 = vld [vmem:[#allocation31_spill] sm:$0xff] }
 0x62d   :  { %7702 = vmatmul.mubr.f32.gmra.mxu1 %v19481_v4  ;;  %7755 = vmatprep.subr.mxu0 %v19483_v57  ;;  %v19499_v4 = vld [vmem:[#allocation120_spill] sm:$0xff] }
 0x62e   :  { %8058 = vmatprep.subr.mxu1 %v19484_v23  ;;  %7490 = vmatprep.mubr.f32.mxu0 %v14548_v7  ;;  %v19495_v7 = vand.u32 4294901760, %v14619_v12  ;;  %v19500_v13 = vand.u32 4294901760, %v19499_v4  ;;  %v19501_v57 = vld [vmem:[#allocation36_spill] sm:$0xff]  ;;  %v19502_v23 = vld [vmem:[#allocation99_spill] sm:$0xff] }
 0x62f   :  { %7710 = vmatprep.mubr.f32.mxu1 %v19485_v11  ;;  %7759 = vmatpush1.msra.mxu0 %v19487_v20  ;;  %v19503_v11 = vld [vmem:[#allocation24_spill] sm:$0xff]  ;;  %v19506_v20 = vld [vmem:[#allocation162_spill] sm:$0xff] }
 0x630   :  { %8060 = vmatpush1.msra.mxu1 %v19488_v26  ;;  %7763 = vmatprep.subr.mxu0 %v19490_v53  ;;  %v19504_v16 = vand.u32 4294901760, %v19503_v11  ;;  %v19507_v26 = vand.u32 4294901760, %v19506_v20  ;;  %v19510_v53 = vld [vmem:[#allocation25_spill] sm:$0xff] }
 0x631   :  { %8062 = vmatprep.subr.mxu1 %v19491_v15  ;;  %7767 = vmatpush1.msra.mxu0 %v19493_v28  ;;  %v19511_v15 = vand.u32 4294901760, %v19370_v24  ;;  %v19513_v28 = vld [vmem:[#allocation29_spill] sm:$0xff]  ;;  %v19522_v24 = vld [vmem:[#allocation83_spill] sm:$0xff] }
 0x632   :  { %8064 = vmatpush1.msra.mxu1 %v19494_v2  ;;  %7493 = vmatmul.mubr.f32.gmra.mxu0 %v14567_v47  ;;  %v19505_v47 = vld [vmem:[#allocation32_spill] sm:$0xff]  ;;  %v19514_v2 = vand.u32 4294901760, %v19513_v28  ;;  %v19523_v4 = vand.u32 4294901760, %v19522_v24  ;;  %v6562_v28 = vld [vmem:[#allocation11 + $0x2e8] sm:$0xff]  ;;  %v19543_v24 = vld [vmem:[#allocation39_spill] sm:$0xff] }
 0x633   :  { %7714 = vmatmul.mubr.f32.gmra.mxu1 %v19495_v7  ;;  %7771 = vmatprep.subr.mxu0 %v19497_v5  ;;  %v19515_v7 = vld [vmem:[#allocation50_spill] sm:$0xff]  ;;  %v19517_v5 = vand.u32 4294901760, %v19516_v34  ;;  %v19538_v34 = vld [vmem:[#allocation41_spill] sm:$0xff] }
 0x634   :  { %8066 = vmatprep.subr.mxu1 %v19498_v62  ;;  %7500 = vmatprep.mubr.f32.mxu0 %v14577_v32  ;;  %v19509_v32 = vand.u32 4294901760, %v19368_v46  ;;  %v19519_v46 = vld [vmem:[#allocation37_spill] sm:$0xff] }
 0x635   :  { %7775 = vmatpush1.msra.mxu0 %v19500_v13  ;;  %8068 = vmatpush1.msra.mxu1 %v19501_v57  ;;  %v19520_v62 = vand.u32 4294901760, %v19519_v46  ;;  %v19524_v13 = vld [vmem:[#allocation75_spill] sm:$0xff]  ;;  %v19525_v57 = vld [vmem:[#allocation86_spill] sm:$0xff]  ;;  %v19541_v46 = vld [vmem:[#allocation48_spill] sm:$0xff] }
 0x636   :  { %8154 = vmatprep.mubr.f32.mxu1 %v19502_v23  ;;  %7779 = vmatprep.subr.mxu0 %v19504_v16  ;;  %v19526_v11 = vand.u32 4294901760, %v19525_v57  ;;  %v19527_v16 = vld [vmem:[#allocation44_spill] sm:$0xff]  ;;  %v14910_v57 = vand.u32 4294901760, %v6562_v28 }
 0x637   :  { %8070 = vmatprep.subr.mxu1 %v19505_v47  ;;  %7783 = vmatpush1.msra.mxu0 %v19507_v26  ;;  %v19528_v47 = vld [vmem:[#allocation27_spill] sm:$0xff]  ;;  %v19531_v26 = vld [vmem:[#allocation38_spill] sm:$0xff] }
 0x638   :  { %8072 = vmatpush1.msra.mxu1 %v19508_v10  ;;  %7503 = vmatmul.mubr.f32.gmra.mxu0 %v19480_v38  ;;  %v19518_v38 = vld [vmem:[#allocation33_spill] sm:$0xff]  ;;  %v19529_v20 = vand.u32 4294901760, %v19528_v47  ;;  %v19532_v10 = vand.u32 4294901760, %v19531_v26  ;;  %19546 = vst [vmem:[#allocation172_spill] sm:$0xff] %v14910_v57  ;;  %v19549_v47 = vld [vmem:[#allocation64_spill] sm:$0xff] }
 0x639   :  { %7787 = vmatprep.subr.mxu0 %v19509_v32  ;;  %8074 = vmatprep.subr.mxu1 %v19510_v53  ;;  %v6564_v32 = vld [vmem:[#allocation11 + $0x2f8] sm:$0xff]  ;;  %v19533_v53 = vld [vmem:[#allocation158_spill] sm:$0xff]  ;;  %v19552_v26 = vld [vmem:[#allocation69_spill] sm:$0xff] }
 0x63a   :  { %7510 = vmatprep.mubr.f32.mxu0 %v14603_v17  ;;  %7791 = vmatpush1.msra.mxu0 %v19511_v15  ;;  %v19521_v17 = vld [vmem:[#allocation52_spill] sm:$0xff] }
 0x63b   :  { %8076 = vmatpush1.msra.mxu1 %v19512_v58  ;;  %7795 = vmatprep.subr.mxu0 %v19514_v2  ;;  %v19535_v15 = vld [vmem:[#allocation40_spill] sm:$0xff]  ;;  %v6563_v58 = vld [vmem:[#allocation11 + $0x2f0] sm:$0xff] }
 0x63c   :  { %8078 = vmatprep.subr.mxu1 %v19515_v7  ;;  %7799 = vmatpush1.msra.mxu0 %v19517_v5  ;;  %v19536_v2 = vld [vmem:[#allocation88_spill] sm:$0xff]  ;;  %v19539_v5 = vld [vmem:[#allocation45_spill] sm:$0xff] }
 0x63d   :  { %8080 = vmatpush1.msra.mxu1 %v19518_v38  ;;  %7513 = vmatmul.mubr.f32.gmra.mxu0 %v14619_v12  ;;  %v19530_v12 = vld [vmem:[#allocation137_spill] sm:$0xff]  ;;  %v19537_v7 = vand.u32 4294901760, %v19536_v2  ;;  %v19540_v38 = vand.u32 4294901760, %v19539_v5  ;;  %v6559_v2 = vld [vmem:[#allocation11 + $0x2d0] sm:$0xff]  ;;  %v14935_v5 = vsub.f32 %v6562_v28, %v14910_v57 }
 0x63e   :  { %7803 = vmatprep.subr.mxu0 %v19520_v62  ;;  %8082 = vmatprep.subr.mxu1 %v19521_v17  ;;  %v14903_v62 = vand.u32 4294901760, %v6564_v32  ;;  %v6560_v17 = vld [vmem:[#allocation11 + $0x2d8] sm:$0xff]  ;;  %v14949_v28 = vand.u32 4294901760, %v6559_v2 }
 0x63f   :  { %7807 = vmatpush1.msra.mxu0 %v19523_v4  ;;  %7977 = vmatprep.mubr.f32.mxu0 %v19502_v23  ;;  %v19534_v23 = vand.u32 4294901760, %v19533_v53  ;;  %v19544_v4 = vand.u32 4294901760, %v19543_v24  ;;  %v14920_v53 = vand.u32 4294901760, %v6560_v17  ;;  %19560 = vst [vmem:[#allocation150_spill] sm:$0xff] %v14935_v5 }
 0x640   :  { %8084 = vmatpush1.msra.mxu1 %v19524_v13  ;;  %7811 = vmatprep.subr.mxu0 %v19526_v11  ;;  %19542 = vst [vmem:[#allocation61_spill] sm:$0xff] %v14903_v62  ;;  %v14908_v13 = vand.u32 4294901760, %v6563_v58  ;;  %v19547_v11 = vld [vmem:[#allocation76_spill] sm:$0xff]  ;;  %19567 = vst [vmem:[#allocation95_spill] sm:$0xff] %v14949_v28 }
 0x641   :  { %8086 = vmatprep.subr.mxu1 %v19527_v16  ;;  %7815 = vmatpush1.msra.mxu0 %v19529_v20  ;;  %v19548_v16 = vand.u32 4294901760, %v19547_v11  ;;  %v19550_v20 = vld [vmem:[#allocation81_spill] sm:$0xff]  ;;  %19554 = vst [vmem:[#allocation107_spill] sm:$0xff] %v14920_v53  ;;  %v19568_v11 = vld [vmem:[#allocation70_spill] sm:$0xff] }
 0x642   :  { %8088 = vmatpush1.msra.mxu1 %v19530_v12  ;;  %7819 = vmatprep.subr.mxu0 %v19532_v10  ;;  %19545 = vst [vmem:[#allocation177_spill] sm:$0xff] %v14908_v13  ;;  %v19551_v12 = vand.u32 4294901760, %v19550_v20  ;;  %v19572_v20 = vld [vmem:[#allocation57_spill] sm:$0xff] }
 0x643   :  { %8090 = vmatprep.subr.mxu1 %v19386_v36  ;;  %7823 = vmatpush1.msra.mxu0 %v19534_v23  ;;  %v6561_v36 = vld [vmem:[#allocation11 + $0x2e0] sm:$0xff]  ;;  %v19556_v23 = vld [vmem:[#allocation104_spill] sm:$0xff] }
 0x644   :  { %8092 = vmatpush2.msra.mxu1 %v19535_v15  ;;  %7827 = vmatprep.subr.mxu0 %v19537_v7  ;;  %v14918_v10 = vand.u32 4294901760, %v6561_v36  ;;  %v14926_v15 = vsub.f32 %v6564_v32, %v14903_v62  ;;  %v19558_v7 = vand.u32 4294901760, %v19400_v30  ;;  %v6557_v32 = vld [vmem:[#allocation11 + $0x2c0] sm:$0xff]  ;;  %v19564_v30 = vld [vmem:[#allocation98_spill] sm:$0xff] }
 0x645   :  { %8094 = vmatprep.subr.mxu1 %v19538_v34  ;;  %7831 = vmatpush1.msra.mxu0 %v19540_v38  ;;  %v14932_v34 = vsub.f32 %v6563_v58, %v14908_v13  ;;  %v6558_v38 = vld [vmem:[#allocation11 + $0x2c8] sm:$0xff]  ;;  %v14947_v58 = vsub.f32 %v6560_v17, %v14920_v53 }
 0x646   :  { %8096 = vmatpush2.msra.mxu1 %v19541_v46  ;;  %7835 = vmatprep.subr.mxu0 %v19544_v4  ;;  %19553 = vst [vmem:[#allocation82_spill] sm:$0xff] %v14918_v10  ;;  %19557 = vst [vmem:[#allocation119_spill] sm:$0xff] %v14926_v15  ;;  %v19562_v46 = vld [vmem:[#allocation63_spill] sm:$0xff]  ;;  %v6556_v4 = vld [vmem:[#allocation11 + $0x2b8] sm:$0xff] }
 0x647   :  { %8098 = vmatprep.subr.mxu1 %v19394_v60  ;;  %7839 = vmatpush1.msra.mxu0 %v19548_v16  ;;  %v19555_v60 = vand.u32 4294901760, %v19397_v9  ;;  %19559 = vst [vmem:[#allocation139_spill] sm:$0xff] %v14932_v34  ;;  %v19561_v9 = vand.u32 4294901760, %v19402_v19  ;;  %v19563_v24 = vand.u32 4294901760, %v19562_v46  ;;  %19566 = vst [vmem:[#allocation108_spill] sm:$0xff] %v14947_v58  ;;  %v19569_v19 = vand.u32 4294901760, %v19568_v11 }
 0x648   :  { %8100 = vmatpush2.msra.mxu1 %v19549_v47  ;;  %7843 = vmatprep.subr.mxu0 %v19551_v12  ;;  %v19570_v16 = vld [vmem:[#allocation101_spill] sm:$0xff]  ;;  %v14955_v47 = vand.u32 4294901760, %v6558_v38  ;;  %v19573_v12 = vand.u32 4294901760, %v19572_v20  ;;  %v17664_v17 = vand.u32 4294901760, %v14932_v34  ;;  %v19579_v46 = vand.u32 4294901760, %v19409_v42  ;;  %v19582_v20 = vld [vmem:[#allocation84_spill] sm:$0xff] }
 0x649   :  { %8102 = vmatprep.subr.mxu1 %v19552_v26  ;;  %7847 = vmatpush1.msra.mxu0 %v19555_v60  ;;  %v17666_v26 = vand.u32 4294901760, %v14935_v5  ;;  %v14962_v60 = vand.u32 4294901760, %v6557_v32  ;;  %v14975_v11 = vsub.f32 %v6559_v2, %v14949_v28  ;;  %v19586_v2 = vand.u32 4294901760, %v19414_v45  ;;  %v19591_v45 = vld [vmem:[#allocation129_spill] sm:$0xff] }
 0x64a   :  { %8104 = vmatpush2.msra.mxu1 %v19556_v23  ;;  %7851 = vmatprep.subr.mxu0 %v19558_v7  ;;  %19571 = vst [vmem:[#allocation130_spill] sm:$0xff] %v14955_v47  ;;  %v19576_v23 = vand.u32 4294901760, %v19407_v0  ;;  %v19577_v7 = vld [vmem:[#allocation171_spill] sm:$0xff]  ;;  %v19581_v0 = vld [vmem:[#allocation161_spill] sm:$0xff] }
 0x64b   :  { %8106 = vmatprep.subr.mxu1 %v13934_v14  ;;  %7855 = vmatpush2.msra.mxu0 %v19561_v9  ;;  %v14944_v14 = vsub.f32 %v6561_v36, %v14918_v10  ;;  %v19574_v36 = vld [vmem:[#allocation94_spill] sm:$0xff]  ;;  %19575 = vst [vmem:[#allocation22_spill] sm:$0xff] %v14962_v60  ;;  %v14967_v9 = vand.u32 4294901760, %v6556_v4  ;;  %19580 = vst [vmem:[#allocation153_spill] sm:$0xff] %v14975_v11 }
 0x64c   :  { %8108 = vmatpush2.msra.mxu1 %v13944_v56  ;;  %7859 = vmatprep.subr.mxu0 %v19563_v24  ;;  %v17665_v56 = vand.u32 4294901760, %v14926_v15 }
 0x64d   :  { %8110 = vmatprep.subr.mxu1 %v19564_v30  ;;  %19565 = vst [vmem:[#allocation17_spill] sm:$0xff] %v14944_v14  ;;  %7863 = vmatpush2.msra.mxu0 %v19569_v19  ;;  %19578 = vst [vmem:[#allocation71_spill] sm:$0xff] %v14967_v9  ;;  %v17671_v24 = vand.u32 4294901760, %v14944_v14  ;;  %v6555_v19 = vld [vmem:[#allocation11 + $0x2b0] sm:$0xff] }
 0x64e   :  { %8112 = vmatpush2.msra.mxu1 %v19570_v16  ;;  %7867 = vmatprep.subr.mxu0 %v19573_v12  ;;  %v6554_v16 = vld [vmem:[#allocation11 + $0x2a8] sm:$0xff]  ;;  %v4994_v12 = vadd.f32 %v19582_v20, %v19581_v0  ;;  %v14985_v42 = vsub.f32 %v14926_v15, %v17665_v56  ;;  %v15004_v0 = vsub.f32 %v6557_v32, %v14962_v60  ;;  %v19595_v56 = vld [vmem:[#allocation115_spill] sm:$0xff] }
 0x64f   :  { %8114 = vmatprep.subr.mxu1 %v19574_v36  ;;  %7871 = vmatpush2.msra.mxu0 %v19576_v23  ;;  %v19583_v36 = vand.u32 4294901760, %v19412_v33  ;;  %v19584_v23 = vld [vmem:[#allocation97_spill] sm:$0xff]  ;;  %v14996_v33 = vsub.f32 %v14932_v34, %v17664_v17  ;;  %v19589_v20 = vld [vmem:[#allocation114_spill] sm:$0xff]  ;;  %v6552_v17 = vld [vmem:[#allocation11 + $0x298] sm:$0xff]  ;;  %v15022_v32 = vsub.f32 %v14944_v14, %v17671_v24 }
 0x650   :  { %8116 = vmatpush2.msra.mxu1 %v19577_v7  ;;  %7875 = vmatprep.subr.mxu0 %v19579_v46  ;;  %v19587_v7 = vld [vmem:[#allocation126_spill] sm:$0xff]  ;;  %v15001_v46 = vsub.f32 %v14935_v5, %v17666_v26  ;;  %19588 = vst [vmem:[#allocation54_spill] sm:$0xff] %v15004_v0  ;;  %v19596_v26 = vand.u32 4294901760, %v19595_v56  ;;  %v19597_v30 = vld [vmem:[#allocation131_spill] sm:$0xff]  ;;  %v19600_v56 = vand.u32 4294901760, %v19417_v49 }
 0x651   :  { %8118 = vmatprep.subr.mxu1 %v19410_v44  ;;  %7879 = vmatpush2.msra.mxu0 %v19583_v36  ;;  %v14988_v44 = vsub.f32 %v6558_v38, %v14955_v47  ;;  %v6553_v38 = vld [vmem:[#allocation11 + $0x2a0] sm:$0xff]  ;;  %v19590_v36 = vand.u32 4294901760, %v19589_v20  ;;  %v19598_v20 = vand.u32 4294901760, %v14947_v58  ;;  %v19599_v5 = vld [vmem:[#allocation103_spill] sm:$0xff]  ;;  %v6550_v15 = vld [vmem:[#allocation11 + $0x288] sm:$0xff] }
 0x652   :  { %8120 = vmatpush2.msra.mxu1 %v19584_v23  ;;  %7883 = vmatprep.subr.mxu0 %v19586_v2  ;;  %v15010_v23 = vsub.f32 %v6556_v4, %v14967_v9  ;;  %v15012_v2 = vand.u32 4294901760, %v6555_v19  ;;  %v15031_v34 = vadd.f32 %v19599_v5, %v4994_v12  ;;  %v15038_v14 = vand.u32 4294901760, %v6553_v38  ;;  %v6547_v5 = vld [vmem:[#allocation11 + $0x270] sm:$0xff]  ;;  %v6546_v49 = vld [vmem:[#allocation11 + $0x268] sm:$0xff] }
 0x653   :  { %19585 = vst [vmem:[#allocation78_spill] sm:$0xff] %v14988_v44  ;;  %8122 = vmatprep.subr.mxu1 %v19587_v7  ;;  %7887 = vmatpush2.msra.mxu0 %v19590_v36  ;;  %v15014_v7 = vand.u32 4294901760, %v6554_v16  ;;  %v15027_v4 = vsub.f32 %v14947_v58, %v19598_v20  ;;  %v19603_v20 = vand.u32 4294901760, %v19419_v55  ;;  %v19604_v36 = vld [vmem:[#allocation18_spill] sm:$0xff]  ;;  %v19615_v55 = vand.u32 4294901760, %v19423_v37 }
 0x654   :  { %8124 = vmatpush2.msra.mxu1 %v19591_v45  ;;  %19592 = vst [vmem:[#allocation58_spill] sm:$0xff] %v15010_v23  ;;  %19593 = vst [vmem:[#allocation43_spill] sm:$0xff] %v15012_v2  ;;  %7891 = vmatprep.subr.mxu0 %v19596_v26  ;;  %v6551_v45 = vld [vmem:[#allocation11 + $0x290] sm:$0xff]  ;;  %v19601_v26 = vld [vmem:[#allocation173_spill] sm:$0xff]  ;;  %v19616_v43 = vand.u32 4294901760, %v14988_v44  ;;  %v19621_v37 = vand.u32 4294901760, %v15004_v0 }
 0x655   :  { %19594 = vst [vmem:[#allocation77_spill] sm:$0xff] %v15014_v7  ;;  %8126 = vmatprep.subr.mxu1 %v19597_v30  ;;  %7895 = vmatpush2.msra.mxu0 %v19600_v56  ;;  %19602 = vst [vmem:[#allocation56_spill] sm:$0xff] %v15038_v14  ;;  %v15046_v56 = vand.u32 4294901760, %v6552_v17  ;;  %v6548_v30 = vld [vmem:[#allocation11 + $0x278] sm:$0xff]  ;;  %v19606_v58 = vld [vmem:[#allocation166_spill] sm:$0xff]  ;;  %v15058_v12 = vand.u32 4294901760, %v6551_v45 }
 0x656   :  { %8128 = vmatpush2.msra.mxu1 %v19601_v26  ;;  %7899 = vmatprep.subr.mxu0 %v19603_v20  ;;  %v6549_v26 = vld [vmem:[#allocation11 + $0x280] sm:$0xff]  ;;  %v19607_v24 = vand.u32 4294901760, %v19606_v58  ;;  %v15053_v20 = vsub.f32 %v6555_v19, %v15012_v2  ;;  %v15085_v58 = vand.u32 4294901760, %v6548_v30 }
 0x657   :  { %8130 = vmatprep.subr.mxu1 %v19604_v36  ;;  %19605 = vst [vmem:[#allocation85_spill] sm:$0xff] %v15046_v56  ;;  %v15056_v36 = vsub.f32 %v6554_v16, %v15014_v7  ;;  %19611 = vst [vmem:[#allocation80_spill] sm:$0xff] %v15058_v12  ;;  %v15070_v16 = vand.u32 4294901760, %v6550_v15  ;;  %v19620_v7 = vand.u32 4294901760, %v19425_v39  ;;  %v19627_v39 = vand.u32 4294901760, %v15010_v23 }
 0x658   :  { %7903 = vmatpush2.msra.mxu0 %v19607_v24  ;;  %8132 = vmatpush2.msra.mxu1 %v19608_v54  ;;  %19609 = vst [vmem:[#allocation60_spill] sm:$0xff] %v15053_v20  ;;  %v19613_v24 = vand.u32 4294901760, %v14975_v11  ;;  %v15083_v54 = vand.u32 4294901760, %v6549_v26  ;;  %19619 = vst [vmem:[#allocation121_spill] sm:$0xff] %v15085_v58 }
 0x659   :  { %19610 = vst [vmem:[#allocation55_spill] sm:$0xff] %v15056_v36  ;;  %7907 = vmatprep.subr.mxu0 %v19612_v50  ;;  %8134 = vmatprep.subr.mxu1 %v14138_v59  ;;  %19614 = vst [vmem:[#allocation176_spill] sm:$0xff] %v15070_v16  ;;  %v15078_v59 = vsub.f32 %v14988_v44, %v19616_v43  ;;  %v15081_v50 = vsub.f32 %v6553_v38, %v15038_v14  ;;  %v15098_v38 = vand.u32 4294901760, %v6547_v5  ;;  %v19626_v14 = vld [vmem:[#allocation74_spill] sm:$0xff] }
 0x65a   :  { %v15068_v19 = vsub.f32 %v14975_v11, %v19613_v24  ;;  %7911 = vmatpush2.msra.mxu0 %v19615_v55  ;;  %8136 = vmatpush2.msra.mxu1 %v14199_v40  ;;  %19618 = vst [vmem:[#allocation111_spill] sm:$0xff] %v15083_v54  ;;  %v6545_v24 = vld [vmem:[#allocation11 + $0x260] sm:$0xff]  ;;  %v6544_v11 = vld [vmem:[#allocation11 + $0x258] sm:$0xff]  ;;  %v15093_v40 = vsub.f32 %v15004_v0, %v19621_v37  ;;  %v15100_v43 = vand.u32 4294901760, %v6546_v49  ;;  %v19625_v44 = vand.u32 4294901760, %v19426_v21  ;;  %v15118_v21 = vpop.f32.mrf.mxu1 }
 0x65b   :  { %19617 = vst [vmem:[#allocation100_spill] sm:$0xff] %v15081_v50  ;;  %7915 = vmatprep.subr.mxu0 %v19620_v7  ;;  %8138 = vmatprep.subr.mxu1 %v14215_v8  ;;  %v15096_v55 = vsub.f32 %v6552_v17, %v15046_v56  ;;  %19623 = vst [vmem:[#allocation164_spill] sm:$0xff] %v15098_v38  ;;  %v15108_v8 = vsub.f32 %v15010_v23, %v19627_v39  ;;  %v19629_v0 = vand.u32 4294901760, %v19427_v29  ;;  %v19634_v37 = vld [vmem:[#allocation140_spill] sm:$0xff] }
 0x65c   :  { %19624 = vst [vmem:[#allocation167_spill] sm:$0xff] %v15100_v43  ;;  %7919 = vmatpush2.msra.mxu0 %v19625_v44  ;;  %8140 = vmatpush2.msra.mxu1 %v19626_v14  ;;  %v15113_v17 = vsub.f32 %v6551_v45, %v15058_v12  ;;  %19630 = vst [vmem:[#allocation122_spill] sm:$0xff] %v15118_v21  ;;  %v15122_v44 = vsub.f32 %v6550_v15, %v15070_v16  ;;  %v15124_v39 = vand.u32 4294901760, %v6545_v24  ;;  %v19636_v45 = vld [vmem:[#allocation149_spill] sm:$0xff]  ;;  %v6543_v15 = vld [vmem:[#allocation11 + $0x250] sm:$0xff] }
 0x65d   :  { %19622 = vst [vmem:[#allocation67_spill] sm:$0xff] %v15096_v55  ;;  %7923 = vmatprep.subr.mxu0 %v19629_v0  ;;  %8142 = vmatprep.subr.mxu1 %v14240_v41  ;;  %v15126_v7 = vand.u32 4294901760, %v6544_v11  ;;  %v19635_v23 = vand.u32 4294901760, %v19634_v37  ;;  %v15134_v0 = vsub.f32 %v6549_v26, %v15083_v54  ;;  %v15137_v14 = vsub.f32 %v6548_v30, %v15085_v58  ;;  %v6542_v26 = vld [vmem:[#allocation11 + $0x248] sm:$0xff]  ;;  %v6541_v37 = vld [vmem:[#allocation11 + $0x240] sm:$0xff]  ;;  %v6540_v41 = vld [vmem:[#allocation11 + $0x238] sm:$0xff] }
 0x65e   :  { %19628 = vst [vmem:[#allocation169_spill] sm:$0xff] %v15113_v17  ;;  %19631 = vst [vmem:[#allocation135_spill] sm:$0xff] %v15122_v44  ;;  %8144 = vmatpush2.msra.mxu1 %v19636_v45  ;;  %v19639_v21 = vand.u32 4294901760, %v19430_v35  ;;  %v15145_v45 = vsub.f32 %v6547_v5, %v15098_v38  ;;  %v15148_v29 = vsub.f32 %v6546_v49, %v15100_v43  ;;  %v19642_v30 = vand.u32 4294901760, %v19431_v61  ;;  %v19649_v49 = vld [vmem:[#allocation73_spill] sm:$0xff] }
 0x65f   :  { %19632 = vst [vmem:[#allocation142_spill] sm:$0xff] %v15124_v39  ;;  %19633 = vst [vmem:[#allocation175_spill] sm:$0xff] %v15126_v7  ;;  %7927 = vmatpush2.msra.mxu0 %v19635_v23  ;;  %8146 = vmatprep.subr.mxu1 %v14263_v18  ;;  %v19643_v18 = vand.u32 4294901760, %v15053_v20  ;;  %v19644_v23 = vand.u32 4294901760, %v15056_v36  ;;  %v19645_v61 = vand.u32 4294901760, %v19433_v52  ;;  %v15175_v35 = vsub.f32 %v6544_v11, %v15126_v7  ;;  %v19653_v11 = vld [vmem:[#allocation138_spill] sm:$0xff] }
 0x660   :  { %19637 = vst [vmem:[#allocation155_spill] sm:$0xff] %v15134_v0  ;;  %19638 = vst [vmem:[#allocation154_spill] sm:$0xff] %v15137_v14  ;;  %7931 = vmatprep.subr.mxu0 %v19639_v21  ;;  %8148 = vmatpush2.msra.mxu1 %v14265_v51  ;;  %v15168_v51 = vpop.f32.mrf.mxu1  ;;  %v19655_v7 = vld [vmem:[#allocation46_spill] sm:$0xff] }
 0x661   :  { %19640 = vst [vmem:[#allocation87_spill] sm:$0xff] %v15145_v45  ;;  %19641 = vst [vmem:[#allocation79_spill] sm:$0xff] %v15148_v29  ;;  %7935 = vmatpush2.msra.mxu0 %v19642_v30  ;;  %v15157_v21 = vsub.f32 %v15053_v20, %v19643_v18  ;;  %v15162_v5 = vsub.f32 %v15056_v36, %v19644_v23  ;;  %8150 = vmatprep.subr.mxu1 %v14290_v6  ;;  %v15177_v23 = vand.u32 4294901760, %v6543_v15 }
 0x662   :  { %7939 = vmatprep.subr.mxu0 %v19645_v61  ;;  %v15172_v18 = vsub.f32 %v6545_v24, %v15124_v39  ;;  %19647 = vst [vmem:[#allocation62_spill] sm:$0xff] %v15175_v35  ;;  %v19650_v36 = vand.u32 4294901760, %v19649_v49  ;;  %8152 = vmatpush2.msra.mxu1 %v14292_v27  ;;  %v19651_v6 = vand.u32 4294901760, %v15081_v50  ;;  %v15189_v30 = vand.u32 4294901760, %v6542_v26 }
 0x663   :  { %19648 = vst [vmem:[#allocation91_spill] sm:$0xff] %v15177_v23  ;;  %v19654_v20 = vand.u32 4294901760, %v19653_v11  ;;  %8156 = vmatmul.mubr.f32.vlgmr.msra.gmra.mxu1 %v19655_v7  ;;  %v19658_v24 = vand.u32 4294901760, %v14985_v42  ;;  %v19659_v61 = vand.u32 4294901760, %v19437_v1  ;;  %v19660_v39 = vand.u32 4294901760, %v15113_v17  ;;  %v15219_v42 = vpop.f32.mrf.mxu1 }
 0x664   :  { %19646 = vst [vmem:[#allocation156_spill] sm:$0xff] %v15172_v18  ;;  %7943 = vmatpush2.msra.mxu0 %v19650_v36  ;;  %v15185_v52 = vsub.f32 %v15081_v50, %v19651_v6  ;;  %19652 = vst [vmem:[#allocation96_spill] sm:$0xff] %v15189_v30  ;;  %v19656_v36 = vand.u32 4294901760, %v15096_v55  ;;  %v15201_v50 = vand.u32 4294901760, %v6541_v37  ;;  %v15214_v49 = vand.u32 4294901760, %v6540_v41  ;;  %v19662_v6 = vld [vmem:[#allocation51_spill] sm:$0xff] }
 0x665   :  { %7947 = vmatprep.subr.mxu0 %v19654_v20  ;;  %8432 = vmatprep.subr.mxu1 %v19658_v24  ;;  %19664 = vst [vmem:[#allocation28_spill] sm:$0xff] %v15219_v42  ;;  %v19665_v1 = vand.u32 4294901760, %v15122_v44  ;;  %v6539_v20 = vld [vmem:[#allocation11 + $0x230] sm:$0xff]  ;;  %v19669_v42 = vand.u32 4294901760, %v15134_v0  ;;  %v19670_v24 = vand.u32 4294901760, %v15137_v14 }
 0x666   :  { %v15197_v27 = vsub.f32 %v15096_v55, %v19656_v36  ;;  %19657 = vst [vmem:[#allocation132_spill] sm:$0xff] %v15201_v50  ;;  %7951 = vmatpush2.msra.mxu0 %v19659_v61  ;;  %v15212_v36 = vsub.f32 %v15113_v17, %v19660_v39  ;;  %19661 = vst [vmem:[#allocation106_spill] sm:$0xff] %v15214_v49  ;;  %8162 = vmatprep.mubr.f32.mxu1 %v19662_v6  ;;  %v19663_v55 = vand.u32 4294901760, %v14996_v33 }
 0x667   :  { %v15224_v61 = vsub.f32 %v15122_v44, %v19665_v1  ;;  %v15229_v39 = vsub.f32 %v6543_v15, %v15177_v23  ;;  %v19667_v17 = vand.u32 4294901760, %v19440_v48  ;;  %v19668_v33 = vand.u32 4294901760, %v15001_v46  ;;  %v19688_v44 = vld [vmem:[#allocation65_spill] sm:$0xff] }
 0x668   :  { %8438 = vmatpush1.msra.mxu1 %v19663_v55  ;;  %v15239_v1 = vsub.f32 %v15134_v0, %v19669_v42  ;;  %v15244_v11 = vsub.f32 %v15137_v14, %v19670_v24  ;;  %v15247_v15 = vsub.f32 %v6542_v26, %v15189_v30  ;;  %v19672_v48 = vand.u32 4294901760, %v19442_v22  ;;  %v19707_v30 = vld [vmem:[#allocation143_spill] sm:$0xff] }
 0x669   :  { %19666 = vst [vmem:[#allocation72_spill] sm:$0xff] %v15229_v39  ;;  %7955 = vmatprep.subr.mxu0 %v19667_v17  ;;  %8444 = vmatprep.subr.mxu1 %v19668_v33  ;;  %v19673_v46 = vand.u32 4294901760, %v15022_v32  ;;  %v15253_v17 = vpop.f32.mrf.mxu0  ;;  %v19675_v42 = vand.u32 4294901760, %v15145_v45  ;;  %v19676_v24 = vand.u32 4294901760, %v15148_v29  ;;  %v15267_v22 = vsub.f32 %v6541_v37, %v15201_v50  ;;  %v19678_v32 = vld [vmem:[#allocation35_spill] sm:$0xff]  ;;  %v19680_v33 = vld [vmem:[#allocation109_spill] sm:$0xff] }
 0x66a   :  { %19671 = vst [vmem:[#allocation125_spill] sm:$0xff] %v15247_v15  ;;  %7959 = vmatpush2.msra.mxu0 %v19672_v48  ;;  %19674 = vst [vmem:[#allocation102_spill] sm:$0xff] %v15253_v17  ;;  %v6538_v48 = vld [vmem:[#allocation11 + $0x228] sm:$0xff]  ;;  %v19679_v14 = vand.u32 4294901760, %v19444_v25  ;;  %8164 = vmatmul.mubr.f32.gmra.mxu1 %v19680_v33  ;;  %v15278_v0 = vand.u32 4294901760, %v6539_v20  ;;  %v19683_v37 = vand.u32 4294901760, %v15027_v4 }
 0x66b   :  { %8450 = vmatpush1.msra.mxu1 %v19673_v46  ;;  %v15259_v55 = vsub.f32 %v15145_v45, %v19675_v42  ;;  %v15264_v26 = vsub.f32 %v15148_v29, %v19676_v24  ;;  %19677 = vst [vmem:[#allocation127_spill] sm:$0xff] %v15267_v22  ;;  %v5710_v46 = vadd.f32 %v19678_v32, %v15031_v34  ;;  %v6537_v24 = vld [vmem:[#allocation11 + $0x220] sm:$0xff]  ;;  %v19684_v29 = vand.u32 4294901760, %v19447_v3  ;;  %v15284_v34 = vpop.f32.mrf.mxu1  ;;  %v6534_v25 = vld [vmem:[#allocation11 + $0x208] sm:$0xff] }
 0x66c   :  { %7963 = vmatprep.subr.mxu0 %v19679_v14  ;;  %v15276_v45 = vsub.f32 %v6540_v41, %v15214_v49  ;;  %19682 = vst [vmem:[#allocation168_spill] sm:$0xff] %v15278_v0  ;;  %8456 = vmatprep.subr.mxu1 %v19683_v37  ;;  %19685 = vst [vmem:[#allocation123_spill] sm:$0xff] %v15284_v34  ;;  %v19686_v14 = vand.u32 4294901760, %v15172_v18  ;;  %v19687_v41 = vand.u32 4294901760, %v15175_v35  ;;  %v6536_v37 = vld [vmem:[#allocation11 + $0x218] sm:$0xff]  ;;  %v19689_v3 = vand.u32 4294901760, %v15068_v19 }
 0x66d   :  { %7967 = vmatpush2.msra.mxu0 %v19684_v29  ;;  %8170 = vmatprep.mubr.f32.mxu1 %v19688_v44  ;;  %v6535_v34 = vld [vmem:[#allocation11 + $0x210] sm:$0xff]  ;;  %v19692_v4 = vand.u32 4294901760, %v15078_v59  ;;  %v15313_v29 = vand.u32 4294901760, %v6537_v24  ;;  %v19695_v49 = vand.u32 4294901760, %v15093_v40  ;;  %v15324_v17 = vand.u32 4294901760, %v6536_v37  ;;  %v6533_v19 = vld [vmem:[#allocation11 + $0x200] sm:$0xff]  ;;  %v15326_v50 = vpop.f32.mrf.mxu1 }
 0x66e   :  { %19681 = vst [vmem:[#allocation117_spill] sm:$0xff] %v15276_v45  ;;  %v15290_v32 = vsub.f32 %v15172_v18, %v19686_v14  ;;  %v15295_v42 = vsub.f32 %v15175_v35, %v19687_v41  ;;  %8462 = vmatpush1.msra.mxu1 %v19689_v3  ;;  %v15304_v18 = vand.u32 4294901760, %v6538_v48  ;;  %v19691_v41 = vand.u32 4294901760, %v19451_v31  ;;  %v6225_v35 = vpop.f32.mrf.mxu0  ;;  %v19696_v31 = vld [vmem:[#allocation89_spill] sm:$0xff]  ;;  %v6596_v3 = vld [vmem:[#allocation11 + $0x3f8] sm:$0xff]  ;;  %19699 = vst [vmem:[#allocation19_spill] sm:$0xff] %v15326_v50 }
 0x66f   :  { %8468 = vmatprep.subr.mxu1 %v19692_v4  ;;  %19693 = vst [vmem:[#allocation116_spill] sm:$0xff] %v15313_v29  ;;  %v19694_v14 = vand.u32 4294901760, %v19453_v63  ;;  %v15322_v4 = vsub.f32 %v6539_v20, %v15278_v0  ;;  %19698 = vst [vmem:[#allocation118_spill] sm:$0xff] %v15324_v17  ;;  %v19700_v63 = vld [vmem:[#allocation159_spill] sm:$0xff]  ;;  %v15337_v20 = vand.u32 4294901760, %v6535_v34  ;;  %v19703_v59 = vand.u32 4294901760, %v15108_v8 }
 0x670   :  { %19690 = vst [vmem:[#allocation145_spill] sm:$0xff] %v15304_v18  ;;  %7971 = vmatprep.subr.mxu0 %v19691_v41  ;;  %8474 = vmatpush1.msra.mxu1 %v19695_v49  ;;  %v5901_v41 = vadd.f32 %v19696_v31, %v5710_v46  ;;  %v19701_v46 = vand.u32 4294901760, %v15229_v39  ;;  %v6595_v31 = vld [vmem:[#allocation11 + $0x3f0] sm:$0xff]  ;;  %v19704_v50 = vand.u32 4294901760, %v15247_v15  ;;  %v15348_v49 = vsub.f32 %v6538_v48, %v15304_v18 }
 0x671   :  { %7975 = vmatpush2.msra.mxu0 %v19694_v14  ;;  %19697 = vst [vmem:[#allocation124_spill] sm:$0xff] %v15322_v4  ;;  %8172 = vmatmul.mubr.f32.gmra.mxu1 %v19700_v63  ;;  %19702 = vst [vmem:[#allocation128_spill] sm:$0xff] %v15337_v20  ;;  %v15350_v0 = vand.u32 4294901760, %v6534_v25  ;;  %v19709_v8 = vand.u32 4294901760, %v15267_v22  ;;  %v15364_v48 = vand.u32 4294901760, %v6533_v19 }
 0x672   :  { %7979 = vmatmul.mubr.f32.vlgmr.msra.gmra.mxu0 %v19655_v7  ;;  %v15335_v14 = vsub.f32 %v15229_v39, %v19701_v46  ;;  %8203 = vmatprep.subr.mxu0 %v14903_v62  ;;  %v6226_v7 = vadd.f32 %v6225_v35, %v5901_v41  ;;  %v15345_v40 = vsub.f32 %v15247_v15, %v19704_v50  ;;  %v6594_v46 = vld [vmem:[#allocation11 + $0x3e8] sm:$0xff]  ;;  %v6593_v39 = vld [vmem:[#allocation11 + $0x3e0] sm:$0xff]  ;;  %v15354_v62 = vpop.f32.mrf.mxu0  ;;  %v15366_v41 = vand.u32 4294901760, %v6596_v3 }
 0x673   :  { %8480 = vmatprep.subr.mxu1 %v19703_v59  ;;  %19705 = vst [vmem:[#allocation157_spill] sm:$0xff] %v15348_v49  ;;  %19706 = vst [vmem:[#allocation20_spill] sm:$0xff] %v15350_v0  ;;  %7985 = vmatprep.mubr.f32.mxu0 %v19662_v6  ;;  %v15359_v35 = vsub.f32 %v15267_v22, %v19709_v8  ;;  %v15362_v50 = vsub.f32 %v6537_v24, %v15313_v29  ;;  %v19713_v6 = vand.u32 4294901760, %v15157_v21 }
 0x674   :  { %8178 = vmatprep.mubr.f32.mxu1 %v19707_v30  ;;  %19708 = vst [vmem:[#allocation92_spill] sm:$0xff] %v15354_v62  ;;  %19711 = vst [vmem:[#allocation144_spill] sm:$0xff] %v15364_v48  ;;  %8205 = vmatpush1.msra.mxu0 %v14908_v13  ;;  %v19714_v59 = vand.u32 4294901760, %v15276_v45  ;;  %v15378_v22 = vsub.f32 %v6536_v37, %v15324_v17  ;;  %v15380_v24 = vand.u32 4294901760, %v6595_v31  ;;  %v15382_v62 = vpop.f32.mrf.mxu1  ;;  %v19718_v13 = vand.u32 4294901760, %v15162_v5  ;;  %v6591_v5 = vld [vmem:[#allocation11 + $0x3d0] sm:$0xff] }
 0x675   :  { %19710 = vst [vmem:[#allocation165_spill] sm:$0xff] %v15362_v50  ;;  %19712 = vst [vmem:[#allocation146_spill] sm:$0xff] %v15366_v41  ;;  %8486 = vmatpush1.msra.mxu1 %v19713_v6  ;;  %8207 = vmatprep.subr.mxu0 %v14910_v57  ;;  %v15389_v6 = vsub.f32 %v6535_v34, %v15337_v20  ;;  %v15393_v8 = vand.u32 4294901760, %v6593_v39  ;;  %v15396_v37 = vadd.f32 %v15168_v51, %v6226_v7  ;;  %v6592_v34 = vld [vmem:[#allocation11 + $0x3d8] sm:$0xff]  ;;  %v19724_v57 = vld [vmem:[#allocation47_spill] sm:$0xff] }
 0x676   :  { %v15374_v15 = vsub.f32 %v15276_v45, %v19714_v59  ;;  %19715 = vst [vmem:[#allocation160_spill] sm:$0xff] %v15378_v22  ;;  %19716 = vst [vmem:[#allocation174_spill] sm:$0xff] %v15380_v24  ;;  %8492 = vmatprep.subr.mxu1 %v19718_v13  ;;  %v15391_v59 = vand.u32 4294901760, %v6594_v46  ;;  %8209 = vmatpush1.msra.mxu0 %v14918_v10  ;;  %v19722_v45 = vand.u32 4294901760, %v15185_v52  ;;  %v19729_v13 = vand.u32 4294901760, %v15322_v4  ;;  %v6590_v7 = vld [vmem:[#allocation11 + $0x3c8] sm:$0xff] }
 0x677   :  { %19717 = vst [vmem:[#allocation23_spill] sm:$0xff] %v15382_v62  ;;  %19719 = vst [vmem:[#allocation136_spill] sm:$0xff] %v15389_v6  ;;  %v15404_v21 = vsub.f32 %v6534_v25, %v15350_v0  ;;  %7987 = vmatmul.mubr.f32.gmra.mxu0 %v19680_v33  ;;  %8180 = vmatmul.mubr.f32.gmra.mxu1 %v19724_v57  ;;  %v15408_v62 = vpop.f32.mrf.mxu0  ;;  %v15416_v52 = vsub.f32 %v6596_v3, %v15366_v41  ;;  %v19728_v25 = vand.u32 4294901760, %v15197_v27  ;;  %v15431_v3 = vpop.f32.mrf.mxu1 }
 0x678   :  { %19720 = vst [vmem:[#allocation21_spill] sm:$0xff] %v15391_v59  ;;  %19721 = vst [vmem:[#allocation26_spill] sm:$0xff] %v15393_v8  ;;  %8498 = vmatpush1.msra.mxu1 %v19722_v45  ;;  %v15413_v45 = vsub.f32 %v6533_v19, %v15364_v48  ;;  %8211 = vmatprep.subr.mxu0 %v14920_v53  ;;  %v15425_v51 = vsub.f32 %v15322_v4, %v19729_v13  ;;  %v19732_v53 = vld [vmem:[#allocation113_spill] sm:$0xff]  ;;  %v15442_v13 = vand.u32 4294901760, %v6592_v34 }
 0x679   :  { %19723 = vst [vmem:[#allocation34_spill] sm:$0xff] %v15404_v21  ;;  %19725 = vst [vmem:[#allocation120_spill] sm:$0xff] %v15408_v62  ;;  %8504 = vmatprep.subr.mxu1 %v19728_v25  ;;  %v15429_v19 = vsub.f32 %v6595_v31, %v15380_v24  ;;  %7993 = vmatprep.mubr.f32.mxu0 %v19688_v44  ;;  %v15437_v25 = vsub.f32 %v6594_v46, %v15391_v59  ;;  %v6448_v31 = vmax.f32 %v15396_v37, 0.0  ;;  %v19748_v46 = vld [vmem:[#allocation148_spill] sm:$0xff] }
 0x67a   :  { %19726 = vst [vmem:[#allocation36_spill] sm:$0xff] %v15413_v45  ;;  %19727 = vst [vmem:[#allocation99_spill] sm:$0xff] %v15416_v52  ;;  %8186 = vmatprep.mubr.f32.mxu1 %v19732_v53  ;;  %v15440_v33 = vsub.f32 %v6593_v39, %v15393_v8  ;;  %8213 = vmatpush1.msra.mxu0 %v14949_v28  ;;  %v19736_v4 = vand.u32 4294901760, %v15212_v36  ;;  %v19737_v44 = vand.u32 4294901760, %v15348_v49  ;;  %v15454_v10 = vand.u32 4294901760, %v6591_v5  ;;  %v19739_v39 = vld [vmem:[#allocation141_spill] sm:$0xff]  ;;  %v15461_v28 = vpop.f32.mrf.mxu0 }
 0x67b   :  { %19730 = vst [vmem:[#allocation24_spill] sm:$0xff] %v15429_v19  ;;  %19731 = vst [vmem:[#allocation32_spill] sm:$0xff] %v15431_v3  ;;  %v19740_v3 = vld [vmem:[#allocation66_spill] sm:$0xff]  ;;  %8215 = vmatprep.subr.mxu0 %v14955_v47  ;;  %v19741_v37 = vand.u32 4294901760, %v15224_v61  ;;  %v19743_v36 = vand.u32 4294901760, %v15362_v50  ;;  %v19745_v61 = vand.u32 4294901760, %v15378_v22  ;;  %7995 = vmatmul.mubr.f32.gmra.mxu0 %v19700_v63 }
 0x67c   :  { %19733 = vst [vmem:[#allocation162_spill] sm:$0xff] %v15437_v25  ;;  %19734 = vst [vmem:[#allocation152_spill] sm:$0xff] %v15440_v33  ;;  %8510 = vmatpush1.msra.mxu1 %v19736_v4  ;;  %v15451_v27 = vsub.f32 %v15348_v49, %v19737_v44  ;;  %v5720_v62 = vadd.f32 %v19740_v3, %v19739_v39  ;;  %8217 = vmatpush1.msra.mxu0 %v14962_v60  ;;  %v19744_v3 = vand.u32 4294901760, %v15239_v1  ;;  %v6589_v49 = vld [vmem:[#allocation11 + $0x3c0] sm:$0xff]  ;;  %v19757_v47 = vld [vmem:[#allocation30_spill] sm:$0xff] }
 0x67d   :  { %19735 = vst [vmem:[#allocation25_spill] sm:$0xff] %v15442_v13  ;;  %19738 = vst [vmem:[#allocation49_spill] sm:$0xff] %v15454_v10  ;;  %8516 = vmatprep.subr.mxu1 %v19741_v37  ;;  %v15466_v4 = vsub.f32 %v15362_v50, %v19743_v36  ;;  %v15477_v37 = vsub.f32 %v15378_v22, %v19745_v61  ;;  %v15480_v36 = vand.u32 4294901760, %v6590_v7  ;;  %v15482_v50 = vpop.f32.mrf.mxu1  ;;  %8188 = vmatmul.mubr.f32.gmra.mxu1 %v19748_v46 }
 0x67e   :  { %19742 = vst [vmem:[#allocation29_spill] sm:$0xff] %v15461_v28  ;;  %8522 = vmatpush1.msra.mxu1 %v19744_v3  ;;  %19747 = vst [vmem:[#allocation31_spill] sm:$0xff] %v15482_v50  ;;  %v19749_v1 = vand.u32 4294901760, %v15389_v6  ;;  %v15494_v44 = vsub.f32 %v6592_v34, %v15442_v13  ;;  %v15496_v22 = vand.u32 4294901760, %v6448_v31  ;;  %8219 = vmatprep.subr.mxu0 %v14967_v9  ;;  %v19752_v63 = vand.u32 4294901760, %v15244_v11  ;;  %v19755_v34 = vld [vmem:[#allocation112_spill] sm:$0xff]  ;;  %v15515_v9 = vpop.f32.mrf.mxu0 }
 0x67f   :  { %19746 = vst [vmem:[#allocation50_spill] sm:$0xff] %v15480_v36  ;;  %v15508_v61 = vsub.f32 %v6591_v5, %v15454_v10  ;;  %v15511_v39 = vadd.f32 %v19755_v34, %v5720_v62  ;;  %8001 = vmatprep.mubr.f32.mxu0 %v19707_v30  ;;  %8194 = vmatprep.mubr.f32.mxu1 %v19757_v47  ;;  %19758 = vst [vmem:[#allocation75_spill] sm:$0xff] %v15515_v9  ;;  %v6588_v62 = vld [vmem:[#allocation11 + $0x3b8] sm:$0xff]  ;;  %v19761_v30 = vand.u32 4294901760, %v15259_v55  ;;  %v15542_v50 = vpop.f32.mrf.mxu1  ;;  %v19775_v28 = vld [vmem:[#allocation170_spill] sm:$0xff] }
 0x680   :  { %v15489_v3 = vsub.f32 %v15389_v6, %v19749_v1  ;;  %19750 = vst [vmem:[#allocation33_spill] sm:$0xff] %v15494_v44  ;;  %19751 = vst [vmem:[#allocation37_spill] sm:$0xff] %v15496_v22  ;;  %8528 = vmatprep.subr.mxu1 %v19752_v63  ;;  %v19753_v1 = vand.u32 4294901760, %v15404_v21  ;;  %v19759_v63 = vand.u32 4294901760, %v15413_v45  ;;  %8221 = vmatpush1.msra.mxu0 %v15012_v2  ;;  %v19762_v11 = vand.u32 4294901760, %v15429_v19  ;;  %v19766_v2 = vld [vmem:[#allocation77_spill] sm:$0xff] }
 0x681   :  { %19754 = vst [vmem:[#allocation52_spill] sm:$0xff] %v15508_v61  ;;  %19756 = vst [vmem:[#allocation83_spill] sm:$0xff] %v15511_v39  ;;  %8534 = vmatpush1.msra.mxu1 %v19761_v30  ;;  %8223 = vmatprep.subr.mxu0 %v19766_v2  ;;  %v19767_v55 = vand.u32 4294901760, %v15264_v26  ;;  %v19768_v34 = vand.u32 4294901760, %v15437_v25  ;;  %v15560_v2 = vsub.f32 %v6448_v31, %v15496_v22  ;;  %v19771_v26 = vld [vmem:[#allocation56_spill] sm:$0xff]  ;;  %v19777_v30 = vand.u32 4294901760, %v15295_v42  ;;  %v15589_v10 = vpop.f32.mrf.mxu1 }
 0x682   :  { %v15505_v6 = vsub.f32 %v15404_v21, %v19753_v1  ;;  %v15521_v60 = vsub.f32 %v15413_v45, %v19759_v63  ;;  %v19760_v1 = vand.u32 4294901760, %v15416_v52  ;;  %v15535_v21 = vsub.f32 %v15429_v19, %v19762_v11  ;;  %19765 = vst [vmem:[#allocation27_spill] sm:$0xff] %v15542_v50  ;;  %v6585_v50 = vld [vmem:[#allocation11 + $0x3a0] sm:$0xff]  ;;  %8225 = vmatpush1.msra.mxu0 %v19771_v26  ;;  %v6584_v9 = vld [vmem:[#allocation11 + $0x398] sm:$0xff] }
 0x683   :  { %v15538_v63 = vsub.f32 %v6590_v7, %v15480_v36  ;;  %v15540_v45 = vand.u32 4294901760, %v6589_v49  ;;  %8540 = vmatprep.subr.mxu1 %v19767_v55  ;;  %v15551_v11 = vsub.f32 %v15437_v25, %v19768_v34  ;;  %v19769_v7 = vand.u32 4294901760, %v15440_v33  ;;  %19770 = vst [vmem:[#allocation137_spill] sm:$0xff] %v15560_v2  ;;  %8003 = vmatmul.mubr.f32.gmra.mxu0 %v19724_v57  ;;  %v6581_v36 = vld [vmem:[#allocation11 + $0x380] sm:$0xff] }
 0x684   :  { %v15526_v5 = vsub.f32 %v15416_v52, %v19760_v1  ;;  %v6587_v1 = vld [vmem:[#allocation11 + $0x3b0] sm:$0xff]  ;;  %v6586_v52 = vld [vmem:[#allocation11 + $0x3a8] sm:$0xff]  ;;  %v19772_v55 = vand.u32 4294901760, %v15290_v32  ;;  %v15567_v25 = vand.u32 4294901760, %v6588_v62  ;;  %8196 = vmatmul.mubr.f32.gmra.mxu1 %v19775_v28  ;;  %8227 = vmatprep.subr.mxu0 %v15046_v56  ;;  %v15587_v31 = vand.u32 4294901760, %v6585_v50  ;;  %19779 = vst [vmem:[#allocation41_spill] sm:$0xff] %v15589_v10 }
 0x685   :  { %19763 = vst [vmem:[#allocation86_spill] sm:$0xff] %v15538_v63  ;;  %19764 = vst [vmem:[#allocation44_spill] sm:$0xff] %v15540_v45  ;;  %v15556_v19 = vsub.f32 %v15440_v33, %v19769_v7  ;;  %v15569_v7 = vpop.f32.mrf.mxu0  ;;  %v15575_v26 = vand.u32 4294901760, %v6587_v1  ;;  %v15577_v32 = vand.u32 4294901760, %v6586_v52  ;;  %v6582_v33 = vld [vmem:[#allocation11 + $0x388] sm:$0xff]  ;;  %8009 = vmatprep.mubr.f32.mxu0 %v19732_v53  ;;  %8229 = vmatpush1.msra.mxu0 %v15058_v12  ;;  %v19780_v34 = vand.u32 4294901760, %v15494_v44 }
 0x686   :  { %8546 = vmatpush1.msra.mxu1 %v19772_v55  ;;  %19773 = vst [vmem:[#allocation38_spill] sm:$0xff] %v15567_v25  ;;  %19774 = vst [vmem:[#allocation158_spill] sm:$0xff] %v15569_v7  ;;  %v6583_v55 = vld [vmem:[#allocation11 + $0x390] sm:$0xff]  ;;  %v15585_v7 = vsub.f32 %v6589_v49, %v15540_v45  ;;  %v15600_v49 = vand.u32 4294901760, %v6584_v9  ;;  %v6580_v56 = vld [vmem:[#allocation11 + $0x378] sm:$0xff]  ;;  %v19782_v45 = vand.u32 4294901760, %v15335_v14  ;;  %8812 = vmatprep.mubr.f32.mxu1 %v15496_v22 }
 0x687   :  { %19776 = vst [vmem:[#allocation40_spill] sm:$0xff] %v15575_v26  ;;  %8552 = vmatprep.subr.mxu1 %v19777_v30  ;;  %v15598_v57 = vsub.f32 %v15494_v44, %v19780_v34  ;;  %v19783_v12 = vand.u32 4294901760, %v15508_v61  ;;  %v15612_v30 = vsub.f32 %v6588_v62, %v15567_v25  ;;  %v15614_v34 = vand.u32 4294901760, %v6583_v55  ;;  %v6579_v44 = vld [vmem:[#allocation11 + $0x370] sm:$0xff]  ;;  %v6578_v10 = vld [vmem:[#allocation11 + $0x368] sm:$0xff]  ;;  %v15616_v39 = vpop.f32.mrf.mxu0  ;;  %8231 = vmatprep.subr.mxu0 %v15070_v16  ;;  %v15645_v16 = vpop.f32.mrf.mxu1 }
 0x688   :  { %19778 = vst [vmem:[#allocation88_spill] sm:$0xff] %v15585_v7  ;;  %19781 = vst [vmem:[#allocation45_spill] sm:$0xff] %v15600_v49  ;;  %8558 = vmatpush1.msra.mxu1 %v19782_v45  ;;  %v19787_v14 = vand.u32 4294901760, %v15345_v40  ;;  %v15622_v45 = vsub.f32 %v6587_v1, %v15575_v26  ;;  %v15627_v53 = vand.u32 4294901760, %v6582_v33  ;;  %v15629_v62 = vand.u32 4294901760, %v6581_v36  ;;  %8233 = vmatpush1.msra.mxu0 %v15083_v54  ;;  %v6577_v1 = vld [vmem:[#allocation11 + $0x360] sm:$0xff] }
 0x689   :  { %v15609_v42 = vsub.f32 %v15508_v61, %v19783_v12  ;;  %19784 = vst [vmem:[#allocation48_spill] sm:$0xff] %v15612_v30  ;;  %19785 = vst [vmem:[#allocation39_spill] sm:$0xff] %v15614_v34  ;;  %v15625_v12 = vsub.f32 %v6586_v52, %v15577_v32  ;;  %v19791_v22 = vand.u32 4294901760, %v15359_v35  ;;  %v19792_v61 = vand.u32 4294901760, %v15538_v63  ;;  %8011 = vmatmul.mubr.f32.gmra.mxu0 %v19748_v46 }
 0x68a   :  { %19786 = vst [vmem:[#allocation76_spill] sm:$0xff] %v15616_v39  ;;  %8564 = vmatprep.subr.mxu1 %v19787_v14  ;;  %19788 = vst [vmem:[#allocation64_spill] sm:$0xff] %v15622_v45  ;;  %v15641_v14 = vsub.f32 %v6585_v50, %v15587_v31  ;;  %v15643_v52 = vand.u32 4294901760, %v6580_v56  ;;  %8235 = vmatprep.subr.mxu0 %v15085_v58  ;;  %v15651_v35 = vsub.f32 %v6584_v9, %v15600_v49  ;;  %v15668_v39 = vpop.f32.mrf.mxu0 }
 0x68b   :  { %19789 = vst [vmem:[#allocation81_spill] sm:$0xff] %v15625_v12  ;;  %19790 = vst [vmem:[#allocation69_spill] sm:$0xff] %v15629_v62  ;;  %8570 = vmatpush1.msra.mxu1 %v19791_v22  ;;  %v15637_v40 = vsub.f32 %v15538_v63, %v19792_v61  ;;  %v15653_v61 = vand.u32 4294901760, %v6579_v44  ;;  %v15655_v63 = vand.u32 4294901760, %v6578_v10  ;;  %v19796_v50 = vand.u32 4294901760, %v15374_v15  ;;  %8017 = vmatprep.mubr.f32.mxu0 %v19757_v47  ;;  %v19808_v47 = vld [vmem:[#allocation142_spill] sm:$0xff] }
 0x68c   :  { %19793 = vst [vmem:[#allocation104_spill] sm:$0xff] %v15641_v14  ;;  %19794 = vst [vmem:[#allocation63_spill] sm:$0xff] %v15645_v16  ;;  %v19797_v54 = vand.u32 4294901760, %v15560_v2  ;;  %v15666_v9 = vsub.f32 %v6583_v55, %v15614_v34  ;;  %v6576_v16 = vld [vmem:[#allocation11 + $0x358] sm:$0xff]  ;;  %8237 = vmatpush1.msra.mxu0 %v15098_v38  ;;  %v19800_v15 = vand.u32 4294901760, %v15425_v51  ;;  %v15679_v58 = vsub.f32 %v6581_v36, %v15629_v62  ;;  %v6575_v55 = vld [vmem:[#allocation11 + $0x350] sm:$0xff]  ;;  %v15695_v36 = vpop.f32.mrf.mxu1 }
 0x68d   :  { %19795 = vst [vmem:[#allocation98_spill] sm:$0xff] %v15651_v35  ;;  %8576 = vmatprep.subr.mxu1 %v19796_v50  ;;  %19799 = vst [vmem:[#allocation101_spill] sm:$0xff] %v15668_v39  ;;  %8239 = vmatprep.subr.mxu0 %v15100_v43  ;;  %v19803_v22 = vand.u32 4294901760, %v15451_v27  ;;  %v15691_v50 = vsub.f32 %v6580_v56, %v15643_v52  ;;  %v19809_v43 = vand.u32 4294901760, %v15466_v4  ;;  %v19813_v56 = vld [vmem:[#allocation175_spill] sm:$0xff]  ;;  %v15717_v27 = vand.u32 4294901760, %v6575_v55 }
 0x68e   :  { %v8333_v46 = vsub.f32 %v15560_v2, %v19797_v54  ;;  %19798 = vst [vmem:[#allocation70_spill] sm:$0xff] %v15666_v9  ;;  %8582 = vmatpush1.msra.mxu1 %v19800_v15  ;;  %v15676_v54 = vsub.f32 %v6582_v33, %v15627_v53  ;;  %19802 = vst [vmem:[#allocation94_spill] sm:$0xff] %v15679_v58  ;;  %v19804_v2 = vand.u32 4294901760, %v15585_v7  ;;  %v15693_v33 = vand.u32 4294901760, %v6577_v1  ;;  %v15736_v38 = vpop.f32.mrf.mxu1 }
 0x68f   :  { %8588 = vmatprep.subr.mxu1 %v19803_v22  ;;  %19805 = vst [vmem:[#allocation171_spill] sm:$0xff] %v15691_v50  ;;  %19807 = vst [vmem:[#allocation84_spill] sm:$0xff] %v15695_v36  ;;  %8241 = vmatpush1.msra.mxu0 %v19808_v47  ;;  %v15702_v22 = vsub.f32 %v6579_v44, %v15653_v61  ;;  %v15707_v15 = vand.u32 4294901760, %v6576_v16  ;;  %v19814_v47 = vand.u32 4294901760, %v15612_v30  ;;  %v15719_v44 = vpop.f32.mrf.mxu0  ;;  %v19843_v36 = vld [vmem:[#allocation133_spill] sm:$0xff] }
 0x690   :  { %19801 = vst [vmem:[#allocation57_spill] sm:$0xff] %v15676_v54  ;;  %v15687_v51 = vsub.f32 %v15585_v7, %v19804_v2  ;;  %19806 = vst [vmem:[#allocation161_spill] sm:$0xff] %v15693_v33  ;;  %8594 = vmatpush1.msra.mxu1 %v19809_v43  ;;  %v15705_v2 = vsub.f32 %v6578_v10, %v15655_v63  ;;  %8019 = vmatmul.mubr.f32.gmra.mxu0 %v19775_v28  ;;  %v8334_v7 = vand.u32 4294901760, %v8333_v46  ;;  %v19823_v43 = vld [vmem:[#allocation96_spill] sm:$0xff] }
 0x691   :  { %19810 = vst [vmem:[#allocation97_spill] sm:$0xff] %v15702_v22  ;;  %19812 = vst [vmem:[#allocation114_spill] sm:$0xff] %v15707_v15  ;;  %8243 = vmatprep.subr.mxu0 %v19813_v56  ;;  %v15714_v4 = vsub.f32 %v15612_v30, %v19814_v47  ;;  %v19817_v10 = vand.u32 4294901760, %v15477_v37  ;;  %v19818_v28 = vand.u32 4294901760, %v15622_v45  ;;  %v19819_v56 = vand.u32 4294901760, %v15625_v12 }
 0x692   :  { %19811 = vst [vmem:[#allocation126_spill] sm:$0xff] %v15705_v2  ;;  %19815 = vst [vmem:[#allocation129_spill] sm:$0xff] %v15717_v27  ;;  %8245 = vmatpush1.msra.mxu0 %v15177_v23  ;;  %8335 = vmatprep.mubr.f32.mxu0 %v8334_v7  ;;  %v19820_v37 = vand.u32 4294901760, %v15489_v3  ;;  %v19824_v30 = vand.u32 4294901760, %v15505_v6  ;;  %v19825_v3 = vand.u32 4294901760, %v15651_v35  ;;  %v8665_v6 = vand.u32 4294901760, %v15687_v51 }
 0x693   :  { %19816 = vst [vmem:[#allocation115_spill] sm:$0xff] %v15719_v44  ;;  %8600 = vmatprep.subr.mxu1 %v19817_v10  ;;  %v15727_v46 = vsub.f32 %v15622_v45, %v19818_v28  ;;  %v15732_v47 = vsub.f32 %v15625_v12, %v19819_v56  ;;  %v19821_v28 = vand.u32 4294901760, %v15641_v14  ;;  %v15748_v12 = vsub.f32 %v6577_v1, %v15693_v33  ;;  %v6574_v56 = vld [vmem:[#allocation11 + $0x348] sm:$0xff]  ;;  %v19827_v1 = vld [vmem:[#allocation132_spill] sm:$0xff] }
 0x694   :  { %8606 = vmatpush1.msra.mxu1 %v19820_v37  ;;  %8247 = vmatprep.subr.mxu0 %v19823_v43  ;;  %v15756_v7 = vsub.f32 %v15651_v35, %v19825_v3  ;;  %v15761_v10 = vsub.f32 %v6576_v16, %v15707_v15  ;;  %v19829_v3 = vand.u32 4294901760, %v15666_v9  ;;  %v15776_v16 = vpop.f32.mrf.mxu1  ;;  %v15778_v37 = vpop.f32.mrf.mxu0  ;;  %v6573_v43 = vld [vmem:[#allocation11 + $0x340] sm:$0xff]  ;;  %v111_v23 = vld [vmem:[#allocation7 + $0x4] ss:$8 sm:$0x3]  ;;  %v19838_v51 = vand.u32 4294901760, %v15691_v50 }
 0x695   :  { %v15744_v45 = vsub.f32 %v15641_v14, %v19821_v28  ;;  %19822 = vst [vmem:[#allocation131_spill] sm:$0xff] %v15748_v12  ;;  %8612 = vmatprep.subr.mxu1 %v19824_v30  ;;  %8249 = vmatpush1.msra.mxu0 %v19827_v1  ;;  %v19828_v14 = vand.u32 4294901760, %v15521_v60  ;;  %v15774_v28 = vsub.f32 %v6575_v55, %v15717_v27  ;;  %19831 = vst [vmem:[#allocation18_spill] sm:$0xff] %v15778_v37  ;;  %v19832_v1 = vld [vmem:[#allocation106_spill] sm:$0xff] }
 0x696   :  { %19826 = vst [vmem:[#allocation103_spill] sm:$0xff] %v15761_v10  ;;  %v15771_v35 = vsub.f32 %v15666_v9, %v19829_v3  ;;  %8251 = vmatprep.subr.mxu0 %v19832_v1  ;;  %v19833_v60 = vand.u32 4294901760, %v15526_v5  ;;  %v19834_v30 = vand.u32 4294901760, %v15676_v54  ;;  %v19835_v55 = vand.u32 4294901760, %v15679_v58  ;;  %v19836_v1 = vld [vmem:[#allocation168_spill] sm:$0xff] }
 0x697   :  { %8618 = vmatpush1.msra.mxu1 %v19828_v14  ;;  %19830 = vst [vmem:[#allocation173_spill] sm:$0xff] %v15774_v28  ;;  %8253 = vmatpush1.msra.mxu0 %v19836_v1  ;;  %v19837_v5 = vand.u32 4294901760, %v15535_v21  ;;  %v15802_v14 = vsub.f32 %v15691_v50, %v19838_v51  ;;  %v19839_v1 = vand.u32 4294901760, %v15551_v11  ;;  %v19841_v51 = vand.u32 4294901760, %v15705_v2 }
 0x698   :  { %8624 = vmatprep.subr.mxu1 %v19833_v60  ;;  %v15788_v3 = vsub.f32 %v15676_v54, %v19834_v30  ;;  %v15793_v9 = vsub.f32 %v15679_v58, %v19835_v55  ;;  %v15805_v54 = vand.u32 4294901760, %v6574_v56  ;;  %v6572_v55 = vld [vmem:[#allocation11 + $0x338] sm:$0xff]  ;;  %v6571_v58 = vld [vmem:[#allocation11 + $0x330] sm:$0xff]  ;;  %8255 = vmatprep.subr.mxu0 %v15304_v18  ;;  %v19842_v18 = vand.u32 4294901760, %v15556_v19 }
 0x699   :  { %8630 = vmatpush2.msra.mxu1 %v19837_v5  ;;  %v19840_v5 = vand.u32 4294901760, %v15702_v22  ;;  %v15819_v30 = vsub.f32 %v15705_v2, %v19841_v51  ;;  %8257 = vmatpush1.msra.mxu0 %v15313_v29  ;;  %v15827_v21 = vand.u32 4294901760, %v6573_v43  ;;  %v15832_v37 = vrot.slane %v111_v23, %v19843_v36  ;;  %v15834_v51 = vpop.f32.mrf.mxu0  ;;  %v6569_v2 = vld [vmem:[#allocation11 + $0x320] sm:$0xff]  ;;  %v6568_v19 = vld [vmem:[#allocation11 + $0x318] sm:$0xff] }
 0x69a   :  { %8636 = vmatprep.subr.mxu1 %v19839_v1  ;;  %19844 = vst [vmem:[#allocation166_spill] sm:$0xff] %v15834_v51  ;;  %8259 = vmatprep.subr.mxu0 %v15324_v17  ;;  %v19845_v50 = vand.u32 4294901760, %v15598_v57  ;;  %v15841_v11 = vand.u32 4294901760, %v6572_v55  ;;  %v15843_v1 = vand.u32 4294901760, %v6571_v58  ;;  %v19848_v36 = vand.u32 4294901760, %v15609_v42  ;;  %v19851_v51 = vld [vmem:[#allocation134_spill] sm:$0xff] }
 0x69b   :  { %v15814_v60 = vsub.f32 %v15702_v22, %v19840_v5  ;;  %8642 = vmatpush2.msra.mxu1 %v19842_v18  ;;  %v6570_v5 = vld [vmem:[#allocation11 + $0x328] sm:$0xff]  ;;  %v15829_v22 = vpop.f32.mrf.mxu1  ;;  %8261 = vmatpush1.msra.mxu0 %v15337_v20  ;;  %v19849_v17 = vand.u32 4294901760, %v15748_v12  ;;  %v6567_v18 = vld [vmem:[#allocation11 + $0x310] sm:$0xff]  ;;  %v15858_v39 = vrot.slane %v111_v23, %v19851_v51  ;;  %v19852_v42 = vand.u32 4294901760, %v15637_v40  ;;  %v6748_v20 = vpop.f32.mrf.mxu0  ;;  %v6565_v51 = vld [vmem:[#allocation11 + $0x300] sm:$0xff] }
 0x69c   :  { %8648 = vmatprep.subr.mxu1 %v19845_v50  ;;  %19846 = vst [vmem:[#allocation151_spill] sm:$0xff] %v15841_v11  ;;  %19847 = vst [vmem:[#allocation74_spill] sm:$0xff] %v15843_v1  ;;  %v15855_v50 = vsub.f32 %v6574_v56, %v15805_v54  ;;  %8263 = vmatprep.subr.mxu0 %v15350_v0  ;;  %v15870_v56 = vand.u32 4294901760, %v6570_v5  ;;  %v19854_v23 = vand.u32 4294901760, %v15774_v28  ;;  %v15881_v29 = vand.u32 4294901760, %v6569_v2 }
 0x69d   :  { %8654 = vmatpush2.msra.mxu1 %v19848_v36  ;;  %v15852_v57 = vsub.f32 %v15748_v12, %v19849_v17  ;;  %v19853_v17 = vand.u32 4294901760, %v15761_v10  ;;  %8265 = vmatpush1.msra.mxu0 %v15364_v48  ;;  %v6566_v36 = vld [vmem:[#allocation11 + $0x308] sm:$0xff]  ;;  %v15890_v48 = vsub.f32 %v6572_v55, %v15841_v11  ;;  %v6750_v0 = vpop.f32.mrf.mxu0  ;;  %v19865_v44 = vand.u32 4294901760, %v15732_v47 }
 0x69e   :  { %19850 = vst [vmem:[#allocation140_spill] sm:$0xff] %v15855_v50  ;;  %8660 = vmatprep.subr.mxu1 %v19852_v42  ;;  %v15876_v40 = vsub.f32 %v15774_v28, %v19854_v23  ;;  %v15879_v42 = vsub.f32 %v6573_v43, %v15827_v21  ;;  %19856 = vst [vmem:[#allocation73_spill] sm:$0xff] %v15881_v29  ;;  %8267 = vmatprep.subr.mxu0 %v15366_v41  ;;  %v15895_v43 = vand.u32 4294901760, %v6568_v19 }
 0x69f   :  { %v15868_v12 = vsub.f32 %v15761_v10, %v19853_v17  ;;  %8666 = vmatpush2.msra.mxu1 %v8665_v6  ;;  %v15883_v17 = vpop.f32.mrf.mxu1  ;;  %v6749_v10 = vadd.f32 %v6748_v20, %v15832_v37  ;;  %v19857_v6 = vand.u32 4294901760, %v15714_v4  ;;  %19858 = vst [vmem:[#allocation138_spill] sm:$0xff] %v15890_v48  ;;  %v15893_v23 = vsub.f32 %v6571_v58, %v15843_v1  ;;  %v19863_v58 = vld [vmem:[#allocation147_spill] sm:$0xff]  ;;  %v19864_v1 = vld [vmem:[#allocation102_spill] sm:$0xff]  ;;  %v19876_v4 = vld [vmem:[#allocation120_spill] sm:$0xff] }
 0x6a0   :  { %19855 = vst [vmem:[#allocation149_spill] sm:$0xff] %v15879_v42  ;;  %v15897_v28 = vand.u32 4294901760, %v6567_v18  ;;  %8269 = vmatpush2.msra.mxu0 %v15380_v24  ;;  %v19861_v20 = vand.u32 4294901760, %v15727_v46  ;;  %v6751_v55 = vadd.f32 %v6750_v0, %v15858_v39  ;;  %v6224_v11 = vadd.f32 %v19864_v1, %v19863_v58 }
 0x6a1   :  { %8672 = vmatprep.subr.mxu1 %v19857_v6  ;;  %19859 = vst [vmem:[#allocation46_spill] sm:$0xff] %v15893_v23  ;;  %v15906_v6 = vadd.f32 %v15736_v38, %v6749_v10  ;;  %8271 = vmatprep.subr.mxu0 %v15391_v59  ;;  %v15914_v46 = vsub.f32 %v6570_v5, %v15870_v56  ;;  %v15918_v41 = vand.u32 4294901760, %v6565_v51  ;;  %v19869_v38 = vand.u32 4294901760, %v15744_v45  ;;  %v19875_v10 = vld [vmem:[#allocation83_spill] sm:$0xff]  ;;  %v19880_v45 = vld [vmem:[#allocation122_spill] sm:$0xff] }
 0x6a2   :  { %19860 = vst [vmem:[#allocation51_spill] sm:$0xff] %v15897_v28  ;;  %8678 = vmatpush2.msra.mxu1 %v19861_v20  ;;  %v15916_v20 = vand.u32 4294901760, %v6566_v36  ;;  %8273 = vmatpush2.msra.mxu0 %v15393_v8  ;;  %v8743_v0 = vand.u32 4294901760, %v15868_v12  ;;  %v15926_v1 = vsub.f32 %v6569_v2, %v15881_v29  ;;  %v15931_v47 = vadd.f32 %v15776_v16, %v6751_v55  ;;  %v19877_v55 = vld [vmem:[#allocation49_spill] sm:$0xff] }
 0x6a3   :  { %19862 = vst [vmem:[#allocation35_spill] sm:$0xff] %v15906_v6  ;;  %8684 = vmatprep.subr.mxu1 %v19865_v44  ;;  %19866 = vst [vmem:[#allocation109_spill] sm:$0xff] %v15914_v46  ;;  %v15928_v44 = vpop.f32.mrf.mxu1  ;;  %8275 = vmatprep.subr.mxu0 %v15442_v13  ;;  %v19872_v5 = vand.u32 4294901760, %v15756_v7  ;;  %v15939_v12 = vsub.f32 %v6568_v19, %v15895_v43  ;;  %v15942_v2 = vsub.f32 %v6567_v18, %v15897_v28  ;;  %v19881_v6 = vld [vmem:[#allocation50_spill] sm:$0xff] }
 0x6a4   :  { %19867 = vst [vmem:[#allocation65_spill] sm:$0xff] %v15916_v20  ;;  %19868 = vst [vmem:[#allocation89_spill] sm:$0xff] %v15918_v41  ;;  %8690 = vmatpush2.msra.mxu1 %v19869_v38  ;;  %v6764_v38 = vpop.f32.mrf.mxu0  ;;  %v6234_v16 = vadd.f32 %v19876_v4, %v19875_v10  ;;  %8277 = vmatpush2.msra.mxu0 %v19877_v55  ;;  %v8749_v7 = vand.u32 4294901760, %v15876_v40  ;;  %v15955_v18 = vadd.f32 %v19880_v45, %v6224_v11 }
 0x6a5   :  { %19870 = vst [vmem:[#allocation159_spill] sm:$0xff] %v15926_v1  ;;  %19871 = vst [vmem:[#allocation143_spill] sm:$0xff] %v15931_v47  ;;  %8696 = vmatprep.subr.mxu1 %v19872_v5  ;;  %v19878_v47 = vand.u32 4294901760, %v15771_v35  ;;  %v19879_v5 = vand.u32 4294901760, %v15855_v50  ;;  %v6765_v19 = vadd.f32 %v6764_v38, %v15832_v37  ;;  %8279 = vmatprep.subr.mxu0 %v19881_v6  ;;  %v19882_v4 = vand.u32 4294901760, %v15788_v3 }
 0x6a6   :  { %19873 = vst [vmem:[#allocation47_spill] sm:$0xff] %v15939_v12  ;;  %19874 = vst [vmem:[#allocation113_spill] sm:$0xff] %v15942_v2  ;;  %v15962_v35 = vsub.f32 %v6566_v36, %v15916_v20  ;;  %v15965_v40 = vsub.f32 %v6565_v51, %v15918_v41  ;;  %v19886_v38 = vand.u32 4294901760, %v15793_v9  ;;  %v19887_v11 = vand.u32 4294901760, %v15879_v42 }
 0x6a7   :  { %8702 = vmatpush2.msra.mxu1 %v19878_v47  ;;  %v8754_v58 = vsub.f32 %v15855_v50, %v19879_v5  ;;  %v6766_v47 = vpop.f32.mrf.mxu0  ;;  %v19885_v5 = vld [vmem:[#allocation44_spill] sm:$0xff]  ;;  %v15976_v36 = vadd.f32 %v15829_v22, %v6765_v19  ;;  %v19889_v51 = vand.u32 4294901760, %v15802_v14  ;;  %v19890_v9 = vand.u32 4294901760, %v15890_v48 }
 0x6a8   :  { %8708 = vmatprep.subr.mxu1 %v19882_v4  ;;  %19883 = vst [vmem:[#allocation141_spill] sm:$0xff] %v15962_v35  ;;  %19884 = vst [vmem:[#allocation66_spill] sm:$0xff] %v15965_v40  ;;  %8281 = vmatpush2.msra.mxu0 %v19885_v5  ;;  %v8760_v45 = vsub.f32 %v15879_v42, %v19887_v11  ;;  %v7239_v4 = vpop.f32.mrf.mxu1  ;;  %v6767_v10 = vadd.f32 %v6766_v47, %v15858_v39  ;;  %v19891_v50 = vand.u32 4294901760, %v15893_v23  ;;  %v19892_v42 = vld [vmem:[#allocation42_spill] sm:$0xff]  ;;  %v19893_v22 = vld [vmem:[#allocation92_spill] sm:$0xff] }
 0x6a9   :  { %8714 = vmatpush2.msra.mxu1 %v19886_v38  ;;  %19888 = vst [vmem:[#allocation148_spill] sm:$0xff] %v15976_v36  ;;  %8283 = vmatprep.subr.mxu0 %v15567_v25  ;;  %v8766_v38 = vsub.f32 %v15890_v48, %v19890_v9  ;;  %v6232_v19 = vadd.f32 %v19893_v22, %v19892_v42  ;;  %v19894_v36 = vld [vmem:[#allocation123_spill] sm:$0xff]  ;;  %v19895_v14 = vand.u32 4294901760, %v15814_v60  ;;  %v19896_v47 = vand.u32 4294901760, %v15819_v30  ;;  %v6780_v22 = vpop.f32.mrf.mxu0  ;;  %v19936_v48 = vld [vmem:[#allocation93_spill] sm:$0xff] }
 0x6aa   :  { %8720 = vmatprep.subr.mxu1 %v19889_v51  ;;  %v8772_v11 = vsub.f32 %v15893_v23, %v19891_v50  ;;  %v15992_v25 = vadd.f32 %v19894_v36, %v6234_v16  ;;  %8285 = vmatpush2.msra.mxu0 %v15575_v26  ;;  %v8755_v51 = vand.u32 4294901760, %v8754_v58  ;;  %v15998_v9 = vadd.f32 %v15883_v17, %v6767_v10  ;;  %v19898_v58 = vld [vmem:[#allocation163_spill] sm:$0xff]  ;;  %v7245_v3 = vpop.f32.mrf.mxu1 }
 0x6ab   :  { %8726 = vmatpush2.msra.mxu1 %v19895_v14  ;;  %v6447_v50 = vmax.f32 %v15955_v18, 0.0  ;;  %8287 = vmatprep.subr.mxu0 %v15577_v32  ;;  %v19897_v42 = vand.u32 4294901760, %v15914_v46  ;;  %v19899_v14 = vld [vmem:[#allocation75_spill] sm:$0xff]  ;;  %v19900_v18 = vand.u32 4294901760, %v15852_v57  ;;  %v8761_v10 = vand.u32 4294901760, %v8760_v45 }
 0x6ac   :  { %8732 = vmatprep.subr.mxu1 %v19896_v47  ;;  %v6242_v17 = vadd.f32 %v19899_v14, %v19898_v58  ;;  %8289 = vmatpush2.msra.mxu0 %v15587_v31  ;;  %v19901_v30 = vand.u32 4294901760, %v15926_v1  ;;  %v8767_v60 = vand.u32 4294901760, %v8766_v38  ;;  %v8773_v36 = vand.u32 4294901760, %v8772_v11 }
 0x6ad   :  { %v8778_v16 = vsub.f32 %v15914_v46, %v19897_v42  ;;  %8738 = vmatpush2.msra.mxu1 %v19900_v18  ;;  %v6781_v42 = vadd.f32 %v6780_v22, %v15832_v37  ;;  %8291 = vmatprep.subr.mxu0 %v15600_v49  ;;  %v19902_v58 = vand.u32 4294901760, %v15939_v12  ;;  %v19903_v57 = vand.u32 4294901760, %v15942_v2  ;;  %v6782_v18 = vpop.f32.mrf.mxu0  ;;  %v19904_v46 = vld [vmem:[#allocation28_spill] sm:$0xff] }
 0x6ae   :  { %v8784_v47 = vsub.f32 %v15926_v1, %v19901_v30  ;;  %8744 = vmatprep.subr.mxu1 %v8743_v0  ;;  %v16026_v23 = vadd.f32 %v19904_v46, %v6232_v19  ;;  %v6452_v30 = vmax.f32 %v15992_v25, 0.0  ;;  %8293 = vmatpush2.msra.mxu0 %v15614_v34  ;;  %v6783_v0 = vadd.f32 %v6782_v18, %v15858_v39 }
 0x6af   :  { %v8790_v14 = vsub.f32 %v15939_v12, %v19902_v58  ;;  %v8796_v45 = vsub.f32 %v15942_v2, %v19903_v57  ;;  %8750 = vmatpush2.msra.mxu1 %v8749_v7  ;;  %v16032_v38 = vadd.f32 %v15928_v44, %v6781_v42  ;;  %v16034_v11 = vand.u32 4294901760, %v6447_v50  ;;  %8295 = vmatprep.subr.mxu0 %v15627_v53  ;;  %v19908_v7 = vld [vmem:[#allocation53_spill] sm:$0xff]  ;;  %v19910_v2 = vld [vmem:[#allocation23_spill] sm:$0xff] }
 0x6b0   :  { %8756 = vmatprep.subr.mxu1 %v8755_v51  ;;  %v8779_v22 = vand.u32 4294901760, %v8778_v16  ;;  %v19906_v58 = vand.u32 4294901760, %v15962_v35  ;;  %v19907_v25 = vand.u32 4294901760, %v15965_v40  ;;  %v19909_v57 = vld [vmem:[#allocation29_spill] sm:$0xff]  ;;  %v16046_v44 = vadd.f32 %v19910_v2, %v6242_v17  ;;  %8297 = vmatpush2.msra.mxu0 %v15629_v62  ;;  %v7247_v51 = vpop.f32.mrf.mxu1 }
 0x6b1   :  { %19905 = vst [vmem:[#allocation112_spill] sm:$0xff] %v16034_v11  ;;  %v6240_v18 = vadd.f32 %v19909_v57, %v19908_v7  ;;  %8762 = vmatpush2.msra.mxu1 %v8761_v10  ;;  %v8785_v42 = vand.u32 4294901760, %v8784_v47  ;;  %v16049_v16 = vadd.f32 %v7239_v4, %v6783_v0  ;;  %8299 = vmatprep.subr.mxu0 %v15643_v52  ;;  %v8797_v2 = vand.u32 4294901760, %v8796_v45  ;;  %v19913_v4 = vld [vmem:[#allocation59_spill] sm:$0xff]  ;;  %v19914_v47 = vld [vmem:[#allocation76_spill] sm:$0xff] }
 0x6b2   :  { %v8802_v46 = vsub.f32 %v15962_v35, %v19906_v58  ;;  %v8808_v19 = vsub.f32 %v15965_v40, %v19907_v25  ;;  %8768 = vmatprep.subr.mxu1 %v8767_v60  ;;  %v8791_v58 = vand.u32 4294901760, %v8790_v14  ;;  %v6796_v35 = vpop.f32.mrf.mxu0  ;;  %v6451_v25 = vmax.f32 %v16026_v23, 0.0  ;;  %8301 = vmatpush2.msra.mxu0 %v15653_v61  ;;  %v19915_v7 = vld [vmem:[#allocation19_spill] sm:$0xff] }
 0x6b3   :  { %v16053_v40 = vand.u32 4294901760, %v6452_v30  ;;  %8774 = vmatpush2.msra.mxu1 %v8773_v36  ;;  %v6797_v17 = vadd.f32 %v6796_v35, %v15832_v37  ;;  %v16058_v10 = vsub.f32 %v6447_v50, %v16034_v11  ;;  %v6250_v0 = vadd.f32 %v19914_v47, %v19913_v4  ;;  %8303 = vmatprep.subr.mxu0 %v15655_v63  ;;  %v7253_v35 = vpop.f32.mrf.mxu1  ;;  %v19919_v4 = vld [vmem:[#allocation31_spill] sm:$0xff] }
 0x6b4   :  { %8780 = vmatprep.subr.mxu1 %v8779_v22  ;;  %v8803_v60 = vand.u32 4294901760, %v8802_v46  ;;  %v8809_v14 = vand.u32 4294901760, %v8808_v19  ;;  %v6798_v23 = vpop.f32.mrf.mxu0  ;;  %v16064_v57 = vadd.f32 %v19915_v7, %v6240_v18  ;;  %v6456_v36 = vmax.f32 %v16046_v44, 0.0  ;;  %8305 = vmatpush2.msra.mxu0 %v15693_v33  ;;  %v19917_v18 = vld [vmem:[#allocation90_spill] sm:$0xff]  ;;  %v19922_v7 = vld [vmem:[#allocation115_spill] sm:$0xff] }
 0x6b5   :  { %19911 = vst [vmem:[#allocation30_spill] sm:$0xff] %v16053_v40  ;;  %19912 = vst [vmem:[#allocation170_spill] sm:$0xff] %v16058_v10  ;;  %8786 = vmatpush2.msra.mxu1 %v8785_v42  ;;  %v6799_v50 = vadd.f32 %v6798_v23, %v15858_v39  ;;  %v16069_v45 = vadd.f32 %v7245_v3, %v6797_v17  ;;  %8307 = vmatprep.subr.mxu0 %v15707_v15  ;;  %v16072_v22 = vand.u32 4294901760, %v6451_v25  ;;  %v19918_v44 = vld [vmem:[#allocation158_spill] sm:$0xff] }
 0x6b6   :  { %8792 = vmatprep.subr.mxu1 %v8791_v58  ;;  %v16075_v46 = vsub.f32 %v6452_v30, %v16053_v40  ;;  %8309 = vmatpush2.msra.mxu0 %v15717_v27  ;;  %v6248_v42 = vadd.f32 %v19918_v44, %v19917_v18  ;;  %v16083_v47 = vadd.f32 %v19919_v4, %v6250_v0  ;;  %v6812_v3 = vpop.f32.mrf.mxu0  ;;  %v6455_v30 = vmax.f32 %v16064_v57, 0.0  ;;  %v19921_v23 = vld [vmem:[#allocation110_spill] sm:$0xff]  ;;  %v19924_v57 = vld [vmem:[#allocation61_spill] sm:$0xff]  ;;  %v19927_v58 = vld [vmem:[#allocation32_spill] sm:$0xff] }
 0x6b7   :  { %19916 = vst [vmem:[#allocation147_spill] sm:$0xff] %v16072_v22  ;;  %8798 = vmatpush2.msra.mxu1 %v8797_v2  ;;  %v16078_v19 = vadd.f32 %v7247_v51, %v6799_v50  ;;  %8311 = vmatprep.subr.mxu0 %v15805_v54  ;;  %v16088_v17 = vand.u32 4294901760, %v6456_v36  ;;  %v7255_v51 = vpop.f32.mrf.mxu1  ;;  %v6813_v2 = vadd.f32 %v6812_v3, %v15832_v37  ;;  %v19923_v50 = vld [vmem:[#allocation151_spill] sm:$0xff]  ;;  %v19925_v44 = vld [vmem:[#allocation74_spill] sm:$0xff] }
 0x6b8   :  { %8804 = vmatprep.subr.mxu1 %v8803_v60  ;;  %8313 = vmatpush2.msra.mxu0 %v15827_v21  ;;  %v6258_v0 = vadd.f32 %v19922_v7, %v19921_v23  ;;  %v6814_v60 = vpop.f32.mrf.mxu0  ;;  %v16097_v18 = vsub.f32 %v6451_v25, %v16072_v22  ;;  %v16106_v23 = vadd.f32 %v19927_v58, %v6248_v42  ;;  %v6460_v7 = vmax.f32 %v16083_v47, 0.0 }
 0x6b9   :  { %19920 = vst [vmem:[#allocation102_spill] sm:$0xff] %v16088_v17  ;;  %8810 = vmatpush2.msra.mxu1 %v8809_v14  ;;  %8315 = vmatprep.subr.mxu0 %v19923_v50  ;;  %v6815_v4 = vadd.f32 %v6814_v60, %v15858_v39  ;;  %v16103_v3 = vadd.f32 %v7253_v35, %v6813_v2  ;;  %v19929_v25 = vand.u32 4294901760, %v16058_v10  ;;  %v16114_v1 = vand.u32 4294901760, %v6455_v30  ;;  %v19931_v35 = vld [vmem:[#allocation172_spill] sm:$0xff]  ;;  %v7261_v42 = vpop.f32.mrf.mxu1  ;;  %v19933_v60 = vld [vmem:[#allocation101_spill] sm:$0xff] }
 0x6ba   :  { %8814 = vmatmul.mubr.f32.vlgmr.msra.gmra.mxu1 %v16034_v11  ;;  %9114 = vmatprep.subr.mxu1 %v19924_v57  ;;  %v19928_v11 = vld [vmem:[#allocation177_spill] sm:$0xff]  ;;  %v16117_v14 = vsub.f32 %v6456_v36, %v16088_v17  ;;  %v6828_v58 = vpop.f32.mrf.mxu0  ;;  %v19932_v2 = vld [vmem:[#allocation68_spill] sm:$0xff] }
 0x6bb   :  { %8317 = vmatpush2.msra.mxu0 %v19925_v44  ;;  %19926 = vst [vmem:[#allocation83_spill] sm:$0xff] %v16103_v3  ;;  %8820 = vmatprep.mubr.f32.mxu1 %v16053_v40  ;;  %v8339_v12 = vsub.f32 %v16058_v10, %v19929_v25  ;;  %19930 = vst [vmem:[#allocation120_spill] sm:$0xff] %v16114_v1  ;;  %v16121_v47 = vadd.f32 %v7255_v51, %v6815_v4  ;;  %v19935_v25 = vld [vmem:[#allocation82_spill] sm:$0xff]  ;;  %v19938_v51 = vand.u32 4294901760, %v16075_v46  ;;  %v7263_v10 = vpop.f32.mrf.mxu1 }
 0x6bc   :  { %9116 = vmatpush1.msra.mxu1 %v19928_v11  ;;  %8319 = vmatprep.subr.mxu0 %v15870_v56  ;;  %v6256_v40 = vadd.f32 %v19933_v60, %v19932_v2  ;;  %v19934_v11 = vld [vmem:[#allocation41_spill] sm:$0xff]  ;;  %v6829_v36 = vadd.f32 %v6828_v58, %v15832_v37  ;;  %v19937_v3 = vld [vmem:[#allocation166_spill] sm:$0xff]  ;;  %v16138_v2 = vand.u32 4294901760, %v6460_v7  ;;  %v19940_v60 = vld [vmem:[#allocation107_spill] sm:$0xff]  ;;  %v16146_v58 = vsub.f32 %v6455_v30, %v16114_v1 }
 0x6bd   :  { %9118 = vmatprep.subr.mxu1 %v19931_v35  ;;  %v6435_v57 = vadd.f32 %v19934_v11, %v6258_v0  ;;  %8321 = vmatpush2.msra.mxu0 %v15881_v29  ;;  %v6266_v35 = vadd.f32 %v19937_v3, %v19936_v48  ;;  %v8349_v4 = vsub.f32 %v16075_v46, %v19938_v51  ;;  %v6830_v11 = vpop.f32.mrf.mxu0  ;;  %v6459_v0 = vmax.f32 %v16106_v23, 0.0  ;;  %v19942_v51 = vld [vmem:[#allocation95_spill] sm:$0xff] }
 0x6be   :  { %9120 = vmatpush1.msra.mxu1 %v19935_v25  ;;  %8323 = vmatprep.subr.mxu0 %v15895_v43  ;;  %19939 = vst [vmem:[#allocation122_spill] sm:$0xff] %v16138_v2  ;;  %v6831_v37 = vadd.f32 %v6830_v11, %v15858_v39  ;;  %v16143_v48 = vadd.f32 %v7261_v42, %v6829_v36  ;;  %v8340_v3 = vand.u32 4294901760, %v8339_v12  ;;  %v19943_v23 = vld [vmem:[#allocation27_spill] sm:$0xff]  ;;  %v17892_v39 = vand.u32 4294901760, %v16117_v14  ;;  %v19945_v12 = vld [vmem:[#allocation105_spill] sm:$0xff]  ;;  %v19946_v36 = vld [vmem:[#allocation18_spill] sm:$0xff] }
 0x6bf   :  { %8822 = vmatmul.mubr.f32.gmra.mxu1 %v16072_v22  ;;  %9122 = vmatprep.subr.mxu1 %v19940_v60  ;;  %v6433_v22 = vadd.f32 %v19943_v23, %v6256_v40  ;;  %v6464_v25 = vmax.f32 %v6435_v57, 0.0  ;;  %v19944_v60 = vld [vmem:[#allocation130_spill] sm:$0xff]  ;;  %v6264_v30 = vadd.f32 %v19946_v36, %v19945_v12  ;;  %v19947_v11 = vld [vmem:[#allocation84_spill] sm:$0xff]  ;;  %v16164_v40 = vsub.f32 %v6460_v7, %v16138_v2  ;;  %v19951_v23 = vld [vmem:[#allocation119_spill] sm:$0xff] }
 0x6c0   :  { %8325 = vmatpush2.msra.mxu0 %v15897_v28  ;;  %19941 = vst [vmem:[#allocation42_spill] sm:$0xff] %v16143_v48  ;;  %8828 = vmatprep.mubr.f32.mxu1 %v16088_v17  ;;  %v16154_v42 = vadd.f32 %v7263_v10, %v6831_v37  ;;  %v6443_v48 = vadd.f32 %v19947_v11, %v6266_v35  ;;  %v19948_v17 = vld [vmem:[#allocation22_spill] sm:$0xff]  ;;  %v8350_v57 = vand.u32 4294901760, %v8349_v4  ;;  %v19950_v10 = vand.u32 4294901760, %v16097_v18  ;;  %v19952_v35 = vld [vmem:[#allocation71_spill] sm:$0xff]  ;;  %v19958_v12 = vld [vmem:[#allocation77_spill] sm:$0xff] }
 0x6c1   :  { %9124 = vmatpush1.msra.mxu1 %v19942_v51  ;;  %8327 = vmatprep.subr.mxu0 %v15916_v20  ;;  %v16161_v51 = vand.u32 4294901760, %v6459_v0  ;;  %v6463_v36 = vmax.f32 %v6433_v22, 0.0  ;;  %v16173_v11 = vand.u32 4294901760, %v6464_v25  ;;  %v8365_v7 = vsub.f32 %v16117_v14, %v17892_v39  ;;  %v19954_v4 = vld [vmem:[#allocation63_spill] sm:$0xff]  ;;  %v19957_v22 = vld [vmem:[#allocation150_spill] sm:$0xff]  ;;  %v19960_v39 = vld [vmem:[#allocation56_spill] sm:$0xff] }
 0x6c2   :  { %9126 = vmatprep.subr.mxu1 %v19944_v60  ;;  %8329 = vmatpush2.msra.mxu0 %v15918_v41  ;;  %v8355_v37 = vsub.f32 %v16097_v18, %v19950_v10  ;;  %v19955_v10 = vld [vmem:[#allocation139_spill] sm:$0xff] }
 0x6c3   :  { %9128 = vmatpush1.msra.mxu1 %v19948_v17  ;;  %19949 = vst [vmem:[#allocation92_spill] sm:$0xff] %v16161_v51  ;;  %8341 = vmatmul.mubr.f32.vlgmr.msra.gmra.mxu0 %v8340_v3  ;;  %19953 = vst [vmem:[#allocation123_spill] sm:$0xff] %v16173_v11  ;;  %v6441_v3 = vadd.f32 %v19954_v4, %v6264_v30  ;;  %v19959_v17 = vld [vmem:[#allocation17_spill] sm:$0xff]  ;;  %v16190_v30 = vand.u32 4294901760, %v6463_v36  ;;  %v19962_v4 = vand.u32 4294901760, %v16146_v58 }
 0x6c4   :  { %8830 = vmatmul.mubr.f32.gmra.mxu1 %v16114_v1  ;;  %8862 = vmatprep.subr.mxu0 %v19951_v23  ;;  %v6468_v1 = vmax.f32 %v6443_v48, 0.0  ;;  %v19956_v23 = vld [vmem:[#allocation43_spill] sm:$0xff]  ;;  %v16193_v48 = vsub.f32 %v6464_v25, %v16173_v11  ;;  %v19966_v25 = vand.u32 4294901760, %v16164_v40 }
 0x6c5   :  { %9130 = vmatprep.subr.mxu1 %v19952_v35  ;;  %8351 = vmatprep.mubr.f32.mxu0 %v8350_v57  ;;  %v16183_v35 = vsub.f32 %v6459_v0, %v16161_v51  ;;  %v8356_v57 = vand.u32 4294901760, %v8355_v37  ;;  %19961 = vst [vmem:[#allocation163_spill] sm:$0xff] %v16190_v30  ;;  %v8366_v0 = vand.u32 4294901760, %v8365_v7  ;;  %v6467_v37 = vmax.f32 %v6441_v3, 0.0 }
 0x6c6   :  { %8836 = vmatprep.mubr.f32.mxu1 %v16138_v2  ;;  %8865 = vmatpush1.msra.mxu0 %v19955_v10  ;;  %v19964_v2 = vld [vmem:[#allocation108_spill] sm:$0xff]  ;;  %v8381_v7 = vsub.f32 %v16164_v40, %v19966_v25  ;;  %v16211_v3 = vsub.f32 %v6463_v36, %v16190_v30  ;;  %v19973_v25 = vld [vmem:[#allocation54_spill] sm:$0xff] }
 0x6c7   :  { %9132 = vmatpush1.msra.mxu1 %v19956_v23  ;;  %8868 = vmatprep.subr.mxu0 %v19957_v22  ;;  %v16199_v22 = vand.u32 4294901760, %v6468_v1 }
 0x6c8   :  { %9134 = vmatprep.subr.mxu1 %v19958_v12  ;;  %8871 = vmatpush1.msra.mxu0 %v19959_v17  ;;  %v8371_v12 = vsub.f32 %v16146_v58, %v19962_v4  ;;  %v19965_v17 = vld [vmem:[#allocation85_spill] sm:$0xff]  ;;  %19969 = vst [vmem:[#allocation28_spill] sm:$0xff] %v16211_v3  ;;  %v19970_v4 = vld [vmem:[#allocation78_spill] sm:$0xff]  ;;  %v8382_v36 = vand.u32 4294901760, %v8381_v7  ;;  %v19979_v7 = vld [vmem:[#allocation60_spill] sm:$0xff] }
 0x6c9   :  { %9136 = vmatpush1.msra.mxu1 %v19960_v39  ;;  %8357 = vmatmul.mubr.f32.gmra.mxu0 %v8356_v57  ;;  %19963 = vst [vmem:[#allocation75_spill] sm:$0xff] %v16199_v22  ;;  %v19967_v57 = vld [vmem:[#allocation153_spill] sm:$0xff]  ;;  %v16216_v39 = vand.u32 4294901760, %v6467_v37 }
 0x6ca   :  { %8838 = vmatmul.mubr.f32.gmra.mxu1 %v16161_v51  ;;  %8874 = vmatprep.subr.mxu0 %v19964_v2  ;;  %v19968_v51 = vld [vmem:[#allocation80_spill] sm:$0xff] }
 0x6cb   :  { %9138 = vmatprep.subr.mxu1 %v19965_v17  ;;  %8367 = vmatprep.mubr.f32.mxu0 %v8366_v0  ;;  %v19971_v2 = vld [vmem:[#allocation176_spill] sm:$0xff]  ;;  %v8372_v17 = vand.u32 4294901760, %v8371_v12  ;;  %19972 = vst [vmem:[#allocation53_spill] sm:$0xff] %v16216_v39  ;;  %v19976_v12 = vld [vmem:[#allocation58_spill] sm:$0xff]  ;;  %v19977_v0 = vld [vmem:[#allocation121_spill] sm:$0xff] }
 0x6cc   :  { %8844 = vmatprep.mubr.f32.mxu1 %v16173_v11  ;;  %8877 = vmatpush1.msra.mxu0 %v19967_v57  ;;  %v16219_v11 = vsub.f32 %v6468_v1, %v16199_v22  ;;  %v19974_v57 = vld [vmem:[#allocation111_spill] sm:$0xff]  ;;  %v19978_v1 = vand.u32 4294901760, %v16193_v48 }
 0x6cd   :  { %9140 = vmatpush1.msra.mxu1 %v19968_v51  ;;  %8880 = vmatprep.subr.mxu0 %v19970_v4  ;;  %v19975_v4 = vand.u32 4294901760, %v16183_v35  ;;  %v19983_v51 = vld [vmem:[#allocation100_spill] sm:$0xff] }
 0x6ce   :  { %9142 = vmatprep.subr.mxu1 %v19971_v2  ;;  %8883 = vmatpush1.msra.mxu0 %v19973_v25 }
 0x6cf   :  { %9144 = vmatpush1.msra.mxu1 %v19974_v57  ;;  %8373 = vmatmul.mubr.f32.gmra.mxu0 %v8372_v17  ;;  %v8387_v2 = vsub.f32 %v16183_v35, %v19975_v4  ;;  %v8397_v17 = vsub.f32 %v16193_v48, %v19978_v1  ;;  %v19980_v57 = vld [vmem:[#allocation164_spill] sm:$0xff]  ;;  %v19985_v1 = vand.u32 4294901760, %v16211_v3  ;;  %v19986_v4 = vld [vmem:[#allocation67_spill] sm:$0xff] }
 0x6d0   :  { %8846 = vmatmul.mubr.f32.gmra.mxu1 %v16190_v30  ;;  %8886 = vmatprep.subr.mxu0 %v19976_v12  ;;  %v16235_v30 = vsub.f32 %v6467_v37, %v16216_v39  ;;  %v19981_v12 = vld [vmem:[#allocation55_spill] sm:$0xff] }
 0x6d1   :  { %9146 = vmatprep.subr.mxu1 %v19977_v0  ;;  %8383 = vmatprep.mubr.f32.mxu0 %v8382_v36  ;;  %v19982_v0 = vld [vmem:[#allocation167_spill] sm:$0xff]  ;;  %v8388_v36 = vand.u32 4294901760, %v8387_v2  ;;  %v8398_v37 = vand.u32 4294901760, %v8397_v17  ;;  %v19988_v2 = vand.u32 4294901760, %v16219_v11  ;;  %v19991_v17 = vld [vmem:[#allocation137_spill] sm:$0xff] }
 0x6d2   :  { %8852 = vmatprep.mubr.f32.mxu1 %v16199_v22  ;;  %8889 = vmatpush1.msra.mxu0 %v19979_v7  ;;  %v19984_v22 = vld [vmem:[#allocation142_spill] sm:$0xff]  ;;  %v8403_v7 = vsub.f32 %v16211_v3, %v19985_v1  ;;  %v19994_v1 = vld [vmem:[#allocation96_spill] sm:$0xff] }
 0x6d3   :  { %9148 = vmatpush1.msra.mxu1 %v19980_v57  ;;  %8892 = vmatprep.subr.mxu0 %v19981_v12  ;;  %v19987_v12 = vld [vmem:[#allocation175_spill] sm:$0xff] }
 0x6d4   :  { %9150 = vmatprep.subr.mxu1 %v19982_v0  ;;  %8895 = vmatpush1.msra.mxu0 %v19983_v51  ;;  %v8413_v51 = vsub.f32 %v16219_v11, %v19988_v2  ;;  %v19993_v0 = vld [vmem:[#allocation135_spill] sm:$0xff]  ;;  %v8404_v57 = vand.u32 4294901760, %v8403_v7  ;;  %v19997_v2 = vand.u32 4294901760, %v16235_v30 }
 0x6d5   :  { %9152 = vmatpush1.msra.mxu1 %v19984_v22  ;;  %8389 = vmatmul.mubr.f32.gmra.mxu0 %v8388_v36  ;;  %v19989_v22 = vld [vmem:[#allocation169_spill] sm:$0xff]  ;;  %v19990_v36 = vld [vmem:[#allocation91_spill] sm:$0xff] }
 0x6d6   :  { %8854 = vmatmul.mubr.f32.gmra.mxu1 %v16216_v39  ;;  %8898 = vmatprep.subr.mxu0 %v19986_v4  ;;  %v19992_v39 = vand.u32 4294901760, %v19991_v17  ;;  %v19995_v4 = vld [vmem:[#allocation155_spill] sm:$0xff]  ;;  %v8414_v3 = vand.u32 4294901760, %v8413_v51  ;;  %v20004_v51 = vld [vmem:[#allocation156_spill] sm:$0xff] }
 0x6d7   :  { %9154 = vmatprep.subr.mxu1 %v19987_v12  ;;  %8399 = vmatprep.mubr.f32.mxu0 %v8398_v37  ;;  %v19996_v12 = vld [vmem:[#allocation132_spill] sm:$0xff]  ;;  %v8419_v37 = vsub.f32 %v16235_v30, %v19997_v2  ;;  %v20002_v7 = vld [vmem:[#allocation79_spill] sm:$0xff]  ;;  %v20007_v2 = vld [vmem:[#allocation118_spill] sm:$0xff] }
 0x6d8   :  { %8901 = vmatpush1.msra.mxu0 %v19989_v22  ;;  %9156 = vmatpush1.msra.mxu1 %v19990_v36  ;;  %v19998_v22 = vld [vmem:[#allocation154_spill] sm:$0xff] }
 0x6d9   :  { %9244 = vmatprep.mubr.f32.mxu1 %v19992_v39  ;;  %8904 = vmatprep.subr.mxu0 %v19993_v0  ;;  %v19999_v36 = vld [vmem:[#allocation106_spill] sm:$0xff]  ;;  %v20000_v39 = vld [vmem:[#allocation87_spill] sm:$0xff]  ;;  %v20001_v0 = vld [vmem:[#allocation168_spill] sm:$0xff] }
 0x6da   :  { %9158 = vmatprep.subr.mxu1 %v19994_v1  ;;  %8907 = vmatpush1.msra.mxu0 %v19995_v4  ;;  %v20003_v4 = vld [vmem:[#allocation145_spill] sm:$0xff]  ;;  %v20005_v1 = vld [vmem:[#allocation116_spill] sm:$0xff] }
 0x6db   :  { %9160 = vmatpush1.msra.mxu1 %v19996_v12  ;;  %8405 = vmatmul.mubr.f32.gmra.mxu0 %v8404_v57  ;;  %v8420_v12 = vand.u32 4294901760, %v8419_v37  ;;  %v20006_v57 = vld [vmem:[#allocation62_spill] sm:$0xff]  ;;  %v20012_v37 = vld [vmem:[#allocation127_spill] sm:$0xff] }
 0x6dc   :  { %8910 = vmatprep.subr.mxu0 %v19998_v22  ;;  %9162 = vmatprep.subr.mxu1 %v19999_v36  ;;  %v20008_v36 = vld [vmem:[#allocation72_spill] sm:$0xff] }
 0x6dd   :  { %8415 = vmatprep.mubr.f32.mxu0 %v8414_v3  ;;  %8913 = vmatpush1.msra.mxu0 %v20000_v39  ;;  %v7655_v3 = vpop.f32.mrf.mxu1 }
 0x6de   :  { %9164 = vmatpush1.msra.mxu1 %v20001_v0  ;;  %8916 = vmatprep.subr.mxu0 %v20002_v7  ;;  %v20009_v0 = vld [vmem:[#allocation128_spill] sm:$0xff]  ;;  %v20010_v7 = vld [vmem:[#allocation125_spill] sm:$0xff] }
 0x6df   :  { %9166 = vmatprep.subr.mxu1 %v20003_v4  ;;  %8919 = vmatpush1.msra.mxu0 %v20004_v51  ;;  %v20011_v4 = vld [vmem:[#allocation20_spill] sm:$0xff] }
 0x6e0   :  { %9168 = vmatpush1.msra.mxu1 %v20005_v1  ;;  %8421 = vmatmul.mubr.f32.gmra.mxu0 %v8420_v12  ;;  %v20013_v51 = vld [vmem:[#allocation144_spill] sm:$0xff]  ;;  %v7657_v12 = vpop.f32.mrf.mxu1  ;;  %v20014_v1 = vld [vmem:[#allocation117_spill] sm:$0xff] }
 0x6e1   :  { %8922 = vmatprep.subr.mxu0 %v20006_v57  ;;  %9170 = vmatprep.subr.mxu1 %v20007_v2  ;;  %v20015_v57 = vld [vmem:[#allocation146_spill] sm:$0xff]  ;;  %v20016_v2 = vld [vmem:[#allocation124_spill] sm:$0xff] }
 0x6e2   :  { %8925 = vmatpush1.msra.mxu0 %v20008_v36  ;;  %9054 = vmatprep.mubr.f32.mxu0 %v19991_v17  ;;  %v20017_v17 = vld [vmem:[#allocation157_spill] sm:$0xff] }
 0x6e3   :  { %9172 = vmatpush1.msra.mxu1 %v20009_v0  ;;  %8928 = vmatprep.subr.mxu0 %v20010_v7  ;;  %v20018_v7 = vld [vmem:[#allocation165_spill] sm:$0xff] }
 0x6e4   :  { %9174 = vmatprep.subr.mxu1 %v20011_v4  ;;  %8931 = vmatpush1.msra.mxu0 %v20012_v37  ;;  %v7667_v37 = vpop.f32.mrf.mxu1  ;;  %v20019_v4 = vld [vmem:[#allocation160_spill] sm:$0xff] }
 0x6e5   :  { %9176 = vmatpush1.msra.mxu1 %v20013_v51  ;;  %8934 = vmatprep.subr.mxu0 %v20014_v1  ;;  %v20020_v1 = vld [vmem:[#allocation136_spill] sm:$0xff]  ;;  %v20029_v51 = vld [vmem:[#allocation162_spill] sm:$0xff] }
 0x6e6   :  { %9178 = vmatprep.subr.mxu1 %v20015_v57  ;;  %8937 = vmatpush1.msra.mxu0 %v20016_v2  ;;  %v20021_v2 = vld [vmem:[#allocation34_spill] sm:$0xff]  ;;  %v20024_v57 = vld [vmem:[#allocation99_spill] sm:$0xff] }
 0x6e7   :  { %9180 = vmatpush2.msra.mxu1 %v15380_v24  ;;  %8940 = vmatprep.subr.mxu0 %v20017_v17  ;;  %v7464_v17 = vpop.f32.mrf.mxu0  ;;  %v20022_v24 = vld [vmem:[#allocation36_spill] sm:$0xff] }
 0x6e8   :  { %9182 = vmatprep.subr.mxu1 %v15391_v59  ;;  %8943 = vmatpush1.msra.mxu0 %v20018_v7  ;;  %v7669_v7 = vpop.f32.mrf.mxu1 }
 0x6e9   :  { %9184 = vmatpush2.msra.mxu1 %v15393_v8  ;;  %8946 = vmatprep.subr.mxu0 %v20019_v4  ;;  %v20023_v8 = vld [vmem:[#allocation35_spill] sm:$0xff]  ;;  %v20025_v4 = vld [vmem:[#allocation38_spill] sm:$0xff] }
 0x6ea   :  { %9186 = vmatprep.subr.mxu1 %v15442_v13  ;;  %8949 = vmatpush1.msra.mxu0 %v20020_v1  ;;  %v7465_v59 = vadd.f32 %v7464_v17, %v20023_v8  ;;  %v7466_v13 = vpop.f32.mrf.mxu0  ;;  %v20026_v1 = vld [vmem:[#allocation24_spill] sm:$0xff]  ;;  %v7679_v8 = vpop.f32.mrf.mxu1 }
 0x6eb   :  { %9188 = vmatpush2.msra.mxu1 %v19877_v55  ;;  %8952 = vmatprep.subr.mxu0 %v20021_v2  ;;  %v20027_v2 = vld [vmem:[#allocation143_spill] sm:$0xff] }
 0x6ec   :  { %9190 = vmatprep.subr.mxu1 %v19881_v6  ;;  %8955 = vmatpush1.msra.mxu0 %v20022_v24  ;;  %v7467_v55 = vadd.f32 %v7466_v13, %v20027_v2  ;;  %v16304_v6 = vadd.f32 %v7655_v3, %v7465_v59  ;;  %v20034_v59 = vld [vmem:[#allocation148_spill] sm:$0xff]  ;;  %v20035_v2 = vld [vmem:[#allocation86_spill] sm:$0xff] }
 0x6ed   :  { %9192 = vmatpush2.msra.mxu1 %v19885_v5  ;;  %8958 = vmatprep.subr.mxu0 %v20024_v57  ;;  %v20030_v5 = vld [vmem:[#allocation152_spill] sm:$0xff] }
 0x6ee   :  { %9194 = vmatprep.subr.mxu1 %v20025_v4  ;;  %8961 = vmatpush2.msra.mxu0 %v20026_v1  ;;  %20028 = vst [vmem:[#allocation29_spill] sm:$0xff] %v16304_v6  ;;  %v16310_v17 = vadd.f32 %v7657_v12, %v7467_v55  ;;  %v20032_v4 = vld [vmem:[#allocation33_spill] sm:$0xff]  ;;  %v20033_v1 = vld [vmem:[#allocation52_spill] sm:$0xff]  ;;  %v7681_v55 = vpop.f32.mrf.mxu1 }
 0x6ef   :  { %9196 = vmatpush2.msra.mxu1 %v15575_v26  ;;  %8964 = vmatprep.subr.mxu0 %v20029_v51  ;;  %v7474_v26 = vpop.f32.mrf.mxu0  ;;  %v20036_v6 = vld [vmem:[#allocation88_spill] sm:$0xff] }
 0x6f0   :  { %9198 = vmatprep.subr.mxu1 %v15577_v32  ;;  %8967 = vmatpush2.msra.mxu0 %v20030_v5  ;;  %20031 = vst [vmem:[#allocation23_spill] sm:$0xff] %v16310_v17  ;;  %v7475_v13 = vadd.f32 %v7474_v26, %v20034_v59  ;;  %v20041_v59 = vld [vmem:[#allocation81_spill] sm:$0xff] }
 0x6f1   :  { %9200 = vmatpush2.msra.mxu1 %v15587_v31  ;;  %8970 = vmatprep.subr.mxu0 %v20032_v4  ;;  %v7476_v3 = vpop.f32.mrf.mxu0 }
 0x6f2   :  { %9202 = vmatprep.subr.mxu1 %v15600_v49  ;;  %8973 = vmatpush2.msra.mxu0 %v20033_v1  ;;  %v7477_v12 = vadd.f32 %v7476_v3, %v15998_v9  ;;  %v16322_v17 = vadd.f32 %v7667_v37, %v7475_v13  ;;  %v20038_v49 = vld [vmem:[#allocation48_spill] sm:$0xff]  ;;  %v7691_v9 = vpop.f32.mrf.mxu1  ;;  %v20043_v13 = vld [vmem:[#allocation98_spill] sm:$0xff] }
 0x6f3   :  { %9204 = vmatpush2.msra.mxu1 %v15614_v34  ;;  %8976 = vmatprep.subr.mxu0 %v20035_v2  ;;  %v20039_v34 = vld [vmem:[#allocation64_spill] sm:$0xff] }
 0x6f4   :  { %9206 = vmatprep.subr.mxu1 %v15627_v53  ;;  %8979 = vmatpush2.msra.mxu0 %v20036_v6  ;;  %20037 = vst [vmem:[#allocation59_spill] sm:$0xff] %v16322_v17  ;;  %v16328_v26 = vadd.f32 %v7669_v7, %v7477_v12  ;;  %v20042_v6 = vld [vmem:[#allocation104_spill] sm:$0xff]  ;;  %v20044_v17 = vld [vmem:[#allocation70_spill] sm:$0xff] }
 0x6f5   :  { %9208 = vmatpush2.msra.mxu1 %v15629_v62  ;;  %8982 = vmatprep.subr.mxu0 %v20038_v49  ;;  %v7484_v62 = vpop.f32.mrf.mxu0 }
 0x6f6   :  { %9210 = vmatprep.subr.mxu1 %v15643_v52  ;;  %8985 = vmatpush2.msra.mxu0 %v20039_v34  ;;  %20040 = vst [vmem:[#allocation76_spill] sm:$0xff] %v16328_v26  ;;  %v7485_v37 = vadd.f32 %v7484_v62, %v16032_v38  ;;  %v20046_v26 = vld [vmem:[#allocation57_spill] sm:$0xff]  ;;  %v7693_v62 = vpop.f32.mrf.mxu1 }
 0x6f7   :  { %9212 = vmatpush2.msra.mxu1 %v15653_v61  ;;  %8988 = vmatprep.subr.mxu0 %v20041_v59  ;;  %v7486_v3 = vpop.f32.mrf.mxu0 }
 0x6f8   :  { %9214 = vmatprep.subr.mxu1 %v15655_v63  ;;  %8991 = vmatpush2.msra.mxu0 %v20042_v6  ;;  %v7487_v7 = vadd.f32 %v7486_v3, %v16049_v16  ;;  %v16340_v12 = vadd.f32 %v7679_v8, %v7485_v37  ;;  %v20051_v8 = vld [vmem:[#allocation126_spill] sm:$0xff]  ;;  %v20052_v3 = vld [vmem:[#allocation131_spill] sm:$0xff] }
 0x6f9   :  { %9216 = vmatpush2.msra.mxu1 %v15693_v33  ;;  %8994 = vmatprep.subr.mxu0 %v20043_v13  ;;  %v20047_v33 = vld [vmem:[#allocation94_spill] sm:$0xff] }
 0x6fa   :  { %9218 = vmatprep.subr.mxu1 %v15707_v15  ;;  %8997 = vmatpush2.msra.mxu0 %v20044_v17  ;;  %20045 = vst [vmem:[#allocation19_spill] sm:$0xff] %v16340_v12  ;;  %v16346_v38 = vadd.f32 %v7681_v55, %v7487_v7  ;;  %v20049_v15 = vld [vmem:[#allocation171_spill] sm:$0xff]  ;;  %v20050_v17 = vld [vmem:[#allocation97_spill] sm:$0xff]  ;;  %v7703_v55 = vpop.f32.mrf.mxu1 }
 0x6fb   :  { %9220 = vmatpush2.msra.mxu1 %v15717_v27  ;;  %9000 = vmatprep.subr.mxu0 %v20046_v26  ;;  %v7494_v27 = vpop.f32.mrf.mxu0  ;;  %v20054_v12 = vld [vmem:[#allocation103_spill] sm:$0xff] }
 0x6fc   :  { %9222 = vmatprep.subr.mxu1 %v15805_v54  ;;  %9003 = vmatpush2.msra.mxu0 %v20047_v33  ;;  %20048 = vst [vmem:[#allocation90_spill] sm:$0xff] %v16346_v38  ;;  %v7495_v16 = vadd.f32 %v7494_v27, %v16069_v45  ;;  %v20057_v45 = vld [vmem:[#allocation140_spill] sm:$0xff] }
 0x6fd   :  { %9224 = vmatpush2.msra.mxu1 %v15827_v21  ;;  %9006 = vmatprep.subr.mxu0 %v20049_v15  ;;  %v7496_v37 = vpop.f32.mrf.mxu0 }
 0x6fe   :  { %9226 = vmatprep.subr.mxu1 %v19923_v50  ;;  %9009 = vmatpush2.msra.mxu0 %v20050_v17  ;;  %v7497_v7 = vadd.f32 %v7496_v37, %v16078_v19  ;;  %v16358_v38 = vadd.f32 %v7691_v9, %v7495_v16  ;;  %v7705_v19 = vpop.f32.mrf.mxu1  ;;  %v20059_v9 = vld [vmem:[#allocation83_spill] sm:$0xff]  ;;  %v20060_v37 = vld [vmem:[#allocation138_spill] sm:$0xff] }
 0x6ff   :  { %9228 = vmatpush2.msra.mxu1 %v19925_v44  ;;  %9012 = vmatprep.subr.mxu0 %v20051_v8  ;;  %v20055_v44 = vld [vmem:[#allocation173_spill] sm:$0xff] }
 0x700   :  { %9230 = vmatprep.subr.mxu1 %v15870_v56  ;;  %9015 = vmatpush2.msra.mxu0 %v20052_v3  ;;  %20053 = vst [vmem:[#allocation158_spill] sm:$0xff] %v16358_v38  ;;  %v16364_v27 = vadd.f32 %v7693_v62, %v7497_v7  ;;  %v20058_v3 = vld [vmem:[#allocation149_spill] sm:$0xff]  ;;  %v20061_v38 = vld [vmem:[#allocation170_spill] sm:$0xff] }
 0x701   :  { %9232 = vmatpush2.msra.mxu1 %v15881_v29  ;;  %9018 = vmatprep.subr.mxu0 %v20054_v12  ;;  %v7504_v29 = vpop.f32.mrf.mxu0  ;;  %v20063_v62 = vld [vmem:[#allocation61_spill] sm:$0xff]  ;;  %v20064_v7 = vld [vmem:[#allocation46_spill] sm:$0xff] }
 0x702   :  { %9234 = vmatprep.subr.mxu1 %v15895_v43  ;;  %9021 = vmatpush2.msra.mxu0 %v20055_v44  ;;  %20056 = vst [vmem:[#allocation31_spill] sm:$0xff] %v16364_v27  ;;  %v7505_v16 = vadd.f32 %v7504_v29, %v20059_v9  ;;  %v20062_v44 = vand.u32 4294901760, %v20061_v38  ;;  %v20068_v29 = vld [vmem:[#allocation109_spill] sm:$0xff]  ;;  %v20069_v9 = vld [vmem:[#allocation172_spill] sm:$0xff] }
 0x703   :  { %9236 = vmatpush2.msra.mxu1 %v15897_v28  ;;  %9024 = vmatprep.subr.mxu0 %v20057_v45  ;;  %v7506_v28 = vpop.f32.mrf.mxu0 }
 0x704   :  { %9238 = vmatprep.subr.mxu1 %v15916_v20  ;;  %9027 = vmatpush2.msra.mxu0 %v20058_v3  ;;  %v7507_v27 = vadd.f32 %v7506_v28, %v16121_v47  ;;  %v16377_v20 = vadd.f32 %v7703_v55, %v7505_v16  ;;  %v20066_v3 = vand.u32 4294901760, %v16075_v46  ;;  %v20073_v28 = vld [vmem:[#allocation42_spill] sm:$0xff]  ;;  %v20074_v55 = vld [vmem:[#allocation47_spill] sm:$0xff] }
 0x705   :  { %9240 = vmatpush2.msra.mxu1 %v15918_v41  ;;  %9030 = vmatprep.subr.mxu0 %v20060_v37  ;;  %v20067_v41 = vld [vmem:[#allocation177_spill] sm:$0xff]  ;;  %v7715_v37 = vpop.f32.mrf.mxu1  ;;  %v20076_v16 = vld [vmem:[#allocation107_spill] sm:$0xff] }
 0x706   :  { %9248 = vmatmul.mubr.f32.vlgmr.msra.gmra.mxu1 %v20062_v44  ;;  %9620 = vmatprep.subr.mxu1 %v20063_v62  ;;  %20065 = vst [vmem:[#allocation110_spill] sm:$0xff] %v16377_v20  ;;  %v7514_v44 = vpop.f32.mrf.mxu0  ;;  %v16384_v45 = vadd.f32 %v7705_v19, %v7507_v27  ;;  %v20071_v62 = vld [vmem:[#allocation159_spill] sm:$0xff]  ;;  %v20077_v20 = vld [vmem:[#allocation113_spill] sm:$0xff]  ;;  %v20078_v19 = vand.u32 4294901760, %v16117_v14 }
 0x707   :  { %9033 = vmatpush2.msra.mxu0 %v20064_v7  ;;  %9256 = vmatprep.mubr.f32.mxu1 %v20066_v3  ;;  %v20072_v7 = vld [vmem:[#allocation82_spill] sm:$0xff]  ;;  %v7515_v47 = vadd.f32 %v7514_v44, %v20073_v28  ;;  %v20075_v3 = vand.u32 4294901760, %v16097_v18  ;;  %v7717_v44 = vpop.f32.mrf.mxu1  ;;  %v20080_v28 = vld [vmem:[#allocation141_spill] sm:$0xff] }
 0x708   :  { %9622 = vmatpush1.msra.mxu1 %v20067_v41  ;;  %9036 = vmatprep.subr.mxu0 %v20068_v29  ;;  %20070 = vst [vmem:[#allocation115_spill] sm:$0xff] %v16384_v45  ;;  %v7516_v41 = vpop.f32.mrf.mxu0  ;;  %v20081_v45 = vld [vmem:[#allocation66_spill] sm:$0xff] }
 0x709   :  { %9624 = vmatprep.subr.mxu1 %v20069_v9  ;;  %9039 = vmatpush2.msra.mxu0 %v20071_v62  ;;  %v7517_v9 = vadd.f32 %v7516_v41, %v16154_v42  ;;  %v16395_v27 = vadd.f32 %v7715_v37, %v7515_v47  ;;  %v20083_v42 = vand.u32 4294901760, %v16146_v58  ;;  %v20084_v37 = vld [vmem:[#allocation119_spill] sm:$0xff] }
 0x70a   :  { %9626 = vmatpush1.msra.mxu1 %v20072_v7  ;;  %9042 = vmatprep.subr.mxu0 %v20074_v55  ;;  %v20079_v7 = vld [vmem:[#allocation95_spill] sm:$0xff]  ;;  %v20085_v47 = vand.u32 4294901760, %v20084_v37  ;;  %v20096_v37 = vld [vmem:[#allocation108_spill] sm:$0xff] }
 0x70b   :  { %9260 = vmatmul.mubr.f32.gmra.mxu1 %v20075_v3  ;;  %9628 = vmatprep.subr.mxu1 %v20076_v16  ;;  %v16402_v3 = vadd.f32 %v7717_v44, %v7517_v9  ;;  %v20082_v16 = vld [vmem:[#allocation22_spill] sm:$0xff]  ;;  %v20086_v41 = vld [vmem:[#allocation71_spill] sm:$0xff]  ;;  %v20088_v9 = vand.u32 4294901760, %v19955_v10  ;;  %v20092_v44 = vld [vmem:[#allocation17_spill] sm:$0xff]  ;;  %v20097_v10 = vand.u32 4294901760, %v20096_v37 }
 0x70c   :  { %9045 = vmatpush2.msra.mxu0 %v20077_v20  ;;  %9268 = vmatprep.mubr.f32.mxu1 %v20078_v19  ;;  %v20089_v19 = vld [vmem:[#allocation150_spill] sm:$0xff]  ;;  %v20112_v37 = vld [vmem:[#allocation121_spill] sm:$0xff] }
 0x70d   :  { %9630 = vmatpush1.msra.mxu1 %v20079_v7  ;;  %9048 = vmatprep.subr.mxu0 %v20080_v28  ;;  %v20091_v7 = vld [vmem:[#allocation77_spill] sm:$0xff] }
 0x70e   :  { %9632 = vmatprep.subr.mxu1 %v19944_v60  ;;  %9051 = vmatpush2.msra.mxu0 %v20081_v45  ;;  %v20087_v60 = vand.u32 4294901760, %v16164_v40 }
 0x70f   :  { %9634 = vmatpush1.msra.mxu1 %v20082_v16  ;;  %9057 = vmatmul.mubr.f32.vlgmr.msra.gmra.mxu0 %v20061_v38  ;;  %v20090_v38 = vand.u32 4294901760, %v20089_v19  ;;  %v20093_v16 = vand.u32 4294901760, %v20092_v44  ;;  %v20103_v19 = vld [vmem:[#allocation78_spill] sm:$0xff]  ;;  %v20107_v44 = vld [vmem:[#allocation111_spill] sm:$0xff] }
 0x710   :  { %9272 = vmatmul.mubr.f32.gmra.mxu1 %v20083_v42  ;;  %9317 = vmatprep.subr.mxu0 %v20085_v47  ;;  %v20094_v42 = vld [vmem:[#allocation56_spill] sm:$0xff]  ;;  %v20098_v47 = vld [vmem:[#allocation85_spill] sm:$0xff] }
 0x711   :  { %9636 = vmatprep.subr.mxu1 %v20086_v41  ;;  %9064 = vmatprep.mubr.f32.mxu0 %v16075_v46  ;;  %v20095_v46 = vand.u32 4294901760, %v16183_v35  ;;  %v20100_v41 = vld [vmem:[#allocation153_spill] sm:$0xff] }
 0x712   :  { %9280 = vmatprep.mubr.f32.mxu1 %v20087_v60  ;;  %9321 = vmatpush1.msra.mxu0 %v20088_v9  ;;  %v20101_v60 = vand.u32 4294901760, %v20100_v41  ;;  %v20102_v9 = vld [vmem:[#allocation80_spill] sm:$0xff]  ;;  %v20117_v41 = vld [vmem:[#allocation55_spill] sm:$0xff] }
 0x713   :  { %9638 = vmatpush1.msra.mxu1 %v19956_v23  ;;  %9325 = vmatprep.subr.mxu0 %v20090_v38  ;;  %v20099_v23 = vand.u32 4294901760, %v16193_v48  ;;  %v20105_v38 = vld [vmem:[#allocation176_spill] sm:$0xff] }
 0x714   :  { %9640 = vmatprep.subr.mxu1 %v20091_v7  ;;  %9329 = vmatpush1.msra.mxu0 %v20093_v16  ;;  %v20106_v7 = vand.u32 4294901760, %v19973_v25 }
 0x715   :  { %9642 = vmatpush1.msra.mxu1 %v20094_v42  ;;  %9067 = vmatmul.mubr.f32.gmra.mxu0 %v16097_v18  ;;  %v20104_v18 = vand.u32 4294901760, %v20103_v19  ;;  %v20110_v42 = vld [vmem:[#allocation58_spill] sm:$0xff] }
 0x716   :  { %9284 = vmatmul.mubr.f32.gmra.mxu1 %v20095_v46  ;;  %9333 = vmatprep.subr.mxu0 %v20097_v10  ;;  %v20111_v46 = vand.u32 4294901760, %v20110_v42  ;;  %v20113_v10 = vand.u32 4294901760, %v16219_v11 }
 0x717   :  { %9644 = vmatprep.subr.mxu1 %v20098_v47  ;;  %9074 = vmatprep.mubr.f32.mxu0 %v16117_v14  ;;  %v20108_v14 = vld [vmem:[#allocation28_spill] sm:$0xff] }
 0x718   :  { %9292 = vmatprep.mubr.f32.mxu1 %v20099_v23  ;;  %9337 = vmatpush1.msra.mxu0 %v20101_v60  ;;  %v20109_v16 = vand.u32 4294901760, %v20108_v14  ;;  %v20114_v47 = vld [vmem:[#allocation60_spill] sm:$0xff]  ;;  %v20119_v60 = vld [vmem:[#allocation167_spill] sm:$0xff] }
 0x719   :  { %9646 = vmatpush1.msra.mxu1 %v20102_v9  ;;  %9341 = vmatprep.subr.mxu0 %v20104_v18  ;;  %v20115_v25 = vand.u32 4294901760, %v20114_v47  ;;  %v20116_v23 = vld [vmem:[#allocation164_spill] sm:$0xff]  ;;  %v20122_v18 = vld [vmem:[#allocation142_spill] sm:$0xff] }
 0x71a   :  { %9648 = vmatprep.subr.mxu1 %v20105_v38  ;;  %9345 = vmatpush1.msra.mxu0 %v20106_v7  ;;  %v20120_v9 = vld [vmem:[#allocation100_spill] sm:$0xff]  ;;  %v20124_v38 = vld [vmem:[#allocation67_spill] sm:$0xff] }
 0x71b   :  { %9650 = vmatpush1.msra.mxu1 %v20107_v44  ;;  %9077 = vmatmul.mubr.f32.gmra.mxu0 %v16146_v58  ;;  %v20118_v58 = vand.u32 4294901760, %v20117_v41  ;;  %v20121_v19 = vand.u32 4294901760, %v20120_v9  ;;  %v20125_v7 = vand.u32 4294901760, %v20124_v38  ;;  %v20126_v44 = vld [vmem:[#allocation175_spill] sm:$0xff]  ;;  %v20136_v41 = vld [vmem:[#allocation132_spill] sm:$0xff] }
 0x71c   :  { %9296 = vmatmul.mubr.f32.gmra.mxu1 %v20109_v16  ;;  %9349 = vmatprep.subr.mxu0 %v20111_v46  ;;  %v20127_v16 = vld [vmem:[#allocation169_spill] sm:$0xff]  ;;  %v20129_v46 = vld [vmem:[#allocation91_spill] sm:$0xff]  ;;  %v20140_v9 = vld [vmem:[#allocation168_spill] sm:$0xff] }
 0x71d   :  { %9652 = vmatprep.subr.mxu1 %v20112_v37  ;;  %9084 = vmatprep.mubr.f32.mxu0 %v16164_v40  ;;  %v20123_v40 = vand.u32 4294901760, %v16235_v30  ;;  %v20128_v42 = vand.u32 4294901760, %v20127_v16  ;;  %v20130_v37 = vld [vmem:[#allocation37_spill] sm:$0xff]  ;;  %v20144_v38 = vld [vmem:[#allocation156_spill] sm:$0xff] }
 0x71e   :  { %9304 = vmatprep.mubr.f32.mxu1 %v20113_v10  ;;  %9353 = vmatpush1.msra.mxu0 %v20115_v25  ;;  %v20131_v10 = vld [vmem:[#allocation135_spill] sm:$0xff]  ;;  %v20151_v16 = vld [vmem:[#allocation125_spill] sm:$0xff] }
 0x71f   :  { %9654 = vmatpush1.msra.mxu1 %v20116_v23  ;;  %9357 = vmatprep.subr.mxu0 %v20118_v58  ;;  %v20132_v47 = vand.u32 4294901760, %v20131_v10  ;;  %v20134_v25 = vld [vmem:[#allocation155_spill] sm:$0xff]  ;;  %v20138_v58 = vld [vmem:[#allocation106_spill] sm:$0xff] }
 0x720   :  { %9656 = vmatprep.subr.mxu1 %v20119_v60  ;;  %9361 = vmatpush1.msra.mxu0 %v20121_v19  ;;  %v20135_v23 = vand.u32 4294901760, %v20134_v25  ;;  %v20139_v60 = vand.u32 4294901760, %v20000_v39  ;;  %v20141_v19 = vld [vmem:[#allocation79_spill] sm:$0xff]  ;;  %v20150_v39 = vand.u32 4294901760, %v20008_v36  ;;  %v20160_v36 = vld [vmem:[#allocation124_spill] sm:$0xff] }
 0x721   :  { %9658 = vmatpush1.msra.mxu1 %v20122_v18  ;;  %9087 = vmatmul.mubr.f32.gmra.mxu0 %v16183_v35  ;;  %v20133_v35 = vld [vmem:[#allocation96_spill] sm:$0xff]  ;;  %v20142_v18 = vand.u32 4294901760, %v20141_v19  ;;  %v20154_v10 = vld [vmem:[#allocation127_spill] sm:$0xff]  ;;  %v20168_v19 = vld [vmem:[#allocation26_spill] sm:$0xff] }
 0x722   :  { %9308 = vmatmul.mubr.f32.gmra.mxu1 %v20123_v40  ;;  %9365 = vmatprep.subr.mxu0 %v20125_v7  ;;  %v20143_v40 = vld [vmem:[#allocation145_spill] sm:$0xff]  ;;  %v20145_v7 = vand.u32 4294901760, %v20144_v38 }
 0x723   :  { %9660 = vmatprep.subr.mxu1 %v20126_v44  ;;  %9094 = vmatprep.mubr.f32.mxu0 %v16193_v48  ;;  %v20137_v48 = vand.u32 4294901760, %v19998_v22  ;;  %v20147_v22 = vld [vmem:[#allocation62_spill] sm:$0xff]  ;;  %v20171_v38 = vld [vmem:[#allocation25_spill] sm:$0xff] }
 0x724   :  { %9369 = vmatpush1.msra.mxu0 %v20128_v42  ;;  %9662 = vmatpush1.msra.mxu1 %v20129_v46  ;;  %v20148_v44 = vand.u32 4294901760, %v20147_v22  ;;  %v20152_v42 = vand.u32 4294901760, %v20151_v16  ;;  %v20153_v46 = vld [vmem:[#allocation20_spill] sm:$0xff]  ;;  %v20174_v22 = vld [vmem:[#allocation49_spill] sm:$0xff]  ;;  %v20178_v16 = vand.u32 4294901760, %v20022_v24  ;;  %v20186_v24 = vand.u32 4294901760, %v20030_v5 }
 0x725   :  { %9748 = vmatprep.mubr.f32.mxu1 %v20130_v37  ;;  %9373 = vmatprep.subr.mxu0 %v20132_v47  ;;  %v20155_v47 = vand.u32 4294901760, %v20154_v10  ;;  %v20181_v10 = vld [vmem:[#allocation38_spill] sm:$0xff] }
 0x726   :  { %9664 = vmatprep.subr.mxu1 %v20133_v35  ;;  %9377 = vmatpush1.msra.mxu0 %v20135_v23  ;;  %v20157_v35 = vld [vmem:[#allocation117_spill] sm:$0xff]  ;;  %v20159_v23 = vld [vmem:[#allocation146_spill] sm:$0xff] }
 0x727   :  { %9666 = vmatpush1.msra.mxu1 %v20136_v41  ;;  %9097 = vmatmul.mubr.f32.gmra.mxu0 %v20108_v14  ;;  %v20146_v14 = vld [vmem:[#allocation116_spill] sm:$0xff]  ;;  %v20158_v25 = vand.u32 4294901760, %v20157_v35  ;;  %v20161_v41 = vand.u32 4294901760, %v20160_v36  ;;  %v20189_v36 = vand.u32 4294901760, %v20033_v1  ;;  %v20197_v1 = vand.u32 4294901760, %v20041_v59 }
 0x728   :  { %9381 = vmatprep.subr.mxu0 %v20137_v48  ;;  %9668 = vmatprep.subr.mxu1 %v20138_v58  ;;  %v20165_v58 = vld [vmem:[#allocation21_spill] sm:$0xff]  ;;  %v20184_v35 = vld [vmem:[#allocation40_spill] sm:$0xff]  ;;  %v20208_v59 = vand.u32 4294901760, %v20050_v17  ;;  %v20217_v17 = vld [vmem:[#allocation51_spill] sm:$0xff] }
 0x729   :  { %9104 = vmatprep.mubr.f32.mxu0 %v16219_v11  ;;  %9385 = vmatpush1.msra.mxu0 %v20139_v60  ;;  %v20149_v11 = vld [vmem:[#allocation118_spill] sm:$0xff]  ;;  %v20166_v60 = vld [vmem:[#allocation165_spill] sm:$0xff] }
 0x72a   :  { %9670 = vmatpush1.msra.mxu1 %v20140_v9  ;;  %9389 = vmatprep.subr.mxu0 %v20142_v18  ;;  %v20167_v9 = vand.u32 4294901760, %v20166_v60  ;;  %v20169_v18 = vld [vmem:[#allocation160_spill] sm:$0xff] }
 0x72b   :  { %9672 = vmatprep.subr.mxu1 %v20143_v40  ;;  %9393 = vmatpush1.msra.mxu0 %v20145_v7  ;;  %v20170_v40 = vand.u32 4294901760, %v20169_v18  ;;  %v20172_v7 = vld [vmem:[#allocation136_spill] sm:$0xff]  ;;  %v20223_v18 = vld [vmem:[#allocation89_spill] sm:$0xff] }
 0x72c   :  { %9674 = vmatpush1.msra.mxu1 %v20146_v14  ;;  %9107 = vmatmul.mubr.f32.gmra.mxu0 %v16235_v30  ;;  %v20156_v30 = vld [vmem:[#allocation144_spill] sm:$0xff]  ;;  %v20173_v14 = vand.u32 4294901760, %v20172_v7 }
 0x72d   :  { %9397 = vmatprep.subr.mxu0 %v20148_v44  ;;  %9676 = vmatprep.subr.mxu1 %v20149_v11  ;;  %v20175_v44 = vld [vmem:[#allocation34_spill] sm:$0xff]  ;;  %v20218_v60 = vld [vmem:[#allocation140_spill] sm:$0xff] }
 0x72e   :  { %9401 = vmatpush1.msra.mxu0 %v20150_v39  ;;  %9571 = vmatprep.mubr.f32.mxu0 %v20130_v37  ;;  %v20162_v37 = vld [vmem:[#allocation174_spill] sm:$0xff]  ;;  %v20176_v11 = vand.u32 4294901760, %v20175_v44  ;;  %v20231_v44 = vand.u32 4294901760, %v20071_v62 }
 0x72f   :  { %9678 = vmatpush1.msra.mxu1 %v20009_v0  ;;  %9405 = vmatprep.subr.mxu0 %v20152_v42  ;;  %v20163_v0 = vld [vmem:[#allocation157_spill] sm:$0xff]  ;;  %v20177_v39 = vld [vmem:[#allocation50_spill] sm:$0xff]  ;;  %v20179_v42 = vld [vmem:[#allocation44_spill] sm:$0xff] }
 0x730   :  { %9680 = vmatprep.subr.mxu1 %v20153_v46  ;;  %9409 = vmatpush1.msra.mxu0 %v20155_v47  ;;  %v20164_v48 = vand.u32 4294901760, %v20163_v0  ;;  %v20180_v46 = vand.u32 4294901760, %v20024_v57  ;;  %v20182_v47 = vld [vmem:[#allocation24_spill] sm:$0xff]  ;;  %v20187_v57 = vand.u32 4294901760, %v20032_v4  ;;  %v20196_v4 = vand.u32 4294901760, %v20039_v34  ;;  %v20201_v0 = vld [vmem:[#allocation114_spill] sm:$0xff] }
 0x731   :  { %9682 = vmatpush1.msra.mxu1 %v20156_v30  ;;  %9413 = vmatprep.subr.mxu0 %v20158_v25  ;;  %v20183_v30 = vand.u32 4294901760, %v20182_v47  ;;  %v20185_v25 = vand.u32 4294901760, %v20029_v51  ;;  %v20191_v51 = vand.u32 4294901760, %v20035_v2  ;;  %v20199_v2 = vld [vmem:[#allocation161_spill] sm:$0xff]  ;;  %v20239_v62 = vld [vmem:[#allocation122_spill] sm:$0xff] }
 0x732   :  { %9684 = vmatprep.subr.mxu1 %v20159_v23  ;;  %9417 = vmatpush1.msra.mxu0 %v20161_v41  ;;  %v20188_v23 = vld [vmem:[#allocation45_spill] sm:$0xff]  ;;  %v20190_v41 = vld [vmem:[#allocation39_spill] sm:$0xff] }
 0x733   :  { %9686 = vmatpush2.msra.mxu1 %v20162_v37  ;;  %9421 = vmatprep.subr.mxu0 %v20164_v48  ;;  %v20194_v37 = vld [vmem:[#allocation69_spill] sm:$0xff] }
 0x734   :  { %9688 = vmatprep.subr.mxu1 %v20165_v58  ;;  %9425 = vmatpush1.msra.mxu0 %v20167_v9  ;;  %v20204_v48 = vld [vmem:[#allocation129_spill] sm:$0xff] }
 0x735   :  { %9690 = vmatpush2.msra.mxu1 %v20168_v19  ;;  %9429 = vmatprep.subr.mxu0 %v20170_v40  ;;  %v20213_v58 = vld [vmem:[#allocation73_spill] sm:$0xff]  ;;  %v20224_v40 = vld [vmem:[#allocation138_spill] sm:$0xff] }
 0x736   :  { %9692 = vmatprep.subr.mxu1 %v20171_v38  ;;  %9433 = vmatpush1.msra.mxu0 %v20173_v14  ;;  %v20220_v9 = vld [vmem:[#allocation65_spill] sm:$0xff]  ;;  %v20226_v38 = vld [vmem:[#allocation112_spill] sm:$0xff]  ;;  %v20229_v14 = vld [vmem:[#allocation30_spill] sm:$0xff] }
 0x737   :  { %9694 = vmatpush2.msra.mxu1 %v20174_v22  ;;  %9437 = vmatprep.subr.mxu0 %v20176_v11  ;;  %v20230_v22 = vand.u32 4294901760, %v20068_v29  ;;  %v20232_v11 = vand.u32 4294901760, %v20074_v55  ;;  %v20238_v29 = vld [vmem:[#allocation120_spill] sm:$0xff]  ;;  %v20241_v55 = vld [vmem:[#allocation123_spill] sm:$0xff]  ;;  %v20244_v47 = vld [vmem:[#allocation53_spill] sm:$0xff] }
 0x738   :  { %9696 = vmatprep.subr.mxu1 %v20177_v39  ;;  %9441 = vmatpush1.msra.mxu0 %v20178_v16  ;;  %v20233_v39 = vld [vmem:[#allocation147_spill] sm:$0xff]  ;;  %v20234_v16 = vand.u32 4294901760, %v20077_v20  ;;  %v20240_v20 = vld [vmem:[#allocation92_spill] sm:$0xff] }
 0x739   :  { %9698 = vmatpush2.msra.mxu1 %v20179_v42  ;;  %9445 = vmatprep.subr.mxu0 %v20180_v46  ;;  %v20235_v42 = vld [vmem:[#allocation102_spill] sm:$0xff]  ;;  %v20236_v46 = vand.u32 4294901760, %v20080_v28  ;;  %v20243_v28 = vld [vmem:[#allocation75_spill] sm:$0xff] }
 0x73a   :  { %9700 = vmatprep.subr.mxu1 %v20181_v10  ;;  %9449 = vmatpush2.msra.mxu0 %v20183_v30  ;;  %v20237_v10 = vand.u32 4294901760, %v20081_v45  ;;  %v20242_v45 = vld [vmem:[#allocation163_spill] sm:$0xff]  ;;  %v16639_v30 = vpop.f32.mrf.mxu1 }
 0x73b   :  { %9702 = vmatpush2.msra.mxu1 %v20184_v35  ;;  %9453 = vmatprep.subr.mxu0 %v20185_v25 }
 0x73c   :  { %9704 = vmatprep.subr.mxu1 %v15577_v32  ;;  %9457 = vmatpush2.msra.mxu0 %v20186_v24  ;;  %v20192_v32 = vld [vmem:[#allocation88_spill] sm:$0xff]  ;;  %v16641_v35 = vpop.f32.mrf.mxu1  ;;  %v16645_v24 = vpop.f32.mrf.mxu0 }
 0x73d   :  { %9706 = vmatpush2.msra.mxu1 %v15587_v31  ;;  %9461 = vmatprep.subr.mxu0 %v20187_v57  ;;  %v20193_v5 = vand.u32 4294901760, %v20192_v32  ;;  %v20195_v31 = vand.u32 4294901760, %v20038_v49  ;;  %v20200_v49 = vand.u32 4294901760, %v20043_v13  ;;  %v20209_v13 = vld [vmem:[#allocation74_spill] sm:$0xff] }
 0x73e   :  { %9708 = vmatprep.subr.mxu1 %v20188_v23  ;;  %9465 = vmatpush2.msra.mxu0 %v20189_v36  ;;  %v16643_v25 = vpop.f32.mrf.mxu1  ;;  %v7982_v23 = vpop.f32.mrf.mxu0 }
 0x73f   :  { %9710 = vmatpush2.msra.mxu1 %v20190_v41  ;;  %9469 = vmatprep.subr.mxu0 %v20191_v51 }
 0x740   :  { %9712 = vmatprep.subr.mxu1 %v15627_v53  ;;  %9473 = vmatpush2.msra.mxu0 %v20193_v5  ;;  %v20198_v53 = vand.u32 4294901760, %v20042_v6  ;;  %v20207_v6 = vand.u32 4294901760, %v20049_v15  ;;  %v20214_v15 = vand.u32 4294901760, %v20054_v12  ;;  %v20225_v12 = vand.u32 4294901760, %v20224_v40  ;;  %v16647_v57 = vpop.f32.mrf.mxu1  ;;  %v16651_v41 = vpop.f32.mrf.mxu0 }
 0x741   :  { %9714 = vmatpush2.msra.mxu1 %v20194_v37  ;;  %9477 = vmatprep.subr.mxu0 %v20195_v31 }
 0x742   :  { %9716 = vmatprep.subr.mxu1 %v15643_v52  ;;  %9481 = vmatpush2.msra.mxu0 %v20196_v4  ;;  %v20202_v52 = vld [vmem:[#allocation70_spill] sm:$0xff]  ;;  %v16649_v36 = vpop.f32.mrf.mxu1  ;;  %v16655_v32 = vpop.f32.mrf.mxu0 }
 0x743   :  { %9718 = vmatpush2.msra.mxu1 %v15653_v61  ;;  %9485 = vmatprep.subr.mxu0 %v20197_v1  ;;  %v20203_v34 = vand.u32 4294901760, %v20202_v52  ;;  %v20205_v61 = vand.u32 4294901760, %v20046_v26  ;;  %v20210_v26 = vand.u32 4294901760, %v20051_v8  ;;  %v20219_v8 = vand.u32 4294901760, %v20218_v60 }
 0x744   :  { %9720 = vmatprep.subr.mxu1 %v15655_v63  ;;  %9489 = vmatpush2.msra.mxu0 %v20198_v53  ;;  %v20206_v63 = vand.u32 4294901760, %v20047_v33  ;;  %v16653_v51 = vpop.f32.mrf.mxu1  ;;  %v16659_v37 = vpop.f32.mrf.mxu0 }
 0x745   :  { %9722 = vmatpush2.msra.mxu1 %v20199_v2  ;;  %9493 = vmatprep.subr.mxu0 %v20200_v49 }
 0x746   :  { %9724 = vmatprep.subr.mxu1 %v20201_v0  ;;  %9497 = vmatpush2.msra.mxu0 %v20203_v34  ;;  %v16657_v5 = vpop.f32.mrf.mxu1  ;;  %v16663_v4 = vpop.f32.mrf.mxu0 }
 0x747   :  { %9726 = vmatpush2.msra.mxu1 %v20204_v48  ;;  %9501 = vmatprep.subr.mxu0 %v20205_v61 }
 0x748   :  { %9728 = vmatprep.subr.mxu1 %v15805_v54  ;;  %9505 = vmatpush2.msra.mxu0 %v20206_v63  ;;  %v20211_v54 = vld [vmem:[#allocation131_spill] sm:$0xff]  ;;  %v16661_v31 = vpop.f32.mrf.mxu1  ;;  %v16667_v53 = vpop.f32.mrf.mxu0 }
 0x749   :  { %9730 = vmatpush2.msra.mxu1 %v15827_v21  ;;  %9509 = vmatprep.subr.mxu0 %v20207_v6  ;;  %v20212_v33 = vand.u32 4294901760, %v20211_v54  ;;  %v20215_v21 = vld [vmem:[#allocation173_spill] sm:$0xff] }
 0x74a   :  { %9732 = vmatprep.subr.mxu1 %v19923_v50  ;;  %9513 = vmatpush2.msra.mxu0 %v20208_v59  ;;  %v20216_v50 = vand.u32 4294901760, %v20215_v21  ;;  %v16665_v1 = vpop.f32.mrf.mxu1  ;;  %v16671_v49 = vpop.f32.mrf.mxu0 }
 0x74b   :  { %9734 = vmatpush2.msra.mxu1 %v20209_v13  ;;  %9517 = vmatprep.subr.mxu0 %v20210_v26 }
 0x74c   :  { %9736 = vmatprep.subr.mxu1 %v15870_v56  ;;  %9521 = vmatpush2.msra.mxu0 %v20212_v33  ;;  %v20221_v56 = vld [vmem:[#allocation149_spill] sm:$0xff]  ;;  %v16669_v2 = vpop.f32.mrf.mxu1  ;;  %v16675_v52 = vpop.f32.mrf.mxu0 }
 0x74d   :  { %9738 = vmatpush2.msra.mxu1 %v20213_v58  ;;  %9525 = vmatprep.subr.mxu0 %v20214_v15  ;;  %v20222_v19 = vand.u32 4294901760, %v20221_v56 }
 0x74e   :  { %9740 = vmatprep.subr.mxu1 %v15895_v43  ;;  %9529 = vmatpush2.msra.mxu0 %v20216_v50  ;;  %v20227_v43 = vld [vmem:[#allocation46_spill] sm:$0xff]  ;;  %v16673_v0 = vpop.f32.mrf.mxu1  ;;  %v16679_v48 = vpop.f32.mrf.mxu0 }
 0x74f   :  { %9742 = vmatpush2.msra.mxu1 %v20217_v17  ;;  %9533 = vmatprep.subr.mxu0 %v20219_v8  ;;  %v20228_v7 = vand.u32 4294901760, %v20227_v43 }
 0x750   :  { %9744 = vmatprep.subr.mxu1 %v20220_v9  ;;  %9537 = vmatpush2.msra.mxu0 %v20222_v19  ;;  %v16677_v34 = vpop.f32.mrf.mxu1  ;;  %v16681_v63 = vpop.f32.mrf.mxu0 }
 0x751   :  { %9746 = vmatpush2.msra.mxu1 %v20223_v18  ;;  %9541 = vmatprep.subr.mxu0 %v20225_v12 }
 0x752   :  { %9750 = vmatmul.mubr.f32.vlgmr.msra.gmra.mxu1 %v20226_v38  ;;  %9545 = vmatpush2.msra.mxu0 %v20228_v7  ;;  %v16685_v59 = vpop.f32.mrf.mxu0 }
 0x753   :  { %9756 = vmatprep.mubr.f32.mxu1 %v20229_v14  ;;  %9549 = vmatprep.subr.mxu0 %v20230_v22 }
 0x754   :  { %9553 = vmatpush2.msra.mxu0 %v20231_v44 }
 0x755   :  { %9557 = vmatprep.subr.mxu0 %v20232_v11 }
 0x756   :  { %9758 = vmatmul.mubr.f32.gmra.mxu1 %v20233_v39  ;;  %9561 = vmatpush2.msra.mxu0 %v20234_v16 }
 0x757   :  { %9764 = vmatprep.mubr.f32.mxu1 %v20235_v42  ;;  %9565 = vmatprep.subr.mxu0 %v20236_v46 }
 0x758   :  { %9569 = vmatpush2.msra.mxu0 %v20237_v10 }
 0x759   :  { %9573 = vmatmul.mubr.f32.vlgmr.msra.gmra.mxu0 %v20226_v38 }
 0x75a   :  { %9766 = vmatmul.mubr.f32.gmra.mxu1 %v20238_v29  ;;  %9579 = vmatprep.mubr.f32.mxu0 %v20229_v14 }
 0x75b   :  { %9772 = vmatprep.mubr.f32.mxu1 %v20239_v62 }
 0x75d   :  { %9581 = vmatmul.mubr.f32.gmra.mxu0 %v20233_v39 }
 0x75e   :  { %9774 = vmatmul.mubr.f32.gmra.mxu1 %v20240_v20  ;;  %9587 = vmatprep.mubr.f32.mxu0 %v20235_v42 }
 0x75f   :  { %9780 = vmatprep.mubr.f32.mxu1 %v20241_v55 }
 0x761   :  { %9589 = vmatmul.mubr.f32.gmra.mxu0 %v20238_v29 }
 0x762   :  { %9782 = vmatmul.mubr.f32.gmra.mxu1 %v20242_v45  ;;  %9595 = vmatprep.mubr.f32.mxu0 %v20239_v62 }
 0x763   :  { %9788 = vmatprep.mubr.f32.mxu1 %v20243_v28 }
 0x765   :  { %9597 = vmatmul.mubr.f32.gmra.mxu0 %v20240_v20 }
 0x766   :  { %9790 = vmatmul.mubr.f32.gmra.mxu1 %v20244_v47  ;;  %9603 = vmatprep.mubr.f32.mxu0 %v20241_v55 }
 0x769   :  { %9605 = vmatmul.mubr.f32.gmra.mxu0 %v20242_v45 }
 0x76a   :  { %9611 = vmatprep.mubr.f32.mxu0 %v20243_v28 }
 0x76d   :  { %9613 = vmatmul.mubr.f32.gmra.mxu0 %v20244_v47 }
 0x77a   :  { %v8815_v61 = vpop.f32.mrf.mxu1 }
 0x77c   :  { %v16683_v6 = vpop.f32.mrf.mxu1 }
 0x77f   :  { %v16687_v13 = vpop.f32.mrf.mxu1 }
 0x781   :  { %v16689_v54 = vpop.f32.mrf.mxu1 }
 0x783   :  { %v8342_v26 = vpop.f32.mrf.mxu0 }
 0x784   :  { %v16691_v58 = vpop.f32.mrf.mxu1 }
 0x785   :  { %v8344_v33 = vpop.f32.mrf.mxu0 }
 0x786   :  { %v16693_v21 = vpop.f32.mrf.mxu1 }
 0x789   :  { %v8358_v15 = vpop.f32.mrf.mxu0 }
 0x78a   :  { %v16695_v17 = vpop.f32.mrf.mxu1 }
 0x78b   :  { %v8360_v50 = vpop.f32.mrf.mxu0  ;;  %20245 = vst [vmem:[#allocation151_spill] sm:$0xff] %v16695_v17  ;;  %v20269_v17 = vld [vmem:[#allocation19_spill] sm:$0xff] }
 0x78c   :  { %v16699_v8 = vpop.f32.mrf.mxu1 }
 0x78d   :  { %20246 = vst [vmem:[#allocation32_spill] sm:$0xff] %v16699_v8 }
 0x78f   :  { %v16697_v60 = vpop.f32.mrf.mxu0 }
 0x790   :  { %v16703_v56 = vpop.f32.mrf.mxu1 }
 0x791   :  { %v16701_v9 = vpop.f32.mrf.mxu0  ;;  %20247 = vst [vmem:[#allocation68_spill] sm:$0xff] %v16703_v56 }
 0x792   :  { %v16707_v18 = vpop.f32.mrf.mxu1 }
 0x793   :  { %20248 = vst [vmem:[#allocation101_spill] sm:$0xff] %v16707_v18 }
 0x795   :  { %v16705_v19 = vpop.f32.mrf.mxu0 }
 0x796   :  { %v16711_v12 = vpop.f32.mrf.mxu1 }
 0x797   :  { %v16709_v40 = vpop.f32.mrf.mxu0  ;;  %20249 = vst [vmem:[#allocation41_spill] sm:$0xff] %v16711_v12 }
 0x798   :  { %v16715_v43 = vpop.f32.mrf.mxu1 }
 0x799   :  { %20250 = vst [vmem:[#allocation93_spill] sm:$0xff] %v16715_v43 }
 0x79b   :  { %v16713_v38 = vpop.f32.mrf.mxu0 }
 0x79d   :  { %v16717_v7 = vpop.f32.mrf.mxu0 }
 0x79e   :  { %20251 = vst [vmem:[#allocation166_spill] sm:$0xff] %v16717_v7 }
 0x7a0   :  { %v16721_v22 = vpop.f32.mrf.mxu0 }
 0x7a1   :  { %20252 = vst [vmem:[#allocation27_spill] sm:$0xff] %v16721_v22  ;;  %v20263_v22 = vld [vmem:[#allocation29_spill] sm:$0xff] }
 0x7a2   :  { %v16725_v11 = vpop.f32.mrf.mxu0 }
 0x7a3   :  { %20253 = vst [vmem:[#allocation130_spill] sm:$0xff] %v16725_v11 }
 0x7c6   :  { %v16719_v14 = vpop.f32.mrf.mxu1 }
 0x7c8   :  { %v16723_v44 = vpop.f32.mrf.mxu1 }
 0x7cb   :  { %v16727_v39 = vpop.f32.mrf.mxu1 }
 0x7cd   :  { %v16729_v42 = vpop.f32.mrf.mxu1 }
 0x7ce   :  { %20254 = vst [vmem:[#allocation105_spill] sm:$0xff] %v16729_v42  ;;  %v20268_v42 = vld [vmem:[#allocation76_spill] sm:$0xff] }
 0x7cf   :  { %v9058_v16 = vpop.f32.mrf.mxu0 }
 0x7d0   :  { %v16731_v10 = vpop.f32.mrf.mxu1 }
 0x7d1   :  { %v9060_v46 = vpop.f32.mrf.mxu0  ;;  %20255 = vst [vmem:[#allocation18_spill] sm:$0xff] %v16731_v10  ;;  %v20264_v10 = vld [vmem:[#allocation23_spill] sm:$0xff] }
 0x7d2   :  { %v16733_v62 = vpop.f32.mrf.mxu1  ;;  %v7983_v56 = vadd.f32 %v7982_v23, %v20264_v10 }
 0x7d3   :  { %20256 = vst [vmem:[#allocation84_spill] sm:$0xff] %v16733_v62  ;;  %v7981_v62 = vadd.f32 %v16645_v24, %v20263_v22  ;;  %v7997_v24 = vadd.f32 %v16659_v37, %v20269_v17 }
 0x7d5   :  { %v9068_v29 = vpop.f32.mrf.mxu0  ;;  %v8174_v37 = vadd.f32 %v16649_v36, %v7997_v24 }
 0x7d6   :  { %v16735_v55 = vpop.f32.mrf.mxu1 }
 0x7d7   :  { %v9070_v20 = vpop.f32.mrf.mxu0  ;;  %20257 = vst [vmem:[#allocation63_spill] sm:$0xff] %v16735_v55 }
 0x7d8   :  { %v16739_v28 = vpop.f32.mrf.mxu1 }
 0x7d9   :  { %20258 = vst [vmem:[#allocation139_spill] sm:$0xff] %v16739_v28  ;;  %v20267_v28 = vld [vmem:[#allocation59_spill] sm:$0xff] }
 0x7da   :  { %v7989_v7 = vadd.f32 %v16651_v41, %v20267_v28 }
 0x7db   :  { %v16737_v45 = vpop.f32.mrf.mxu0 }
 0x7dc   :  { %v16743_v43 = vpop.f32.mrf.mxu1 }
 0x7dd   :  { %v16741_v47 = vpop.f32.mrf.mxu0  ;;  %20259 = vst [vmem:[#allocation43_spill] sm:$0xff] %v16743_v43  ;;  %v8158_v43 = vadd.f32 %v16639_v30, %v7981_v62 }
 0x7de   :  { %v16747_v18 = vpop.f32.mrf.mxu1 }
 0x7df   :  { %20261 = vst [vmem:[#allocation137_spill] sm:$0xff] %v16747_v18  ;;  %v8343_v18 = vadd.f32 %v8342_v26, %v8158_v43  ;;  %v20271_v43 = vld [vmem:[#allocation158_spill] sm:$0xff] }
 0x7e1   :  { %v16745_v12 = vpop.f32.mrf.mxu0  ;;  %v8816_v26 = vadd.f32 %v8815_v61, %v8343_v18 }
 0x7e2   :  { %20260 = vst [vmem:[#allocation54_spill] sm:$0xff] %v16745_v12  ;;  %v16754_v55 = vpop.f32.mrf.mxu1  ;;  %v7991_v12 = vadd.f32 %v16655_v32, %v20268_v42  ;;  %v20272_v42 = vld [vmem:[#allocation31_spill] sm:$0xff] }
 0x7e3   :  { %v16749_v11 = vpop.f32.mrf.mxu0  ;;  %20265 = vst [vmem:[#allocation87_spill] sm:$0xff] %v16754_v55  ;;  %v8166_v55 = vadd.f32 %v16643_v25, %v7989_v7  ;;  %v9059_v7 = vadd.f32 %v9058_v16, %v8816_v26 }
 0x7e4   :  { %20262 = vst [vmem:[#allocation154_spill] sm:$0xff] %v16749_v11  ;;  %v8160_v11 = vadd.f32 %v16641_v35, %v7983_v56  ;;  %v16766_v22 = vpop.f32.mrf.mxu1  ;;  %v8168_v32 = vadd.f32 %v16647_v57, %v7991_v12  ;;  %v8005_v35 = vadd.f32 %v16667_v53, %v20271_v43  ;;  %v20274_v57 = vld [vmem:[#allocation115_spill] sm:$0xff]  ;;  %v8021_v53 = vadd.f32 %v16681_v63, %v16395_v27  ;;  %v20276_v43 = vld [vmem:[#allocation133_spill] sm:$0xff] }
 0x7e5   :  { %v8359_v62 = vadd.f32 %v8358_v15, %v8166_v55  ;;  %v8015_v61 = vadd.f32 %v16679_v48, %v20274_v57  ;;  %v8375_v12 = vadd.f32 %v16697_v60, %v8174_v37  ;;  %v9250_v60 = vadd.f32 %v16719_v14, %v9059_v7 }
 0x7e6   :  { %v8345_v10 = vadd.f32 %v8344_v33, %v8160_v11  ;;  %v8007_v33 = vadd.f32 %v16671_v49, %v20272_v42  ;;  %v8361_v25 = vadd.f32 %v8360_v50, %v8168_v32 }
 0x7e7   :  { %v16756_v8 = vpop.f32.mrf.mxu0  ;;  %v8824_v49 = vadd.f32 %v16687_v13, %v8359_v62  ;;  %v8832_v28 = vadd.f32 %v16691_v58, %v8375_v12  ;;  %v20283_v12 = vld [vmem:[#allocation18_spill] sm:$0xff] }
 0x7e8   :  { %20266 = vst [vmem:[#allocation72_spill] sm:$0xff] %v16756_v8  ;;  %v20270_v8 = vld [vmem:[#allocation90_spill] sm:$0xff]  ;;  %v8184_v27 = vadd.f32 %v16661_v31, %v8007_v33 }
 0x7e9   :  { %v16768_v23 = vpop.f32.mrf.mxu0  ;;  %v7999_v41 = vadd.f32 %v16663_v4, %v20270_v8  ;;  %v8818_v4 = vadd.f32 %v16683_v6, %v8345_v10  ;;  %v20273_v8 = vld [vmem:[#allocation110_spill] sm:$0xff]  ;;  %v8023_v6 = vadd.f32 %v16685_v59, %v16402_v3  ;;  %v9069_v63 = vadd.f32 %v9068_v29, %v8824_v49  ;;  %v113_v29 = vld [vmem:[#allocation7 + $0x5] ss:$8 sm:$0x3] }
 0x7ea   :  { %v8013_v15 = vadd.f32 %v16675_v52, %v20273_v8  ;;  %v8182_v52 = vadd.f32 %v16657_v5, %v8005_v35  ;;  %v8192_v3 = vadd.f32 %v16669_v2, %v8015_v61  ;;  %v8198_v59 = vadd.f32 %v16673_v0, %v8021_v53  ;;  %v20279_v33 = vld [vmem:[#allocation166_spill] sm:$0xff]  ;;  %v20282_v8 = vld [vmem:[#allocation68_spill] sm:$0xff]  ;;  %v20284_v49 = vld [vmem:[#allocation27_spill] sm:$0xff] }
 0x7eb   :  { %v8176_v36 = vadd.f32 %v16653_v51, %v7999_v41  ;;  %v9061_v11 = vadd.f32 %v9060_v46, %v8818_v4  ;;  %v8826_v51 = vadd.f32 %v16689_v54, %v8361_v25  ;;  %v8393_v54 = vadd.f32 %v16709_v40, %v8184_v27 }
 0x7ec   :  { %v16777_v17 = vpop.f32.mrf.mxu0  ;;  %v8391_v46 = vadd.f32 %v16705_v19, %v8182_v52  ;;  %v8190_v13 = vadd.f32 %v16665_v1, %v8013_v15  ;;  %v8200_v19 = vadd.f32 %v16677_v34, %v8023_v6  ;;  %v9079_v0 = vadd.f32 %v16737_v45, %v8832_v28  ;;  %v20277_v34 = vld [vmem:[#allocation134_spill] sm:$0xff]  ;;  %v20278_v45 = vld [vmem:[#allocation105_spill] sm:$0xff] }
 0x7ed   :  { %v8377_v50 = vadd.f32 %v16701_v9, %v8176_v36  ;;  %v9071_v55 = vadd.f32 %v9070_v20, %v8826_v51  ;;  %v9252_v31 = vadd.f32 %v16723_v44, %v9061_v11  ;;  %v9262_v58 = vadd.f32 %v16727_v39, %v9069_v63  ;;  %v20275_v44 = vld [vmem:[#allocation151_spill] sm:$0xff]  ;;  %v20280_v39 = vld [vmem:[#allocation54_spill] sm:$0xff]  ;;  %v20286_v63 = vld [vmem:[#allocation84_spill] sm:$0xff] }
 0x7ee   :  { %v16795_v16 = vpop.f32.mrf.mxu0  ;;  %v8407_v14 = vadd.f32 %v16713_v38, %v8190_v13  ;;  %v8840_v32 = vadd.f32 %v20275_v44, %v8391_v46  ;;  %v16815_v38 = vrot.slane %v113_v29, %v20276_v43  ;;  %v16818_v35 = vrot.slane %v113_v29, %v20277_v34 }
 0x7ef   :  { %v8834_v1 = vadd.f32 %v16693_v21, %v8377_v50  ;;  %v8409_v25 = vadd.f32 %v20279_v33, %v8192_v3  ;;  %v9274_v11 = vadd.f32 %v20283_v12, %v9079_v0  ;;  %v8423_v6 = vadd.f32 %v20284_v49, %v8198_v59  ;;  %v20288_v28 = vld [vmem:[#allocation72_spill] sm:$0xff]  ;;  %v20296_v49 = vld [vmem:[#allocation87_spill] sm:$0xff] }
 0x7f0   :  { %v9089_v7 = vadd.f32 %v20280_v39, %v8840_v32  ;;  %v8848_v15 = vadd.f32 %v20282_v8, %v8407_v14  ;;  %v20292_v32 = vld [vmem:[#allocation139_spill] sm:$0xff] }
 0x7f1   :  { %v9081_v62 = vadd.f32 %v16741_v47, %v8834_v1  ;;  %v20281_v47 = vld [vmem:[#allocation32_spill] sm:$0xff] }
 0x7f2   :  { %v8842_v4 = vadd.f32 %v20281_v47, %v8393_v54  ;;  %v20290_v54 = vld [vmem:[#allocation63_spill] sm:$0xff] }
 0x7f3   :  { %v9276_v51 = vadd.f32 %v20286_v63, %v9081_v62  ;;  %v9286_v14 = vadd.f32 %v20290_v54, %v9089_v7 }
 0x812   :  { %v9751_v30 = vpop.f32.mrf.mxu1 }
 0x814   :  { %v9753_v56 = vpop.f32.mrf.mxu1 }
 0x816   :  { %v9759_v18 = vpop.f32.mrf.mxu1 }
 0x818   :  { %v9761_v48 = vpop.f32.mrf.mxu1 }
 0x819   :  { %v9574_v9 = vpop.f32.mrf.mxu0 }
 0x81a   :  { %v9767_v5 = vpop.f32.mrf.mxu1  ;;  %v9575_v24 = vadd.f32 %v9574_v9, %v9250_v60 }
 0x81b   :  { %v9576_v2 = vpop.f32.mrf.mxu0 }
 0x81c   :  { %v9769_v10 = vpop.f32.mrf.mxu1  ;;  %v9752_v41 = vadd.f32 %v9751_v30, %v9575_v24  ;;  %v9577_v20 = vadd.f32 %v9576_v2, %v9252_v31  ;;  %v9264_v30 = vadd.f32 %v20278_v45, %v9071_v55  ;;  %v20287_v55 = vld [vmem:[#allocation130_spill] sm:$0xff]  ;;  %v9099_v24 = vadd.f32 %v20288_v28, %v8848_v15  ;;  %v20289_v31 = vld [vmem:[#allocation101_spill] sm:$0xff] }
 0x81d   :  { %v9582_v26 = vpop.f32.mrf.mxu0  ;;  %v8850_v29 = vadd.f32 %v20289_v31, %v8409_v25 }
 0x81e   :  { %v9775_v40 = vpop.f32.mrf.mxu1  ;;  %v9796_v21 = vmax.f32 %v9752_v41, 0.0  ;;  %v9754_v37 = vadd.f32 %v9753_v56, %v9577_v20  ;;  %v9583_v42 = vadd.f32 %v9582_v26, %v9262_v58  ;;  %v20285_v56 = vld [vmem:[#allocation154_spill] sm:$0xff]  ;;  %v20291_v58 = vld [vmem:[#allocation41_spill] sm:$0xff] }
 0x81f   :  { %v9584_v57 = vpop.f32.mrf.mxu0  ;;  %v9091_v50 = vadd.f32 %v20285_v56, %v8842_v4  ;;  %v9101_v20 = vadd.f32 %v16768_v23, %v8850_v29  ;;  %v20294_v23 = vld [vmem:[#allocation43_spill] sm:$0xff] }
 0x820   :  { %v9797_v61 = vmax.f32 %v9754_v37, 0.0  ;;  %v9760_v53 = vadd.f32 %v9759_v18, %v9583_v42  ;;  %v9585_v36 = vadd.f32 %v9584_v57, %v9264_v30  ;;  %v9777_v52 = vpop.f32.mrf.mxu1  ;;  %v9819_v60 = vmul.f32 %v16815_v38, %v9796_v21  ;;  %v20293_v42 = vld [vmem:[#allocation93_spill] sm:$0xff] }
 0x821   :  { %v9590_v27 = vpop.f32.mrf.mxu0  ;;  %v8425_v18 = vadd.f32 %v20287_v55, %v8200_v19  ;;  %v9288_v26 = vadd.f32 %v20292_v32, %v9091_v50  ;;  %v9298_v33 = vadd.f32 %v20294_v23, %v9099_v24 }
 0x822   :  { %v9798_v46 = vmax.f32 %v9760_v53, 0.0  ;;  %v9762_v13 = vadd.f32 %v9761_v48, %v9585_v36  ;;  %v9591_v3 = vadd.f32 %v9590_v27, %v9274_v11  ;;  %v9820_v9 = vmul.f32 %v16818_v35, %v9797_v61  ;;  %v9783_v62 = vpop.f32.mrf.mxu1 }
 0x823   :  { %v9592_v59 = vpop.f32.mrf.mxu0  ;;  %v8856_v48 = vadd.f32 %v20291_v58, %v8423_v6  ;;  %v8858_v45 = vadd.f32 %v20293_v42, %v8425_v18 }
 0x824   :  { %v9799_v1 = vmax.f32 %v9762_v13, 0.0  ;;  %v9768_v2 = vadd.f32 %v9767_v5, %v9591_v3  ;;  %v9593_v0 = vadd.f32 %v9592_v59, %v9276_v51  ;;  %v9831_v41 = vadd.f32 %v9820_v9, %v9819_v60  ;;  %v9785_v8 = vpop.f32.mrf.mxu1 }
 0x825   :  { %v9598_v44 = vpop.f32.mrf.mxu0  ;;  %v9821_v19 = vmul.f32 %v16815_v38, %v9798_v46  ;;  %v9109_v5 = vadd.f32 %v16777_v17, %v8856_v48  ;;  %v9111_v4 = vadd.f32 %v16795_v16, %v8858_v45 }
 0x826   :  { %v9800_v43 = vmax.f32 %v9768_v2, 0.0  ;;  %v9770_v34 = vadd.f32 %v9769_v10, %v9593_v0  ;;  %v9599_v21 = vadd.f32 %v9598_v44, %v9286_v14  ;;  %9832 = vadd.xlane.f32.xlu0 %v9831_v41  ;;  %v9822_v37 = vmul.f32 %v16818_v35, %v9799_v1  ;;  %v20295_v10 = vld [vmem:[#allocation137_spill] sm:$0xff]  ;;  %v9791_v16 = vpop.f32.mrf.mxu1 }
 0x827   :  { %v9600_v30 = vpop.f32.mrf.mxu0  ;;  %v9300_v57 = vadd.f32 %v20295_v10, %v9101_v20  ;;  %v9310_v6 = vadd.f32 %v20296_v49, %v9109_v5  ;;  %v9312_v51 = vadd.f32 %v16766_v22, %v9111_v4  ;;  %v114_v20 = vld [vmem:[#allocation7 + $0x6] ss:$0 sm:$0xff] }
 0x828   :  { %v9801_v25 = vmax.f32 %v9770_v34, 0.0  ;;  %v9776_v39 = vadd.f32 %v9775_v40, %v9599_v21  ;;  %v9601_v7 = vadd.f32 %v9600_v30, %v9288_v26  ;;  %v9834_v47 = vadd.f32 %v9822_v37, %v9821_v19  ;;  %v9793_v31 = vpop.f32.mrf.mxu1 }
 0x829   :  { %v9606_v15 = vpop.f32.mrf.mxu0  ;;  %v9823_v61 = vmul.f32 %v16815_v38, %v9800_v43 }
 0x82a   :  { %v9802_v53 = vmax.f32 %v9776_v39, 0.0  ;;  %v9778_v36 = vadd.f32 %v9777_v52, %v9601_v7  ;;  %v9607_v17 = vadd.f32 %v9606_v15, %v9298_v33  ;;  %9835 = vadd.xlane.f32.xlu1 %v9834_v47  ;;  %v9824_v12 = vmul.f32 %v16818_v35, %v9801_v25 }
 0x82b   :  { %v9608_v11 = vpop.f32.mrf.mxu0 }
 0x82c   :  { %v9803_v40 = vmax.f32 %v9778_v36, 0.0  ;;  %v9784_v56 = vadd.f32 %v9783_v62, %v9607_v17  ;;  %v9609_v50 = vadd.f32 %v9608_v11, %v9300_v57  ;;  %v9837_v27 = vadd.f32 %v9824_v12, %v9823_v61 }
 0x82d   :  { %v9614_v63 = vpop.f32.mrf.mxu0  ;;  %v9825_v60 = vmul.f32 %v16815_v38, %v9802_v53 }
 0x82e   :  { %v9804_v46 = vmax.f32 %v9784_v56, 0.0  ;;  %v9786_v13 = vadd.f32 %v9785_v8, %v9609_v50  ;;  %v9615_v52 = vadd.f32 %v9614_v63, %v9310_v6  ;;  %9838 = vadd.xlane.f32.xlu0 %v9837_v27  ;;  %v9826_v3 = vmul.f32 %v16818_v35, %v9803_v40 }
 0x82f   :  { %v9616_v9 = vpop.f32.mrf.mxu0 }
 0x830   :  { %v9805_v55 = vmax.f32 %v9786_v13, 0.0  ;;  %v9792_v18 = vadd.f32 %v9791_v16, %v9615_v52  ;;  %v9617_v28 = vadd.f32 %v9616_v9, %v9312_v51  ;;  %v9840_v24 = vadd.f32 %v9826_v3, %v9825_v60 }
 0x831   :  { %v9827_v54 = vmul.f32 %v16815_v38, %v9804_v46 }
 0x832   :  { %v9806_v29 = vmax.f32 %v9792_v18, 0.0  ;;  %v9794_v59 = vadd.f32 %v9793_v31, %v9617_v28  ;;  %9841 = vadd.xlane.f32.xlu0 %v9840_v24  ;;  %v9828_v22 = vmul.f32 %v16818_v35, %v9805_v55 }
 0x834   :  { %v9807_v14 = vmax.f32 %v9794_v59, 0.0  ;;  %v9843_v1 = vadd.f32 %v9828_v22, %v9827_v54  ;;  %v9829_v2 = vmul.f32 %v16815_v38, %v9806_v29 }
 0x836   :  { %9844 = vadd.xlane.f32.xlu1 %v9843_v1  ;;  %v9830_v0 = vmul.f32 %v16818_v35, %v9807_v14 }
 0x838   :  { %v9846_v41 = vadd.f32 %v9830_v0, %v9829_v2 }
 0x83a   :  { %9847 = vadd.xlane.f32.xlu0 %v9846_v41 }
 0x8af   :  { %v9833_v58 = vpop.xlane.xlu0 %9832 }
 0x8b0   :  { %v9849_v48 = vadd.f32 %v9833_v58, %v114_v20 }
 0x8b2   :  { %v9855_v62 = vsub.f32 0.0, %v9849_v48 }
 0x8b3   :  { %v9836_v44 = vpop.xlane.xlu1 %9835 }
 0x8b4   :  { %v9861_v32 = vmul.f32 1.442695, %v9855_v62  ;;  %v9850_v26 = vadd.f32 %v9836_v44, %v114_v20 }
 0x8b6   :  { %10071 = vpow2.f32 %v9861_v32  ;;  %v9856_v19 = vsub.f32 0.0, %v9850_v26 }
 0x8b7   :  { %v9839_v43 = vpop.xlane.xlu0 %9838 }
 0x8b8   :  { %v9863_v34 = vmul.f32 1.442695, %v9856_v19  ;;  %v9851_v21 = vadd.f32 %v9839_v43, %v114_v20 }
 0x8ba   :  { %10073 = vpow2.f32 %v9863_v34  ;;  %v9857_v37 = vsub.f32 0.0, %v9851_v21 }
 0x8bb   :  { %v9842_v5 = vpop.xlane.xlu0 %9841 }
 0x8bc   :  { %v9865_v38 = vmul.f32 1.442695, %v9857_v37  ;;  %v9852_v42 = vadd.f32 %v9842_v5, %v114_v20 }
 0x8be   :  { %10075 = vpow2.f32 %v9865_v38  ;;  %v9858_v35 = vsub.f32 0.0, %v9852_v42 }
 0x8bf   :  { %v9845_v45 = vpop.xlane.xlu1 %9844 }
 0x8c0   :  { %v9867_v30 = vmul.f32 1.442695, %v9858_v35  ;;  %v9853_v23 = vadd.f32 %v9845_v45, %v114_v20 }
 0x8c2   :  { %10077 = vpow2.f32 %v9867_v30  ;;  %v9859_v33 = vsub.f32 0.0, %v9853_v23 }
 0x8c3   :  { %v10072_v25 = vpop.eup %10071  ;;  %v9848_v39 = vpop.xlane.xlu0 %9847 }
 0x8c4   :  { %v9873_v7 = vadd.f32 1.0, %v10072_v25  ;;  %v9869_v47 = vmul.f32 1.442695, %v9859_v33  ;;  %v9854_v4 = vadd.f32 %v9848_v39, %v114_v20 }
 0x8c6   :  { %10079 = vrcp.f32 %v9873_v7  ;;  %v9860_v8 = vsub.f32 0.0, %v9854_v4 }
 0x8c7   :  { %v10074_v15 = vpop.eup %10073  ;;  %10081 = vpow2.f32 %v9869_v47 }
 0x8c8   :  { %v9874_v10 = vadd.f32 1.0, %v10074_v15  ;;  %v9871_v57 = vmul.f32 1.442695, %v9860_v8 }
 0x8ca   :  { %10083 = vrcp.f32 %v9874_v10 }
 0x8cb   :  { %v10076_v61 = vpop.eup %10075  ;;  %10085 = vpow2.f32 %v9871_v57 }
 0x8cc   :  { %v9875_v53 = vadd.f32 1.0, %v10076_v61 }
 0x8ce   :  { %10087 = vrcp.f32 %v9875_v53 }
 0x8cf   :  { %v10078_v36 = vpop.eup %10077 }
 0x8d0   :  { %v9876_v17 = vadd.f32 1.0, %v10078_v36 }
 0x8d2   :  { %10089 = vrcp.f32 %v9876_v17 }
 0x8d3   :  { %v10080_v12 = vpop.eup %10079 }
 0x8d4   :  { %v10082_v11 = vpop.eup %10081  ;;  %9892 = vst.msk [vmem:[%s16885_s6] sm:$0xff] %vm9891_vm6, %v10080_v12 }
 0x8d5   :  { %v9877_v49 = vadd.f32 1.0, %v10082_v11 }
 0x8d7   :  { %v10084_v6 = vpop.eup %10083  ;;  %10091 = vrcp.f32 %v9877_v49 }
 0x8d8   :  { %v10086_v40 = vpop.eup %10085  ;;  %9893 = vst.msk [vmem:[%s16885_s6 + $0x8] sm:$0xff] %vm9891_vm6, %v10084_v6 }
 0x8d9   :  { %v9878_v56 = vadd.f32 1.0, %v10086_v40 }
 0x8db   :  { %v10088_v50 = vpop.eup %10087  ;;  %10093 = vrcp.f32 %v9878_v56 }
 0x8dc   :  { %9894 = vst.msk [vmem:[%s16885_s6 + $0x10] sm:$0xff] %vm9891_vm6, %v10088_v50 }
 0x8df   :  { %v10090_v27 = vpop.eup %10089 }
 0x8e0   :  { %9895 = vst.msk [vmem:[%s16885_s6 + $0x18] sm:$0xff] %vm9891_vm6, %v10090_v27 }
 0x8e4   :  { %v10092_v16 = vpop.eup %10091 }
 0x8e5   :  { %9896 = vst.msk [vmem:[%s16885_s6 + $0x20] sm:$0xff] %vm9891_vm6, %v10092_v16 }
 0x8e8   :  { %v10094_v63 = vpop.eup %10093 }
 0x8e9   :  { %9897 = vst.msk [vmem:[%s16885_s6 + $0x28] sm:$0xff] %vm9891_vm6, %v10094_v63 }
 0x8ea   :  { %9902 = vsyncpa [#allocation4], 1 }
 0x8eb   :  { %9903 = vsyncpa [#allocation6], 1 }
 0x8ec   :  { %9904 = vsyncpa [#allocation9], 1 }
 0x8ed   :  { %9905 = vsyncpa [#allocation12], 1 }

</bundles_post_ra>
